<compile_context>
chip_gen: v7x
topology: tpu7x:2x2x1
jax: 0.10.0
libtpu: 0.0.40
codegen_flags: <defaults>
</compile_context>

<pallas_src>
import functools

import jax
import jax.numpy as jnp
from jax import lax
from jax.experimental import pallas as pl
from jax.experimental.pallas import tpu as pltpu

EPS = 1e-5
_LANE = 128
_VMEM_LIMIT = 48 * 1024 * 1024   # explicit scoped-VMEM budget, fits v5e/v6e/v7x


def _round_up(x, m):
    return ((x + m - 1) // m) * m


def _silu(y):
    # sigmoid via EUP exp + approximate reciprocal (off the VALU critical path)
    return y * pl.reciprocal(1.0 + jnp.exp(-y), approx=True)


# ---------------------------------------------------------------------------
# kernels
# ---------------------------------------------------------------------------
def _make_conv_kernel(tap_offsets, wt, ls, cpo, mode):
    """mode in {'plain', 'bn_silu', 'residual_relu'}.

    plain:         a = input (buffer already zero in ring/slack)
    bn_silu:       a = mask * SiLU(folded-BN(input))            (prev stage's BN+act fused)
    residual_relu: r = mask * ReLU(folded-BN(input) + identity) (written out) ; a = r

    Then: tap-accumulated conv matmuls -> masked raw conv output (stored in out dtype)
    + per-image (sum, sum-of-squares) f32 partials.
    """
    base = 2 * wt                 # flat offset of the padded frame inside the buffer
    lb = ls + 4 * wt

    def _conv_body(a, mb, w_ref, out_ref, st_ref):
        a16 = a.astype(jnp.bfloat16)                   # single downcast, sliced per tap
        acc = jnp.zeros((ls, cpo), jnp.float32)
        for t, off in enumerate(tap_offsets):          # unrolled: <= 9 MXU matmuls
            win = a16[base + off:base + off + ls, :]
            acc = acc + jnp.dot(win, w_ref[t], preferred_element_type=jnp.float32)
        mf = mb[base:base + ls, :]
        raw = jnp.where(mf > 0.5, acc, 0.0)            # zero the padding ring (f32)
        zpad = jnp.zeros((base, cpo), out_ref.dtype)
        out_ref[0, 0:base, :] = zpad
        out_ref[0, base:base + ls, :] = raw.astype(out_ref.dtype)
        out_ref[0, base + ls:lb, :] = zpad
        st_ref[0, 0:1, :] = jnp.sum(raw, axis=0, keepdims=True)
        st_ref[0, 1:2, :] = jnp.sum(raw * raw, axis=0, keepdims=True)

    if mode == 'bn_silu':
        def kernel(in_ref, mb_ref, sc_ref, sh_ref, w_ref, out_ref, st_ref):
            mb = mb_ref[...]
            y = in_ref[0] * sc_ref[...] + sh_ref[...]   # folded BN of previous stage
            a = jnp.where(mb > 0.5, _silu(y), 0.0)
            _conv_body(a, mb, w_ref, out_ref, st_ref)
    elif mode == 'residual_relu':
        def kernel(y_ref, id_ref, mb_ref, sc_ref, sh_ref, w_ref,
                   r_ref, out_ref, st_ref):
            mb = mb_ref[...]
            v = y_ref[0] * sc_ref[...] + sh_ref[...] + id_ref[0]
            r = jnp.where(mb > 0.5, jnp.maximum(v, 0.0), 0.0)
            r_ref[0, :, :] = r                          # residual buffer (f32)
            _conv_body(r, mb, w_ref, out_ref, st_ref)
    else:  # 'plain' -- input buffer already has a zero ring / slack rows
        def kernel(in_ref, mb_ref, w_ref, out_ref, st_ref):
            _conv_body(in_ref[0], mb_ref[...], w_ref, out_ref, st_ref)
    return kernel


def _make_add_kernel(relu):
    """out = [ReLU]( folded-BN(y) + identity ).  No mask needed: the wrapper slices the
    output back to the valid H x W frame."""
    def kernel(y_ref, id_ref, sc_ref, sh_ref, out_ref):
        v = y_ref[0] * sc_ref[...] + sh_ref[...] + id_ref[0]
        if relu:
            v = jnp.maximum(v, 0.0)
        out_ref[0, :, :] = v
    return kernel


# ---------------------------------------------------------------------------
# pallas_call wrappers
# ---------------------------------------------------------------------------
_CPARAMS = pltpu.CompilerParams(dimension_semantics=("parallel",),
                                vmem_limit_bytes=_VMEM_LIMIT)


def _conv_stage(inp, maskb, w_taps, tap_offsets, wt, scale_shift=None,
                out_dtype=jnp.bfloat16):
    n, lb, cpi = inp.shape
    t, _, cpo = w_taps.shape
    ls = lb - 4 * wt
    mode = 'bn_silu' if scale_shift is not None else 'plain'
    kernel = _make_conv_kernel(tuple(tap_offsets), wt, ls, cpo, mode)
    args = [inp, maskb]
    in_specs = [pl.BlockSpec((1, lb, cpi), lambda i: (i, 0, 0)),
                pl.BlockSpec((lb, 1), lambda i: (0, 0))]
    if scale_shift is not None:
        args += list(scale_shift)
        in_specs += [pl.BlockSpec((1, cpi), lambda i: (0, 0)),
                     pl.BlockSpec((1, cpi), lambda i: (0, 0))]
    args.append(w_taps)
    in_specs.append(pl.BlockSpec((t, cpi, cpo), lambda i: (0, 0, 0)))
    return pl.pallas_call(
        kernel,
        out_shape=(jax.ShapeDtypeStruct((n, lb, cpo), out_dtype),
                   jax.ShapeDtypeStruct((n, 2, cpo), jnp.float32)),
        grid=(n,),
        in_specs=in_specs,
        out_specs=(pl.BlockSpec((1, lb, cpo), lambda i: (i, 0, 0)),
                   pl.BlockSpec((1, 2, cpo), lambda i: (i, 0, 0))),
        compiler_params=_CPARAMS,
    )(*args)


def _conv_residual_stage(y, identity, maskb, scale, shift, w_taps, tap_offsets, wt,
                         out_dtype=jnp.bfloat16):
    """Fused: r = ReLU(BN(y) + identity); then conv(r).  Emits (r, conv_raw, stats)."""
    n, lb, cpi = y.shape
    t, _, cpo = w_taps.shape
    ls = lb - 4 * wt
    kernel = _make_conv_kernel(tuple(tap_offsets), wt, ls, cpo, 'residual_relu')
    return pl.pallas_call(
        kernel,
        out_shape=(jax.ShapeDtypeStruct((n, lb, cpi), jnp.float32),    # r (residual)
                   jax.ShapeDtypeStruct((n, lb, cpo), out_dtype),      # conv(r) raw
                   jax.ShapeDtypeStruct((n, 2, cpo), jnp.float32)),    # stats
        grid=(n,),
        in_specs=[pl.BlockSpec((1, lb, cpi), lambda i: (i, 0, 0)),
                  pl.BlockSpec((1, lb, cpi), lambda i: (i, 0, 0)),
                  pl.BlockSpec((lb, 1), lambda i: (0, 0)),
                  pl.BlockSpec((1, cpi), lambda i: (0, 0)),
                  pl.BlockSpec((1, cpi), lambda i: (0, 0)),
                  pl.BlockSpec((t, cpi, cpo), lambda i: (0, 0, 0))],
        out_specs=(pl.BlockSpec((1, lb, cpi), lambda i: (i, 0, 0)),
                   pl.BlockSpec((1, lb, cpo), lambda i: (i, 0, 0)),
                   pl.BlockSpec((1, 2, cpo), lambda i: (i, 0, 0))),
        compiler_params=_CPARAMS,
    )(y, identity, maskb, scale, shift, w_taps)


def _add_stage(y, identity, scale, shift, relu):
    n, lb, cp = y.shape
    kernel = _make_add_kernel(relu)
    return pl.pallas_call(
        kernel,
        out_shape=jax.ShapeDtypeStruct((n, lb, cp), jnp.float32),
        grid=(n,),
        in_specs=[pl.BlockSpec((1, lb, cp), lambda i: (i, 0, 0)),
                  pl.BlockSpec((1, lb, cp), lambda i: (i, 0, 0)),
                  pl.BlockSpec((1, cp), lambda i: (0, 0)),
                  pl.BlockSpec((1, cp), lambda i: (0, 0))],
        out_specs=pl.BlockSpec((1, lb, cp), lambda i: (i, 0, 0)),
        compiler_params=_CPARAMS,
    )(y, identity, scale, shift)


# ---------------------------------------------------------------------------
# plain-JAX glue (tiny per-channel math + layout)
# ---------------------------------------------------------------------------
def _fold_bn(stats, count, gamma, beta):
    """Reduce per-image (sum, sumsq) partials; fold BN into a single scale/shift."""
    s = jnp.sum(stats, axis=0)                       # (2, Cp)
    mean = s[0] / count
    var = jnp.maximum(s[1] / count - mean * mean, 0.0)
    scale = gamma * lax.rsqrt(var + EPS)
    shift = beta - scale * mean
    return scale.reshape(1, -1), shift.reshape(1, -1)


def _pad_w(w_hwio, cpi, cpo):
    kh, kw, ci, co = w_hwio.shape
    taps = w_hwio.reshape(kh * kw, ci, co)
    return jnp.pad(taps, ((0, 0), (0, cpi - ci), (0, cpo - co))).astype(jnp.bfloat16)


def _pad_c(v, cp):
    return jnp.pad(v.astype(jnp.float32), (0, cp - v.shape[0]))


def _tap_offsets(kh, kw, wt):
    ph, pw = (kh - 1) // 2, (kw - 1) // 2
    return [(i - ph) * wt + (j - pw) for i in range(kh) for j in range(kw)]


def light_res_block(x_nchw, params, use_ffn=False):
    n, c, h, w = x_nchw.shape
    cp = _round_up(c, _LANE)
    c2p = _round_up(2 * c, _LANE)
    wt = w + 2                                   # padded row width
    lb = (h + 6) * wt                            # 2 slack rows + (H+2) frame + 2 slack
    count = float(n * h * w)

    x = jnp.transpose(x_nchw, (0, 2, 3, 1)).astype(jnp.float32)         # NHWC
    xbuf = jnp.pad(x, ((0, 0), (3, 3), (1, 1), (0, cp - c))).reshape(n, lb, cp)
    maskb = jnp.pad(jnp.ones((h, w), jnp.float32), ((3, 3), (1, 1))).reshape(lb, 1)

    # stage 1: ConvBnAct (1,3) -- conv + stats here; its BN+SiLU is fused into stage 2
    y1, s1 = _conv_stage(xbuf, maskb, _pad_w(params['w1'], cp, cp),
                         _tap_offsets(1, 3, wt), wt)
    sc1, sh1 = _fold_bn(s1, count, _pad_c(params['g1'], cp), _pad_c(params['b1'], cp))

    # stage 2: ConvBnAct (3,3)
    y2, s2 = _conv_stage(y1, maskb, _pad_w(params['w2'], cp, cp),
                         _tap_offsets(3, 3, wt), wt, scale_shift=(sc1, sh1))
    sc2, sh2 = _fold_bn(s2, count, _pad_c(params['g2'], cp), _pad_c(params['b2'], cp))

    # stage 3: ConvBn (3,1)
    y3, s3 = _conv_stage(y2, maskb, _pad_w(params['w3'], cp, cp),
                         _tap_offsets(3, 1, wt), wt, scale_shift=(sc2, sh2))
    sc3, sh3 = _fold_bn(s3, count, _pad_c(params['g3'], cp), _pad_c(params['b3'], cp))

    if use_ffn:
        # residual r = ReLU(BN3(y3) + x) fused into the FFN's first 1x1 conv
        r, f1, s4 = _conv_residual_stage(y3, xbuf, maskb, sc3, sh3,
                                         _pad_w(params['wf1'], cp, c2p),
                                         _tap_offsets(1, 1, wt), wt)
        sc4, sh4 = _fold_bn(s4, count, _pad_c(params['gf1'], c2p),
                            _pad_c(params['bf1'], c2p))
        f2, s5 = _conv_stage(f1, maskb, _pad_w(params['wf2'], c2p, cp),
                             _tap_offsets(1, 1, wt), wt, scale_shift=(sc4, sh4))
        sc5, sh5 = _fold_bn(s5, count, _pad_c(params['gf2'], cp),
                            _pad_c(params['bf2'], cp))
        r = _add_stage(f2, r, sc5, sh5, relu=False)
    else:
        # residual: r = ReLU(BN3(y3) + x)
        r = _add_stage(y3, xbuf, sc3, sh3, relu=True)

    out = r.reshape(n, h + 6, w + 2, cp)[:, 3:3 + h, 1:1 + w, :c]
    return jnp.transpose(out, (0, 3, 1, 2))                             # back to NCHW


# ---------------------------------------------------------------------------
# pure-JAX reference (f32, lax.conv) with identical semantics, for validation
# ---------------------------------------------------------------------------
def ref_forward(x_nchw, params, use_ffn=False):
    x = jnp.transpose(x_nchw, (0, 2, 3, 1)).astype(jnp.float32)
    dn = ('NHWC', 'HWIO', 'NHWC')

    def conv(t, wgt, pad):
        return lax.conv_general_dilated(t, wgt, (1, 1), pad, dimension_numbers=dn)

    def bn(y, g, b):
        mu = y.mean(axis=(0, 1, 2), keepdims=True)
        var = ((y - mu) ** 2).mean(axis=(0, 1, 2), keepdims=True)
        return (y - mu) * lax.rsqrt(var + EPS) * g + b

    def silu(t):
        return t * jax.nn.sigmoid(t)

    t1 = silu(bn(conv(x, params['w1'], [(0, 0), (1, 1)]), params['g1'], params['b1']))
    t2 = silu(bn(conv(t1, params['w2'], [(1, 1), (1, 1)]), params['g2'], params['b2']))
    t3 = bn(conv(t2, params['w3'], [(1, 1), (0, 0)]), params['g3'], params['b3'])
    r = jnp.maximum(t3 + x, 0.0)
    if use_ffn:
        f1 = silu(bn(conv(r, params['wf1'], [(0, 0), (0, 0)]),
                     params['gf1'], params['bf1']))
        f2 = bn(conv(f1, params['wf2'], [(0, 0), (0, 0)]),
                params['gf2'], params['bf2'])
        r = f2 + r
    return jnp.transpose(r, (0, 3, 1, 2))


if __name__ == "__main__":
    key = jax.random.PRNGKey(0)
    n, c, h, w = 2, 4, 16, 16
    ks = jax.random.split(key, 16)

    def bf16_round(a):   # weights rounded to bf16 so the bf16 MXU path and the f32
        return a.astype(jnp.bfloat16).astype(jnp.float32)   # reference share exact weights

    def rnd(k, shape, s):
        return s * jax.random.normal(k, shape, jnp.float32)

    params = {
        'w1': bf16_round(rnd(ks[0], (1, 3, c, c), 0.2)),           # HWIO
        'g1': 1.0 + 0.1 * jax.random.normal(ks[1], (c,), jnp.float32),
        'b1': 0.1 * jax.random.normal(ks[2], (c,), jnp.float32),
        'w2': bf16_round(rnd(ks[3], (3, 3, c, c), 0.2)),
        'g2': 1.0 + 0.1 * jax.random.normal(ks[4], (c,), jnp.float32),
        'b2': 0.1 * jax.random.normal(ks[5], (c,), jnp.float32),
        'w3': bf16_round(rnd(ks[6], (3, 1, c, c), 0.2)),
        'g3': 1.0 + 0.1 * jax.random.normal(ks[7], (c,), jnp.float32),
        'b3': 0.1 * jax.random.normal(ks[8], (c,), jnp.float32),
        'wf1': bf16_round(rnd(ks[9], (1, 1, c, 2 * c), 0.2)),
        'gf1': 1.0 + 0.1 * jax.random.normal(ks[10], (2 * c,), jnp.float32),
        'bf1': 0.1 * jax.random.normal(ks[11], (2 * c,), jnp.float32),
        'wf2': bf16_round(rnd(ks[12], (1, 1, 2 * c, c), 0.2)),
        'gf2': 1.0 + 0.1 * jax.random.normal(ks[13], (c,), jnp.float32),
        'bf2': 0.1 * jax.random.normal(ks[14], (c,), jnp.float32),
    }
    x = jax.random.normal(ks[15], (n, c, h, w), jnp.float32)       # NCHW like PyTorch

    for use_ffn in (False, True):
        fwd = jax.jit(functools.partial(light_res_block, use_ffn=use_ffn))
        out = jax.block_until_ready(fwd(x, params))
        assert out.shape == (n, c, h, w), out.shape
        ref = ref_forward(x, params, use_ffn=use_ffn)
        max_err = float(jnp.max(jnp.abs(out - ref)))
        mean_err = float(jnp.mean(jnp.abs(out - ref)))
        # tolerance covers bf16 matmul operands, bf16 inter-stage storage and the
        # approximate-reciprocal sigmoid
        assert max_err < 1.5e-1 and mean_err < 2e-2, (use_ffn, max_err, mean_err)
    print("KERNEL_OK")
</pallas_src>

<mosaic_0001>
module attributes {stable_mosaic.version = 11 : i64} {
  func.func @kernel(%arg0: i32, %arg1: memref<1x396x128xf32, #tpu.memory_space<vmem>>, %arg2: memref<396x1xf32, #tpu.memory_space<vmem>>, %arg3: memref<3x128x128xbf16, #tpu.memory_space<vmem>>, %arg4: memref<1x396x128xbf16, #tpu.memory_space<vmem>>, %arg5: memref<1x2x128xf32, #tpu.memory_space<vmem>>) attributes {dimension_semantics = [#tpu.dimension_semantics<parallel>], iteration_bounds = array<i64: 2>, scalar_prefetch = 0 : i64, scratch_operands = 0 : i64, tpu.core_type = #tpu.core_type<tc>, window_params = [{transform_indices = @transform_0, window_bounds = array<i64: 1, 396, 128>}, {pipeline_mode = #tpu.pipeline_mode<synchronous>, transform_indices = @transform_1, window_bounds = array<i64: 396, 1>}, {pipeline_mode = #tpu.pipeline_mode<synchronous>, transform_indices = @transform_2, window_bounds = array<i64: 3, 128, 128>}, {transform_indices = @transform_3, window_bounds = array<i64: 1, 396, 128>}, {transform_indices = @transform_4, window_bounds = array<i64: 1, 2, 128>}]} {
    %c0 = arith.constant 0 : index
    %c0_0 = arith.constant 0 : index
    %c0_1 = arith.constant 0 : index
    %0 = vector.load %arg1[%c0, %c0_0, %c0_1] : memref<1x396x128xf32, #tpu.memory_space<vmem>>, vector<1x396x128xf32>
    %1 = vector.shape_cast %0 : vector<1x396x128xf32> to vector<396x128xf32>
    %c0_2 = arith.constant 0 : index
    %c0_3 = arith.constant 0 : index
    %2 = vector.load %arg2[%c0_2, %c0_3] : memref<396x1xf32, #tpu.memory_space<vmem>>, vector<396x1xf32>
    %3 = arith.truncf %1 : vector<396x128xf32> to vector<396x128xbf16>
    %cst = arith.constant 0.000000e+00 : f32
    %4 = vector.broadcast %cst : f32 to vector<324x128xf32>
    %5 = vector.extract_strided_slice %3 {offsets = [35, 0], sizes = [324, 128], strides = [1, 1]} : vector<396x128xbf16> to vector<324x128xbf16>
    %c0_4 = arith.constant 0 : index
    %c0_5 = arith.constant 0 : index
    %c0_6 = arith.constant 0 : index
    %6 = vector.load %arg3[%c0_4, %c0_5, %c0_6] : memref<3x128x128xbf16, #tpu.memory_space<vmem>>, vector<1x128x128xbf16>
    %7 = vector.shape_cast %6 : vector<1x128x128xbf16> to vector<128x128xbf16>
    %cst_7 = arith.constant dense<0.000000e+00> : vector<324x128xf32>
    %8 = tpu.matmul %5, %7, %cst_7 {dimension_numbers = #tpu.dot_dimension_numbers<[1], [0], [0], [1], [0, 0, 1, 1], [], []>} : vector<324x128xbf16>, vector<128x128xbf16>, vector<324x128xf32> -> vector<324x128xf32>
    %9 = arith.addf %4, %8 : vector<324x128xf32>
    %10 = vector.extract_strided_slice %3 {offsets = [36, 0], sizes = [324, 128], strides = [1, 1]} : vector<396x128xbf16> to vector<324x128xbf16>
    %c1 = arith.constant 1 : index
    %c0_8 = arith.constant 0 : index
    %c0_9 = arith.constant 0 : index
    %11 = vector.load %arg3[%c1, %c0_8, %c0_9] : memref<3x128x128xbf16, #tpu.memory_space<vmem>>, vector<1x128x128xbf16>
    %12 = vector.shape_cast %11 : vector<1x128x128xbf16> to vector<128x128xbf16>
    %cst_10 = arith.constant dense<0.000000e+00> : vector<324x128xf32>
    %13 = tpu.matmul %10, %12, %cst_10 {dimension_numbers = #tpu.dot_dimension_numbers<[1], [0], [0], [1], [0, 0, 1, 1], [], []>} : vector<324x128xbf16>, vector<128x128xbf16>, vector<324x128xf32> -> vector<324x128xf32>
    %14 = arith.addf %9, %13 : vector<324x128xf32>
    %15 = vector.extract_strided_slice %3 {offsets = [37, 0], sizes = [324, 128], strides = [1, 1]} : vector<396x128xbf16> to vector<324x128xbf16>
    %c2 = arith.constant 2 : index
    %c0_11 = arith.constant 0 : index
    %c0_12 = arith.constant 0 : index
    %16 = vector.load %arg3[%c2, %c0_11, %c0_12] : memref<3x128x128xbf16, #tpu.memory_space<vmem>>, vector<1x128x128xbf16>
    %17 = vector.shape_cast %16 : vector<1x128x128xbf16> to vector<128x128xbf16>
    %cst_13 = arith.constant dense<0.000000e+00> : vector<324x128xf32>
    %18 = tpu.matmul %15, %17, %cst_13 {dimension_numbers = #tpu.dot_dimension_numbers<[1], [0], [0], [1], [0, 0, 1, 1], [], []>} : vector<324x128xbf16>, vector<128x128xbf16>, vector<324x128xf32> -> vector<324x128xf32>
    %19 = arith.addf %14, %18 : vector<324x128xf32>
    %20 = vector.extract_strided_slice %2 {offsets = [36, 0], sizes = [324, 1], strides = [1, 1]} : vector<396x1xf32> to vector<324x1xf32>
    %cst_14 = arith.constant 5.000000e-01 : f32
    %21 = vector.broadcast %cst_14 : f32 to vector<324x1xf32>
    %22 = arith.cmpf ogt, %20, %21 : vector<324x1xf32>
    %cst_15 = arith.constant 0.000000e+00 : f32
    %23 = vector.shape_cast %22 : vector<324x1xi1> to vector<324x1xi1>
    %24 = vector.broadcast %23 : vector<324x1xi1> to vector<324x128xi1>
    %25 = vector.broadcast %cst_15 : f32 to vector<324x128xf32>
    %26 = arith.select %24, %19, %25 : vector<324x128xi1>, vector<324x128xf32>
    %cst_16 = arith.constant 0.000000e+00 : bf16
    %27 = vector.broadcast %cst_16 : bf16 to vector<36x128xbf16>
    %c0_17 = arith.constant 0 : index
    %c0_18 = arith.constant 0 : index
    %c0_19 = arith.constant 0 : index
    %28 = vector.load %arg4[%c0_17, %c0_18, %c0_19] : memref<1x396x128xbf16, #tpu.memory_space<vmem>>, vector<1x36x128xbf16>
    %29 = vector.shape_cast %28 : vector<1x36x128xbf16> to vector<36x128xbf16>
    %30 = vector.shape_cast %27 : vector<36x128xbf16> to vector<1x36x128xbf16>
    tpu.vector_store %arg4[%c0_17, %c0_18, %c0_19], %30 {strides = array<i32>} : memref<1x396x128xbf16, #tpu.memory_space<vmem>>, vector<1x36x128xbf16>,
    %31 = arith.truncf %26 : vector<324x128xf32> to vector<324x128xbf16>
    %c0_20 = arith.constant 0 : index
    %c36 = arith.constant 36 : index
    %c0_21 = arith.constant 0 : index
    %32 = vector.load %arg4[%c0_20, %c36, %c0_21] : memref<1x396x128xbf16, #tpu.memory_space<vmem>>, vector<1x324x128xbf16>
    %33 = vector.shape_cast %32 : vector<1x324x128xbf16> to vector<324x128xbf16>
    %34 = vector.shape_cast %31 : vector<324x128xbf16> to vector<1x324x128xbf16>
    tpu.vector_store %arg4[%c0_20, %c36, %c0_21], %34 {strides = array<i32>} : memref<1x396x128xbf16, #tpu.memory_space<vmem>>, vector<1x324x128xbf16>,
    %c0_22 = arith.constant 0 : index
    %c360 = arith.constant 360 : index
    %c0_23 = arith.constant 0 : index
    %35 = vector.load %arg4[%c0_22, %c360, %c0_23] : memref<1x396x128xbf16, #tpu.memory_space<vmem>>, vector<1x36x128xbf16>
    %36 = vector.shape_cast %35 : vector<1x36x128xbf16> to vector<36x128xbf16>
    %37 = vector.shape_cast %27 : vector<36x128xbf16> to vector<1x36x128xbf16>
    tpu.vector_store %arg4[%c0_22, %c360, %c0_23], %37 {strides = array<i32>} : memref<1x396x128xbf16, #tpu.memory_space<vmem>>, vector<1x36x128xbf16>,
    %cst_24 = arith.constant dense<0.000000e+00> : vector<128xf32>
    %38 = vector.multi_reduction <add>, %26, %cst_24 [0] : vector<324x128xf32> to vector<128xf32>
    %39 = vector.shape_cast %38 : vector<128xf32> to vector<1x128xf32>
    %c0_25 = arith.constant 0 : index
    %c0_26 = arith.constant 0 : index
    %c0_27 = arith.constant 0 : index
    %40 = vector.load %arg5[%c0_25, %c0_26, %c0_27] : memref<1x2x128xf32, #tpu.memory_space<vmem>>, vector<1x1x128xf32>
    %41 = vector.shape_cast %40 : vector<1x1x128xf32> to vector<1x128xf32>
    %42 = vector.shape_cast %39 : vector<1x128xf32> to vector<1x1x128xf32>
    tpu.vector_store %arg5[%c0_25, %c0_26, %c0_27], %42 {strides = array<i32>} : memref<1x2x128xf32, #tpu.memory_space<vmem>>, vector<1x1x128xf32>,
    %43 = arith.mulf %26, %26 : vector<324x128xf32>
    %cst_28 = arith.constant dense<0.000000e+00> : vector<128xf32>
    %44 = vector.multi_reduction <add>, %43, %cst_28 [0] : vector<324x128xf32> to vector<128xf32>
    %45 = vector.shape_cast %44 : vector<128xf32> to vector<1x128xf32>
    %c0_29 = arith.constant 0 : index
    %c1_30 = arith.constant 1 : index
    %c0_31 = arith.constant 0 : index
    %46 = vector.load %arg5[%c0_29, %c1_30, %c0_31] : memref<1x2x128xf32, #tpu.memory_space<vmem>>, vector<1x1x128xf32>
    %47 = vector.shape_cast %46 : vector<1x1x128xf32> to vector<1x128xf32>
    %48 = vector.shape_cast %45 : vector<1x128xf32> to vector<1x1x128xf32>
    tpu.vector_store %arg5[%c0_29, %c1_30, %c0_31], %48 {strides = array<i32>} : memref<1x2x128xf32, #tpu.memory_space<vmem>>, vector<1x1x128xf32>,
    return
  }
  func.func @transform_0(%arg0: i32) -> (i32, i32, i32) {
    %c0_i32 = arith.constant 0 : i32
    %c0_i32_0 = arith.constant 0 : i32
    %c0_i32_1 = arith.constant 0 : i32
    return %arg0, %c0_i32, %c0_i32_0 : i32, i32, i32
  }
  func.func @transform_1(%arg0: i32) -> (i32, i32) {
    %c0_i32 = arith.constant 0 : i32
    %c0_i32_0 = arith.constant 0 : i32
    %c0_i32_1 = arith.constant 0 : i32
    return %c0_i32, %c0_i32_0 : i32, i32
  }
  func.func @transform_2(%arg0: i32) -> (i32, i32, i32) {
    %c0_i32 = arith.constant 0 : i32
    %c0_i32_0 = arith.constant 0 : i32
    %c0_i32_1 = arith.constant 0 : i32
    %c0_i32_2 = arith.constant 0 : i32
    return %c0_i32, %c0_i32_0, %c0_i32_1 : i32, i32, i32
  }
  func.func @transform_3(%arg0: i32) -> (i32, i32, i32) {
    %c0_i32 = arith.constant 0 : i32
    %c0_i32_0 = arith.constant 0 : i32
    %c0_i32_1 = arith.constant 0 : i32
    return %arg0, %c0_i32, %c0_i32_0 : i32, i32, i32
  }
  func.func @transform_4(%arg0: i32) -> (i32, i32, i32) {
    %c0_i32 = arith.constant 0 : i32
    %c0_i32_0 = arith.constant 0 : i32
    %c0_i32_1 = arith.constant 0 : i32
    return %arg0, %c0_i32, %c0_i32_0 : i32, i32, i32
  }
}

module attributes {stable_mosaic.version = 11 : i64} {
  func.func @kernel(%arg0: i32, %arg1: memref<1x396x128xbf16, #tpu.memory_space<vmem>>, %arg2: memref<396x1xf32, #tpu.memory_space<vmem>>, %arg3: memref<1x128xf32, #tpu.memory_space<vmem>>, %arg4: memref<1x128xf32, #tpu.memory_space<vmem>>, %arg5: memref<9x128x128xbf16, #tpu.memory_space<vmem>>, %arg6: memref<1x396x128xbf16, #tpu.memory_space<vmem>>, %arg7: memref<1x2x128xf32, #tpu.memory_space<vmem>>) attributes {dimension_semantics = [#tpu.dimension_semantics<parallel>], iteration_bounds = array<i64: 2>, scalar_prefetch = 0 : i64, scratch_operands = 0 : i64, tpu.core_type = #tpu.core_type<tc>, window_params = [{transform_indices = @transform_0, window_bounds = array<i64: 1, 396, 128>}, {pipeline_mode = #tpu.pipeline_mode<synchronous>, transform_indices = @transform_1, window_bounds = array<i64: 396, 1>}, {pipeline_mode = #tpu.pipeline_mode<synchronous>, transform_indices = @transform_2, window_bounds = array<i64: 1, 128>}, {pipeline_mode = #tpu.pipeline_mode<synchronous>, transform_indices = @transform_3, window_bounds = array<i64: 1, 128>}, {pipeline_mode = #tpu.pipeline_mode<synchronous>, transform_indices = @transform_4, window_bounds = array<i64: 9, 128, 128>}, {transform_indices = @transform_5, window_bounds = array<i64: 1, 396, 128>}, {transform_indices = @transform_6, window_bounds = array<i64: 1, 2, 128>}]} {
    %c0 = arith.constant 0 : index
    %c0_0 = arith.constant 0 : index
    %0 = vector.load %arg2[%c0, %c0_0] : memref<396x1xf32, #tpu.memory_space<vmem>>, vector<396x1xf32>
    %c0_1 = arith.constant 0 : index
    %c0_2 = arith.constant 0 : index
    %c0_3 = arith.constant 0 : index
    %1 = vector.load %arg1[%c0_1, %c0_2, %c0_3] : memref<1x396x128xbf16, #tpu.memory_space<vmem>>, vector<1x396x128xbf16>
    %2 = vector.shape_cast %1 : vector<1x396x128xbf16> to vector<396x128xbf16>
    %c0_4 = arith.constant 0 : index
    %c0_5 = arith.constant 0 : index
    %3 = vector.load %arg3[%c0_4, %c0_5] : memref<1x128xf32, #tpu.memory_space<vmem>>, vector<1x128xf32>
    %4 = arith.extf %2 : vector<396x128xbf16> to vector<396x128xf32>
    %5 = vector.broadcast %3 : vector<1x128xf32> to vector<396x128xf32>
    %6 = arith.mulf %4, %5 : vector<396x128xf32>
    %c0_6 = arith.constant 0 : index
    %c0_7 = arith.constant 0 : index
    %7 = vector.load %arg4[%c0_6, %c0_7] : memref<1x128xf32, #tpu.memory_space<vmem>>, vector<1x128xf32>
    %8 = vector.broadcast %7 : vector<1x128xf32> to vector<396x128xf32>
    %9 = arith.addf %6, %8 : vector<396x128xf32>
    %cst = arith.constant 5.000000e-01 : f32
    %10 = vector.broadcast %cst : f32 to vector<396x1xf32>
    %11 = arith.cmpf ogt, %0, %10 : vector<396x1xf32>
    %cst_8 = arith.constant 0.000000e+00 : f32
    %12 = vector.broadcast %cst_8 : f32 to vector<396x128xf32>
    %13 = arith.subf %12, %9 : vector<396x128xf32>
    %14 = math.exp %13 : vector<396x128xf32>
    %cst_9 = arith.constant 1.000000e+00 : f32
    %15 = vector.broadcast %cst_9 : f32 to vector<396x128xf32>
    %16 = arith.addf %15, %14 : vector<396x128xf32>
    %17 = tpu.reciprocal %16 {approx = true} : vector<396x128xf32> -> vector<396x128xf32>
    %18 = arith.mulf %9, %17 : vector<396x128xf32>
    %cst_10 = arith.constant 0.000000e+00 : f32
    %19 = vector.shape_cast %11 : vector<396x1xi1> to vector<396x1xi1>
    %20 = vector.broadcast %19 : vector<396x1xi1> to vector<396x128xi1>
    %21 = vector.broadcast %cst_10 : f32 to vector<396x128xf32>
    %22 = arith.select %20, %18, %21 : vector<396x128xi1>, vector<396x128xf32>
    %23 = arith.truncf %22 : vector<396x128xf32> to vector<396x128xbf16>
    %cst_11 = arith.constant 0.000000e+00 : f32
    %24 = vector.broadcast %cst_11 : f32 to vector<324x128xf32>
    %25 = vector.extract_strided_slice %23 {offsets = [17, 0], sizes = [324, 128], strides = [1, 1]} : vector<396x128xbf16> to vector<324x128xbf16>
    %c0_12 = arith.constant 0 : index
    %c0_13 = arith.constant 0 : index
    %c0_14 = arith.constant 0 : index
    %26 = vector.load %arg5[%c0_12, %c0_13, %c0_14] : memref<9x128x128xbf16, #tpu.memory_space<vmem>>, vector<1x128x128xbf16>
    %27 = vector.shape_cast %26 : vector<1x128x128xbf16> to vector<128x128xbf16>
    %cst_15 = arith.constant dense<0.000000e+00> : vector<324x128xf32>
    %28 = tpu.matmul %25, %27, %cst_15 {dimension_numbers = #tpu.dot_dimension_numbers<[1], [0], [0], [1], [0, 0, 1, 1], [], []>} : vector<324x128xbf16>, vector<128x128xbf16>, vector<324x128xf32> -> vector<324x128xf32>
    %29 = arith.addf %24, %28 : vector<324x128xf32>
    %30 = vector.extract_strided_slice %23 {offsets = [18, 0], sizes = [324, 128], strides = [1, 1]} : vector<396x128xbf16> to vector<324x128xbf16>
    %c1 = arith.constant 1 : index
    %c0_16 = arith.constant 0 : index
    %c0_17 = arith.constant 0 : index
    %31 = vector.load %arg5[%c1, %c0_16, %c0_17] : memref<9x128x128xbf16, #tpu.memory_space<vmem>>, vector<1x128x128xbf16>
    %32 = vector.shape_cast %31 : vector<1x128x128xbf16> to vector<128x128xbf16>
    %cst_18 = arith.constant dense<0.000000e+00> : vector<324x128xf32>
    %33 = tpu.matmul %30, %32, %cst_18 {dimension_numbers = #tpu.dot_dimension_numbers<[1], [0], [0], [1], [0, 0, 1, 1], [], []>} : vector<324x128xbf16>, vector<128x128xbf16>, vector<324x128xf32> -> vector<324x128xf32>
    %34 = arith.addf %29, %33 : vector<324x128xf32>
    %35 = vector.extract_strided_slice %23 {offsets = [19, 0], sizes = [324, 128], strides = [1, 1]} : vector<396x128xbf16> to vector<324x128xbf16>
    %c2 = arith.constant 2 : index
    %c0_19 = arith.constant 0 : index
    %c0_20 = arith.constant 0 : index
    %36 = vector.load %arg5[%c2, %c0_19, %c0_20] : memref<9x128x128xbf16, #tpu.memory_space<vmem>>, vector<1x128x128xbf16>
    %37 = vector.shape_cast %36 : vector<1x128x128xbf16> to vector<128x128xbf16>
    %cst_21 = arith.constant dense<0.000000e+00> : vector<324x128xf32>
    %38 = tpu.matmul %35, %37, %cst_21 {dimension_numbers = #tpu.dot_dimension_numbers<[1], [0], [0], [1], [0, 0, 1, 1], [], []>} : vector<324x128xbf16>, vector<128x128xbf16>, vector<324x128xf32> -> vector<324x128xf32>
    %39 = arith.addf %34, %38 : vector<324x128xf32>
    %40 = vector.extract_strided_slice %23 {offsets = [35, 0], sizes = [324, 128], strides = [1, 1]} : vector<396x128xbf16> to vector<324x128xbf16>
    %c3 = arith.constant 3 : index
    %c0_22 = arith.constant 0 : index
    %c0_23 = arith.constant 0 : index
    %41 = vector.load %arg5[%c3, %c0_22, %c0_23] : memref<9x128x128xbf16, #tpu.memory_space<vmem>>, vector<1x128x128xbf16>
    %42 = vector.shape_cast %41 : vector<1x128x128xbf16> to vector<128x128xbf16>
    %cst_24 = arith.constant dense<0.000000e+00> : vector<324x128xf32>
    %43 = tpu.matmul %40, %42, %cst_24 {dimension_numbers = #tpu.dot_dimension_numbers<[1], [0], [0], [1], [0, 0, 1, 1], [], []>} : vector<324x128xbf16>, vector<128x128xbf16>, vector<324x128xf32> -> vector<324x128xf32>
    %44 = arith.addf %39, %43 : vector<324x128xf32>
    %45 = vector.extract_strided_slice %23 {offsets = [36, 0], sizes = [324, 128], strides = [1, 1]} : vector<396x128xbf16> to vector<324x128xbf16>
    %c4 = arith.constant 4 : index
    %c0_25 = arith.constant 0 : index
    %c0_26 = arith.constant 0 : index
    %46 = vector.load %arg5[%c4, %c0_25, %c0_26] : memref<9x128x128xbf16, #tpu.memory_space<vmem>>, vector<1x128x128xbf16>
    %47 = vector.shape_cast %46 : vector<1x128x128xbf16> to vector<128x128xbf16>
    %cst_27 = arith.constant dense<0.000000e+00> : vector<324x128xf32>
    %48 = tpu.matmul %45, %47, %cst_27 {dimension_numbers = #tpu.dot_dimension_numbers<[1], [0], [0], [1], [0, 0, 1, 1], [], []>} : vector<324x128xbf16>, vector<128x128xbf16>, vector<324x128xf32> -> vector<324x128xf32>
    %49 = arith.addf %44, %48 : vector<324x128xf32>
    %50 = vector.extract_strided_slice %23 {offsets = [37, 0], sizes = [324, 128], strides = [1, 1]} : vector<396x128xbf16> to vector<324x128xbf16>
    %c5 = arith.constant 5 : index
    %c0_28 = arith.constant 0 : index
    %c0_29 = arith.constant 0 : index
    %51 = vector.load %arg5[%c5, %c0_28, %c0_29] : memref<9x128x128xbf16, #tpu.memory_space<vmem>>, vector<1x128x128xbf16>
    %52 = vector.shape_cast %51 : vector<1x128x128xbf16> to vector<128x128xbf16>
    %cst_30 = arith.constant dense<0.000000e+00> : vector<324x128xf32>
    %53 = tpu.matmul %50, %52, %cst_30 {dimension_numbers = #tpu.dot_dimension_numbers<[1], [0], [0], [1], [0, 0, 1, 1], [], []>} : vector<324x128xbf16>, vector<128x128xbf16>, vector<324x128xf32> -> vector<324x128xf32>
    %54 = arith.addf %49, %53 : vector<324x128xf32>
    %55 = vector.extract_strided_slice %23 {offsets = [53, 0], sizes = [324, 128], strides = [1, 1]} : vector<396x128xbf16> to vector<324x128xbf16>
    %c6 = arith.constant 6 : index
    %c0_31 = arith.constant 0 : index
    %c0_32 = arith.constant 0 : index
    %56 = vector.load %arg5[%c6, %c0_31, %c0_32] : memref<9x128x128xbf16, #tpu.memory_space<vmem>>, vector<1x128x128xbf16>
    %57 = vector.shape_cast %56 : vector<1x128x128xbf16> to vector<128x128xbf16>
    %cst_33 = arith.constant dense<0.000000e+00> : vector<324x128xf32>
    %58 = tpu.matmul %55, %57, %cst_33 {dimension_numbers = #tpu.dot_dimension_numbers<[1], [0], [0], [1], [0, 0, 1, 1], [], []>} : vector<324x128xbf16>, vector<128x128xbf16>, vector<324x128xf32> -> vector<324x128xf32>
    %59 = arith.addf %54, %58 : vector<324x128xf32>
    %60 = vector.extract_strided_slice %23 {offsets = [54, 0], sizes = [324, 128], strides = [1, 1]} : vector<396x128xbf16> to vector<324x128xbf16>
    %c7 = arith.constant 7 : index
    %c0_34 = arith.constant 0 : index
    %c0_35 = arith.constant 0 : index
    %61 = vector.load %arg5[%c7, %c0_34, %c0_35] : memref<9x128x128xbf16, #tpu.memory_space<vmem>>, vector<1x128x128xbf16>
    %62 = vector.shape_cast %61 : vector<1x128x128xbf16> to vector<128x128xbf16>
    %cst_36 = arith.constant dense<0.000000e+00> : vector<324x128xf32>
    %63 = tpu.matmul %60, %62, %cst_36 {dimension_numbers = #tpu.dot_dimension_numbers<[1], [0], [0], [1], [0, 0, 1, 1], [], []>} : vector<324x128xbf16>, vector<128x128xbf16>, vector<324x128xf32> -> vector<324x128xf32>
    %64 = arith.addf %59, %63 : vector<324x128xf32>
    %65 = vector.extract_strided_slice %23 {offsets = [55, 0], sizes = [324, 128], strides = [1, 1]} : vector<396x128xbf16> to vector<324x128xbf16>
    %c8 = arith.constant 8 : index
    %c0_37 = arith.constant 0 : index
    %c0_38 = arith.constant 0 : index
    %66 = vector.load %arg5[%c8, %c0_37, %c0_38] : memref<9x128x128xbf16, #tpu.memory_space<vmem>>, vector<1x128x128xbf16>
    %67 = vector.shape_cast %66 : vector<1x128x128xbf16> to vector<128x128xbf16>
    %cst_39 = arith.constant dense<0.000000e+00> : vector<324x128xf32>
    %68 = tpu.matmul %65, %67, %cst_39 {dimension_numbers = #tpu.dot_dimension_numbers<[1], [0], [0], [1], [0, 0, 1, 1], [], []>} : vector<324x128xbf16>, vector<128x128xbf16>, vector<324x128xf32> -> vector<324x128xf32>
    %69 = arith.addf %64, %68 : vector<324x128xf32>
    %70 = vector.extract_strided_slice %0 {offsets = [36, 0], sizes = [324, 1], strides = [1, 1]} : vector<396x1xf32> to vector<324x1xf32>
    %cst_40 = arith.constant 5.000000e-01 : f32
    %71 = vector.broadcast %cst_40 : f32 to vector<324x1xf32>
    %72 = arith.cmpf ogt, %70, %71 : vector<324x1xf32>
    %cst_41 = arith.constant 0.000000e+00 : f32
    %73 = vector.shape_cast %72 : vector<324x1xi1> to vector<324x1xi1>
    %74 = vector.broadcast %73 : vector<324x1xi1> to vector<324x128xi1>
    %75 = vector.broadcast %cst_41 : f32 to vector<324x128xf32>
    %76 = arith.select %74, %69, %75 : vector<324x128xi1>, vector<324x128xf32>
    %cst_42 = arith.constant 0.000000e+00 : bf16
    %77 = vector.broadcast %cst_42 : bf16 to vector<36x128xbf16>
    %c0_43 = arith.constant 0 : index
    %c0_44 = arith.constant 0 : index
    %c0_45 = arith.constant 0 : index
    %78 = vector.load %arg6[%c0_43, %c0_44, %c0_45] : memref<1x396x128xbf16, #tpu.memory_space<vmem>>, vector<1x36x128xbf16>
    %79 = vector.shape_cast %78 : vector<1x36x128xbf16> to vector<36x128xbf16>
    %80 = vector.shape_cast %77 : vector<36x128xbf16> to vector<1x36x128xbf16>
    tpu.vector_store %arg6[%c0_43, %c0_44, %c0_45], %80 {strides = array<i32>} : memref<1x396x128xbf16, #tpu.memory_space<vmem>>, vector<1x36x128xbf16>,
    %81 = arith.truncf %76 : vector<324x128xf32> to vector<324x128xbf16>
    %c0_46 = arith.constant 0 : index
    %c36 = arith.constant 36 : index
    %c0_47 = arith.constant 0 : index
    %82 = vector.load %arg6[%c0_46, %c36, %c0_47] : memref<1x396x128xbf16, #tpu.memory_space<vmem>>, vector<1x324x128xbf16>
    %83 = vector.shape_cast %82 : vector<1x324x128xbf16> to vector<324x128xbf16>
    %84 = vector.shape_cast %81 : vector<324x128xbf16> to vector<1x324x128xbf16>
    tpu.vector_store %arg6[%c0_46, %c36, %c0_47], %84 {strides = array<i32>} : memref<1x396x128xbf16, #tpu.memory_space<vmem>>, vector<1x324x128xbf16>,
    %c0_48 = arith.constant 0 : index
    %c360 = arith.constant 360 : index
    %c0_49 = arith.constant 0 : index
    %85 = vector.load %arg6[%c0_48, %c360, %c0_49] : memref<1x396x128xbf16, #tpu.memory_space<vmem>>, vector<1x36x128xbf16>
    %86 = vector.shape_cast %85 : vector<1x36x128xbf16> to vector<36x128xbf16>
    %87 = vector.shape_cast %77 : vector<36x128xbf16> to vector<1x36x128xbf16>
    tpu.vector_store %arg6[%c0_48, %c360, %c0_49], %87 {strides = array<i32>} : memref<1x396x128xbf16, #tpu.memory_space<vmem>>, vector<1x36x128xbf16>,
    %cst_50 = arith.constant dense<0.000000e+00> : vector<128xf32>
    %88 = vector.multi_reduction <add>, %76, %cst_50 [0] : vector<324x128xf32> to vector<128xf32>
    %89 = vector.shape_cast %88 : vector<128xf32> to vector<1x128xf32>
    %c0_51 = arith.constant 0 : index
    %c0_52 = arith.constant 0 : index
    %c0_53 = arith.constant 0 : index
    %90 = vector.load %arg7[%c0_51, %c0_52, %c0_53] : memref<1x2x128xf32, #tpu.memory_space<vmem>>, vector<1x1x128xf32>
    %91 = vector.shape_cast %90 : vector<1x1x128xf32> to vector<1x128xf32>
    %92 = vector.shape_cast %89 : vector<1x128xf32> to vector<1x1x128xf32>
    tpu.vector_store %arg7[%c0_51, %c0_52, %c0_53], %92 {strides = array<i32>} : memref<1x2x128xf32, #tpu.memory_space<vmem>>, vector<1x1x128xf32>,
    %93 = arith.mulf %76, %76 : vector<324x128xf32>
    %cst_54 = arith.constant dense<0.000000e+00> : vector<128xf32>
    %94 = vector.multi_reduction <add>, %93, %cst_54 [0] : vector<324x128xf32> to vector<128xf32>
    %95 = vector.shape_cast %94 : vector<128xf32> to vector<1x128xf32>
    %c0_55 = arith.constant 0 : index
    %c1_56 = arith.constant 1 : index
    %c0_57 = arith.constant 0 : index
    %96 = vector.load %arg7[%c0_55, %c1_56, %c0_57] : memref<1x2x128xf32, #tpu.memory_space<vmem>>, vector<1x1x128xf32>
    %97 = vector.shape_cast %96 : vector<1x1x128xf32> to vector<1x128xf32>
    %98 = vector.shape_cast %95 : vector<1x128xf32> to vector<1x1x128xf32>
    tpu.vector_store %arg7[%c0_55, %c1_56, %c0_57], %98 {strides = array<i32>} : memref<1x2x128xf32, #tpu.memory_space<vmem>>, vector<1x1x128xf32>,
    return
  }
  func.func @transform_0(%arg0: i32) -> (i32, i32, i32) {
    %c0_i32 = arith.constant 0 : i32
    %c0_i32_0 = arith.constant 0 : i32
    %c0_i32_1 = arith.constant 0 : i32
    return %arg0, %c0_i32, %c0_i32_0 : i32, i32, i32
  }
  func.func @transform_1(%arg0: i32) -> (i32, i32) {
    %c0_i32 = arith.constant 0 : i32
    %c0_i32_0 = arith.constant 0 : i32
    %c0_i32_1 = arith.constant 0 : i32
    return %c0_i32, %c0_i32_0 : i32, i32
  }
  func.func @transform_2(%arg0: i32) -> (i32, i32) {
    %c0_i32 = arith.constant 0 : i32
    %c0_i32_0 = arith.constant 0 : i32
    %c0_i32_1 = arith.constant 0 : i32
    return %c0_i32, %c0_i32_0 : i32, i32
  }
  func.func @transform_3(%arg0: i32) -> (i32, i32) {
    %c0_i32 = arith.constant 0 : i32
    %c0_i32_0 = arith.constant 0 : i32
    %c0_i32_1 = arith.constant 0 : i32
    return %c0_i32, %c0_i32_0 : i32, i32
  }
  func.func @transform_4(%arg0: i32) -> (i32, i32, i32) {
    %c0_i32 = arith.constant 0 : i32
    %c0_i32_0 = arith.constant 0 : i32
    %c0_i32_1 = arith.constant 0 : i32
    %c0_i32_2 = arith.constant 0 : i32
    return %c0_i32, %c0_i32_0, %c0_i32_1 : i32, i32, i32
  }
  func.func @transform_5(%arg0: i32) -> (i32, i32, i32) {
    %c0_i32 = arith.constant 0 : i32
    %c0_i32_0 = arith.constant 0 : i32
    %c0_i32_1 = arith.constant 0 : i32
    return %arg0, %c0_i32, %c0_i32_0 : i32, i32, i32
  }
  func.func @transform_6(%arg0: i32) -> (i32, i32, i32) {
    %c0_i32 = arith.constant 0 : i32
    %c0_i32_0 = arith.constant 0 : i32
    %c0_i32_1 = arith.constant 0 : i32
    return %arg0, %c0_i32, %c0_i32_0 : i32, i32, i32
  }
}

module attributes {stable_mosaic.version = 11 : i64} {
  func.func @kernel(%arg0: i32, %arg1: memref<1x396x128xbf16, #tpu.memory_space<vmem>>, %arg2: memref<396x1xf32, #tpu.memory_space<vmem>>, %arg3: memref<1x128xf32, #tpu.memory_space<vmem>>, %arg4: memref<1x128xf32, #tpu.memory_space<vmem>>, %arg5: memref<3x128x128xbf16, #tpu.memory_space<vmem>>, %arg6: memref<1x396x128xbf16, #tpu.memory_space<vmem>>, %arg7: memref<1x2x128xf32, #tpu.memory_space<vmem>>) attributes {dimension_semantics = [#tpu.dimension_semantics<parallel>], iteration_bounds = array<i64: 2>, scalar_prefetch = 0 : i64, scratch_operands = 0 : i64, tpu.core_type = #tpu.core_type<tc>, window_params = [{transform_indices = @transform_0, window_bounds = array<i64: 1, 396, 128>}, {pipeline_mode = #tpu.pipeline_mode<synchronous>, transform_indices = @transform_1, window_bounds = array<i64: 396, 1>}, {pipeline_mode = #tpu.pipeline_mode<synchronous>, transform_indices = @transform_2, window_bounds = array<i64: 1, 128>}, {pipeline_mode = #tpu.pipeline_mode<synchronous>, transform_indices = @transform_3, window_bounds = array<i64: 1, 128>}, {pipeline_mode = #tpu.pipeline_mode<synchronous>, transform_indices = @transform_4, window_bounds = array<i64: 3, 128, 128>}, {transform_indices = @transform_5, window_bounds = array<i64: 1, 396, 128>}, {transform_indices = @transform_6, window_bounds = array<i64: 1, 2, 128>}]} {
    %c0 = arith.constant 0 : index
    %c0_0 = arith.constant 0 : index
    %0 = vector.load %arg2[%c0, %c0_0] : memref<396x1xf32, #tpu.memory_space<vmem>>, vector<396x1xf32>
    %c0_1 = arith.constant 0 : index
    %c0_2 = arith.constant 0 : index
    %c0_3 = arith.constant 0 : index
    %1 = vector.load %arg1[%c0_1, %c0_2, %c0_3] : memref<1x396x128xbf16, #tpu.memory_space<vmem>>, vector<1x396x128xbf16>
    %2 = vector.shape_cast %1 : vector<1x396x128xbf16> to vector<396x128xbf16>
    %c0_4 = arith.constant 0 : index
    %c0_5 = arith.constant 0 : index
    %3 = vector.load %arg3[%c0_4, %c0_5] : memref<1x128xf32, #tpu.memory_space<vmem>>, vector<1x128xf32>
    %4 = arith.extf %2 : vector<396x128xbf16> to vector<396x128xf32>
    %5 = vector.broadcast %3 : vector<1x128xf32> to vector<396x128xf32>
    %6 = arith.mulf %4, %5 : vector<396x128xf32>
    %c0_6 = arith.constant 0 : index
    %c0_7 = arith.constant 0 : index
    %7 = vector.load %arg4[%c0_6, %c0_7] : memref<1x128xf32, #tpu.memory_space<vmem>>, vector<1x128xf32>
    %8 = vector.broadcast %7 : vector<1x128xf32> to vector<396x128xf32>
    %9 = arith.addf %6, %8 : vector<396x128xf32>
    %cst = arith.constant 5.000000e-01 : f32
    %10 = vector.broadcast %cst : f32 to vector<396x1xf32>
    %11 = arith.cmpf ogt, %0, %10 : vector<396x1xf32>
    %cst_8 = arith.constant 0.000000e+00 : f32
    %12 = vector.broadcast %cst_8 : f32 to vector<396x128xf32>
    %13 = arith.subf %12, %9 : vector<396x128xf32>
    %14 = math.exp %13 : vector<396x128xf32>
    %cst_9 = arith.constant 1.000000e+00 : f32
    %15 = vector.broadcast %cst_9 : f32 to vector<396x128xf32>
    %16 = arith.addf %15, %14 : vector<396x128xf32>
    %17 = tpu.reciprocal %16 {approx = true} : vector<396x128xf32> -> vector<396x128xf32>
    %18 = arith.mulf %9, %17 : vector<396x128xf32>
    %cst_10 = arith.constant 0.000000e+00 : f32
    %19 = vector.shape_cast %11 : vector<396x1xi1> to vector<396x1xi1>
    %20 = vector.broadcast %19 : vector<396x1xi1> to vector<396x128xi1>
    %21 = vector.broadcast %cst_10 : f32 to vector<396x128xf32>
    %22 = arith.select %20, %18, %21 : vector<396x128xi1>, vector<396x128xf32>
    %23 = arith.truncf %22 : vector<396x128xf32> to vector<396x128xbf16>
    %cst_11 = arith.constant 0.000000e+00 : f32
    %24 = vector.broadcast %cst_11 : f32 to vector<324x128xf32>
    %25 = vector.extract_strided_slice %23 {offsets = [18, 0], sizes = [324, 128], strides = [1, 1]} : vector<396x128xbf16> to vector<324x128xbf16>
    %c0_12 = arith.constant 0 : index
    %c0_13 = arith.constant 0 : index
    %c0_14 = arith.constant 0 : index
    %26 = vector.load %arg5[%c0_12, %c0_13, %c0_14] : memref<3x128x128xbf16, #tpu.memory_space<vmem>>, vector<1x128x128xbf16>
    %27 = vector.shape_cast %26 : vector<1x128x128xbf16> to vector<128x128xbf16>
    %cst_15 = arith.constant dense<0.000000e+00> : vector<324x128xf32>
    %28 = tpu.matmul %25, %27, %cst_15 {dimension_numbers = #tpu.dot_dimension_numbers<[1], [0], [0], [1], [0, 0, 1, 1], [], []>} : vector<324x128xbf16>, vector<128x128xbf16>, vector<324x128xf32> -> vector<324x128xf32>
    %29 = arith.addf %24, %28 : vector<324x128xf32>
    %30 = vector.extract_strided_slice %23 {offsets = [36, 0], sizes = [324, 128], strides = [1, 1]} : vector<396x128xbf16> to vector<324x128xbf16>
    %c1 = arith.constant 1 : index
    %c0_16 = arith.constant 0 : index
    %c0_17 = arith.constant 0 : index
    %31 = vector.load %arg5[%c1, %c0_16, %c0_17] : memref<3x128x128xbf16, #tpu.memory_space<vmem>>, vector<1x128x128xbf16>
    %32 = vector.shape_cast %31 : vector<1x128x128xbf16> to vector<128x128xbf16>
    %cst_18 = arith.constant dense<0.000000e+00> : vector<324x128xf32>
    %33 = tpu.matmul %30, %32, %cst_18 {dimension_numbers = #tpu.dot_dimension_numbers<[1], [0], [0], [1], [0, 0, 1, 1], [], []>} : vector<324x128xbf16>, vector<128x128xbf16>, vector<324x128xf32> -> vector<324x128xf32>
    %34 = arith.addf %29, %33 : vector<324x128xf32>
    %35 = vector.extract_strided_slice %23 {offsets = [54, 0], sizes = [324, 128], strides = [1, 1]} : vector<396x128xbf16> to vector<324x128xbf16>
    %c2 = arith.constant 2 : index
    %c0_19 = arith.constant 0 : index
    %c0_20 = arith.constant 0 : index
    %36 = vector.load %arg5[%c2, %c0_19, %c0_20] : memref<3x128x128xbf16, #tpu.memory_space<vmem>>, vector<1x128x128xbf16>
    %37 = vector.shape_cast %36 : vector<1x128x128xbf16> to vector<128x128xbf16>
    %cst_21 = arith.constant dense<0.000000e+00> : vector<324x128xf32>
    %38 = tpu.matmul %35, %37, %cst_21 {dimension_numbers = #tpu.dot_dimension_numbers<[1], [0], [0], [1], [0, 0, 1, 1], [], []>} : vector<324x128xbf16>, vector<128x128xbf16>, vector<324x128xf32> -> vector<324x128xf32>
    %39 = arith.addf %34, %38 : vector<324x128xf32>
    %40 = vector.extract_strided_slice %0 {offsets = [36, 0], sizes = [324, 1], strides = [1, 1]} : vector<396x1xf32> to vector<324x1xf32>
    %cst_22 = arith.constant 5.000000e-01 : f32
    %41 = vector.broadcast %cst_22 : f32 to vector<324x1xf32>
    %42 = arith.cmpf ogt, %40, %41 : vector<324x1xf32>
    %cst_23 = arith.constant 0.000000e+00 : f32
    %43 = vector.shape_cast %42 : vector<324x1xi1> to vector<324x1xi1>
    %44 = vector.broadcast %43 : vector<324x1xi1> to vector<324x128xi1>
    %45 = vector.broadcast %cst_23 : f32 to vector<324x128xf32>
    %46 = arith.select %44, %39, %45 : vector<324x128xi1>, vector<324x128xf32>
    %cst_24 = arith.constant 0.000000e+00 : bf16
    %47 = vector.broadcast %cst_24 : bf16 to vector<36x128xbf16>
    %c0_25 = arith.constant 0 : index
    %c0_26 = arith.constant 0 : index
    %c0_27 = arith.constant 0 : index
    %48 = vector.load %arg6[%c0_25, %c0_26, %c0_27] : memref<1x396x128xbf16, #tpu.memory_space<vmem>>, vector<1x36x128xbf16>
    %49 = vector.shape_cast %48 : vector<1x36x128xbf16> to vector<36x128xbf16>
    %50 = vector.shape_cast %47 : vector<36x128xbf16> to vector<1x36x128xbf16>
    tpu.vector_store %arg6[%c0_25, %c0_26, %c0_27], %50 {strides = array<i32>} : memref<1x396x128xbf16, #tpu.memory_space<vmem>>, vector<1x36x128xbf16>,
    %51 = arith.truncf %46 : vector<324x128xf32> to vector<324x128xbf16>
    %c0_28 = arith.constant 0 : index
    %c36 = arith.constant 36 : index
    %c0_29 = arith.constant 0 : index
    %52 = vector.load %arg6[%c0_28, %c36, %c0_29] : memref<1x396x128xbf16, #tpu.memory_space<vmem>>, vector<1x324x128xbf16>
    %53 = vector.shape_cast %52 : vector<1x324x128xbf16> to vector<324x128xbf16>
    %54 = vector.shape_cast %51 : vector<324x128xbf16> to vector<1x324x128xbf16>
    tpu.vector_store %arg6[%c0_28, %c36, %c0_29], %54 {strides = array<i32>} : memref<1x396x128xbf16, #tpu.memory_space<vmem>>, vector<1x324x128xbf16>,
    %c0_30 = arith.constant 0 : index
    %c360 = arith.constant 360 : index
    %c0_31 = arith.constant 0 : index
    %55 = vector.load %arg6[%c0_30, %c360, %c0_31] : memref<1x396x128xbf16, #tpu.memory_space<vmem>>, vector<1x36x128xbf16>
    %56 = vector.shape_cast %55 : vector<1x36x128xbf16> to vector<36x128xbf16>
    %57 = vector.shape_cast %47 : vector<36x128xbf16> to vector<1x36x128xbf16>
    tpu.vector_store %arg6[%c0_30, %c360, %c0_31], %57 {strides = array<i32>} : memref<1x396x128xbf16, #tpu.memory_space<vmem>>, vector<1x36x128xbf16>,
    %cst_32 = arith.constant dense<0.000000e+00> : vector<128xf32>
    %58 = vector.multi_reduction <add>, %46, %cst_32 [0] : vector<324x128xf32> to vector<128xf32>
    %59 = vector.shape_cast %58 : vector<128xf32> to vector<1x128xf32>
    %c0_33 = arith.constant 0 : index
    %c0_34 = arith.constant 0 : index
    %c0_35 = arith.constant 0 : index
    %60 = vector.load %arg7[%c0_33, %c0_34, %c0_35] : memref<1x2x128xf32, #tpu.memory_space<vmem>>, vector<1x1x128xf32>
    %61 = vector.shape_cast %60 : vector<1x1x128xf32> to vector<1x128xf32>
    %62 = vector.shape_cast %59 : vector<1x128xf32> to vector<1x1x128xf32>
    tpu.vector_store %arg7[%c0_33, %c0_34, %c0_35], %62 {strides = array<i32>} : memref<1x2x128xf32, #tpu.memory_space<vmem>>, vector<1x1x128xf32>,
    %63 = arith.mulf %46, %46 : vector<324x128xf32>
    %cst_36 = arith.constant dense<0.000000e+00> : vector<128xf32>
    %64 = vector.multi_reduction <add>, %63, %cst_36 [0] : vector<324x128xf32> to vector<128xf32>
    %65 = vector.shape_cast %64 : vector<128xf32> to vector<1x128xf32>
    %c0_37 = arith.constant 0 : index
    %c1_38 = arith.constant 1 : index
    %c0_39 = arith.constant 0 : index
    %66 = vector.load %arg7[%c0_37, %c1_38, %c0_39] : memref<1x2x128xf32, #tpu.memory_space<vmem>>, vector<1x1x128xf32>
    %67 = vector.shape_cast %66 : vector<1x1x128xf32> to vector<1x128xf32>
    %68 = vector.shape_cast %65 : vector<1x128xf32> to vector<1x1x128xf32>
    tpu.vector_store %arg7[%c0_37, %c1_38, %c0_39], %68 {strides = array<i32>} : memref<1x2x128xf32, #tpu.memory_space<vmem>>, vector<1x1x128xf32>,
    return
  }
  func.func @transform_0(%arg0: i32) -> (i32, i32, i32) {
    %c0_i32 = arith.constant 0 : i32
    %c0_i32_0 = arith.constant 0 : i32
    %c0_i32_1 = arith.constant 0 : i32
    return %arg0, %c0_i32, %c0_i32_0 : i32, i32, i32
  }
  func.func @transform_1(%arg0: i32) -> (i32, i32) {
    %c0_i32 = arith.constant 0 : i32
    %c0_i32_0 = arith.constant 0 : i32
    %c0_i32_1 = arith.constant 0 : i32
    return %c0_i32, %c0_i32_0 : i32, i32
  }
  func.func @transform_2(%arg0: i32) -> (i32, i32) {
    %c0_i32 = arith.constant 0 : i32
    %c0_i32_0 = arith.constant 0 : i32
    %c0_i32_1 = arith.constant 0 : i32
    return %c0_i32, %c0_i32_0 : i32, i32
  }
  func.func @transform_3(%arg0: i32) -> (i32, i32) {
    %c0_i32 = arith.constant 0 : i32
    %c0_i32_0 = arith.constant 0 : i32
    %c0_i32_1 = arith.constant 0 : i32
    return %c0_i32, %c0_i32_0 : i32, i32
  }
  func.func @transform_4(%arg0: i32) -> (i32, i32, i32) {
    %c0_i32 = arith.constant 0 : i32
    %c0_i32_0 = arith.constant 0 : i32
    %c0_i32_1 = arith.constant 0 : i32
    %c0_i32_2 = arith.constant 0 : i32
    return %c0_i32, %c0_i32_0, %c0_i32_1 : i32, i32, i32
  }
  func.func @transform_5(%arg0: i32) -> (i32, i32, i32) {
    %c0_i32 = arith.constant 0 : i32
    %c0_i32_0 = arith.constant 0 : i32
    %c0_i32_1 = arith.constant 0 : i32
    return %arg0, %c0_i32, %c0_i32_0 : i32, i32, i32
  }
  func.func @transform_6(%arg0: i32) -> (i32, i32, i32) {
    %c0_i32 = arith.constant 0 : i32
    %c0_i32_0 = arith.constant 0 : i32
    %c0_i32_1 = arith.constant 0 : i32
    return %arg0, %c0_i32, %c0_i32_0 : i32, i32, i32
  }
}

module attributes {stable_mosaic.version = 11 : i64} {
  func.func @kernel(%arg0: i32, %arg1: memref<1x396x128xbf16, #tpu.memory_space<vmem>>, %arg2: memref<1x396x128xf32, #tpu.memory_space<vmem>>, %arg3: memref<1x128xf32, #tpu.memory_space<vmem>>, %arg4: memref<1x128xf32, #tpu.memory_space<vmem>>, %arg5: memref<1x396x128xf32, #tpu.memory_space<vmem>>) attributes {dimension_semantics = [#tpu.dimension_semantics<parallel>], iteration_bounds = array<i64: 2>, scalar_prefetch = 0 : i64, scratch_operands = 0 : i64, tpu.core_type = #tpu.core_type<tc>, window_params = [{transform_indices = @transform_0, window_bounds = array<i64: 1, 396, 128>}, {transform_indices = @transform_1, window_bounds = array<i64: 1, 396, 128>}, {pipeline_mode = #tpu.pipeline_mode<synchronous>, transform_indices = @transform_2, window_bounds = array<i64: 1, 128>}, {pipeline_mode = #tpu.pipeline_mode<synchronous>, transform_indices = @transform_3, window_bounds = array<i64: 1, 128>}, {transform_indices = @transform_4, window_bounds = array<i64: 1, 396, 128>}]} {
    %c0 = arith.constant 0 : index
    %c0_0 = arith.constant 0 : index
    %c0_1 = arith.constant 0 : index
    %0 = vector.load %arg1[%c0, %c0_0, %c0_1] : memref<1x396x128xbf16, #tpu.memory_space<vmem>>, vector<1x396x128xbf16>
    %1 = vector.shape_cast %0 : vector<1x396x128xbf16> to vector<396x128xbf16>
    %c0_2 = arith.constant 0 : index
    %c0_3 = arith.constant 0 : index
    %2 = vector.load %arg3[%c0_2, %c0_3] : memref<1x128xf32, #tpu.memory_space<vmem>>, vector<1x128xf32>
    %3 = arith.extf %1 : vector<396x128xbf16> to vector<396x128xf32>
    %4 = vector.broadcast %2 : vector<1x128xf32> to vector<396x128xf32>
    %5 = arith.mulf %3, %4 : vector<396x128xf32>
    %c0_4 = arith.constant 0 : index
    %c0_5 = arith.constant 0 : index
    %6 = vector.load %arg4[%c0_4, %c0_5] : memref<1x128xf32, #tpu.memory_space<vmem>>, vector<1x128xf32>
    %7 = vector.broadcast %6 : vector<1x128xf32> to vector<396x128xf32>
    %8 = arith.addf %5, %7 : vector<396x128xf32>
    %c0_6 = arith.constant 0 : index
    %c0_7 = arith.constant 0 : index
    %c0_8 = arith.constant 0 : index
    %9 = vector.load %arg2[%c0_6, %c0_7, %c0_8] : memref<1x396x128xf32, #tpu.memory_space<vmem>>, vector<1x396x128xf32>
    %10 = vector.shape_cast %9 : vector<1x396x128xf32> to vector<396x128xf32>
    %11 = arith.addf %8, %10 : vector<396x128xf32>
    %cst = arith.constant 0.000000e+00 : f32
    %12 = vector.broadcast %cst : f32 to vector<396x128xf32>
    %13 = arith.maximumf %11, %12 : vector<396x128xf32>
    %c0_9 = arith.constant 0 : index
    %c0_10 = arith.constant 0 : index
    %c0_11 = arith.constant 0 : index
    %14 = vector.load %arg5[%c0_9, %c0_10, %c0_11] : memref<1x396x128xf32, #tpu.memory_space<vmem>>, vector<1x396x128xf32>
    %15 = vector.shape_cast %14 : vector<1x396x128xf32> to vector<396x128xf32>
    %16 = vector.shape_cast %13 : vector<396x128xf32> to vector<1x396x128xf32>
    tpu.vector_store %arg5[%c0_9, %c0_10, %c0_11], %16 {strides = array<i32>} : memref<1x396x128xf32, #tpu.memory_space<vmem>>, vector<1x396x128xf32>,
    return
  }
  func.func @transform_0(%arg0: i32) -> (i32, i32, i32) {
    %c0_i32 = arith.constant 0 : i32
    %c0_i32_0 = arith.constant 0 : i32
    %c0_i32_1 = arith.constant 0 : i32
    return %arg0, %c0_i32, %c0_i32_0 : i32, i32, i32
  }
  func.func @transform_1(%arg0: i32) -> (i32, i32, i32) {
    %c0_i32 = arith.constant 0 : i32
    %c0_i32_0 = arith.constant 0 : i32
    %c0_i32_1 = arith.constant 0 : i32
    return %arg0, %c0_i32, %c0_i32_0 : i32, i32, i32
  }
  func.func @transform_2(%arg0: i32) -> (i32, i32) {
    %c0_i32 = arith.constant 0 : i32
    %c0_i32_0 = arith.constant 0 : i32
    %c0_i32_1 = arith.constant 0 : i32
    return %c0_i32, %c0_i32_0 : i32, i32
  }
  func.func @transform_3(%arg0: i32) -> (i32, i32) {
    %c0_i32 = arith.constant 0 : i32
    %c0_i32_0 = arith.constant 0 : i32
    %c0_i32_1 = arith.constant 0 : i32
    return %c0_i32, %c0_i32_0 : i32, i32
  }
  func.func @transform_4(%arg0: i32) -> (i32, i32, i32) {
    %c0_i32 = arith.constant 0 : i32
    %c0_i32_0 = arith.constant 0 : i32
    %c0_i32_1 = arith.constant 0 : i32
    return %arg0, %c0_i32, %c0_i32_0 : i32, i32, i32
  }
}

</mosaic_0001>

<bundles_post_ra>
// kernel: light_res_block.7
= control target key start
LH: loop header
LB: loop body
LE: loop exit
PB: predicated region body
PF: predicated region fallthrough
CT: control target
= control target key end

     0   :  { %s873_s15 = smov 0   ;;  %s1143_s0 = inlined_call_operand.vmem [shape: bf16[2,396,128], index: 0, kind: input, shape index: {}]   ;;  %s1144_s1 = inlined_call_operand.vmem [shape: f32[2,396,128], index: 1, kind: input, shape index: {}]   ;;  %s1145_s2 = inlined_call_operand.vmem [shape: f32[1,128], index: 2, kind: input, shape index: {}]   ;;  %s1146_s3 = inlined_call_operand.vmem [shape: f32[1,128], index: 3, kind: input, shape index: {}]   ;;  %s1147_s4 = inlined_call_operand.vmem [shape: f32[2,396,128], index: 4, kind: output, shape index: {}]  }
   0x1 LB: > { %s699_s16 = sadd.s32 4294967295, %s846_s15   ;;  %p703_p0 = scmp.ge.s32.totalorder %s846_s15, 1  ;;  %s846_s15 = sphi %s873_s15, %s14_s15  }
   0x2   : > { %p172_p1 = scmp.lt.s32.totalorder %s846_s15, 3 }
   0x4   : > { %p173_p2 = pnand %p703_p0, %p172_p1 }
   0x5   : > { %p203_p3 = scmp.lt.s32.totalorder (!%p173_p2), %s699_s16, 1  ;;  %v893_v0 = vld [vmem:[%s1145_s2] ss:$0 sm:$0xff] (!%p173_p2) }
   0x6   : > { %176 = sbr.rel (%p173_p2) target bundleno = 88 (0x58), region = 36  ;;  %v908_v8 = vld [vmem:[%s1146_s3] ss:$0 sm:$0xff] (!%p173_p2) }
   0xd   : > { %s1149_s16 = smov (!%p203_p3, %s699_s16), 1 }
   0xe   : > { %s830_s17 = smul.u32 200, %s1149_s16 }
   0xf   : > { %s831_s18 = smul.u32 400, %s1149_s16 }
  0x10   : > { %s888_s21 = scalar_lea.vmem %s1143_s0, %s830_s17 }
  0x11   : > { %s900_s26 = scalar_lea.vmem %s1144_s1, %s831_s18  ;;  %v712_v1 = vld [vmem:[%s888_s21] sm:$0xff]   ;;  %v807_v2 = vld [vmem:[%s888_s21 + $0x8] sm:$0xff]   ;;  %v808_v3 = vld [vmem:[%s888_s21 + $0x10] sm:$0xff]   ;;  %s938_s5 = scalar_lea.vmem %s1147_s4, %s831_s18 }
  0x12   : > { %v713_v4 = vunpack.c.l.bf16 %v712_v1  ;;  %v714_v5 = vunpack.c.h.bf16 %v712_v1  ;;  %v717_v6 = vunpack.c.l.bf16 %v807_v2  ;;  %v718_v7 = vunpack.c.h.bf16 %v807_v2  ;;  %v432_v12 = vld [vmem:[%s900_s26] sm:$0xff]  ;;  %v809_v16 = vld [vmem:[%s888_s21 + $0x18] sm:$0xff]   ;;  %v433_v17 = vld [vmem:[%s900_s26 + $0x8] sm:$0xff] }
  0x13   : > { %v721_v9 = vunpack.c.l.bf16 %v808_v3  ;;  %v722_v10 = vunpack.c.h.bf16 %v808_v3  ;;  %v434_v18 = vld [vmem:[%s900_s26 + $0x10] sm:$0xff]  ;;  %v435_v19 = vld [vmem:[%s900_s26 + $0x18] sm:$0xff]  ;;  %v725_v22 = vunpack.c.l.bf16 %v809_v16  ;;  %v726_v23 = vunpack.c.h.bf16 %v809_v16  ;;  %v436_v28 = vld [vmem:[%s900_s26 + $0x20] sm:$0xff] }
  0x14   : > { %v325_v11 = vmul.f32 %v713_v4, %v893_v0  ;;  %v326_v13 = vmul.f32 %v714_v5, %v893_v0  ;;  %v327_v14 = vmul.f32 %v717_v6, %v893_v0  ;;  %v328_v15 = vmul.f32 %v718_v7, %v893_v0  ;;  %v437_v29 = vld [vmem:[%s900_s26 + $0x28] sm:$0xff]  ;;  %v438_v38 = vld [vmem:[%s900_s26 + $0x30] sm:$0xff]  ;;  %v439_v39 = vld [vmem:[%s900_s26 + $0x38] sm:$0xff] }
  0x15   : > { %v329_v20 = vmul.f32 %v721_v9, %v893_v0  ;;  %v330_v21 = vmul.f32 %v722_v10, %v893_v0  ;;  %v331_v32 = vmul.f32 %v725_v22, %v893_v0  ;;  %v332_v33 = vmul.f32 %v726_v23, %v893_v0  ;;  %v810_v44 = vld [vmem:[%s888_s21 + $0x20] sm:$0xff]   ;;  %v811_v45 = vld [vmem:[%s888_s21 + $0x28] sm:$0xff]   ;;  %v812_v50 = vld [vmem:[%s888_s21 + $0x30] sm:$0xff]  }
  0x16   : > { %v382_v24 = vadd.f32 %v908_v8, %v325_v11  ;;  %v383_v25 = vadd.f32 %v908_v8, %v326_v13  ;;  %v384_v26 = vadd.f32 %v908_v8, %v327_v14  ;;  %v385_v27 = vadd.f32 %v908_v8, %v328_v15  ;;  %v813_v59 = vld [vmem:[%s888_s21 + $0x38] sm:$0xff]   ;;  %v440_v2 = vld [vmem:[%s900_s26 + $0x40] sm:$0xff]  ;;  %v441_v6 = vld [vmem:[%s900_s26 + $0x48] sm:$0xff] }
  0x17   : > { %v386_v30 = vadd.f32 %v908_v8, %v329_v20  ;;  %v387_v31 = vadd.f32 %v908_v8, %v330_v21  ;;  %v388_v42 = vadd.f32 %v908_v8, %v331_v32  ;;  %v389_v43 = vadd.f32 %v908_v8, %v332_v33  ;;  %v442_v7 = vld [vmem:[%s900_s26 + $0x50] sm:$0xff]  ;;  %v443_v9 = vld [vmem:[%s900_s26 + $0x58] sm:$0xff] }
  0x18   : > { %v482_v34 = vadd.f32 %v432_v12, %v382_v24  ;;  %v483_v35 = vadd.f32 %v433_v17, %v383_v25  ;;  %v484_v36 = vadd.f32 %v434_v18, %v384_v26  ;;  %v485_v37 = vadd.f32 %v435_v19, %v385_v27  ;;  %v444_v18 = vld [vmem:[%s900_s26 + $0x60] sm:$0xff]  ;;  %v445_v19 = vld [vmem:[%s900_s26 + $0x68] sm:$0xff] }
  0x19   : > { %v486_v40 = vadd.f32 %v436_v28, %v386_v30  ;;  %v487_v41 = vadd.f32 %v437_v29, %v387_v31  ;;  %v488_v53 = vadd.f32 %v438_v38, %v388_v42  ;;  %v489_v54 = vadd.f32 %v439_v39, %v389_v43  ;;  %v446_v28 = vld [vmem:[%s900_s26 + $0x70] sm:$0xff]  ;;  %v447_v29 = vld [vmem:[%s900_s26 + $0x78] sm:$0xff] }
  0x1a   : > { %v532_v46 = vmax.f32 %v482_v34, 0.0  ;;  %v533_v47 = vmax.f32 %v483_v35, 0.0  ;;  %v534_v48 = vmax.f32 %v484_v36, 0.0  ;;  %v535_v49 = vmax.f32 %v485_v37, 0.0  ;;  %v814_v34 = vld [vmem:[%s888_s21 + $0x40] sm:$0xff]   ;;  %v815_v35 = vld [vmem:[%s888_s21 + $0x48] sm:$0xff]  }
  0x1b   : > { %v536_v51 = vmax.f32 %v486_v40, 0.0  ;;  %v537_v52 = vmax.f32 %v487_v41, 0.0  ;;  %v729_v55 = vunpack.c.l.bf16 %v810_v44  ;;  %v730_v56 = vunpack.c.h.bf16 %v810_v44  ;;  %v816_v40 = vld [vmem:[%s888_s21 + $0x50] sm:$0xff]  }
  0x1c   : > { %582 = vst [vmem:[%s938_s5] sm:$0xff] %v532_v46  ;;  %583 = vst [vmem:[%s938_s5 + $0x8] sm:$0xff] %v533_v47  ;;  %v733_v57 = vunpack.c.l.bf16 %v811_v45  ;;  %v734_v58 = vunpack.c.h.bf16 %v811_v45  ;;  %v538_v60 = vmax.f32 %v488_v53, 0.0  ;;  %v539_v61 = vmax.f32 %v489_v54, 0.0 }
  0x1d   : > { %584 = vst [vmem:[%s938_s5 + $0x10] sm:$0xff] %v534_v48  ;;  %585 = vst [vmem:[%s938_s5 + $0x18] sm:$0xff] %v535_v49  ;;  %v737_v62 = vunpack.c.l.bf16 %v812_v50  ;;  %v738_v63 = vunpack.c.h.bf16 %v812_v50  ;;  %v333_v1 = vmul.f32 %v729_v55, %v893_v0  ;;  %v334_v3 = vmul.f32 %v730_v56, %v893_v0  ;;  %v817_v49 = vld [vmem:[%s888_s21 + $0x58] sm:$0xff]   ;;  %v448_v55 = vld [vmem:[%s900_s26 + $0x80] sm:$0xff] }
  0x1e   : > { %586 = vst [vmem:[%s938_s5 + $0x20] sm:$0xff] %v536_v51  ;;  %587 = vst [vmem:[%s938_s5 + $0x28] sm:$0xff] %v537_v52  ;;  %v335_v4 = vmul.f32 %v733_v57, %v893_v0  ;;  %v336_v5 = vmul.f32 %v734_v58, %v893_v0  ;;  %v741_v12 = vunpack.c.l.bf16 %v813_v59  ;;  %v742_v13 = vunpack.c.h.bf16 %v813_v59  ;;  %v449_v59 = vld [vmem:[%s900_s26 + $0x88] sm:$0xff] }
  0x1f   : > { %588 = vst [vmem:[%s938_s5 + $0x30] sm:$0xff] %v538_v60  ;;  %589 = vst [vmem:[%s938_s5 + $0x38] sm:$0xff] %v539_v61  ;;  %v337_v10 = vmul.f32 %v737_v62, %v893_v0  ;;  %v338_v11 = vmul.f32 %v738_v63, %v893_v0  ;;  %v390_v14 = vadd.f32 %v908_v8, %v333_v1  ;;  %v745_v45 = vunpack.c.l.bf16 %v814_v34  ;;  %v450_v60 = vld [vmem:[%s900_s26 + $0x90] sm:$0xff]  ;;  %v451_v61 = vld [vmem:[%s900_s26 + $0x98] sm:$0xff] }
  0x20   : > { %v391_v15 = vadd.f32 %v908_v8, %v334_v3  ;;  %v392_v16 = vadd.f32 %v908_v8, %v335_v4  ;;  %v393_v17 = vadd.f32 %v908_v8, %v336_v5  ;;  %v339_v22 = vmul.f32 %v741_v12, %v893_v0 }
  0x21   : > { %v394_v20 = vadd.f32 %v908_v8, %v337_v10  ;;  %v395_v21 = vadd.f32 %v908_v8, %v338_v11  ;;  %v340_v23 = vmul.f32 %v742_v13, %v893_v0  ;;  %v490_v24 = vadd.f32 %v440_v2, %v390_v14 }
  0x22   : > { %v491_v25 = vadd.f32 %v441_v6, %v391_v15  ;;  %v492_v26 = vadd.f32 %v442_v7, %v392_v16  ;;  %v493_v27 = vadd.f32 %v443_v9, %v393_v17  ;;  %v396_v32 = vadd.f32 %v908_v8, %v339_v22  ;;  %v452_v7 = vld [vmem:[%s900_s26 + $0xa0] sm:$0xff]  ;;  %v453_v9 = vld [vmem:[%s900_s26 + $0xa8] sm:$0xff] }
  0x23   : > { %v494_v30 = vadd.f32 %v444_v18, %v394_v20  ;;  %v495_v31 = vadd.f32 %v445_v19, %v395_v21  ;;  %v397_v33 = vadd.f32 %v908_v8, %v340_v23  ;;  %v540_v36 = vmax.f32 %v490_v24, 0.0  ;;  %v454_v18 = vld [vmem:[%s900_s26 + $0xb0] sm:$0xff]  ;;  %v455_v19 = vld [vmem:[%s900_s26 + $0xb8] sm:$0xff]  ;;  %v818_v24 = vld [vmem:[%s888_s21 + $0x60] sm:$0xff]  }
  0x24   : > { %v541_v37 = vmax.f32 %v491_v25, 0.0  ;;  %v542_v38 = vmax.f32 %v492_v26, 0.0  ;;  %v543_v39 = vmax.f32 %v493_v27, 0.0  ;;  %v496_v43 = vadd.f32 %v446_v28, %v396_v32  ;;  %v819_v25 = vld [vmem:[%s888_s21 + $0x68] sm:$0xff]  }
  0x25   : > { %v544_v41 = vmax.f32 %v494_v30, 0.0  ;;  %v545_v42 = vmax.f32 %v495_v31, 0.0  ;;  %v497_v44 = vadd.f32 %v447_v29, %v397_v33  ;;  %590 = vst [vmem:[%s938_s5 + $0x40] sm:$0xff] %v540_v36  ;;  %v746_v46 = vunpack.c.h.bf16 %v814_v34  ;;  %v820_v30 = vld [vmem:[%s888_s21 + $0x70] sm:$0xff]  }
  0x26   : > { %591 = vst [vmem:[%s938_s5 + $0x48] sm:$0xff] %v541_v37  ;;  %592 = vst [vmem:[%s938_s5 + $0x50] sm:$0xff] %v542_v38  ;;  %v749_v47 = vunpack.c.l.bf16 %v815_v35  ;;  %v750_v48 = vunpack.c.h.bf16 %v815_v35  ;;  %v546_v50 = vmax.f32 %v496_v43, 0.0  ;;  %v753_v52 = vunpack.c.l.bf16 %v816_v40 }
  0x27   : > { %593 = vst [vmem:[%s938_s5 + $0x58] sm:$0xff] %v543_v39  ;;  %594 = vst [vmem:[%s938_s5 + $0x60] sm:$0xff] %v544_v41  ;;  %v547_v51 = vmax.f32 %v497_v44, 0.0  ;;  %v754_v53 = vunpack.c.h.bf16 %v816_v40  ;;  %v341_v54 = vmul.f32 %v745_v45, %v893_v0  ;;  %v342_v56 = vmul.f32 %v746_v46, %v893_v0  ;;  %v821_v39 = vld [vmem:[%s888_s21 + $0x78] sm:$0xff]   ;;  %v456_v45 = vld [vmem:[%s900_s26 + $0xc0] sm:$0xff] }
  0x28   : > { %595 = vst [vmem:[%s938_s5 + $0x68] sm:$0xff] %v545_v42  ;;  %v343_v57 = vmul.f32 %v749_v47, %v893_v0  ;;  %v344_v58 = vmul.f32 %v750_v48, %v893_v0  ;;  %596 = vst [vmem:[%s938_s5 + $0x70] sm:$0xff] %v546_v50  ;;  %v345_v62 = vmul.f32 %v753_v52, %v893_v0  ;;  %v757_v1 = vunpack.c.l.bf16 %v817_v49  ;;  %v458_v50 = vld [vmem:[%s900_s26 + $0xd0] sm:$0xff] }
  0x29   : > { %597 = vst [vmem:[%s938_s5 + $0x78] sm:$0xff] %v547_v51  ;;  %v346_v63 = vmul.f32 %v754_v53, %v893_v0  ;;  %v758_v2 = vunpack.c.h.bf16 %v817_v49  ;;  %v398_v3 = vadd.f32 %v908_v8, %v341_v54  ;;  %v399_v4 = vadd.f32 %v908_v8, %v342_v56  ;;  %v457_v49 = vld [vmem:[%s900_s26 + $0xc8] sm:$0xff]  ;;  %v459_v51 = vld [vmem:[%s900_s26 + $0xd8] sm:$0xff] }
  0x2a   : > { %v400_v5 = vadd.f32 %v908_v8, %v343_v57  ;;  %v401_v6 = vadd.f32 %v908_v8, %v344_v58  ;;  %v402_v10 = vadd.f32 %v908_v8, %v345_v62  ;;  %v347_v12 = vmul.f32 %v757_v1, %v893_v0 }
  0x2b   : > { %v403_v11 = vadd.f32 %v908_v8, %v346_v63  ;;  %v348_v13 = vmul.f32 %v758_v2, %v893_v0  ;;  %v498_v14 = vadd.f32 %v448_v55, %v398_v3  ;;  %v499_v15 = vadd.f32 %v449_v59, %v399_v4 }
  0x2c   : > { %v500_v16 = vadd.f32 %v450_v60, %v400_v5  ;;  %v501_v17 = vadd.f32 %v451_v61, %v401_v6  ;;  %v502_v20 = vadd.f32 %v452_v7, %v402_v10  ;;  %v404_v22 = vadd.f32 %v908_v8, %v347_v12  ;;  %v460_v60 = vld [vmem:[%s900_s26 + $0xe0] sm:$0xff]  ;;  %v461_v61 = vld [vmem:[%s900_s26 + $0xe8] sm:$0xff]  ;;  %v462_v7 = vld [vmem:[%s900_s26 + $0xf0] sm:$0xff] }
  0x2d   : > { %v503_v21 = vadd.f32 %v453_v9, %v403_v11  ;;  %v405_v23 = vadd.f32 %v908_v8, %v348_v13  ;;  %v548_v26 = vmax.f32 %v498_v14, 0.0  ;;  %v549_v27 = vmax.f32 %v499_v15, 0.0  ;;  %v463_v9 = vld [vmem:[%s900_s26 + $0xf8] sm:$0xff]  ;;  %v822_v14 = vld [vmem:[%s888_s21 + $0x80] sm:$0xff]   ;;  %v823_v15 = vld [vmem:[%s888_s21 + $0x88] sm:$0xff]  }
  0x2e   : > { %v550_v28 = vmax.f32 %v500_v16, 0.0  ;;  %v551_v29 = vmax.f32 %v501_v17, 0.0  ;;  %v552_v31 = vmax.f32 %v502_v20, 0.0  ;;  %v504_v33 = vadd.f32 %v454_v18, %v404_v22  ;;  %v824_v20 = vld [vmem:[%s888_s21 + $0x90] sm:$0xff]  }
  0x2f   : > { %v553_v32 = vmax.f32 %v503_v21, 0.0  ;;  %v505_v34 = vadd.f32 %v455_v19, %v405_v23  ;;  %598 = vst [vmem:[%s938_s5 + $0x80] sm:$0xff] %v548_v26  ;;  %599 = vst [vmem:[%s938_s5 + $0x88] sm:$0xff] %v549_v27  ;;  %v761_v35 = vunpack.c.l.bf16 %v818_v24  ;;  %v762_v36 = vunpack.c.h.bf16 %v818_v24 }
  0x30   : > { %600 = vst [vmem:[%s938_s5 + $0x90] sm:$0xff] %v550_v28  ;;  %601 = vst [vmem:[%s938_s5 + $0x98] sm:$0xff] %v551_v29  ;;  %v765_v37 = vunpack.c.l.bf16 %v819_v25  ;;  %v766_v38 = vunpack.c.h.bf16 %v819_v25  ;;  %v554_v40 = vmax.f32 %v504_v33, 0.0  ;;  %v769_v42 = vunpack.c.l.bf16 %v820_v30  ;;  %v825_v29 = vld [vmem:[%s888_s21 + $0x98] sm:$0xff]  }
  0x31   : > { %602 = vst [vmem:[%s938_s5 + $0xa0] sm:$0xff] %v552_v31  ;;  %603 = vst [vmem:[%s938_s5 + $0xa8] sm:$0xff] %v553_v32  ;;  %v555_v41 = vmax.f32 %v505_v34, 0.0  ;;  %v770_v43 = vunpack.c.h.bf16 %v820_v30  ;;  %v349_v44 = vmul.f32 %v761_v35, %v893_v0  ;;  %v350_v46 = vmul.f32 %v762_v36, %v893_v0  ;;  %v464_v35 = vld [vmem:[%s900_s26 + $0x100] sm:$0xff] }
  0x32   : > { %v351_v47 = vmul.f32 %v765_v37, %v893_v0  ;;  %v352_v48 = vmul.f32 %v766_v38, %v893_v0  ;;  %604 = vst [vmem:[%s938_s5 + $0xb0] sm:$0xff] %v554_v40  ;;  %v353_v52 = vmul.f32 %v769_v42, %v893_v0  ;;  %v773_v54 = vunpack.c.l.bf16 %v821_v39  ;;  %v466_v40 = vld [vmem:[%s900_s26 + $0x110] sm:$0xff] }
  0x33   : > { %605 = vst [vmem:[%s938_s5 + $0xb8] sm:$0xff] %v555_v41  ;;  %v354_v53 = vmul.f32 %v770_v43, %v893_v0  ;;  %v774_v55 = vunpack.c.h.bf16 %v821_v39  ;;  %v406_v56 = vadd.f32 %v908_v8, %v349_v44  ;;  %v407_v57 = vadd.f32 %v908_v8, %v350_v46  ;;  %v465_v39 = vld [vmem:[%s900_s26 + $0x108] sm:$0xff]  ;;  %v467_v41 = vld [vmem:[%s900_s26 + $0x118] sm:$0xff] }
  0x34   : > { %v408_v58 = vadd.f32 %v908_v8, %v351_v47  ;;  %v409_v59 = vadd.f32 %v908_v8, %v352_v48  ;;  %v410_v62 = vadd.f32 %v908_v8, %v353_v52  ;;  %v355_v1 = vmul.f32 %v773_v54, %v893_v0 }
  0x35   : > { %v411_v63 = vadd.f32 %v908_v8, %v354_v53  ;;  %v356_v2 = vmul.f32 %v774_v55, %v893_v0  ;;  %v506_v3 = vadd.f32 %v456_v45, %v406_v56  ;;  %v507_v4 = vadd.f32 %v457_v49, %v407_v57 }
  0x36   : > { %v508_v5 = vadd.f32 %v458_v50, %v408_v58  ;;  %v509_v6 = vadd.f32 %v459_v51, %v409_v59  ;;  %v510_v10 = vadd.f32 %v460_v60, %v410_v62  ;;  %v412_v12 = vadd.f32 %v908_v8, %v355_v1  ;;  %v468_v50 = vld [vmem:[%s900_s26 + $0x120] sm:$0xff]  ;;  %v469_v51 = vld [vmem:[%s900_s26 + $0x128] sm:$0xff]  ;;  %v470_v60 = vld [vmem:[%s900_s26 + $0x130] sm:$0xff] }
  0x37   : > { %v511_v11 = vadd.f32 %v461_v61, %v411_v63  ;;  %v413_v13 = vadd.f32 %v908_v8, %v356_v2  ;;  %v556_v16 = vmax.f32 %v506_v3, 0.0  ;;  %v557_v17 = vmax.f32 %v507_v4, 0.0  ;;  %v471_v61 = vld [vmem:[%s900_s26 + $0x138] sm:$0xff]  ;;  %v826_v3 = vld [vmem:[%s888_s21 + $0xa0] sm:$0xff]   ;;  %v827_v4 = vld [vmem:[%s888_s21 + $0xa8] sm:$0xff]  }
  0x38   : > { %v558_v18 = vmax.f32 %v508_v5, 0.0  ;;  %v559_v19 = vmax.f32 %v509_v6, 0.0  ;;  %v560_v21 = vmax.f32 %v510_v10, 0.0  ;;  %v512_v23 = vadd.f32 %v462_v7, %v412_v12  ;;  %v828_v10 = vld [vmem:[%s888_s21 + $0xb0] sm:$0xff]  }
  0x39   : > { %v561_v22 = vmax.f32 %v511_v11, 0.0  ;;  %v513_v24 = vadd.f32 %v463_v9, %v413_v13  ;;  %606 = vst [vmem:[%s938_s5 + $0xc0] sm:$0xff] %v556_v16  ;;  %607 = vst [vmem:[%s938_s5 + $0xc8] sm:$0xff] %v557_v17  ;;  %v777_v25 = vunpack.c.l.bf16 %v822_v14  ;;  %v778_v26 = vunpack.c.h.bf16 %v822_v14 }
  0x3a   : > { %608 = vst [vmem:[%s938_s5 + $0xd0] sm:$0xff] %v558_v18  ;;  %609 = vst [vmem:[%s938_s5 + $0xd8] sm:$0xff] %v559_v19  ;;  %v781_v27 = vunpack.c.l.bf16 %v823_v15  ;;  %v782_v28 = vunpack.c.h.bf16 %v823_v15  ;;  %v562_v30 = vmax.f32 %v512_v23, 0.0  ;;  %v785_v32 = vunpack.c.l.bf16 %v824_v20  ;;  %v829_v19 = vld [vmem:[%s888_s21 + $0xb8] sm:$0xff]  }
  0x3b   : > { %610 = vst [vmem:[%s938_s5 + $0xe0] sm:$0xff] %v560_v21  ;;  %611 = vst [vmem:[%s938_s5 + $0xe8] sm:$0xff] %v561_v22  ;;  %v563_v31 = vmax.f32 %v513_v24, 0.0  ;;  %v786_v33 = vunpack.c.h.bf16 %v824_v20  ;;  %v357_v34 = vmul.f32 %v777_v25, %v893_v0  ;;  %v358_v36 = vmul.f32 %v778_v26, %v893_v0  ;;  %v472_v25 = vld [vmem:[%s900_s26 + $0x140] sm:$0xff] }
  0x3c   : > { %v359_v37 = vmul.f32 %v781_v27, %v893_v0  ;;  %v360_v38 = vmul.f32 %v782_v28, %v893_v0  ;;  %612 = vst [vmem:[%s938_s5 + $0xf0] sm:$0xff] %v562_v30  ;;  %v361_v42 = vmul.f32 %v785_v32, %v893_v0  ;;  %v789_v44 = vunpack.c.l.bf16 %v825_v29  ;;  %v474_v30 = vld [vmem:[%s900_s26 + $0x150] sm:$0xff] }
  0x3d   : > { %613 = vst [vmem:[%s938_s5 + $0xf8] sm:$0xff] %v563_v31  ;;  %v362_v43 = vmul.f32 %v786_v33, %v893_v0  ;;  %v790_v45 = vunpack.c.h.bf16 %v825_v29  ;;  %v414_v46 = vadd.f32 %v908_v8, %v357_v34  ;;  %v415_v47 = vadd.f32 %v908_v8, %v358_v36  ;;  %v473_v29 = vld [vmem:[%s900_s26 + $0x148] sm:$0xff]  ;;  %v475_v31 = vld [vmem:[%s900_s26 + $0x158] sm:$0xff] }
  0x3e   : > { %v416_v48 = vadd.f32 %v908_v8, %v359_v37  ;;  %v417_v49 = vadd.f32 %v908_v8, %v360_v38  ;;  %v418_v52 = vadd.f32 %v908_v8, %v361_v42  ;;  %v363_v54 = vmul.f32 %v789_v44, %v893_v0 }
  0x3f   : > { %v419_v53 = vadd.f32 %v908_v8, %v362_v43  ;;  %v364_v55 = vmul.f32 %v790_v45, %v893_v0  ;;  %v514_v56 = vadd.f32 %v464_v35, %v414_v46  ;;  %v515_v57 = vadd.f32 %v465_v39, %v415_v47 }
  0x40   : > { %v516_v58 = vadd.f32 %v466_v40, %v416_v48  ;;  %v517_v59 = vadd.f32 %v467_v41, %v417_v49  ;;  %v518_v62 = vadd.f32 %v468_v50, %v418_v52  ;;  %v420_v1 = vadd.f32 %v908_v8, %v363_v54  ;;  %v476_v40 = vld [vmem:[%s900_s26 + $0x160] sm:$0xff]  ;;  %v477_v41 = vld [vmem:[%s900_s26 + $0x168] sm:$0xff]  ;;  %v478_v50 = vld [vmem:[%s900_s26 + $0x170] sm:$0xff] }
  0x41   : > { %v519_v63 = vadd.f32 %v469_v51, %v419_v53  ;;  %v421_v2 = vadd.f32 %v908_v8, %v364_v55  ;;  %v564_v5 = vmax.f32 %v514_v56, 0.0  ;;  %v565_v6 = vmax.f32 %v515_v57, 0.0  ;;  %v479_v51 = vld [vmem:[%s900_s26 + $0x178] sm:$0xff]  ;;  %v266_v56 = vld [vmem:[%s888_s21 + $0xc0] sm:$0xf] }
  0x42   : > { %v566_v7 = vmax.f32 %v516_v58, 0.0  ;;  %v567_v9 = vmax.f32 %v517_v59, 0.0  ;;  %v568_v11 = vmax.f32 %v518_v62, 0.0  ;;  %v520_v13 = vadd.f32 %v470_v60, %v420_v1  ;;  %v267_v57 = vld [vmem:[%s888_s21 + $0xc4] sm:$0x3] }
  0x43   : > { %v569_v12 = vmax.f32 %v519_v63, 0.0  ;;  %v521_v14 = vadd.f32 %v471_v61, %v421_v2  ;;  %614 = vst [vmem:[%s938_s5 + $0x100] sm:$0xff] %v564_v5  ;;  %615 = vst [vmem:[%s938_s5 + $0x108] sm:$0xff] %v565_v6  ;;  %v793_v15 = vunpack.c.l.bf16 %v826_v3  ;;  %v794_v16 = vunpack.c.h.bf16 %v826_v3 }
  0x44   : > { %616 = vst [vmem:[%s938_s5 + $0x110] sm:$0xff] %v566_v7  ;;  %617 = vst [vmem:[%s938_s5 + $0x118] sm:$0xff] %v567_v9  ;;  %v797_v17 = vunpack.c.l.bf16 %v827_v4  ;;  %v798_v18 = vunpack.c.h.bf16 %v827_v4  ;;  %v570_v20 = vmax.f32 %v520_v13, 0.0  ;;  %v801_v22 = vunpack.c.l.bf16 %v828_v10 }
  0x45   : > { %618 = vst [vmem:[%s938_s5 + $0x120] sm:$0xff] %v568_v11  ;;  %619 = vst [vmem:[%s938_s5 + $0x128] sm:$0xff] %v569_v12  ;;  %v571_v21 = vmax.f32 %v521_v14, 0.0  ;;  %v802_v23 = vunpack.c.h.bf16 %v828_v10  ;;  %v365_v24 = vmul.f32 %v793_v15, %v893_v0  ;;  %v366_v26 = vmul.f32 %v794_v16, %v893_v0  ;;  %v480_v10 = vld [vmem:[%s900_s26 + $0x180] sm:$0xff]  ;;  %v481_v11 = vld [vmem:[%s900_s26 + $0x188] sm:$0xf] }
  0x46   : > { %v367_v27 = vmul.f32 %v797_v17, %v893_v0  ;;  %v368_v28 = vmul.f32 %v798_v18, %v893_v0  ;;  %620 = vst [vmem:[%s938_s5 + $0x130] sm:$0xff] %v570_v20  ;;  %v369_v32 = vmul.f32 %v801_v22, %v893_v0  ;;  %v805_v34 = vunpack.c.l.bf16 %v829_v19 }
  0x47   : > { %621 = vst [vmem:[%s938_s5 + $0x138] sm:$0xff] %v571_v21  ;;  %v370_v33 = vmul.f32 %v802_v23, %v893_v0  ;;  %v806_v35 = vunpack.c.h.bf16 %v829_v19  ;;  %v422_v36 = vadd.f32 %v908_v8, %v365_v24  ;;  %v423_v37 = vadd.f32 %v908_v8, %v366_v26 }
  0x48   : > { %v424_v38 = vadd.f32 %v908_v8, %v367_v27  ;;  %v425_v39 = vadd.f32 %v908_v8, %v368_v28  ;;  %v426_v42 = vadd.f32 %v908_v8, %v369_v32  ;;  %v371_v44 = vmul.f32 %v805_v34, %v893_v0 }
  0x49   : > { %v427_v43 = vadd.f32 %v908_v8, %v370_v33  ;;  %v372_v45 = vmul.f32 %v806_v35, %v893_v0  ;;  %v522_v46 = vadd.f32 %v472_v25, %v422_v36  ;;  %v523_v47 = vadd.f32 %v473_v29, %v423_v37 }
  0x4a   : > { %v524_v48 = vadd.f32 %v474_v30, %v424_v38  ;;  %v525_v49 = vadd.f32 %v475_v31, %v425_v39  ;;  %v526_v52 = vadd.f32 %v476_v40, %v426_v42  ;;  %v428_v54 = vadd.f32 %v908_v8, %v371_v44 }
  0x4b   : > { %v527_v53 = vadd.f32 %v477_v41, %v427_v43  ;;  %v429_v55 = vadd.f32 %v908_v8, %v372_v45  ;;  %v572_v58 = vmax.f32 %v522_v46, 0.0  ;;  %v573_v59 = vmax.f32 %v523_v47, 0.0 }
  0x4c   : > { %v574_v60 = vmax.f32 %v524_v48, 0.0  ;;  %v575_v61 = vmax.f32 %v525_v49, 0.0  ;;  %v576_v62 = vmax.f32 %v526_v52, 0.0  ;;  %v528_v1 = vadd.f32 %v478_v50, %v428_v54 }
  0x4d   : > { %v577_v63 = vmax.f32 %v527_v53, 0.0  ;;  %v529_v2 = vadd.f32 %v479_v51, %v429_v55  ;;  %622 = vst [vmem:[%s938_s5 + $0x140] sm:$0xff] %v572_v58  ;;  %623 = vst [vmem:[%s938_s5 + $0x148] sm:$0xff] %v573_v59  ;;  %v317_v3 = vunpack.c.l.bf16 %v266_v56  ;;  %v318_v4 = vunpack.c.l.bf16 %v267_v57 }
  0x4e   : > { %624 = vst [vmem:[%s938_s5 + $0x150] sm:$0xff] %v574_v60  ;;  %625 = vst [vmem:[%s938_s5 + $0x158] sm:$0xff] %v575_v61  ;;  %v578_v5 = vmax.f32 %v528_v1, 0.0 }
  0x4f   : > { %626 = vst [vmem:[%s938_s5 + $0x160] sm:$0xff] %v576_v62  ;;  %627 = vst [vmem:[%s938_s5 + $0x168] sm:$0xff] %v577_v63  ;;  %v579_v6 = vmax.f32 %v529_v2, 0.0  ;;  %v373_v7 = vmul.f32 %v893_v0, %v317_v3  ;;  %v374_v9 = vmul.f32 %v893_v0, %v318_v4 }
  0x50   : > { %628 = vst [vmem:[%s938_s5 + $0x170] sm:$0xff] %v578_v5 }
  0x51   : > { %629 = vst [vmem:[%s938_s5 + $0x178] sm:$0xff] %v579_v6  ;;  %v430_v12 = vadd.f32 %v908_v8, %v373_v7  ;;  %v431_v13 = vadd.f32 %v908_v8, %v374_v9 }
  0x53   : > { %v530_v14 = vadd.f32 %v480_v10, %v430_v12  ;;  %v531_v15 = vadd.f32 %v481_v11, %v431_v13 }
  0x55   : > { %v580_v16 = vmax.f32 %v530_v14, 0.0  ;;  %v581_v17 = vmax.f32 %v531_v15, 0.0 }
  0x57   : > { %630 = vst [vmem:[%s938_s5 + $0x180] sm:$0xff] %v580_v16  ;;  %631 = vst [vmem:[%s938_s5 + $0x188] sm:$0xf] %v581_v17 }
  0x58 PF: > { %s14_s15 = sadd.s32 1, %s846_s15  }
  0x59   : > { %p11_p4 = scmp.ge.s32.totalorder %s14_s15, 4  }
  0x5b   :  { %13 = sbr.rel (!%p11_p4) target bundleno = 1 (0x1), region = 69 }

// kernel: light_res_block.4
= control target key start
LH: loop header
LB: loop body
LE: loop exit
PB: predicated region body
PF: predicated region fallthrough
CT: control target
= control target key end

     0   :  { %s3629_s15 = smov 0   ;;  %s4767_s0 = inlined_call_operand.vmem [shape: f32[2,396,128], index: 0, kind: input, shape index: {}]   ;;  %s4768_s1 = inlined_call_operand.vmem [shape: f32[396,1], index: 1, kind: input, shape index: {}]   ;;  %s4769_s2 = inlined_call_operand.vmem [shape: bf16[3,128,128], index: 2, kind: input, shape index: {}]   ;;  %s4770_s3 = inlined_call_operand.vmem [shape: bf16[2,396,128], index: 3, kind: output, shape index: {0}]   ;;  %s4771_s4 = inlined_call_operand.vmem [shape: f32[2,2,128], index: 4, kind: output, shape index: {1}]  }
   0x1 LB: > { %s2764_s16 = sadd.s32 4294967295, %s3599_s15   ;;  %p2768_p0 = scmp.ge.s32.totalorder %s3599_s15, 1  ;;  %s3599_s15 = sphi %s3629_s15, %s15_s15  }
   0x2   : > { %p165_p1 = scmp.lt.s32.totalorder %s3599_s15, 3 }
   0x4   : > { %p166_p2 = pnand %p2768_p0, %p165_p1 }
   0x5   : > { %v3569_v0 = vld [vmem:[%s4769_s2 + $0x40] sm:$0xff] (!%p166_p2)   ;;  %v3601_v1 = vmov (!%p166_p2), 0.0   ;;  %v3571_v3 = vld [vmem:[%s4769_s2 + $0x48] sm:$0xff] (!%p166_p2)   ;;  %vm3602_vm0 = vmmov (!%p166_p2), 0   ;;  %p195_p3 = scmp.lt.s32.totalorder (!%p166_p2), %s2764_s16, 1  ;;  %v3573_v5 = vld [vmem:[%s4769_s2 + $0x50] sm:$0xff] (!%p166_p2)  }
   0x6   : > { %169 = sbr.rel (%p166_p2) target bundleno = 528 (0x210), region = 32  ;;  %3113 = vmatprep.subr.bf16.mxu1 (!%p166_p2), %v3601_v1  ;;  %3213 = vmatprep.subr.bf16.mxu0 (!%p166_p2), %v3601_v1  ;;  %v3645_v2 = vld [vmem:[%s4769_s2] sm:$0xff] (!%p166_p2)   ;;  %v3657_v4 = vld [vmem:[%s4769_s2 + $0x8] sm:$0xff] (!%p166_p2)   ;;  %v3672_v6 = vld [vmem:[%s4769_s2 + $0x10] sm:$0xff] (!%p166_p2)   ;;  %vm368_vm1 = vcmask (!%p166_p2), 1045504  }
   0x7   : > { %3114 = vmatpush3.bf16.msra.mxu1 (!%p166_p2), %v3569_v0  ;;  %3129 = vmatprep.mubr.msk.bf16.mxu1 (!%p166_p2), %vm3602_vm0, %v3601_v1  ;;  %v3575_v7 = vld [vmem:[%s4769_s2 + $0x58] sm:$0xff] (!%p166_p2)   ;;  %v3577_v9 = vld [vmem:[%s4769_s2 + $0x60] sm:$0xff] (!%p166_p2)   ;;  %v3579_v16 = vld [vmem:[%s4769_s2 + $0x68] sm:$0xff] (!%p166_p2)   ;;  %vm679_vm2 = vsmask.f32 (!%p166_p2), 6400 }
   0x8   : > { %3214 = vmatpush3.bf16.msra.mxu0 (!%p166_p2), %v3645_v2  ;;  %3115 = vmatprep.subr.bf16.mxu1 (!%p166_p2), %v3601_v1  ;;  %v3684_v8 = vld [vmem:[%s4769_s2 + $0x18] sm:$0xff] (!%p166_p2)   ;;  %v3700_v10 = vld [vmem:[%s4769_s2 + $0x20] sm:$0xff] (!%p166_p2)   ;;  %v3721_v20 = vld [vmem:[%s4769_s2 + $0x28] sm:$0xff] (!%p166_p2)   ;;  %vm1154_vm3 = vsmask.f32 (!%p166_p2), 5376 }
   0x9   : > { %3215 = vmatprep.subr.bf16.mxu0 (!%p166_p2), %v3601_v1  ;;  %3229 = vmatprep.mubr.msk.bf16.mxu0 (!%p166_p2), %vm3602_vm0, %v3601_v1  ;;  %v3581_v28 = vld [vmem:[%s4769_s2 + $0x70] sm:$0xff] (!%p166_p2)   ;;  %v3583_v37 = vld [vmem:[%s4769_s2 + $0x78] sm:$0xff] (!%p166_p2)   ;;  %v3585_v56 = vld [vmem:[%s4769_s2 + $0x80] sm:$0xff] (!%p166_p2)  }
   0xa   : > { %v3738_v29 = vld [vmem:[%s4769_s2 + $0x30] sm:$0xff] (!%p166_p2)   ;;  %v3769_v43 = vld [vmem:[%s4769_s2 + $0x38] sm:$0xff] (!%p166_p2)  }
   0xb   : > { %3116 = vmatpush3.bf16.msra.mxu1 (!%p166_p2), %v3571_v3 }
   0xc   : > { %3216 = vmatpush3.bf16.msra.mxu0 (!%p166_p2), %v3657_v4  ;;  %3117 = vmatprep.subr.bf16.mxu1 (!%p166_p2), %v3601_v1 }
   0xd   : > { %s4777_s16 = smov (!%p195_p3, %s2764_s16), 1  ;;  %3217 = vmatprep.subr.bf16.mxu0 %v3601_v1 }
   0xe   : > { %s3554_s29 = smul.u32 400, %s4777_s16  ;;  %s2771_s13 = sshll.u32 %s4777_s16, 1 }
   0xf   : > { %3118 = vmatpush3.bf16.msra.mxu1 %v3573_v5  ;;  %s208_s18 = scalar_lea.vmem %s4771_s4, %s2771_s13 }
  0x10   : > { %3218 = vmatpush3.bf16.msra.mxu0 %v3672_v6  ;;  %3119 = vmatprep.subr.bf16.mxu1 %v3601_v1  ;;  %s3690_s10 = scalar_lea.vmem %s4767_s0, %s3554_s29 }
  0x11   : > { %3219 = vmatprep.subr.bf16.mxu0 %v3601_v1  ;;  %v210_v11 = vld [vmem:[%s3690_s10 + $0x20] sm:$0xff]  ;;  %v211_v12 = vld [vmem:[%s3690_s10 + $0x28] sm:$0xff]  ;;  %v212_v13 = vld [vmem:[%s3690_s10 + $0x30] sm:$0xff] }
  0x12   : > { %v213_v14 = vld [vmem:[%s3690_s10 + $0x38] sm:$0xff]  ;;  %v3707_v15 = vpack.c.bf16 %v211_v12, %v210_v11  ;;  %v214_v18 = vld [vmem:[%s3690_s10 + $0x40] sm:$0xff]  ;;  %v215_v19 = vld [vmem:[%s3690_s10 + $0x48] sm:$0xff] }
  0x13   : > { %3120 = vmatpush3.bf16.msra.mxu1 %v3575_v7  ;;  %v3712_v17 = vpack.c.bf16 %v213_v14, %v212_v13  ;;  %v3728_v25 = vpack.c.bf16 %v215_v19, %v214_v18  ;;  %v216_v26 = vld [vmem:[%s3690_s10 + $0x50] sm:$0xff]  ;;  %v217_v27 = vld [vmem:[%s3690_s10 + $0x58] sm:$0xff]  ;;  %v218_v34 = vld [vmem:[%s3690_s10 + $0x60] sm:$0xff] }
  0x14   : > { %3220 = vmatpush3.bf16.msra.mxu0 %v3684_v8  ;;  %3121 = vmatprep.subr.bf16.mxu1 %v3601_v1  ;;  %v681_v21 = vshrl.u32 %v3707_v15, 16  ;;  %v684_v22 = vshll.u32 %v3707_v15, 16  ;;  %v219_v35 = vld [vmem:[%s3690_s10 + $0x68] sm:$0xff]  ;;  %v3753_v36 = vpack.c.bf16 %v217_v27, %v216_v26  ;;  %v369_v40 = vrot.slane %v3707_v15, 2  ;;  %v220_v47 = vld [vmem:[%s3690_s10 + $0x70] sm:$0xff]  ;;  %v221_v48 = vld [vmem:[%s3690_s10 + $0x78] sm:$0xff] }
  0x15   : > { %3221 = vmatprep.subr.bf16.mxu0 %v3601_v1  ;;  %v689_v23 = vshrl.u32 %v3712_v17, 16  ;;  %v692_v24 = vshll.u32 %v3712_v17, 16  ;;  %v698_v38 = vshrl.u32 %v3728_v25, 16  ;;  %v701_v39 = vshll.u32 %v3728_v25, 16  ;;  %v226_v60 = vld [vmem:[%s3690_s10 + $0xa0] sm:$0xff]  ;;  %v227_v61 = vld [vmem:[%s3690_s10 + $0xa8] sm:$0xff] }
  0x16   : > { %v683_v30 = vrot.slane %v681_v21, 1  ;;  %v686_v31 = vrot.slane %v684_v22, 2  ;;  %v370_v41 = vrot.slane %v3712_v17, 2  ;;  %v3762_v42 = vpack.c.bf16 %v219_v35, %v218_v34  ;;  %v228_v62 = vld [vmem:[%s3690_s10 + $0xb0] sm:$0xff]  ;;  %v229_v3 = vld [vmem:[%s3690_s10 + $0xb8] sm:$0xff]  ;;  %v231_v11 = vld [vmem:[%s3690_s10 + $0xc8] sm:$0xff] }
  0x17   : > { %3122 = vmatpush3.bf16.msra.mxu1 %v3577_v9  ;;  %v691_v32 = vrot.slane %v689_v23, 1  ;;  %v694_v33 = vrot.slane %v692_v24, 2  ;;  %v707_v46 = vshrl.u32 %v3753_v36, 16  ;;  %v700_v49 = vrot.slane %v698_v38, 1  ;;  %v230_v9 = vld [vmem:[%s3690_s10 + $0xc0] sm:$0xff]  ;;  %v3586_v12 = vld [vmem:[%s4769_s2 + $0x88] sm:$0xff]  }
  0x18   : > { %3222 = vmatpush3.bf16.msra.mxu0 %v3700_v10  ;;  %3123 = vmatprep.subr.bf16.mxu1 %v3601_v1  ;;  %v687_v44 = vor.u32 %v686_v31, %v683_v30  ;;  %v703_v50 = vrot.slane %v701_v39, 2  ;;  %v710_v51 = vshll.u32 %v3753_v36, 16  ;;  %v371_v52 = vsel %vm368_vm1, %v369_v40, %v370_v41  ;;  %v223_v18 = vld [vmem:[%s3690_s10 + $0x88] sm:$0xff]  ;;  %v232_v30 = vld [vmem:[%s3690_s10 + $0xd0] sm:$0xff]  ;;  %v233_v31 = vld [vmem:[%s3690_s10 + $0xd8] sm:$0xff] }
  0x19   : > { %3223 = vmatprep.subr.bf16.mxu0 %v3601_v1  ;;  %v695_v45 = vor.u32 %v694_v33, %v691_v32  ;;  %v716_v53 = vshrl.u32 %v3762_v42, 16  ;;  %v719_v54 = vshll.u32 %v3762_v42, 16  ;;  %v3789_v57 = vpack.c.bf16 %v221_v48, %v220_v47  ;;  %v224_v35 = vld [vmem:[%s3690_s10 + $0x90] sm:$0xff] }
  0x1a   : > { %v372_v58 = vrot.slane %v3728_v25, 2  ;;  %v709_v59 = vrot.slane %v707_v46, 1  ;;  %v704_v63 = vor.u32 %v703_v50, %v700_v49  ;;  %v712_v0 = vrot.slane %v710_v51, 2 }
  0x1b   : > { %3124 = vmatpush3.bf16.msra.mxu1 %v3579_v16  ;;  %v696_v55 = vsel %vm679_vm2, %v687_v44, %v695_v45  ;;  %v718_v5 = vrot.slane %v716_v53, 1  ;;  %v721_v7 = vrot.slane %v719_v54, 2  ;;  %v725_v13 = vshrl.u32 %v3789_v57, 16  ;;  %v222_v16 = vld [vmem:[%s3690_s10 + $0x80] sm:$0xff] }
  0x1c   : > { %3224 = vmatpush3.bf16.msra.mxu0 %v3721_v20  ;;  %3125 = vmatprep.subr.bf16.mxu1 %v3601_v1  ;;  %v728_v14 = vshll.u32 %v3789_v57, 16  ;;  %v373_v19 = vsel %vm368_vm1, %v370_v41, %v372_v58  ;;  %v374_v26 = vrot.slane %v3753_v36, 2  ;;  %v3822_v27 = vpack.c.bf16 %v227_v61, %v226_v60  ;;  %v235_v60 = vld [vmem:[%s3690_s10 + $0xe8] sm:$0xff] }
  0x1d   : > { %3225 = vmatprep.subr.bf16.mxu0 %v3601_v1  ;;  %v705_v32 = vsel %vm679_vm2, %v695_v45, %v704_v63  ;;  %v713_v33 = vor.u32 %v712_v0, %v709_v59  ;;  %v376_v34 = vrot.slane %v3762_v42, 2  ;;  %v3835_v40 = vor.u32 %v721_v7, %v718_v5  ;;  %v3587_v45 = vld [vmem:[%s4769_s2 + $0x90] sm:$0xff]   ;;  %v234_v59 = vld [vmem:[%s3690_s10 + $0xe0] sm:$0xff] }
  0x1e   : > { %v3837_v41 = vpack.c.bf16 %v223_v18, %v222_v16  ;;  %v384_v44 = vrot.slane %v3822_v27, 2  ;;  %v727_v48 = vrot.slane %v725_v13, 1  ;;  %v730_v49 = vrot.slane %v728_v14, 2  ;;  %v236_v18 = vld [vmem:[%s3690_s10 + $0xf0] sm:$0xff] }
  0x1f   : > { %3126 = vmatpush3.bf16.msra.mxu1 %v3581_v28  ;;  %v3824_v28 = vpack.c.bf16 %v229_v3, %v228_v62  ;;  %v375_v61 = vsel %vm368_vm1, %v372_v58, %v374_v26  ;;  %v3866_v62 = vsel %vm368_vm1, %v374_v26, %v376_v34  ;;  %v714_v58 = vsel %vm679_vm2, %v704_v63, %v713_v33 }
  0x20   : > { %3226 = vmatpush3.bf16.msra.mxu0 %v3738_v29  ;;  %3127 = vmatprep.subr.bf16.mxu1 %v3601_v1  ;;  %v3878_v3 = vsel %vm679_vm2, %v713_v33, %v3835_v40  ;;  %v378_v5 = vrot.slane %v3789_v57, 2  ;;  %v734_v7 = vshrl.u32 %v3837_v41, 16  ;;  %v737_v63 = vshll.u32 %v3837_v41, 16 }
  0x21   : > { %3227 = vmatprep.subr.bf16.mxu0 %v3601_v1  ;;  %v386_v47 = vrot.slane %v3824_v28, 2  ;;  %v3893_v16 = vpack.c.bf16 %v235_v60, %v234_v59  ;;  %v752_v33 = vshrl.u32 %v3822_v27, 16  ;;  %v1159_v15 = vrot.slane %v692_v24, 3  ;;  %v3589_v59 = vld [vmem:[%s4769_s2 + $0xa0] sm:$0xff]  }
  0x22   : > { %v764_v60 = vshll.u32 %v3824_v28, 16  ;;  %v1162_v17 = vrot.slane %v698_v38, 2  ;;  %v1163_v24 = vrot.slane %v701_v39, 3  ;;  %v1167_v39 = vrot.slane %v710_v51, 3  ;;  %v244_v51 = vld [vmem:[%s3690_s10 + $0x130] sm:$0xff] }
  0x23   : > { %3128 = vmatpush3.bf16.msra.mxu1 %v3583_v37  ;;  %v225_v37 = vld [vmem:[%s3690_s10 + $0x98] sm:$0xff]  ;;  %v1170_v36 = vrot.slane %v716_v53, 2  ;;  %v1171_v53 = vrot.slane %v719_v54, 3 }
  0x24   : > { %3228 = vmatpush3.bf16.msra.mxu0 %v3769_v43  ;;  %3413 = vmatprep.subr.bf16.mxu1 %v3601_v1  ;;  %v1164_v25 = vor.u32 %v1163_v24, %v1162_v17  ;;  %v246_v17 = vld [vmem:[%s3690_s10 + $0x140] sm:$0xff]  ;;  %v247_v24 = vld [vmem:[%s3690_s10 + $0x148] sm:$0xff] }
  0x25   : > { %3313 = vmatprep.subr.bf16.mxu0 %v3601_v1 }
  0x26   : > { %3130 = vmatmul.mubr.bf16.vlgmr.msra.gmra.mrb[0].mxu1 %v371_v52  ;;  %v3849_v52 = vpack.c.bf16 %v233_v31, %v232_v30  ;;  %v1155_v31 = vrot.slane %v681_v21, 2 }
  0x27   : > { %3230 = vmatmul.mubr.bf16.vlgmr.msra.gmra.mrb[0].mxu0 %v696_v55  ;;  %3133 = vmatprep.mubr.msk.bf16.mxu1 %vm3602_vm0, %v3601_v1  ;;  %v3853_v55 = vpack.c.bf16 %v225_v37, %v224_v35  ;;  %v755_v35 = vshll.u32 %v3822_v27, 16  ;;  %v392_v37 = vrot.slane %v3893_v16, 2 }
  0x28   : > { %3314 = vmatpush3.bf16.msra.mxu0 %v3585_v56  ;;  %3233 = vmatprep.mubr.msk.bf16.mxu0 %vm3602_vm0, %v3601_v1  ;;  %v3858_v56 = vsel %vm368_vm1, %v384_v44, %v386_v47  ;;  %v390_v0 = vrot.slane %v3849_v52, 2 }
  0x29   : > { %3421 = vmatpush3.bf16.msra.mxu1 %v3645_v2  ;;  %3315 = vmatprep.subr.bf16.mxu0 %v3601_v1  ;;  %v3833_v2 = vpack.c.bf16 %v231_v11, %v230_v9  ;;  %v3884_v9 = vor.u32 %v730_v49, %v727_v48  ;;  %v3588_v11 = vld [vmem:[%s4769_s2 + $0x98] sm:$0xff]   ;;  %v743_v26 = vshrl.u32 %v3853_v55, 16  ;;  %v746_v30 = vshll.u32 %v3853_v55, 16  ;;  %v239_v48 = vld [vmem:[%s3690_s10 + $0x108] sm:$0xff] }
  0x2a   : > { %3414 = vmatprep.subr.bf16.mxu1 %v3601_v1 }
  0x2b   : > { %v388_v50 = vrot.slane %v3833_v2, 2  ;;  %v770_v38 = vshrl.u32 %v3833_v2, 16 }
  0x2c   : > { %3316 = vmatpush3.bf16.msra.mxu0 %v3586_v12 }
  0x2d   : > { %3317 = vmatprep.subr.bf16.mxu0 %v3601_v1  ;;  %3422 = vmatpush3.bf16.msra.mxu1 %v3657_v4  ;;  %v3870_v4 = vsel %vm368_vm1, %v386_v47, %v388_v50  ;;  %v3891_v12 = vsel %vm368_vm1, %v388_v50, %v390_v0  ;;  %v1158_v47 = vrot.slane %v689_v23, 2  ;;  %v241_v50 = vld [vmem:[%s3690_s10 + $0x118] sm:$0xff]  ;;  %v3925_v23 = vsel %vm368_vm1, %v390_v0, %v392_v37 }
  0x2e   : > { %3134 = vmatmul.mubr.bf16.gmra.mrb[4].mxu1 %v373_v19  ;;  %3415 = vmatprep.subr.bf16.mxu1 %v3601_v1  ;;  %v237_v19 = vld [vmem:[%s3690_s10 + $0xf8] sm:$0xff]  ;;  %v1166_v0 = vrot.slane %v707_v46, 2  ;;  %v1194_v42 = vrot.slane %v770_v38, 2 }
  0x2f   : > { %3234 = vmatmul.mubr.bf16.gmra.mrb[4].mxu0 %v705_v32  ;;  %3137 = vmatprep.mubr.msk.bf16.mxu1 %vm3602_vm0, %v3601_v1  ;;  %v1156_v32 = vrot.slane %v684_v22, 3  ;;  %v3916_v21 = vpack.c.bf16 %v237_v19, %v236_v18  ;;  %v240_v22 = vld [vmem:[%s3690_s10 + $0x110] sm:$0xff] }
  0x30   : > { %3237 = vmatprep.mubr.msk.bf16.mxu0 %vm3602_vm0, %v3601_v1  ;;  %3318 = vmatpush3.bf16.msra.mxu0 %v3587_v45  ;;  %v238_v45 = vld [vmem:[%s3690_s10 + $0x100] sm:$0xff] }
  0x31   : > { %3319 = vmatprep.subr.bf16.mxu0 %v3601_v1  ;;  %3423 = vmatpush3.bf16.msra.mxu1 %v3672_v6  ;;  %v761_v6 = vshrl.u32 %v3824_v28, 16  ;;  %v1157_v49 = vor.u32 %v1156_v32, %v1155_v31  ;;  %v394_v18 = vrot.slane %v3916_v21, 2  ;;  %v3934_v19 = vpack.c.bf16 %v239_v48, %v238_v45  ;;  %v242_v31 = vld [vmem:[%s3690_s10 + $0x120] sm:$0xff]  ;;  %v243_v32 = vld [vmem:[%s3690_s10 + $0x128] sm:$0xff]  ;;  %v245_v45 = vld [vmem:[%s3690_s10 + $0x138] sm:$0xff] }
  0x32   : > { %3416 = vmatprep.subr.bf16.mxu1 %v3601_v1  ;;  %v1168_v48 = vor.u32 %v1167_v39, %v1166_v0  ;;  %v255_v28 = vld [vmem:[%s4768_s1 + $0x38] sm:$0xff] }
  0x33   : > { %vm1551_vm8 = vcmp.gt.f32.partialorder %v255_v28, 0.5 }
  0x34   : > { %3320 = vmatpush3.bf16.msra.mxu0 %v3588_v11  ;;  %v1160_v11 = vor.u32 %v1159_v15, %v1158_v47  ;;  %v396_v47 = vrot.slane %v3934_v19, 2  ;;  %v3984_v54 = vsel %vm1154_vm3, %v1164_v25, %v1168_v48 }
  0x35   : > { %3321 = vmatprep.subr.bf16.mxu0 %v3601_v1  ;;  %3424 = vmatpush3.bf16.msra.mxu1 %v3684_v8  ;;  %v3942_v8 = vpack.c.bf16 %v241_v50, %v240_v22  ;;  %v3975_v22 = vpack.c.bf16 %v243_v32, %v242_v31  ;;  %v1174_v50 = vrot.slane %v725_v13, 2  ;;  %v1178_v13 = vrot.slane %v734_v7, 2  ;;  %v248_v31 = vld [vmem:[%s3690_s10 + $0x150] sm:$0xff] }
  0x36   : > { %3138 = vmatmul.mubr.bf16.gmra.mrb[8].mxu1 %v375_v61  ;;  %3417 = vmatprep.subr.bf16.mxu1 %v3601_v1  ;;  %v3949_v46 = vsel %vm1154_vm3, %v1157_v49, %v1160_v11  ;;  %v3952_v61 = vsel %vm368_vm1, %v392_v37, %v394_v18  ;;  %v3965_v37 = vsel %vm1154_vm3, %v1160_v11, %v1164_v25  ;;  %v249_v25 = vld [vmem:[%s3690_s10 + $0x158] sm:$0xff]  ;;  %v3591_v32 = vld [vmem:[%s4769_s2 + $0xb0] sm:$0xff]  }
  0x37   : > { %3238 = vmatmul.mubr.bf16.gmra.mrb[8].mxu0 %v714_v58  ;;  %3141 = vmatprep.mubr.msk.bf16.mxu1 %vm3602_vm0, %v3601_v1  ;;  %v3590_v58 = vld [vmem:[%s4769_s2 + $0xa8] sm:$0xff]   ;;  %v398_v49 = vrot.slane %v3942_v8, 2  ;;  %v3973_v15 = vsel %vm368_vm1, %v394_v18, %v396_v47  ;;  %v1172_v11 = vor.u32 %v1171_v53, %v1170_v36  ;;  %v3990_v18 = vpack.c.bf16 %v245_v45, %v244_v51 }
  0x38   : > { %3241 = vmatprep.mubr.msk.bf16.mxu0 %vm3602_vm0, %v3601_v1  ;;  %3322 = vmatpush3.bf16.msra.mxu0 %v3589_v59  ;;  %v1175_v59 = vrot.slane %v728_v14, 3  ;;  %v400_v0 = vrot.slane %v3975_v22, 2  ;;  %v1179_v14 = vrot.slane %v737_v63, 3  ;;  %v4006_v51 = vpack.c.bf16 %v247_v24, %v246_v17 }
  0x39   : > { %3323 = vmatprep.subr.bf16.mxu0 %v3601_v1  ;;  %3425 = vmatpush3.bf16.msra.mxu1 %v3700_v10  ;;  %v3987_v10 = vsel %vm368_vm1, %v396_v47, %v398_v49  ;;  %v4003_v47 = vsel %vm1154_vm3, %v1168_v48, %v1172_v11  ;;  %v402_v36 = vrot.slane %v3990_v18, 2  ;;  %v1182_v45 = vrot.slane %v743_v26, 2 }
  0x3a   : > { %3418 = vmatprep.subr.bf16.mxu1 %v3601_v1  ;;  %v1176_v39 = vor.u32 %v1175_v59, %v1174_v50  ;;  %v1180_v50 = vor.u32 %v1179_v14, %v1178_v13  ;;  %v1183_v48 = vrot.slane %v746_v30, 3  ;;  %v404_v17 = vrot.slane %v4006_v51, 2 }
  0x3b   : > { %v4022_v59 = vsel %vm368_vm1, %v400_v0, %v402_v36  ;;  %v4773_v24 = vshll.u32 %v3833_v2, 16 }
  0x3c   : > { %3324 = vmatpush3.bf16.msra.mxu0 %v3590_v58  ;;  %v4013_v58 = vsel %vm368_vm1, %v398_v49, %v400_v0  ;;  %v4016_v53 = vsel %vm1154_vm3, %v1172_v11, %v1176_v39  ;;  %v1186_v49 = vrot.slane %v752_v33, 2  ;;  %v1184_v11 = vor.u32 %v1183_v48, %v1182_v45 }
  0x3d   : > { %3325 = vmatprep.subr.bf16.mxu0 %v3601_v1  ;;  %3426 = vmatpush3.bf16.msra.mxu1 %v3721_v20  ;;  %v4026_v20 = vpack.c.bf16 %v249_v25, %v248_v31  ;;  %v1187_v0 = vrot.slane %v755_v35, 3  ;;  %v4045_v13 = vsel %vm368_vm1, %v402_v36, %v404_v17  ;;  %v1191_v31 = vrot.slane %v764_v60, 3 }
  0x3e   : > { %3142 = vmatmul.mubr.bf16.gmra.mrb[12].mxu1 %v3866_v62  ;;  %3419 = vmatprep.subr.bf16.mxu1 %v3601_v1  ;;  %v4035_v62 = vsel %vm1154_vm3, %v1176_v39, %v1180_v50  ;;  %v1190_v39 = vrot.slane %v761_v6, 2  ;;  %v379_v25 = vsel %vm368_vm1, %v376_v34, %v378_v5  ;;  %v1195_v34 = vrot.slane %v4773_v24, 3 }
  0x3f   : > { %3242 = vmatmul.mubr.bf16.gmra.mrb[12].mxu0 %v3878_v3  ;;  %3145 = vmatprep.mubr.msk.bf16.mxu1 %vm3602_vm0, %v3601_v1  ;;  %v3592_v3 = vld [vmem:[%s4769_s2 + $0xb8] sm:$0xff]   ;;  %v4772_v14 = vrot.slane %v4026_v20, 2  ;;  %v1188_v36 = vor.u32 %v1187_v0, %v1186_v49  ;;  %v779_v0 = vshrl.u32 %v3849_v52, 16 }
  0x40   : > { %3245 = vmatprep.mubr.msk.bf16.mxu0 %vm3602_vm0, %v3601_v1  ;;  %3326 = vmatpush3.bf16.msra.mxu0 %v3591_v32  ;;  %v4060_v32 = vsel %vm1154_vm3, %v1180_v50, %v1184_v11  ;;  %v1192_v48 = vor.u32 %v1191_v31, %v1190_v39  ;;  %v736_v50 = vrot.slane %v734_v7, 1  ;;  %v782_v39 = vshll.u32 %v3849_v52, 16 }
  0x41   : > { %3327 = vmatprep.subr.bf16.mxu0 %v3601_v1  ;;  %3427 = vmatpush3.bf16.msra.mxu1 %v3738_v29  ;;  %v4065_v45 = vsel %vm368_vm1, %v404_v17, %v4772_v14  ;;  %v732_v29 = vsel %vm679_vm2, %v3835_v40, %v3884_v9  ;;  %v739_v17 = vrot.slane %v737_v63, 2  ;;  %v4080_v49 = vsel %vm1154_vm3, %v1184_v11, %v1188_v36 }
  0x42   : > { %3420 = vmatprep.subr.bf16.mxu1 %v3601_v1  ;;  %v4085_v31 = vsel %vm1154_vm3, %v1188_v36, %v1192_v48  ;;  %v1196_v14 = vor.u32 %v1195_v34, %v1194_v42  ;;  %v380_v7 = vrot.slane %v3837_v41, 2  ;;  %v781_v52 = vrot.slane %v779_v0, 1 }
  0x43   : > { %v740_v63 = vor.u32 %v739_v17, %v736_v50  ;;  %v784_v11 = vrot.slane %v782_v39, 2  ;;  %v1199_v42 = vrot.slane %v782_v39, 3  ;;  %v745_v41 = vrot.slane %v743_v26, 1 }
  0x44   : > { %3328 = vmatpush3.bf16.msra.mxu0 %v3592_v3  ;;  %v4089_v40 = vsel %vm1154_vm3, %v1192_v48, %v1196_v14  ;;  %v788_v3 = vshrl.u32 %v3893_v16, 16  ;;  %v1198_v48 = vrot.slane %v779_v0, 2  ;;  %v381_v34 = vsel %vm368_vm1, %v378_v5, %v380_v7 }
  0x45   : > { %3428 = vmatpush3.bf16.msra.mxu1 %v3769_v43  ;;  %v791_v43 = vshll.u32 %v3893_v16, 16  ;;  %v741_v50 = vsel %vm679_vm2, %v3884_v9, %v740_v63  ;;  %v4107_v17 = vor.u32 %v784_v11, %v781_v52  ;;  %v382_v5 = vrot.slane %v3853_v55, 2  ;;  %v252_v9 = vld [vmem:[%s4768_s1 + $0x20] sm:$0xff] }
  0x46   : > { %3146 = vmatmul.mubr.bf16.gmra.mrb[16].mxu1 %v379_v25  ;;  %v790_v25 = vrot.slane %v788_v3, 1  ;;  %v1200_v24 = vor.u32 %v1199_v42, %v1198_v48  ;;  %vm1548_vm4 = vcmp.gt.f32.partialorder %v252_v9, 0.5  ;;  %v800_v39 = vshll.u32 %v3916_v21, 16 }
  0x47   : > { %3246 = vmatmul.mubr.bf16.gmra.mrb[16].mxu0 %v732_v29  ;;  %3149 = vmatprep.mubr.msk.bf16.mxu1 %vm3602_vm0, %v3601_v1  ;;  %v793_v36 = vrot.slane %v791_v43, 2  ;;  %v748_v29 = vrot.slane %v746_v30, 2  ;;  %v3603_v30 = vmov 0   ;;  %v383_v48 = vsel %vm368_vm1, %v380_v7, %v382_v5  ;;  %v253_v7 = vld [vmem:[%s4768_s1 + $0x28] sm:$0xff] }
  0x48   : > { %3249 = vmatprep.mubr.msk.bf16.mxu0 %vm3602_vm0, %v3601_v1  ;;  %v4114_v57 = vsel %vm1154_vm3, %v1196_v14, %v1200_v24  ;;  %3567 = vset.pattern.permute.xlu0 %v3603_v30  ;;  %v797_v14 = vshrl.u32 %v3916_v21, 16  ;;  %v1589_v52 = vsel %vm1548_vm4, 1, %v3603_v30  ;;  %v802_v11 = vrot.slane %v800_v39, 2 }
  0x49   : > { %v794_v16 = vor.u32 %v793_v36, %v790_v25  ;;  %v749_v26 = vor.u32 %v748_v29, %v745_v41  ;;  %3568 = vset.pattern.permute.xlu1 %v3603_v30  ;;  %1631 = vperm.xlu0 %3567, %v1589_v52   ;;  %v1202_v25 = vrot.slane %v788_v3, 2  ;;  %v1203_v36 = vrot.slane %v791_v43, 3 }
  0x4a   : > { %v799_v55 = vrot.slane %v797_v14, 1  ;;  %v754_v42 = vrot.slane %v752_v33, 1  ;;  %vm1549_vm5 = vcmp.gt.f32.partialorder %v253_v7, 0.5  ;;  %v809_v3 = vshll.u32 %v3934_v19, 16 }
  0x4b   : > { %v4111_v0 = vsel %vm679_vm2, %v4107_v17, %v794_v16  ;;  %v750_v41 = vsel %vm679_vm2, %v740_v63, %v749_v26  ;;  %v1204_v29 = vor.u32 %v1203_v36, %v1202_v25  ;;  %v806_v63 = vshrl.u32 %v3934_v19, 16 }
  0x4c   : > { %v803_v21 = vor.u32 %v802_v11, %v799_v55  ;;  %v811_v52 = vrot.slane %v809_v3, 2  ;;  %v1206_v55 = vrot.slane %v797_v14, 2  ;;  %v1207_v11 = vrot.slane %v800_v39, 3 }
  0x4d   : > { %v4139_v9 = vsel %vm1154_vm3, %v1200_v24, %v1204_v29  ;;  %v1590_v24 = vsel %vm1549_vm5, 1, %v3603_v30  ;;  %v385_v25 = vsel %vm368_vm1, %v382_v5, %v384_v44  ;;  %v763_v36 = vrot.slane %v761_v6, 1  ;;  %v258_v5 = vld [vmem:[%s4768_s1 + $0x50] sm:$0xff] }
  0x4e   : > { %3150 = vmatmul.mubr.bf16.gmra.mrb[20].mxu1 %v381_v34  ;;  %v757_v34 = vrot.slane %v755_v35, 2  ;;  %v254_v35 = vld [vmem:[%s4768_s1 + $0x30] sm:$0xff]  ;;  %1634 = vperm.xlu0 %3567, %v1590_v24   ;;  %v1592_v14 = vsel %vm1551_vm8, 1, %v3603_v30  ;;  %vm1554_vm9 = vcmp.gt.f32.partialorder %v258_v5, 0.5  ;;  %v815_v39 = vshrl.u32 %v3942_v8, 16 }
  0x4f   : > { %3250 = vmatmul.mubr.bf16.gmra.mrb[20].mxu0 %v741_v50  ;;  %3153 = vmatprep.mubr.msk.bf16.mxu1 %vm3602_vm0, %v3601_v1  ;;  %v4136_v50 = vsel %vm679_vm2, %v794_v16, %v803_v21  ;;  %vm1550_vm6 = vcmp.gt.f32.partialorder %v254_v35, 0.5  ;;  %v808_v16 = vrot.slane %v806_v63, 1  ;;  %v1210_v24 = vrot.slane %v806_v63, 2 }
  0x50   : > { %3253 = vmatprep.mubr.msk.bf16.mxu0 %vm3602_vm0, %v3601_v1  ;;  %v758_v33 = vor.u32 %v757_v34, %v754_v42  ;;  %v1591_v43 = vsel %vm1550_vm6, 1, %v3603_v30  ;;  %v1208_v34 = vor.u32 %v1207_v11, %v1206_v55  ;;  %v817_v35 = vrot.slane %v815_v39, 1 }
  0x51   : > { %1637 = vperm.xlu1 %3568, %v1591_v43   ;;  %v812_v42 = vor.u32 %v811_v52, %v808_v16  ;;  %v1211_v43 = vrot.slane %v809_v3, 3  ;;  %v772_v16 = vrot.slane %v770_v38, 1  ;;  %v4774_v52 = vshll.u32 %v3833_v2, 16  ;;  %v259_v38 = vld [vmem:[%s4768_s1 + $0x58] sm:$0xff] }
  0x52   : > { %v759_v19 = vsel %vm679_vm2, %v749_v26, %v758_v33  ;;  %v4170_v44 = vsel %vm1154_vm3, %v1204_v29, %v1208_v34  ;;  %v257_v26 = vld [vmem:[%s4768_s1 + $0x48] sm:$0xff]  ;;  %v818_v29 = vshll.u32 %v3942_v8, 16  ;;  %v260_v8 = vld [vmem:[%s4768_s1 + $0x60] sm:$0xff]  ;;  %vm1555_vm12 = vcmp.gt.f32.partialorder %v259_v38, 0.5 }
  0x53   : > { %v4167_v27 = vsel %vm679_vm2, %v803_v21, %v812_v42  ;;  %vm1553_vm10 = vcmp.gt.f32.partialorder %v257_v26, 0.5  ;;  %v1595_v21 = vsel %vm1554_vm9, 1, %v3603_v30  ;;  %v775_v55 = vrot.slane %v4774_v52, 2 }
  0x54   : > { %v1594_v7 = vsel %vm1553_vm10, 1, %v3603_v30  ;;  %v820_v11 = vrot.slane %v818_v29, 2  ;;  %vm1556_vm11 = vcmp.gt.f32.partialorder %v260_v8, 0.5  ;;  %v1214_v26 = vrot.slane %v815_v39, 2 }
  0x55   : > { %1640 = vperm.xlu1 %3568, %v1592_v14   ;;  %v1597_v2 = vsel %vm1556_vm11, 1, %v3603_v30  ;;  %v1215_v14 = vrot.slane %v818_v29, 3 }
  0x56   : > { %3154 = vmatmul.mubr.bf16.gmra.mrb[24].mxu1 %v383_v48  ;;  %v766_v48 = vrot.slane %v764_v60, 2 }
  0x57   : > { %3254 = vmatmul.mubr.bf16.gmra.mrb[24].mxu0 %v750_v41  ;;  %3157 = vmatprep.mubr.msk.bf16.mxu1 %vm3602_vm0, %v3601_v1  ;;  %v256_v41 = vld [vmem:[%s4768_s1 + $0x40] sm:$0xff] }
  0x58   : > { %3257 = vmatprep.mubr.msk.bf16.mxu0 %vm3602_vm0, %v3601_v1  ;;  %vm1552_vm7 = vcmp.gt.f32.partialorder %v256_v41, 0.5  ;;  %v767_v60 = vor.u32 %v766_v48, %v763_v36  ;;  %v1212_v36 = vor.u32 %v1211_v43, %v1210_v24  ;;  %v821_v48 = vor.u32 %v820_v11, %v817_v35  ;;  %v264_v24 = vld [vmem:[%s4768_s1 + $0x80] sm:$0xff] }
  0x59   : > { %v1593_v6 = vsel %vm1552_vm7, 1, %v3603_v30  ;;  %1646 = vperm.xlu1 %3568, %v1594_v7   ;;  %v1216_v35 = vor.u32 %v1215_v14, %v1214_v26  ;;  %vm1560_vm15 = vcmp.gt.f32.partialorder %v264_v24, 0.5  ;;  %v845_v14 = vshll.u32 %v4006_v51, 16 }
  0x5a   : > { %1643 = vperm.xlu0 %3567, %v1593_v6   ;;  %v4201_v63 = vsel %vm1154_vm3, %v1208_v34, %v1212_v36  ;;  %v4210_v3 = vsel %vm679_vm2, %v812_v42, %v821_v48  ;;  %v1596_v34 = vsel %vm1555_vm12, 1, %v3603_v30  ;;  %v824_v42 = vshrl.u32 %v3975_v22, 16 }
  0x5b   : > { %v827_v6 = vshll.u32 %v3975_v22, 16  ;;  %v4231_v22 = vsel %vm1154_vm3, %v1212_v36, %v1216_v35  ;;  %v1601_v39 = vsel %vm1560_vm15, 1, %v3603_v30 }
  0x5c   : > { %v826_v5 = vrot.slane %v824_v42, 1 }
  0x5d   : > { %1652 = vperm.xlu1 %3568, %v1596_v34   ;;  %v268_v34 = vld [vmem:[%s4768_s1 + $0xa0] sm:$0xff] }
  0x5e   : > { %3158 = vmatmul.mubr.bf16.gmra.mrb[28].mxu1 %v385_v25  ;;  %v768_v25 = vsel %vm679_vm2, %v758_v33, %v767_v60  ;;  %1649 = vperm.xlu0 %3567, %v1595_v21   ;;  %v776_v33 = vor.u32 %v775_v55, %v772_v16  ;;  %v829_v21 = vrot.slane %v827_v6, 2  ;;  %v265_v16 = vld [vmem:[%s4768_s1 + $0x88] sm:$0xff]  ;;  %v833_v55 = vshrl.u32 %v3990_v18, 16 }
  0x5f   : > { %3258 = vmatmul.mubr.bf16.gmra.mrb[28].mxu0 %v759_v19  ;;  %3161 = vmatprep.mubr.msk.bf16.mxu1 %vm3602_vm0, %v3601_v1  ;;  %v261_v19 = vld [vmem:[%s4768_s1 + $0x68] sm:$0xff]  ;;  %vm1561_vm6 = vcmp.gt.f32.partialorder %v265_v16, 0.5  ;;  %vm1564_vm7 = vcmp.gt.f32.partialorder %v268_v34, 0.5  ;;  %v275_v34 = vld [vmem:[%s4768_s1 + $0xd8] sm:$0xff] }
  0x60   : > { %3261 = vmatprep.mubr.msk.bf16.mxu0 %vm3602_vm0, %v3601_v1  ;;  %vm1557_vm14 = vcmp.gt.f32.partialorder %v261_v19, 0.5  ;;  %v777_v7 = vsel %vm679_vm2, %v767_v60, %v776_v33  ;;  %v830_v43 = vor.u32 %v829_v21, %v826_v5  ;;  %v263_v60 = vld [vmem:[%s4768_s1 + $0x78] sm:$0xff]  ;;  %v1602_v36 = vsel %vm1561_vm6, 1, %v3603_v30 }
  0x61   : > { %v1598_v28 = vsel %vm1557_vm14, 1, %v3603_v30  ;;  %vm1559_vm4 = vcmp.gt.f32.partialorder %v263_v60, 0.5  ;;  %v835_v8 = vrot.slane %v833_v55, 1  ;;  %v842_v5 = vshrl.u32 %v4006_v51, 16  ;;  %v272_v60 = vld [vmem:[%s4768_s1 + $0xc0] sm:$0xff] }
  0x62   : > { %1655 = vperm.xlu0 %3567, %v1597_v2   ;;  %1658 = vperm.xlu1 %3568, %v1598_v28   ;;  %v4240_v29 = vsel %vm679_vm2, %v821_v48, %v830_v43  ;;  %v1600_v52 = vsel %vm1559_vm4, 1, %v3603_v30  ;;  %v1218_v48 = vrot.slane %v824_v42, 2  ;;  %v1219_v2 = vrot.slane %v827_v6, 3  ;;  %v269_v6 = vld [vmem:[%s4768_s1 + $0xa8] sm:$0xff] }
  0x63   : > { %v1605_v42 = vsel %vm1564_vm7, 1, %v3603_v30  ;;  %vm1565_vm10 = vcmp.gt.f32.partialorder %v269_v6, 0.5  ;;  %vm1568_vm11 = vcmp.gt.f32.partialorder %v272_v60, 0.5  ;;  %vm1571_vm4 = vcmp.gt.f32.partialorder %v275_v34, 0.5  ;;  %v288_v60 = vld [vmem:[%s4768_s1 + $0x140] sm:$0xff] }
  0x64   : > { %v1220_v19 = vor.u32 %v1219_v2, %v1218_v48  ;;  %v1606_v21 = vsel %vm1565_vm10, 1, %v3603_v30  ;;  %v1609_v16 = vsel %vm1568_vm11, 1, %v3603_v30  ;;  %v1227_v48 = vrot.slane %v845_v14, 3 }
  0x66   : > { %3162 = vmatmul.mubr.bf16.gmra.mrb[32].mxu1 %v3858_v56  ;;  %v262_v56 = vld [vmem:[%s4768_s1 + $0x70] sm:$0xff]  ;;  %1664 = vperm.xlu1 %3568, %v1600_v52   ;;  %v271_v52 = vld [vmem:[%s4768_s1 + $0xb8] sm:$0xff] }
  0x67   : > { %3262 = vmatmul.mubr.bf16.gmra.mrb[32].mxu0 %v768_v25  ;;  %3165 = vmatprep.mubr.msk.bf16.mxu1 %vm3602_vm0, %v3601_v1  ;;  %vm1558_vm13 = vcmp.gt.f32.partialorder %v262_v56, 0.5  ;;  %v836_v25 = vshll.u32 %v3990_v18, 16  ;;  %v786_v56 = vsel %vm679_vm2, %v776_v33, %v4107_v17  ;;  %v4262_v18 = vsel %vm1154_vm3, %v1216_v35, %v1220_v19  ;;  %v267_v17 = vld [vmem:[%s4768_s1 + $0x98] sm:$0xff] }
  0x68   : > { %3265 = vmatprep.mubr.msk.bf16.mxu0 %vm3602_vm0, %v3601_v1  ;;  %v1599_v41 = vsel %vm1558_vm13, 1, %v3603_v30  ;;  %vm1563_vm8 = vcmp.gt.f32.partialorder %v267_v17, 0.5  ;;  %v1222_v35 = vrot.slane %v833_v55, 2  ;;  %vm1567_vm12 = vcmp.gt.f32.partialorder %v271_v52, 0.5  ;;  %v287_v52 = vld [vmem:[%s4768_s1 + $0x138] sm:$0xff] }
  0x69   : > { %1661 = vperm.xlu0 %3567, %v1599_v41   ;;  %v838_v38 = vrot.slane %v836_v25, 2  ;;  %v1604_v28 = vsel %vm1563_vm8, 1, %v3603_v30  ;;  %v1223_v24 = vrot.slane %v836_v25, 3 }
  0x6a   : > { %1670 = vperm.xlu1 %3568, %v1602_v36  }
  0x6b   : > { %v839_v41 = vor.u32 %v838_v38, %v835_v8  ;;  %v1226_v8 = vrot.slane %v842_v5, 2  ;;  %v276_v38 = vld [vmem:[%s4768_s1 + $0xe0] sm:$0xff] }
  0x6c   : > { %vm1572_vm15 = vcmp.gt.f32.partialorder %v276_v38, 0.5 }
  0x6d   : > { %1667 = vperm.xlu0 %3567, %v1601_v39   ;;  %v4271_v33 = vsel %vm679_vm2, %v830_v43, %v839_v41  ;;  %v847_v43 = vrot.slane %v845_v14, 2  ;;  %v1224_v39 = vor.u32 %v1223_v24, %v1222_v35  ;;  %v4317_v2 = vor.u32 %v1227_v48, %v1226_v8  ;;  %v283_v35 = vld [vmem:[%s4768_s1 + $0x118] sm:$0xff]  ;;  %v286_v24 = vld [vmem:[%s4768_s1 + $0x130] sm:$0xff] }
  0x6e   : > { %3166 = vmatmul.mubr.bf16.gmra.mrb[36].mxu1 %v3870_v4  ;;  %v266_v4 = vld [vmem:[%s4768_s1 + $0x90] sm:$0xff]  ;;  %1676 = vperm.xlu1 %3568, %v1604_v28   ;;  %v279_v28 = vld [vmem:[%s4768_s1 + $0xf8] sm:$0xff] }
  0x6f   : > { %3266 = vmatmul.mubr.bf16.gmra.mrb[36].mxu0 %v777_v7  ;;  %3169 = vmatprep.mubr.msk.bf16.mxu1 %vm3602_vm0, %v3601_v1  ;;  %vm1562_vm5 = vcmp.gt.f32.partialorder %v266_v4, 0.5  ;;  %v844_v7 = vrot.slane %v842_v5, 1  ;;  %v4293_v51 = vsel %vm1154_vm3, %v1220_v19, %v1224_v39  ;;  %v1613_v19 = vsel %vm1572_vm15, 1, %v3603_v30  ;;  %v282_v5 = vld [vmem:[%s4768_s1 + $0x110] sm:$0xff] }
  0x70   : > { %3269 = vmatprep.mubr.msk.bf16.mxu0 %vm3602_vm0, %v3601_v1  ;;  %v1603_v11 = vsel %vm1562_vm5, 1, %v3603_v30  ;;  %vm1575_vm8 = vcmp.gt.f32.partialorder %v279_v28, 0.5  ;;  %vm1584_vm15 = vcmp.gt.f32.partialorder %v288_v60, 0.5 }
  0x71   : > { %1673 = vperm.xlu0 %3567, %v1603_v11   ;;  %v4289_v4 = vor.u32 %v847_v43, %v844_v7  ;;  %v273_v11 = vld [vmem:[%s4768_s1 + $0xc8] sm:$0xff] }
  0x72   : > { %1682 = vperm.xlu1 %3568, %v1606_v21   ;;  %vm1569_vm14 = vcmp.gt.f32.partialorder %v273_v11, 0.5  ;;  %v284_v21 = vld [vmem:[%s4768_s1 + $0x120] sm:$0xff] }
  0x73   : > { %v4304_v55 = vsel %vm679_vm2, %v839_v41, %v4289_v4  ;;  %v1610_v36 = vsel %vm1569_vm14, 1, %v3603_v30  ;;  %v277_v41 = vld [vmem:[%s4768_s1 + $0xe8] sm:$0xff]  ;;  %vm1580_vm11 = vcmp.gt.f32.partialorder %v284_v21, 0.5  ;;  %v292_v11 = vld [vmem:[%s4768_s1 + $0x160] sm:$0xff] }
  0x74   : > { %vm1573_vm6 = vcmp.gt.f32.partialorder %v277_v41, 0.5  ;;  %v1621_v7 = vsel %vm1580_vm11, 1, %v3603_v30 }
  0x75   : > { %1679 = vperm.xlu0 %3567, %v1605_v42   ;;  %v1612_v42 = vsel %vm1571_vm4, 1, %v3603_v30  ;;  %v1614_v17 = vsel %vm1573_vm6, 1, %v3603_v30  ;;  %vm1583_vm4 = vcmp.gt.f32.partialorder %v287_v52, 0.5 }
  0x76   : > { %3170 = vmatmul.mubr.bf16.gmra.mrb[40].mxu1 %v3891_v12  ;;  %v270_v12 = vld [vmem:[%s4768_s1 + $0xb0] sm:$0xff] }
  0x77   : > { %3270 = vmatmul.mubr.bf16.gmra.mrb[40].mxu0 %v786_v56  ;;  %3173 = vmatprep.mubr.msk.bf16.mxu1 %vm3602_vm0, %v3601_v1  ;;  %vm1566_vm9 = vcmp.gt.f32.partialorder %v270_v12, 0.5  ;;  %v4325_v56 = vsel %vm1154_vm3, %v1224_v39, %v4317_v2  ;;  %v280_v12 = vld [vmem:[%s4768_s1 + $0x100] sm:$0xff] }
  0x78   : > { %3329 = vmatprep.mubr.msk.bf16.mxu0 %vm3602_vm0, %v3601_v1  ;;  %v1607_v26 = vsel %vm1566_vm9, 1, %v3603_v30  ;;  %vm1576_vm7 = vcmp.gt.f32.partialorder %v280_v12, 0.5  ;;  %vm1578_vm9 = vcmp.gt.f32.partialorder %v282_v5, 0.5 }
  0x79   : > { %1685 = vperm.xlu0 %3567, %v1607_v26   ;;  %v1617_v6 = vsel %vm1576_vm7, 1, %v3603_v30  ;;  %v1616_v26 = vsel %vm1575_vm8, 1, %v3603_v30  ;;  %vm1588_vm7 = vcmp.gt.f32.partialorder %v292_v11, 0.5 }
  0x7a   : > { %v1629_v8 = vsel %vm1588_vm7, 1, %v3603_v30 }
  0x7d   : > { %1691 = vperm.xlu0 %3567, %v1609_v16   ;;  %v1625_v16 = vsel %vm1584_vm15, 1, %v3603_v30 }
  0x7e   : > { %3174 = vmatmul.mubr.bf16.gmra.mrb[44].mxu1 %v3925_v23  ;;  %v274_v23 = vld [vmem:[%s4768_s1 + $0xd0] sm:$0xff] }
  0x7f   : > { %3330 = vmatmul.mubr.bf16.vlgmr.msra.gmra.mrb[0].mxu0 %v3949_v46  ;;  %3177 = vmatprep.mubr.msk.bf16.mxu1 %vm3602_vm0, %v3601_v1  ;;  %v1608_v46 = vsel %vm1567_vm12, 1, %v3603_v30  ;;  %vm1570_vm13 = vcmp.gt.f32.partialorder %v274_v23, 0.5  ;;  %vm1579_vm12 = vcmp.gt.f32.partialorder %v283_v35, 0.5  ;;  %v290_v23 = vld [vmem:[%s4768_s1 + $0x150] sm:$0xff] }
  0x80   : > { %3333 = vmatprep.mubr.msk.bf16.mxu0 %vm3602_vm0, %v3601_v1  ;;  %1688 = vperm.xlu1 %3568, %v1608_v46   ;;  %v1611_v25 = vsel %vm1570_vm13, 1, %v3603_v30  ;;  %v1620_v43 = vsel %vm1579_vm12, 1, %v3603_v30  ;;  %vm1582_vm13 = vcmp.gt.f32.partialorder %v286_v24, 0.5 }
  0x81   : > { %1697 = vperm.xlu0 %3567, %v1611_v25  }
  0x84   : > { %1694 = vperm.xlu1 %3568, %v1610_v36   ;;  %v291_v36 = vld [vmem:[%s4768_s1 + $0x158] sm:$0xff] }
  0x85   : > { %1703 = vperm.xlu0 %3567, %v1613_v19   ;;  %vm1587_vm8 = vcmp.gt.f32.partialorder %v291_v36, 0.5 }
  0x86   : > { %3178 = vmatmul.mubr.bf16.gmra.mrb[48].mxu1 %v3952_v61  ;;  %v278_v61 = vld [vmem:[%s4768_s1 + $0xf0] sm:$0xff]  ;;  %v1628_v48 = vsel %vm1587_vm8, 1, %v3603_v30 }
  0x87   : > { %3334 = vmatmul.mubr.bf16.gmra.mrb[4].mxu0 %v3965_v37  ;;  %3181 = vmatprep.mubr.msk.bf16.mxu1 %vm3602_vm0, %v3601_v1  ;;  %vm1574_vm5 = vcmp.gt.f32.partialorder %v278_v61, 0.5 }
  0x88   : > { %3337 = vmatprep.mubr.msk.bf16.mxu0 %vm3602_vm0, %v3601_v1  ;;  %1700 = vperm.xlu1 %3568, %v1612_v42   ;;  %v1615_v37 = vsel %vm1574_vm5, 1, %v3603_v30  ;;  %vm1586_vm5 = vcmp.gt.f32.partialorder %v290_v23, 0.5 }
  0x89   : > { %1709 = vperm.xlu0 %3567, %v1615_v37   ;;  %v1627_v46 = vsel %vm1586_vm5, 1, %v3603_v30 }
  0x8c   : > { %1706 = vperm.xlu1 %3568, %v1614_v17  }
  0x8d   : > { %1715 = vperm.xlu0 %3567, %v1617_v6  }
  0x8e   : > { %3182 = vmatmul.mubr.bf16.gmra.mrb[52].mxu1 %v3973_v15  ;;  %v281_v15 = vld [vmem:[%s4768_s1 + $0x108] sm:$0xff] }
  0x8f   : > { %3338 = vmatmul.mubr.bf16.gmra.mrb[8].mxu0 %v3984_v54  ;;  %3185 = vmatprep.mubr.msk.bf16.mxu1 %vm3602_vm0, %v3601_v1  ;;  %vm1577_vm10 = vcmp.gt.f32.partialorder %v281_v15, 0.5  ;;  %v1619_v54 = vsel %vm1578_vm9, 1, %v3603_v30 }
  0x90   : > { %3341 = vmatprep.mubr.msk.bf16.mxu0 %vm3602_vm0, %v3601_v1  ;;  %1712 = vperm.xlu1 %3568, %v1616_v26   ;;  %v1618_v14 = vsel %vm1577_vm10, 1, %v3603_v30 }
  0x91   : > { %1721 = vperm.xlu0 %3567, %v1619_v54  }
  0x94   : > { %1718 = vperm.xlu1 %3568, %v1618_v14  }
  0x95   : > { %1727 = vperm.xlu0 %3567, %v1621_v7  }
  0x96   : > { %3186 = vmatmul.mubr.bf16.gmra.mrb[56].mxu1 %v3987_v10  ;;  %v285_v10 = vld [vmem:[%s4768_s1 + $0x128] sm:$0xff] }
  0x97   : > { %3342 = vmatmul.mubr.bf16.gmra.mrb[12].mxu0 %v4003_v47  ;;  %3189 = vmatprep.mubr.msk.bf16.mxu1 %vm3602_vm0, %v3601_v1  ;;  %vm1581_vm14 = vcmp.gt.f32.partialorder %v285_v10, 0.5  ;;  %v1623_v47 = vsel %vm1582_vm13, 1, %v3603_v30 }
  0x98   : > { %3345 = vmatprep.mubr.msk.bf16.mxu0 %vm3602_vm0, %v3601_v1  ;;  %1724 = vperm.xlu1 %3568, %v1620_v43   ;;  %v1622_v39 = vsel %vm1581_vm14, 1, %v3603_v30 }
  0x99   : > { %1733 = vperm.xlu0 %3567, %v1623_v47  }
  0x9c   : > { %1730 = vperm.xlu1 %3568, %v1622_v39  }
  0x9d   : > { %1739 = vperm.xlu0 %3567, %v1625_v16  }
  0x9e   : > { %3190 = vmatmul.mubr.bf16.gmra.mrb[60].mxu1 %v4013_v58  ;;  %v289_v58 = vld [vmem:[%s4768_s1 + $0x148] sm:$0xff] }
  0x9f   : > { %3346 = vmatmul.mubr.bf16.gmra.mrb[16].mxu0 %v4016_v53  ;;  %3193 = vmatprep.mubr.msk.bf16.mxu1 %vm3602_vm0, %v3601_v1  ;;  %v1624_v53 = vsel %vm1583_vm4, 1, %v3603_v30  ;;  %vm1585_vm6 = vcmp.gt.f32.partialorder %v289_v58, 0.5 }
  0xa0   : > { %3349 = vmatprep.mubr.msk.bf16.mxu0 %vm3602_vm0, %v3601_v1  ;;  %1736 = vperm.xlu1 %3568, %v1624_v53   ;;  %v1626_v25 = vsel %vm1585_vm6, 1, %v3603_v30 }
  0xa1   : > { %1745 = vperm.xlu0 %3567, %v1627_v46  }
  0xa4   : > { %1742 = vperm.xlu1 %3568, %v1626_v25  }
  0xa5   : > { %1751 = vperm.xlu0 %3567, %v1629_v8  }
  0xa6   : > { %3194 = vmatmul.mubr.bf16.gmra.mrb[64].mxu1 %v4022_v59  ;;  %v250_v59 = vld [vmem:[%s3690_s10 + $0x160] sm:$0xff] }
  0xa7   : > { %3350 = vmatmul.mubr.bf16.gmra.mrb[20].mxu0 %v4035_v62  ;;  %3197 = vmatprep.mubr.msk.bf16.mxu1 %vm3602_vm0, %v3601_v1  ;;  %v251_v62 = vld [vmem:[%s3690_s10 + $0x168] sm:$0xff]  ;;  %s3555_s10 = smul.u32 200, %s4777_s16 }
  0xa8   : > { %3353 = vmatprep.mubr.msk.bf16.mxu0 %vm3602_vm0, %v3601_v1  ;;  %1748 = vperm.xlu1 %3568, %v1628_v48   ;;  %v4433_v38 = vpack.c.bf16 %v251_v62, %v250_v59 }
  0xa9   : > { %s4469_s12 = scalar_lea.vmem %s4770_s3, %s3555_s10 }
  0xaa   : > { %1999 = vst [vmem:[%s4469_s12] sm:$0xf] %v3603_v30  ;;  %2000 = vst [vmem:[%s4469_s12 + $0x4] sm:$0xf] %v3603_v30 }
  0xab   : > { %2001 = vst [vmem:[%s4469_s12 + $0x8] sm:$0xf] %v3603_v30  ;;  %2002 = vst [vmem:[%s4469_s12 + $0xc] sm:$0xf] %v3603_v30 }
  0xac   : > { %2003 = vst [vmem:[%s4469_s12 + $0x10] sm:$0x3] %v3603_v30  ;;  %2210 = vst [vmem:[%s4469_s12 + $0xb4] sm:$0xf] %v3603_v30 }
  0xad   : > { %2211 = vst [vmem:[%s4469_s12 + $0xb8] sm:$0xf] %v3603_v30  ;;  %2212 = vst [vmem:[%s4469_s12 + $0xbc] sm:$0xf] %v3603_v30 }
  0xae   : > { %3198 = vmatmul.mubr.bf16.gmra.mrb[68].mxu1 %v4045_v13  ;;  %v408_v13 = vrot.slane %v4433_v38, 2  ;;  %2213 = vst [vmem:[%s4469_s12 + $0xc0] sm:$0xf] %v3603_v30  ;;  %2214 = vst [vmem:[%s4469_s12 + $0xc4] sm:$0x3] %v3603_v30 }
  0xaf   : > { %3354 = vmatmul.mubr.bf16.gmra.mrb[24].mxu0 %v4060_v32  ;;  %3201 = vmatprep.mubr.msk.bf16.mxu1 %vm3602_vm0, %v3601_v1  ;;  %v4775_v32 = vrot.slane %v4026_v20, 2 }
  0xb0   : > { %3357 = vmatprep.mubr.msk.bf16.mxu0 %vm3602_vm0, %v3601_v1 }
  0xb1   : > { %v409_v19 = vsel %vm368_vm1, %v4775_v32, %v408_v13  ;;  %vm1835_vm1 = vcmask 1043456  }
  0xb6   : > { %3202 = vmatmul.mubr.bf16.gmra.mrb[72].mxu1 %v4065_v45  ;;  %v851_v45 = vshrl.u32 %v4026_v20, 16 }
  0xb7   : > { %3358 = vmatmul.mubr.bf16.gmra.mrb[28].mxu0 %v4080_v49  ;;  %3205 = vmatprep.mubr.msk.bf16.mxu1 %vm3602_vm0, %v3601_v1  ;;  %v854_v49 = vshll.u32 %v4026_v20, 16  ;;  %v860_v20 = vshrl.u32 %v4433_v38, 16 }
  0xb8   : > { %3361 = vmatprep.mubr.msk.bf16.mxu0 %vm3602_vm0, %v3601_v1 }
  0xb9   : > { %v856_v30 = vrot.slane %v854_v49, 2 }
  0xbe   : > { %3206 = vmatmul.mubr.bf16.gmra.mrb[76].mxu1 %v409_v19 }
  0xbf   : > { %3362 = vmatmul.mubr.bf16.gmra.mrb[32].mxu0 %v4085_v31  ;;  %3209 = vmatprep.mubr.msk.bf16.mxu1 %vm3602_vm0, %v3601_v1 }
  0xc0   : > { %3365 = vmatprep.mubr.msk.bf16.mxu0 %vm3602_vm0, %v3601_v1 }
  0xc6   : > { %3210 = vmatmul.mubr.bf16.gmra.mrb[80].mxu1 %v408_v13 }
  0xc7   : > { %3366 = vmatmul.mubr.bf16.gmra.mrb[36].mxu0 %v4089_v40  ;;  %3273 = vmatprep.mubr.msk.bf16.mxu1 %vm3602_vm0, %v3601_v1 }
  0xc8   : > { %3369 = vmatprep.mubr.msk.bf16.mxu0 %vm3602_vm0, %v3601_v1 }
  0xce   : > { %3274 = vmatmul.mubr.bf16.vlgmr.msra.gmra.mrb[44].mxu1 %v4111_v0 }
  0xcf   : > { %3370 = vmatmul.mubr.bf16.gmra.mrb[40].mxu0 %v4114_v57  ;;  %3277 = vmatprep.mubr.msk.bf16.mxu1 %vm3602_vm0, %v3601_v1  ;;  %v853_v57 = vrot.slane %v851_v45, 1 }
  0xd0   : > { %3373 = vmatprep.mubr.msk.bf16.mxu0 %vm3602_vm0, %v3601_v1 }
  0xd6   : > { %3278 = vmatmul.mubr.bf16.gmra.mrb[48].mxu1 %v4136_v50 }
  0xd7   : > { %3374 = vmatmul.mubr.bf16.gmra.mrb[44].mxu0 %v4139_v9  ;;  %3281 = vmatprep.mubr.msk.bf16.mxu1 %vm3602_vm0, %v3601_v1  ;;  %v857_v9 = vor.u32 %v856_v30, %v853_v57 }
  0xd8   : > { %3377 = vmatprep.mubr.msk.bf16.mxu0 %vm3602_vm0, %v3601_v1 }
  0xde   : > { %3282 = vmatmul.mubr.bf16.gmra.mrb[52].mxu1 %v4167_v27  ;;  %v863_v27 = vshll.u32 %v4433_v38, 16 }
  0xdf   : > { %3378 = vmatmul.mubr.bf16.gmra.mrb[48].mxu0 %v4170_v44  ;;  %3285 = vmatprep.mubr.msk.bf16.mxu1 %vm3602_vm0, %v3601_v1 }
  0xe0   : > { %3381 = vmatprep.mubr.msk.bf16.mxu0 %vm3602_vm0, %v3601_v1  ;;  %v1235_v6 = vrot.slane %v863_v27, 3 }
  0xe6   : > { %3286 = vmatmul.mubr.bf16.gmra.mrb[56].mxu1 %v4210_v3  ;;  %v858_v3 = vsel %vm679_vm2, %v4289_v4, %v857_v9 }
  0xe7   : > { %3382 = vmatmul.mubr.bf16.gmra.mrb[52].mxu0 %v4201_v63  ;;  %3289 = vmatprep.mubr.msk.bf16.mxu1 %vm3602_vm0, %v3601_v1 }
  0xe8   : > { %3385 = vmatprep.mubr.msk.bf16.mxu0 %vm3602_vm0, %v3601_v1 }
  0xee   : > { %3290 = vmatmul.mubr.bf16.gmra.mrb[60].mxu1 %v4240_v29  ;;  %v862_v29 = vrot.slane %v860_v20, 1 }
  0xef   : > { %3386 = vmatmul.mubr.bf16.gmra.mrb[56].mxu0 %v4231_v22  ;;  %3293 = vmatprep.mubr.msk.bf16.mxu1 %vm3602_vm0, %v3601_v1 }
  0xf0   : > { %3389 = vmatprep.mubr.msk.bf16.mxu0 %vm3602_vm0, %v3601_v1 }
  0xf6   : > { %3294 = vmatmul.mubr.bf16.gmra.mrb[64].mxu1 %v4271_v33 }
  0xf7   : > { %3390 = vmatmul.mubr.bf16.gmra.mrb[60].mxu0 %v4262_v18  ;;  %3297 = vmatprep.mubr.msk.bf16.mxu1 %vm3602_vm0, %v3601_v1  ;;  %v865_v18 = vrot.slane %v863_v27, 2 }
  0xf8   : > { %3393 = vmatprep.mubr.msk.bf16.mxu0 %vm3602_vm0, %v3601_v1 }
  0xf9   : > { %v4519_v31 = vpop.f32.mrb[0].mxu1  ;;  %v866_v34 = vor.u32 %v865_v18, %v862_v29 }
  0xfa   : > { %v3131_v40 = vpop.f32.mrb[1].mxu1 }
  0xfb   : > { %v4521_v0 = vpop.f32.mrb[2].mxu1  ;;  %v867_v42 = vsel %vm679_vm2, %v857_v9, %v866_v34 }
  0xfc   : > { %v3132_v50 = vpop.f32.mrb[3].mxu1 }
  0xfe   : > { %3298 = vmatmul.mubr.bf16.gmra.mrb[68].mxu1 %v4304_v55  ;;  %v1231_v55 = vrot.slane %v854_v49, 3 }
  0xff   : > { %3394 = vmatmul.mubr.bf16.gmra.mrb[64].mxu0 %v4293_v51  ;;  %3301 = vmatprep.mubr.msk.bf16.mxu1 %vm3602_vm0, %v3601_v1  ;;  %v1230_v51 = vrot.slane %v851_v45, 2  ;;  %v1632_v45 = vpop.permute.xlu0 %1631 }
 0x100   : > { %3397 = vmatprep.mubr.msk.bf16.mxu0 %vm3602_vm0, %v3601_v1 }
 0x101   : > { %v4531_v44 = vpop.f32.mrb[4].mxu1  ;;  %v1232_v61 = vor.u32 %v1231_v55, %v1230_v51 }
 0x102   : > { %v3135_v63 = vpop.f32.mrb[5].mxu1 }
 0x103   : > { %v4535_v22 = vpop.f32.mrb[6].mxu1  ;;  %v1233_v17 = vsel %vm1154_vm3, %v4317_v2, %v1232_v61  ;;  %v1635_v50 = vpop.permute.xlu0 %1634 }
 0x104   : > { %v3136_v33 = vpop.f32.mrb[7].mxu1  ;;  %v1638_v63 = vpop.permute.xlu1 %1637  ;;  %vm1754_vm2 = vcmp.eq.s32.totalorder %v1635_v50, 1 }
 0x106   : > { %3302 = vmatmul.mubr.bf16.gmra.mrb[72].mxu1 %v858_v3 }
 0x107   : > { %3398 = vmatmul.mubr.bf16.gmra.mrb[68].mxu0 %v4325_v56  ;;  %3305 = vmatprep.mubr.msk.bf16.mxu1 %vm3602_vm0, %v3601_v1  ;;  %v1234_v56 = vrot.slane %v860_v20, 2 }
 0x108   : > { %3401 = vmatprep.mubr.msk.bf16.mxu0 %vm3602_vm0, %v3601_v1 }
 0x109   : > { %v4542_v41 = vpop.f32.mrb[8].mxu1  ;;  %v1236_v28 = vor.u32 %v1235_v6, %v1234_v56  ;;  %v1641_v6 = vpop.permute.xlu1 %1640 }
 0x10a   : > { %v3139_v4 = vpop.f32.mrb[9].mxu1  ;;  %vm1756_vm9 = vcmp.eq.s32.totalorder %v1641_v6, 1 }
 0x10b   : > { %v4545_v37 = vpop.f32.mrb[10].mxu1  ;;  %v1237_v54 = vsel %vm1154_vm3, %v1232_v61, %v1236_v28  ;;  %vm1755_vm3 = vcmp.eq.s32.totalorder %v1638_v63, 1 }
 0x10c   : > { %v3140_v12 = vpop.f32.mrb[11].mxu1 }
 0x10e   : > { %3306 = vmatmul.mubr.bf16.gmra.mrb[76].mxu1 %v867_v42 }
 0x10f   : > { %3402 = vmatmul.mubr.bf16.gmra.mrb[72].mxu0 %v1233_v17  ;;  %3309 = vmatprep.mubr.msk.bf16.mxu1 %vm3602_vm0, %v3601_v1 }
 0x110   : > { %3405 = vmatprep.mubr.msk.bf16.mxu0 %vm3602_vm0, %v3601_v1 }
 0x111   : > { %v4553_v5 = vpop.f32.mrb[12].mxu1 }
 0x112   : > { %v3143_v15 = vpop.f32.mrb[13].mxu1 }
 0x113   : > { %v4555_v26 = vpop.f32.mrb[14].mxu1 }
 0x114   : > { %v3144_v2 = vpop.f32.mrb[15].mxu1 }
 0x116   : > { %3310 = vmatmul.mubr.bf16.gmra.mrb[80].mxu1 %v866_v34 }
 0x117   : > { %3406 = vmatmul.mubr.bf16.gmra.mrb[76].mxu0 %v1237_v54 }
 0x118   : > { %3409 = vmatprep.mubr.msk.bf16.mxu0 %vm3602_vm0, %v3601_v1  ;;  %vm1753_vm0 = vcmp.eq.s32.totalorder %v1632_v45, 1  ;;  %v1644_v45 = vpop.permute.xlu0 %1643 }
 0x119   : > { %v4560_v14 = vpop.f32.mrb[16].mxu1  ;;  %vm1757_vm10 = vcmp.eq.s32.totalorder %v1644_v45, 1 }
 0x11a   : > { %v3147_v21 = vpop.f32.mrb[17].mxu1 }
 0x11b   : > { %v4562_v7 = vpop.f32.mrb[18].mxu1 }
 0x11c   : > { %v3148_v35 = vpop.f32.mrb[19].mxu1 }
 0x11f   : > { %3410 = vmatmul.mubr.bf16.gmra.mrb[80].mxu0 %v1236_v28 }
 0x121   : > { %v4564_v24 = vpop.f32.mrb[20].mxu1 }
 0x122   : > { %v3151_v10 = vpop.f32.mrb[21].mxu1 }
 0x123   : > { %v4566_v43 = vpop.f32.mrb[22].mxu1 }
 0x124   : > { %v3152_v47 = vpop.f32.mrb[23].mxu1 }
 0x129   : > { %v4568_v39 = vpop.f32.mrb[24].mxu1 }
 0x12a   : > { %v3155_v60 = vpop.f32.mrb[25].mxu1 }
 0x12b   : > { %v4570_v16 = vpop.f32.mrb[26].mxu1 }
 0x12c   : > { %v3156_v52 = vpop.f32.mrb[27].mxu1 }
 0x131   : > { %v4572_v1 = vpop.f32.mrb[28].mxu1 }
 0x132   : > { %v3159_v23 = vpop.f32.mrb[29].mxu1 }
 0x133   : > { %v4574_v58 = vpop.f32.mrb[30].mxu1 }
 0x134   : > { %v3160_v11 = vpop.f32.mrb[31].mxu1 }
 0x139   : > { %v4576_v53 = vpop.f32.mrb[32].mxu1 }
 0x13a   : > { %v3163_v46 = vpop.f32.mrb[33].mxu1 }
 0x13b   : > { %v4578_v25 = vpop.f32.mrb[34].mxu1 }
 0x13c   : > { %v3164_v36 = vpop.f32.mrb[35].mxu1 }
 0x141   : > { %v4580_v8 = vpop.f32.mrb[36].mxu1 }
 0x142   : > { %v3167_v48 = vpop.f32.mrb[37].mxu1 }
 0x143   : > { %v4582_v59 = vpop.f32.mrb[38].mxu1 }
 0x144   : > { %v3168_v62 = vpop.f32.mrb[39].mxu1 }
 0x149   : > { %v4584_v38 = vpop.f32.mrb[40].mxu1 }
 0x14a   : > { %v3171_v13 = vpop.f32.mrb[41].mxu1 }
 0x14b   : > { %v4586_v32 = vpop.f32.mrb[42].mxu1 }
 0x14c   : > { %v3172_v19 = vpop.f32.mrb[43].mxu1 }
 0x152   : > { %v1341_v49 = vpop.f32.mrb[0].mxu0 }
 0x153   : > { %v3429_v40 = vadd.f32 %v1341_v49, %v4519_v31  ;;  %v3331_v57 = vpop.f32.mrb[1].mxu0 }
 0x154   : > { %v1344_v30 = vpop.f32.mrb[2].mxu0 }
 0x155   : > { %v1836_v9 = vrot.slane %v3429_v40, 4  ;;  %v3430_v20 = vadd.f32 %v1344_v30, %v4521_v0  ;;  %v3332_v27 = vpop.f32.mrb[3].mxu0 }
 0x157   : > { %v1958_v3 = vsel %vm1753_vm0, %v1836_v9, 0.0  ;;  %v1837_v29 = vrot.slane %v3430_v20, 4 }
 0x158   : > { %v2871_v18 = vpack.c.bf16 %v1958_v3, %v1958_v3  ;;  %v2426_v33 = vmul.f32 %v1958_v3, %v1958_v3  ;;  %v2256_v31 = vrot.slane %v1958_v3, 4 }
 0x159   : > { %v1838_v51 = vsel %vm1835_vm1, %v1836_v9, %v1837_v29 }
 0x15a   : > { %2169 = vst [vmem:[%s4469_s12 + $0x10] sm:$0xc] %v2871_v18  ;;  %v1959_v55 = vsel %vm1754_vm2, %v1838_v51, 0.0  ;;  %v1349_v34 = vpop.f32.mrb[4].mxu0  ;;  %v2508_v12 = vrot.slane %v2426_v33, 4  ;;  %v1647_v18 = vpop.permute.xlu1 %1646 }
 0x15b   : > { %v2872_v61 = vpack.c.bf16 %v1959_v55, %v1959_v55  ;;  %v2257_v4 = vrot.slane %v1959_v55, 4  ;;  %v2427_v42 = vmul.f32 %v1959_v55, %v1959_v55  ;;  %v3431_v0 = vadd.f32 %v1349_v34, %v4531_v44  ;;  %v3335_v17 = vpop.f32.mrb[5].mxu0 }
 0x15c   : > { %v1352_v56 = vpop.f32.mrb[6].mxu0  ;;  %vm1758_vm11 = vcmp.eq.s32.totalorder %v1647_v18, 1 }
 0x15d   : > { %2170 = vst [vmem:[%s4469_s12 + $0x14] sm:$0xf] %v2872_v61  ;;  %v2258_v28 = vsel %vm1835_vm1, %v2256_v31, %v2257_v4  ;;  %v2509_v15 = vrot.slane %v2427_v42, 4  ;;  %v1839_v54 = vrot.slane %v3431_v0, 4  ;;  %v3432_v2 = vadd.f32 %v1352_v56, %v4535_v22  ;;  %v3336_v21 = vpop.f32.mrb[7].mxu0  ;;  %v1650_v0 = vpop.permute.xlu0 %1649 }
 0x15e   : > { %vm1759_vm12 = vcmp.eq.s32.totalorder %v1650_v0, 1 }
 0x15f   : > { %v2510_v35 = vsel %vm1835_vm1, %v2508_v12, %v2509_v15  ;;  %v1840_v10 = vsel %vm1835_vm1, %v1837_v29, %v1839_v54  ;;  %v1841_v47 = vrot.slane %v3432_v2, 4 }
 0x160   : > { %v1960_v44 = vsel %vm1755_vm3, %v1840_v10, 0.0 }
 0x161   : > { %v2259_v60 = vrot.slane %v1960_v44, 4  ;;  %v2428_v52 = vmul.f32 %v1960_v44, %v1960_v44  ;;  %v1842_v23 = vsel %vm1835_vm1, %v1839_v54, %v1841_v47 }
 0x162   : > { %v1961_v11 = vsel %vm1756_vm9, %v1842_v23, 0.0  ;;  %v1357_v46 = vpop.f32.mrb[8].mxu0 }
 0x163   : > { %v2260_v36 = vsel %vm1835_vm1, %v2257_v4, %v2259_v60  ;;  %v2511_v48 = vrot.slane %v2428_v52, 4  ;;  %v2915_v62 = vpack.c.bf16 %v1961_v11, %v1960_v44  ;;  %v2261_v22 = vrot.slane %v1961_v11, 4  ;;  %v3339_v13 = vpop.f32.mrb[9].mxu0 }
 0x164   : > { %v2378_v19 = vadd.f32 %v2260_v36, %v2258_v28  ;;  %v2429_v49 = vmul.f32 %v1961_v11, %v1961_v11  ;;  %v3433_v40 = vadd.f32 %v1357_v46, %v4542_v41  ;;  %v1360_v57 = vpop.f32.mrb[10].mxu0  ;;  %v1653_v46 = vpop.permute.xlu1 %1652 }
 0x165   : > { %v2512_v30 = vsel %vm1835_vm1, %v2509_v15, %v2511_v48  ;;  %3007 = vst [vmem:[%s4469_s12 + $0x18] sm:$0xff] %v2915_v62   ;;  %v2262_v50 = vsel %vm1835_vm1, %v2259_v60, %v2261_v22  ;;  %v3434_v9 = vadd.f32 %v1360_v57, %v4545_v37  ;;  %v3340_v20 = vpop.f32.mrb[11].mxu0  ;;  %vm1760_vm13 = vcmp.eq.s32.totalorder %v1653_v46, 1 }
 0x166   : > { %v2630_v27 = vadd.f32 %v2512_v30, %v2510_v35  ;;  %v2379_v63 = vadd.f32 %v2378_v19, %v2262_v50  ;;  %v2513_v3 = vrot.slane %v2429_v49, 4  ;;  %v1843_v29 = vrot.slane %v3433_v40, 4 }
 0x167   : > { %v1845_v33 = vrot.slane %v3434_v9, 4  ;;  %v1656_v9 = vpop.permute.xlu0 %1655 }
 0x168   : > { %v2514_v51 = vsel %vm1835_vm1, %v2511_v48, %v2513_v3  ;;  %v1844_v41 = vsel %vm1835_vm1, %v1841_v47, %v1843_v29  ;;  %vm1761_vm14 = vcmp.eq.s32.totalorder %v1656_v9, 1 }
 0x169   : > { %v2631_v31 = vadd.f32 %v2630_v27, %v2514_v51  ;;  %v1846_v55 = vsel %vm1835_vm1, %v1843_v29, %v1845_v33  ;;  %v1962_v34 = vsel %vm1757_vm10, %v1844_v41, 0.0 }
 0x16a   : > { %v1963_v61 = vsel %vm1758_vm11, %v1846_v55, 0.0  ;;  %v2263_v37 = vrot.slane %v1962_v34, 4  ;;  %v2430_v4 = vmul.f32 %v1962_v34, %v1962_v34  ;;  %v1365_v42 = vpop.f32.mrb[12].mxu0 }
 0x16b   : > { %v2920_v17 = vpack.c.bf16 %v1963_v61, %v1962_v34  ;;  %v2265_v12 = vrot.slane %v1963_v61, 4  ;;  %v2431_v56 = vmul.f32 %v1963_v61, %v1963_v61  ;;  %v3435_v6 = vadd.f32 %v1365_v42, %v4553_v5  ;;  %v3343_v28 = vpop.f32.mrb[13].mxu0 }
 0x16c   : > { %v2264_v15 = vsel %vm1835_vm1, %v2261_v22, %v2263_v37  ;;  %v2515_v54 = vrot.slane %v2430_v4, 4  ;;  %v1368_v2 = vpop.f32.mrb[14].mxu0 }
 0x16d   : > { %3008 = vst [vmem:[%s4469_s12 + $0x20] sm:$0xff] %v2920_v17   ;;  %v2266_v21 = vsel %vm1835_vm1, %v2263_v37, %v2265_v12  ;;  %v2380_v35 = vadd.f32 %v2379_v63, %v2264_v15  ;;  %v2517_v10 = vrot.slane %v2431_v56, 4  ;;  %v1847_v47 = vrot.slane %v3435_v6, 4  ;;  %v3344_v44 = vpop.f32.mrb[15].mxu0 }
 0x16e   : > { %v2516_v60 = vsel %vm1835_vm1, %v2513_v3, %v2515_v54  ;;  %v3436_v52 = vadd.f32 %v1368_v2, %v4555_v26 }
 0x16f   : > { %v2381_v23 = vadd.f32 %v2380_v35, %v2266_v21  ;;  %v2518_v5 = vsel %vm1835_vm1, %v2515_v54, %v2517_v10  ;;  %v2632_v11 = vadd.f32 %v2631_v31, %v2516_v60  ;;  %v1848_v36 = vsel %vm1835_vm1, %v1845_v33, %v1847_v47 }
 0x170   : > { %v1964_v48 = vsel %vm1759_vm12, %v1848_v36, 0.0  ;;  %v1849_v62 = vrot.slane %v3436_v52, 4 }
 0x171   : > { %v2633_v22 = vadd.f32 %v2632_v11, %v2518_v5  ;;  %v2267_v13 = vrot.slane %v1964_v48, 4  ;;  %v2432_v19 = vmul.f32 %v1964_v48, %v1964_v48 }
 0x172   : > { %v1850_v45 = vsel %vm1835_vm1, %v1847_v47, %v1849_v62  ;;  %v1373_v49 = vpop.f32.mrb[16].mxu0 }
 0x173   : > { %v2268_v40 = vsel %vm1835_vm1, %v2265_v12, %v2267_v13  ;;  %v2519_v26 = vrot.slane %v2432_v19, 4  ;;  %v1965_v57 = vsel %vm1760_vm13, %v1850_v45, 0.0  ;;  %v3437_v30 = vadd.f32 %v1373_v49, %v4560_v14  ;;  %v3347_v50 = vpop.f32.mrb[17].mxu0  ;;  %v1659_v14 = vpop.permute.xlu1 %1658 }
 0x174   : > { %v2382_v20 = vadd.f32 %v2381_v23, %v2268_v40  ;;  %v2925_v27 = vpack.c.bf16 %v1965_v57, %v1964_v48  ;;  %v2269_v63 = vrot.slane %v1965_v57, 4  ;;  %v2433_v3 = vmul.f32 %v1965_v57, %v1965_v57  ;;  %v1376_v29 = vpop.f32.mrb[18].mxu0 }
 0x175   : > { %v2520_v18 = vsel %vm1835_vm1, %v2517_v10, %v2519_v26  ;;  %v1851_v33 = vrot.slane %v3437_v30, 4  ;;  %v3438_v51 = vadd.f32 %v1376_v29, %v4562_v7  ;;  %v3348_v41 = vpop.f32.mrb[19].mxu0  ;;  %vm1762_vm15 = vcmp.eq.s32.totalorder %v1659_v14, 1  ;;  %v1662_v10 = vpop.permute.xlu0 %1661 }
 0x176   : > { %v2634_v31 = vadd.f32 %v2633_v22, %v2520_v18  ;;  %3009 = vst [vmem:[%s4469_s12 + $0x28] sm:$0xff] %v2925_v27   ;;  %v2270_v55 = vsel %vm1835_vm1, %v2267_v13, %v2269_v63  ;;  %v2521_v34 = vrot.slane %v2433_v3, 4  ;;  %vm1763_vm4 = vcmp.eq.s32.totalorder %v1662_v10, 1 }
 0x177   : > { %v2383_v61 = vadd.f32 %v2382_v20, %v2270_v55  ;;  %v1852_v37 = vsel %vm1835_vm1, %v1849_v62, %v1851_v33  ;;  %v1853_v4 = vrot.slane %v3438_v51, 4  ;;  %v1665_v36 = vpop.permute.xlu1 %1664 }
 0x178   : > { %v2522_v42 = vsel %vm1835_vm1, %v2519_v26, %v2521_v34  ;;  %v1966_v0 = vsel %vm1761_vm14, %v1852_v37, 0.0  ;;  %vm1764_vm5 = vcmp.eq.s32.totalorder %v1665_v36, 1 }
 0x179   : > { %v2635_v17 = vadd.f32 %v2634_v31, %v2522_v42  ;;  %v2271_v12 = vrot.slane %v1966_v0, 4  ;;  %v2434_v56 = vmul.f32 %v1966_v0, %v1966_v0  ;;  %v1854_v7 = vsel %vm1835_vm1, %v1851_v33, %v1853_v4  ;;  %v1668_v9 = vpop.permute.xlu0 %1667 }
 0x17a   : > { %v1967_v6 = vsel %vm1762_vm15, %v1854_v7, 0.0  ;;  %v1381_v28 = vpop.f32.mrb[20].mxu0  ;;  %vm1765_vm6 = vcmp.eq.s32.totalorder %v1668_v9, 1 }
 0x17b   : > { %v2272_v15 = vsel %vm1835_vm1, %v2269_v63, %v2271_v12  ;;  %v2523_v54 = vrot.slane %v2434_v56, 4  ;;  %v2930_v2 = vpack.c.bf16 %v1967_v6, %v1966_v0  ;;  %v2273_v21 = vrot.slane %v1967_v6, 4  ;;  %v3351_v35 = vpop.f32.mrb[21].mxu0 }
 0x17c   : > { %v2384_v47 = vadd.f32 %v2383_v61, %v2272_v15  ;;  %v2435_v44 = vmul.f32 %v1967_v6, %v1967_v6  ;;  %v3439_v60 = vadd.f32 %v1381_v28, %v4564_v24  ;;  %v1384_v52 = vpop.f32.mrb[22].mxu0 }
 0x17d   : > { %v2524_v23 = vsel %vm1835_vm1, %v2521_v34, %v2523_v54  ;;  %3010 = vst [vmem:[%s4469_s12 + $0x30] sm:$0xff] %v2930_v2   ;;  %v2274_v5 = vsel %vm1835_vm1, %v2271_v12, %v2273_v21  ;;  %v3440_v11 = vadd.f32 %v1384_v52, %v4566_v43  ;;  %v3352_v46 = vpop.f32.mrb[23].mxu0 }
 0x17e   : > { %v2636_v48 = vadd.f32 %v2635_v17, %v2524_v23  ;;  %v2385_v62 = vadd.f32 %v2384_v47, %v2274_v5  ;;  %v2525_v22 = vrot.slane %v2435_v44, 4  ;;  %v1855_v13 = vrot.slane %v3439_v60, 4  ;;  %v1674_v47 = vpop.permute.xlu0 %1673 }
 0x17f   : > { %v1857_v19 = vrot.slane %v3440_v11, 4  ;;  %vm1767_vm8 = vcmp.eq.s32.totalorder %v1674_v47, 1 }
 0x180   : > { %v2526_v45 = vsel %vm1835_vm1, %v2523_v54, %v2525_v22  ;;  %v1856_v24 = vsel %vm1835_vm1, %v1853_v4, %v1855_v13  ;;  %v1671_v4 = vpop.permute.xlu1 %1670 }
 0x181   : > { %v2637_v49 = vadd.f32 %v2636_v48, %v2526_v45  ;;  %v1968_v40 = vsel %vm1763_vm4, %v1856_v24, 0.0  ;;  %v1858_v26 = vsel %vm1835_vm1, %v1855_v13, %v1857_v19  ;;  %vm1766_vm7 = vcmp.eq.s32.totalorder %v1671_v4, 1 }
 0x182   : > { %v2275_v57 = vrot.slane %v1968_v40, 4  ;;  %v2436_v43 = vmul.f32 %v1968_v40, %v1968_v40  ;;  %v1969_v30 = vsel %vm1764_vm5, %v1858_v26, 0.0  ;;  %v1389_v50 = vpop.f32.mrb[24].mxu0 }
 0x183   : > { %v2935_v20 = vpack.c.bf16 %v1969_v30, %v1968_v40  ;;  %v2277_v27 = vrot.slane %v1969_v30, 4  ;;  %v2437_v63 = vmul.f32 %v1969_v30, %v1969_v30  ;;  %v3441_v3 = vadd.f32 %v1389_v50, %v4568_v39  ;;  %v3355_v29 = vpop.f32.mrb[25].mxu0 }
 0x184   : > { %v2276_v18 = vsel %vm1835_vm1, %v2273_v21, %v2275_v57  ;;  %v2527_v33 = vrot.slane %v2436_v43, 4  ;;  %v1392_v51 = vpop.f32.mrb[26].mxu0  ;;  %v1680_v29 = vpop.permute.xlu0 %1679 }
 0x185   : > { %v2386_v41 = vadd.f32 %v2385_v62, %v2276_v18  ;;  %3011 = vst [vmem:[%s4469_s12 + $0x38] sm:$0xff] %v2935_v20   ;;  %v2278_v31 = vsel %vm1835_vm1, %v2275_v57, %v2277_v27  ;;  %v2529_v55 = vrot.slane %v2437_v63, 4  ;;  %v1859_v34 = vrot.slane %v3441_v3, 4  ;;  %v3356_v14 = vpop.f32.mrb[27].mxu0  ;;  %v1677_v62 = vpop.permute.xlu1 %1676 }
 0x186   : > { %v2528_v61 = vsel %vm1835_vm1, %v2525_v22, %v2527_v33  ;;  %v3442_v37 = vadd.f32 %v1392_v51, %v4570_v16  ;;  %vm1768_vm0 = vcmp.eq.s32.totalorder %v1677_v62, 1  ;;  %vm1769_vm2 = vcmp.eq.s32.totalorder %v1680_v29, 1 }
 0x187   : > { %v2638_v42 = vadd.f32 %v2637_v49, %v2528_v61  ;;  %v2387_v39 = vadd.f32 %v2386_v41, %v2278_v31  ;;  %v2530_v0 = vsel %vm1835_vm1, %v2527_v33, %v2529_v55  ;;  %v1860_v17 = vsel %vm1835_vm1, %v1857_v19, %v1859_v34 }
 0x188   : > { %v1970_v12 = vsel %vm1765_vm6, %v1860_v17, 0.0  ;;  %v1861_v56 = vrot.slane %v3442_v37, 4 }
 0x189   : > { %v2639_v7 = vadd.f32 %v2638_v42, %v2530_v0  ;;  %v2279_v6 = vrot.slane %v1970_v12, 4  ;;  %v2438_v28 = vmul.f32 %v1970_v12, %v1970_v12  ;;  %v1683_v61 = vpop.permute.xlu1 %1682 }
 0x18a   : > { %v1862_v15 = vsel %vm1835_vm1, %v1859_v34, %v1861_v56  ;;  %v1397_v54 = vpop.f32.mrb[28].mxu0  ;;  %vm1770_vm3 = vcmp.eq.s32.totalorder %v1683_v61, 1 }
 0x18b   : > { %v2280_v2 = vsel %vm1835_vm1, %v2277_v27, %v2279_v6  ;;  %v2531_v16 = vrot.slane %v2438_v28, 4  ;;  %v1971_v21 = vsel %vm1766_vm7, %v1862_v15, 0.0  ;;  %v3443_v35 = vadd.f32 %v1397_v54, %v4572_v1  ;;  %v3359_v10 = vpop.f32.mrb[29].mxu0  ;;  %v1686_v54 = vpop.permute.xlu0 %1685 }
 0x18c   : > { %v2388_v44 = vadd.f32 %v2387_v39, %v2280_v2  ;;  %v2940_v60 = vpack.c.bf16 %v1971_v21, %v1970_v12  ;;  %v2281_v52 = vrot.slane %v1971_v21, 4  ;;  %v2439_v23 = vmul.f32 %v1971_v21, %v1971_v21  ;;  %v1400_v5 = vpop.f32.mrb[30].mxu0 }
 0x18d   : > { %v2532_v11 = vsel %vm1835_vm1, %v2529_v55, %v2531_v16  ;;  %v1863_v46 = vrot.slane %v3443_v35, 4  ;;  %v3444_v36 = vadd.f32 %v1400_v5, %v4574_v58  ;;  %v3360_v48 = vpop.f32.mrb[31].mxu0  ;;  %vm1771_vm9 = vcmp.eq.s32.totalorder %v1686_v54, 1  ;;  %v1689_v62 = vpop.permute.xlu1 %1688 }
 0x18e   : > { %v2640_v22 = vadd.f32 %v2639_v7, %v2532_v11  ;;  %3012 = vst [vmem:[%s4469_s12 + $0x40] sm:$0xff] %v2940_v60   ;;  %v2282_v13 = vsel %vm1835_vm1, %v2279_v6, %v2281_v52  ;;  %v2533_v1 = vrot.slane %v2439_v23, 4  ;;  %vm1772_vm10 = vcmp.eq.s32.totalorder %v1689_v62, 1 }
 0x18f   : > { %v2389_v19 = vadd.f32 %v2388_v44, %v2282_v13  ;;  %v1864_v45 = vsel %vm1835_vm1, %v1861_v56, %v1863_v46  ;;  %v1865_v24 = vrot.slane %v3444_v36, 4 }
 0x190   : > { %v2534_v49 = vsel %vm1835_vm1, %v2531_v16, %v2533_v1  ;;  %v1972_v40 = vsel %vm1767_vm8, %v1864_v45, 0.0 }
 0x191   : > { %v2641_v26 = vadd.f32 %v2640_v22, %v2534_v49  ;;  %v2283_v57 = vrot.slane %v1972_v40, 4  ;;  %v2440_v43 = vmul.f32 %v1972_v40, %v1972_v40  ;;  %v1866_v58 = vsel %vm1835_vm1, %v1863_v46, %v1865_v24  ;;  %v1695_v61 = vpop.permute.xlu1 %1694 }
 0x192   : > { %v1973_v30 = vsel %vm1768_vm0, %v1866_v58, 0.0  ;;  %v1405_v50 = vpop.f32.mrb[32].mxu0  ;;  %vm1774_vm12 = vcmp.eq.s32.totalorder %v1695_v61, 1 }
 0x193   : > { %v2284_v9 = vsel %vm1835_vm1, %v2281_v52, %v2283_v57  ;;  %v2535_v20 = vrot.slane %v2440_v43, 4  ;;  %v2945_v27 = vpack.c.bf16 %v1973_v30, %v1972_v40  ;;  %v2285_v63 = vrot.slane %v1973_v30, 4  ;;  %v3363_v3 = vpop.f32.mrb[33].mxu0 }
 0x194   : > { %v2390_v18 = vadd.f32 %v2389_v19, %v2284_v9  ;;  %v2441_v33 = vmul.f32 %v1973_v30, %v1973_v30  ;;  %v3445_v51 = vadd.f32 %v1405_v50, %v4576_v53  ;;  %v1408_v41 = vpop.f32.mrb[34].mxu0 }
 0x195   : > { %v2536_v31 = vsel %vm1835_vm1, %v2533_v1, %v2535_v20  ;;  %3013 = vst [vmem:[%s4469_s12 + $0x48] sm:$0xff] %v2945_v27   ;;  %v2286_v55 = vsel %vm1835_vm1, %v2283_v57, %v2285_v63  ;;  %v3446_v34 = vadd.f32 %v1408_v41, %v4578_v25  ;;  %v3364_v14 = vpop.f32.mrb[35].mxu0 }
 0x196   : > { %v2642_v37 = vadd.f32 %v2641_v26, %v2536_v31  ;;  %v2391_v4 = vadd.f32 %v2390_v18, %v2286_v55  ;;  %v2537_v42 = vrot.slane %v2441_v33, 4  ;;  %v1867_v39 = vrot.slane %v3445_v51, 4 }
 0x197   : > { %v1869_v0 = vrot.slane %v3446_v34, 4 }
 0x198   : > { %v2538_v17 = vsel %vm1835_vm1, %v2535_v20, %v2537_v42  ;;  %v1868_v53 = vsel %vm1835_vm1, %v1865_v24, %v1867_v39  ;;  %v1692_v24 = vpop.permute.xlu0 %1691 }
 0x199   : > { %v2643_v12 = vadd.f32 %v2642_v37, %v2538_v17  ;;  %v1974_v56 = vsel %vm1769_vm2, %v1868_v53, 0.0  ;;  %v1870_v7 = vsel %vm1835_vm1, %v1867_v39, %v1869_v0  ;;  %vm1773_vm11 = vcmp.eq.s32.totalorder %v1692_v24, 1 }
 0x19a   : > { %v2287_v6 = vrot.slane %v1974_v56, 4  ;;  %v2442_v25 = vmul.f32 %v1974_v56, %v1974_v56  ;;  %v1975_v28 = vsel %vm1770_vm3, %v1870_v7, 0.0  ;;  %v1413_v15 = vpop.f32.mrb[36].mxu0 }
 0x19b   : > { %v2950_v2 = vpack.c.bf16 %v1975_v28, %v1974_v56  ;;  %v2289_v16 = vrot.slane %v1975_v28, 4  ;;  %v2443_v21 = vmul.f32 %v1975_v28, %v1975_v28  ;;  %v3447_v35 = vadd.f32 %v1413_v15, %v4580_v8  ;;  %v3367_v10 = vpop.f32.mrb[37].mxu0 }
 0x19c   : > { %v2288_v47 = vsel %vm1835_vm1, %v2285_v63, %v2287_v6  ;;  %v2539_v44 = vrot.slane %v2442_v25, 4  ;;  %v1416_v60 = vpop.f32.mrb[38].mxu0 }
 0x19d   : > { %v2392_v52 = vadd.f32 %v2391_v4, %v2288_v47  ;;  %3014 = vst [vmem:[%s4469_s12 + $0x50] sm:$0xff] %v2950_v2   ;;  %v2290_v23 = vsel %vm1835_vm1, %v2287_v6, %v2289_v16  ;;  %v2541_v5 = vrot.slane %v2443_v21, 4  ;;  %v1871_v11 = vrot.slane %v3447_v35, 4  ;;  %v3368_v46 = vpop.f32.mrb[39].mxu0 }
 0x19e   : > { %v2540_v36 = vsel %vm1835_vm1, %v2537_v42, %v2539_v44  ;;  %v3448_v48 = vadd.f32 %v1416_v60, %v4582_v59 }
 0x19f   : > { %v2644_v22 = vadd.f32 %v2643_v12, %v2540_v36  ;;  %v2393_v8 = vadd.f32 %v2392_v52, %v2290_v23  ;;  %v2542_v13 = vsel %vm1835_vm1, %v2539_v44, %v2541_v5  ;;  %v1872_v1 = vsel %vm1835_vm1, %v1869_v0, %v1871_v11 }
 0x1a0   : > { %v1976_v19 = vsel %vm1771_vm9, %v1872_v1, 0.0  ;;  %v1873_v45 = vrot.slane %v3448_v48, 4 }
 0x1a1   : > { %v2645_v49 = vadd.f32 %v2644_v22, %v2542_v13  ;;  %v2291_v40 = vrot.slane %v1976_v19, 4  ;;  %v2444_v26 = vmul.f32 %v1976_v19, %v1976_v19  ;;  %v1059_v57 = vpop.f32.mrb[44].mxu1  ;;  %v1698_v13 = vpop.permute.xlu0 %1697 }
 0x1a2   : > { %v1874_v43 = vsel %vm1835_vm1, %v1871_v11, %v1873_v45  ;;  %v1421_v58 = vpop.f32.mrb[40].mxu0  ;;  %v3275_v59 = vpop.f32.mrb[45].mxu1  ;;  %vm1775_vm13 = vcmp.eq.s32.totalorder %v1698_v13, 1 }
 0x1a3   : > { %v2292_v30 = vsel %vm1835_vm1, %v2289_v16, %v2291_v40  ;;  %v2543_v50 = vrot.slane %v2444_v26, 4  ;;  %v1977_v9 = vsel %vm1772_vm10, %v1874_v43, 0.0  ;;  %v3449_v20 = vadd.f32 %v1421_v58, %v4584_v38  ;;  %v3371_v27 = vpop.f32.mrb[41].mxu0  ;;  %v1062_v63 = vpop.f32.mrb[46].mxu1 }
 0x1a4   : > { %v2394_v3 = vadd.f32 %v2393_v8, %v2292_v30  ;;  %v2955_v29 = vpack.c.bf16 %v1977_v9, %v1976_v19  ;;  %v2293_v18 = vrot.slane %v1977_v9, 4  ;;  %v2445_v33 = vmul.f32 %v1977_v9, %v1977_v9  ;;  %v1424_v51 = vpop.f32.mrb[42].mxu0  ;;  %v3276_v41 = vpop.f32.mrb[47].mxu1 }
 0x1a5   : > { %v2544_v31 = vsel %vm1835_vm1, %v2541_v5, %v2543_v50  ;;  %v1875_v55 = vrot.slane %v3449_v20, 4  ;;  %v3450_v34 = vadd.f32 %v1424_v51, %v4586_v32  ;;  %v3372_v14 = vpop.f32.mrb[43].mxu0  ;;  %v1701_v19 = vpop.permute.xlu1 %1700 }
 0x1a6   : > { %v2646_v37 = vadd.f32 %v2645_v49, %v2544_v31  ;;  %3015 = vst [vmem:[%s4469_s12 + $0x58] sm:$0xff] %v2955_v29   ;;  %v2294_v38 = vsel %vm1835_vm1, %v2291_v40, %v2293_v18  ;;  %v2545_v4 = vrot.slane %v2445_v33, 4  ;;  %vm1776_vm14 = vcmp.eq.s32.totalorder %v1701_v19, 1  ;;  %v1704_v31 = vpop.permute.xlu0 %1703 }
 0x1a7   : > { %v2395_v42 = vadd.f32 %v2394_v3, %v2294_v38  ;;  %v1876_v39 = vsel %vm1835_vm1, %v1873_v45, %v1875_v55  ;;  %v1877_v0 = vrot.slane %v3450_v34, 4  ;;  %vm1777_vm15 = vcmp.eq.s32.totalorder %v1704_v31, 1 }
 0x1a8   : > { %v2546_v17 = vsel %vm1835_vm1, %v2543_v50, %v2545_v4  ;;  %v1978_v53 = vsel %vm1773_vm11, %v1876_v39, 0.0 }
 0x1a9   : > { %v2647_v12 = vadd.f32 %v2646_v37, %v2546_v17  ;;  %v2295_v56 = vrot.slane %v1978_v53, 4  ;;  %v2446_v7 = vmul.f32 %v1978_v53, %v1978_v53  ;;  %v1878_v32 = vsel %vm1835_vm1, %v1875_v55, %v1877_v0  ;;  %v1067_v6 = vpop.f32.mrb[48].mxu1 }
 0x1aa   : > { %v1979_v25 = vsel %vm1774_vm12, %v1878_v32, 0.0  ;;  %v1429_v28 = vpop.f32.mrb[44].mxu0  ;;  %v3279_v15 = vpop.f32.mrb[49].mxu1 }
 0x1ab   : > { %v2296_v54 = vsel %vm1835_vm1, %v2293_v18, %v2295_v56  ;;  %v2547_v2 = vrot.slane %v2446_v7, 4  ;;  %v2960_v16 = vpack.c.bf16 %v1979_v25, %v1978_v53  ;;  %v2297_v21 = vrot.slane %v1979_v25, 4  ;;  %v3375_v35 = vpop.f32.mrb[45].mxu0  ;;  %v1070_v10 = vpop.f32.mrb[50].mxu1 }
 0x1ac   : > { %v2396_v47 = vadd.f32 %v2395_v42, %v2296_v54  ;;  %v2447_v44 = vmul.f32 %v1979_v25, %v1979_v25  ;;  %v3451_v60 = vadd.f32 %v1429_v28, %v1059_v57  ;;  %v1432_v52 = vpop.f32.mrb[46].mxu0  ;;  %v3280_v23 = vpop.f32.mrb[51].mxu1 }
 0x1ad   : > { %v2548_v5 = vsel %vm1835_vm1, %v2545_v4, %v2547_v2  ;;  %3016 = vst [vmem:[%s4469_s12 + $0x60] sm:$0xff] %v2960_v16   ;;  %v2298_v11 = vsel %vm1835_vm1, %v2295_v56, %v2297_v21  ;;  %v3452_v46 = vadd.f32 %v1432_v52, %v1062_v63  ;;  %v3376_v36 = vpop.f32.mrb[47].mxu0  ;;  %v1707_v56 = vpop.permute.xlu1 %1706 }
 0x1ae   : > { %v2648_v48 = vadd.f32 %v2647_v12, %v2548_v5  ;;  %v2397_v62 = vadd.f32 %v2396_v47, %v2298_v11  ;;  %v2549_v22 = vrot.slane %v2447_v44, 4  ;;  %v1879_v8 = vrot.slane %v3451_v60, 4 }
 0x1af   : > { %v1881_v1 = vrot.slane %v3452_v46, 4  ;;  %vm1778_vm4 = vcmp.eq.s32.totalorder %v1707_v56, 1 }
 0x1b0   : > { %v2550_v45 = vsel %vm1835_vm1, %v2547_v2, %v2549_v22  ;;  %v1880_v24 = vsel %vm1835_vm1, %v1877_v0, %v1879_v8 }
 0x1b1   : > { %v2649_v49 = vadd.f32 %v2648_v48, %v2550_v45  ;;  %v1980_v40 = vsel %vm1775_vm13, %v1880_v24, 0.0  ;;  %v1882_v26 = vsel %vm1835_vm1, %v1879_v8, %v1881_v1  ;;  %v1075_v57 = vpop.f32.mrb[52].mxu1  ;;  %v1713_v19 = vpop.permute.xlu1 %1712 }
 0x1b2   : > { %v2299_v43 = vrot.slane %v1980_v40, 4  ;;  %v2448_v58 = vmul.f32 %v1980_v40, %v1980_v40  ;;  %v1981_v59 = vsel %vm1776_vm14, %v1882_v26, 0.0  ;;  %v1437_v30 = vpop.f32.mrb[48].mxu0  ;;  %v3283_v50 = vpop.f32.mrb[53].mxu1  ;;  %vm1780_vm6 = vcmp.eq.s32.totalorder %v1713_v19, 1 }
 0x1b3   : > { %v2965_v9 = vpack.c.bf16 %v1981_v59, %v1980_v40  ;;  %v2301_v20 = vrot.slane %v1981_v59, 4  ;;  %v2449_v27 = vmul.f32 %v1981_v59, %v1981_v59  ;;  %v3453_v63 = vadd.f32 %v1437_v30, %v1067_v6  ;;  %v3379_v3 = vpop.f32.mrb[49].mxu0  ;;  %v1078_v29 = vpop.f32.mrb[54].mxu1 }
 0x1b4   : > { %v2300_v18 = vsel %vm1835_vm1, %v2297_v21, %v2299_v43  ;;  %v2551_v33 = vrot.slane %v2448_v58, 4  ;;  %v1440_v51 = vpop.f32.mrb[50].mxu0  ;;  %v3284_v41 = vpop.f32.mrb[55].mxu1 }
 0x1b5   : > { %v2398_v55 = vadd.f32 %v2397_v62, %v2300_v18  ;;  %3017 = vst [vmem:[%s4469_s12 + $0x68] sm:$0xff] %v2965_v9   ;;  %v2302_v34 = vsel %vm1835_vm1, %v2299_v43, %v2301_v20  ;;  %v2553_v14 = vrot.slane %v2449_v27, 4  ;;  %v1883_v61 = vrot.slane %v3453_v63, 4  ;;  %v3380_v37 = vpop.f32.mrb[51].mxu0 }
 0x1b6   : > { %v2552_v38 = vsel %vm1835_vm1, %v2549_v22, %v2551_v33  ;;  %v3454_v4 = vadd.f32 %v1440_v51, %v1070_v10  ;;  %v1710_v22 = vpop.permute.xlu0 %1709 }
 0x1b7   : > { %v2650_v42 = vadd.f32 %v2649_v49, %v2552_v38  ;;  %v2399_v39 = vadd.f32 %v2398_v55, %v2302_v34  ;;  %v2554_v0 = vsel %vm1835_vm1, %v2551_v33, %v2553_v14  ;;  %v1884_v17 = vsel %vm1835_vm1, %v1881_v1, %v1883_v61 }
 0x1b8   : > { %v1982_v53 = vsel %vm1777_vm15, %v1884_v17, 0.0  ;;  %v1885_v12 = vrot.slane %v3454_v4, 4  ;;  %vm1779_vm5 = vcmp.eq.s32.totalorder %v1710_v22, 1 }
 0x1b9   : > { %v2651_v7 = vadd.f32 %v2650_v42, %v2554_v0  ;;  %v2303_v32 = vrot.slane %v1982_v53, 4  ;;  %v2450_v6 = vmul.f32 %v1982_v53, %v1982_v53  ;;  %v1083_v25 = vpop.f32.mrb[56].mxu1 }
 0x1ba   : > { %v1886_v28 = vsel %vm1835_vm1, %v1883_v61, %v1885_v12  ;;  %v1445_v15 = vpop.f32.mrb[52].mxu0  ;;  %v3287_v54 = vpop.f32.mrb[57].mxu1 }
 0x1bb   : > { %v2304_v2 = vsel %vm1835_vm1, %v2301_v20, %v2303_v32  ;;  %v2555_v16 = vrot.slane %v2450_v6, 4  ;;  %v1983_v21 = vsel %vm1778_vm4, %v1886_v28, 0.0  ;;  %v3455_v35 = vadd.f32 %v1445_v15, %v1075_v57  ;;  %v3383_v10 = vpop.f32.mrb[53].mxu0  ;;  %v1086_v47 = vpop.f32.mrb[58].mxu1 }
 0x1bc   : > { %v2400_v44 = vadd.f32 %v2399_v39, %v2304_v2  ;;  %v2970_v60 = vpack.c.bf16 %v1983_v21, %v1982_v53  ;;  %v2305_v52 = vrot.slane %v1983_v21, 4  ;;  %v2451_v23 = vmul.f32 %v1983_v21, %v1983_v21  ;;  %v1448_v5 = vpop.f32.mrb[54].mxu0  ;;  %v3288_v11 = vpop.f32.mrb[59].mxu1 }
 0x1bd   : > { %v2556_v46 = vsel %vm1835_vm1, %v2553_v14, %v2555_v16  ;;  %v1887_v36 = vrot.slane %v3455_v35, 4  ;;  %v3456_v48 = vadd.f32 %v1448_v5, %v1078_v29  ;;  %v3384_v62 = vpop.f32.mrb[55].mxu0  ;;  %v1716_v17 = vpop.permute.xlu0 %1715 }
 0x1be   : > { %v2652_v8 = vadd.f32 %v2651_v7, %v2556_v46  ;;  %3018 = vst [vmem:[%s4469_s12 + $0x70] sm:$0xff] %v2970_v60   ;;  %v2306_v13 = vsel %vm1835_vm1, %v2303_v32, %v2305_v52  ;;  %v2557_v1 = vrot.slane %v2451_v23, 4  ;;  %vm1781_vm7 = vcmp.eq.s32.totalorder %v1716_v17, 1 }
 0x1bf   : > { %v2401_v45 = vadd.f32 %v2400_v44, %v2306_v13  ;;  %v1888_v24 = vsel %vm1835_vm1, %v1885_v12, %v1887_v36  ;;  %v1889_v49 = vrot.slane %v3456_v48, 4  ;;  %v1719_v12 = vpop.permute.xlu1 %1718 }
 0x1c0   : > { %v2558_v40 = vsel %vm1835_vm1, %v2555_v16, %v2557_v1  ;;  %v1984_v26 = vsel %vm1779_vm5, %v1888_v24, 0.0  ;;  %vm1782_vm8 = vcmp.eq.s32.totalorder %v1719_v12, 1 }
 0x1c1   : > { %v2653_v57 = vadd.f32 %v2652_v8, %v2558_v40  ;;  %v2307_v43 = vrot.slane %v1984_v26, 4  ;;  %v2452_v58 = vmul.f32 %v1984_v26, %v1984_v26  ;;  %v1890_v59 = vsel %vm1835_vm1, %v1887_v36, %v1889_v49  ;;  %v1091_v30 = vpop.f32.mrb[60].mxu1  ;;  %v1722_v36 = vpop.permute.xlu0 %1721 }
 0x1c2   : > { %v1985_v50 = vsel %vm1780_vm6, %v1890_v59, 0.0  ;;  %v1453_v9 = vpop.f32.mrb[56].mxu0  ;;  %v3291_v20 = vpop.f32.mrb[61].mxu1  ;;  %vm1783_vm0 = vcmp.eq.s32.totalorder %v1722_v36, 1 }
 0x1c3   : > { %v2308_v27 = vsel %vm1835_vm1, %v2305_v52, %v2307_v43  ;;  %v2559_v63 = vrot.slane %v2452_v58, 4  ;;  %v2975_v3 = vpack.c.bf16 %v1985_v50, %v1984_v26  ;;  %v2309_v29 = vrot.slane %v1985_v50, 4  ;;  %v3387_v18 = vpop.f32.mrb[57].mxu0  ;;  %v1094_v33 = vpop.f32.mrb[62].mxu1 }
 0x1c4   : > { %v2402_v51 = vadd.f32 %v2401_v45, %v2308_v27  ;;  %v2453_v41 = vmul.f32 %v1985_v50, %v1985_v50  ;;  %v3457_v31 = vadd.f32 %v1453_v9, %v1083_v25  ;;  %v1456_v55 = vpop.f32.mrb[58].mxu0  ;;  %v3292_v34 = vpop.f32.mrb[63].mxu1 }
 0x1c5   : > { %v2560_v14 = vsel %vm1835_vm1, %v2557_v1, %v2559_v63  ;;  %3019 = vst [vmem:[%s4469_s12 + $0x78] sm:$0xff] %v2975_v3   ;;  %v2310_v61 = vsel %vm1835_vm1, %v2307_v43, %v2309_v29  ;;  %v3458_v37 = vadd.f32 %v1456_v55, %v1086_v47  ;;  %v3388_v38 = vpop.f32.mrb[59].mxu0  ;;  %v1725_v43 = vpop.permute.xlu1 %1724 }
 0x1c6   : > { %v2654_v4 = vadd.f32 %v2653_v57, %v2560_v14  ;;  %v2403_v42 = vadd.f32 %v2402_v51, %v2310_v61  ;;  %v2561_v39 = vrot.slane %v2453_v41, 4  ;;  %v1891_v0 = vrot.slane %v3457_v31, 4 }
 0x1c7   : > { %v1893_v53 = vrot.slane %v3458_v37, 4  ;;  %vm1784_vm2 = vcmp.eq.s32.totalorder %v1725_v43, 1 }
 0x1c8   : > { %v2562_v56 = vsel %vm1835_vm1, %v2559_v63, %v2561_v39  ;;  %v1892_v7 = vsel %vm1835_vm1, %v1889_v49, %v1891_v0 }
 0x1c9   : > { %v2655_v32 = vadd.f32 %v2654_v4, %v2562_v56  ;;  %v1986_v6 = vsel %vm1781_vm7, %v1892_v7, 0.0  ;;  %v1894_v25 = vsel %vm1835_vm1, %v1891_v0, %v1893_v53  ;;  %v1099_v28 = vpop.f32.mrb[64].mxu1  ;;  %v1731_v12 = vpop.permute.xlu1 %1730 }
 0x1ca   : > { %v2311_v15 = vrot.slane %v1986_v6, 4  ;;  %v2454_v54 = vmul.f32 %v1986_v6, %v1986_v6  ;;  %v1987_v2 = vsel %vm1782_vm8, %v1894_v25, 0.0  ;;  %v1461_v16 = vpop.f32.mrb[60].mxu0  ;;  %v3295_v21 = vpop.f32.mrb[65].mxu1  ;;  %vm1786_vm9 = vcmp.eq.s32.totalorder %v1731_v12, 1 }
 0x1cb   : > { %v2980_v35 = vpack.c.bf16 %v1987_v2, %v1986_v6  ;;  %v2313_v10 = vrot.slane %v1987_v2, 4  ;;  %v2455_v47 = vmul.f32 %v1987_v2, %v1987_v2  ;;  %v3459_v44 = vadd.f32 %v1461_v16, %v1091_v30  ;;  %v3391_v60 = vpop.f32.mrb[61].mxu0  ;;  %v1102_v52 = vpop.f32.mrb[66].mxu1 }
 0x1cc   : > { %v2312_v23 = vsel %vm1835_vm1, %v2309_v29, %v2311_v15  ;;  %v2563_v5 = vrot.slane %v2454_v54, 4  ;;  %v1464_v11 = vpop.f32.mrb[62].mxu0  ;;  %v3296_v46 = vpop.f32.mrb[67].mxu1 }
 0x1cd   : > { %v2404_v48 = vadd.f32 %v2403_v42, %v2312_v23  ;;  %3020 = vst [vmem:[%s4469_s12 + $0x80] sm:$0xff] %v2980_v35   ;;  %v2314_v62 = vsel %vm1835_vm1, %v2311_v15, %v2313_v10  ;;  %v2565_v22 = vrot.slane %v2455_v47, 4  ;;  %v1895_v8 = vrot.slane %v3459_v44, 4  ;;  %v3392_v13 = vpop.f32.mrb[63].mxu0 }
 0x1ce   : > { %v2564_v1 = vsel %vm1835_vm1, %v2561_v39, %v2563_v5  ;;  %v3460_v19 = vadd.f32 %v1464_v11, %v1094_v33  ;;  %v1728_v39 = vpop.permute.xlu0 %1727 }
 0x1cf   : > { %v2656_v45 = vadd.f32 %v2655_v32, %v2564_v1  ;;  %v2405_v24 = vadd.f32 %v2404_v48, %v2314_v62  ;;  %v2566_v49 = vsel %vm1835_vm1, %v2563_v5, %v2565_v22  ;;  %v1896_v40 = vsel %vm1835_vm1, %v1893_v53, %v1895_v8 }
 0x1d0   : > { %v1988_v26 = vsel %vm1783_vm0, %v1896_v40, 0.0  ;;  %v1897_v57 = vrot.slane %v3460_v19, 4  ;;  %vm1785_vm3 = vcmp.eq.s32.totalorder %v1728_v39, 1 }
 0x1d1   : > { %v2657_v58 = vadd.f32 %v2656_v45, %v2566_v49  ;;  %v2315_v59 = vrot.slane %v1988_v26, 4  ;;  %v2456_v30 = vmul.f32 %v1988_v26, %v1988_v26  ;;  %v1107_v50 = vpop.f32.mrb[68].mxu1 }
 0x1d2   : > { %v1898_v9 = vsel %vm1835_vm1, %v1895_v8, %v1897_v57  ;;  %v1469_v20 = vpop.f32.mrb[64].mxu0  ;;  %v3299_v27 = vpop.f32.mrb[69].mxu1 }
 0x1d3   : > { %v2316_v63 = vsel %vm1835_vm1, %v2313_v10, %v2315_v59  ;;  %v2567_v3 = vrot.slane %v2456_v30, 4  ;;  %v1989_v29 = vsel %vm1784_vm2, %v1898_v9, 0.0  ;;  %v3461_v18 = vadd.f32 %v1469_v20, %v1099_v28  ;;  %v3395_v33 = vpop.f32.mrb[65].mxu0  ;;  %v1110_v51 = vpop.f32.mrb[70].mxu1 }
 0x1d4   : > { %v2406_v41 = vadd.f32 %v2405_v24, %v2316_v63  ;;  %v2985_v31 = vpack.c.bf16 %v1989_v29, %v1988_v26  ;;  %v2317_v55 = vrot.slane %v1989_v29, 4  ;;  %v2457_v34 = vmul.f32 %v1989_v29, %v1989_v29  ;;  %v1472_v14 = vpop.f32.mrb[66].mxu0  ;;  %v3300_v61 = vpop.f32.mrb[71].mxu1 }
 0x1d5   : > { %v2568_v37 = vsel %vm1835_vm1, %v2565_v22, %v2567_v3  ;;  %v1899_v38 = vrot.slane %v3461_v18, 4  ;;  %v3462_v4 = vadd.f32 %v1472_v14, %v1102_v52  ;;  %v3396_v42 = vpop.f32.mrb[67].mxu0  ;;  %v1734_v40 = vpop.permute.xlu0 %1733 }
 0x1d6   : > { %v2658_v0 = vadd.f32 %v2657_v58, %v2568_v37  ;;  %3021 = vst [vmem:[%s4469_s12 + $0x88] sm:$0xff] %v2985_v31   ;;  %v2318_v17 = vsel %vm1835_vm1, %v2315_v59, %v2317_v55  ;;  %v2569_v53 = vrot.slane %v2457_v34, 4  ;;  %vm1787_vm10 = vcmp.eq.s32.totalorder %v1734_v40, 1 }
 0x1d7   : > { %v2407_v56 = vadd.f32 %v2406_v41, %v2318_v17  ;;  %v1900_v7 = vsel %vm1835_vm1, %v1897_v57, %v1899_v38  ;;  %v1901_v32 = vrot.slane %v3462_v4, 4  ;;  %v1737_v57 = vpop.permute.xlu1 %1736 }
 0x1d8   : > { %v2570_v6 = vsel %vm1835_vm1, %v2567_v3, %v2569_v53  ;;  %v1990_v25 = vsel %vm1785_vm3, %v1900_v7, 0.0  ;;  %vm1788_vm11 = vcmp.eq.s32.totalorder %v1737_v57, 1 }
 0x1d9   : > { %v2659_v28 = vadd.f32 %v2658_v0, %v2570_v6  ;;  %v2319_v15 = vrot.slane %v1990_v25, 4  ;;  %v2458_v54 = vmul.f32 %v1990_v25, %v1990_v25  ;;  %v1902_v2 = vsel %vm1835_vm1, %v1899_v38, %v1901_v32  ;;  %v1115_v16 = vpop.f32.mrb[72].mxu1  ;;  %v1740_v38 = vpop.permute.xlu0 %1739 }
 0x1da   : > { %v1991_v21 = vsel %vm1786_vm9, %v1902_v2, 0.0  ;;  %v1477_v35 = vpop.f32.mrb[68].mxu0  ;;  %v3303_v10 = vpop.f32.mrb[73].mxu1  ;;  %vm1789_vm12 = vcmp.eq.s32.totalorder %v1740_v38, 1 }
 0x1db   : > { %v2320_v47 = vsel %vm1835_vm1, %v2317_v55, %v2319_v15  ;;  %v2571_v44 = vrot.slane %v2458_v54, 4  ;;  %v2990_v60 = vpack.c.bf16 %v1991_v21, %v1990_v25  ;;  %v2321_v52 = vrot.slane %v1991_v21, 4  ;;  %v3399_v23 = vpop.f32.mrb[69].mxu0  ;;  %v1118_v5 = vpop.f32.mrb[74].mxu1 }
 0x1dc   : > { %v2408_v11 = vadd.f32 %v2407_v56, %v2320_v47  ;;  %v2459_v46 = vmul.f32 %v1991_v21, %v1991_v21  ;;  %v3463_v36 = vadd.f32 %v1477_v35, %v1107_v50  ;;  %v1480_v48 = vpop.f32.mrb[70].mxu0  ;;  %v3304_v62 = vpop.f32.mrb[75].mxu1 }
 0x1dd   : > { %v2572_v22 = vsel %vm1835_vm1, %v2569_v53, %v2571_v44  ;;  %3022 = vst [vmem:[%s4469_s12 + $0x90] sm:$0xff] %v2990_v60   ;;  %v2322_v8 = vsel %vm1835_vm1, %v2319_v15, %v2321_v52  ;;  %v3464_v13 = vadd.f32 %v1480_v48, %v1110_v51  ;;  %v3400_v1 = vpop.f32.mrb[71].mxu0  ;;  %v1743_v56 = vpop.permute.xlu1 %1742 }
 0x1de   : > { %v2660_v19 = vadd.f32 %v2659_v28, %v2572_v22  ;;  %v2409_v45 = vadd.f32 %v2408_v11, %v2322_v8  ;;  %v2573_v24 = vrot.slane %v2459_v46, 4  ;;  %v1903_v49 = vrot.slane %v3463_v36, 4 }
 0x1df   : > { %v1905_v26 = vrot.slane %v3464_v13, 4  ;;  %vm1790_vm13 = vcmp.eq.s32.totalorder %v1743_v56, 1 }
 0x1e0   : > { %v2574_v43 = vsel %vm1835_vm1, %v2571_v44, %v2573_v24  ;;  %v1904_v58 = vsel %vm1835_vm1, %v1901_v32, %v1903_v49 }
 0x1e1   : > { %v2661_v59 = vadd.f32 %v2660_v19, %v2574_v43  ;;  %v1992_v30 = vsel %vm1787_vm10, %v1904_v58, 0.0  ;;  %v1906_v50 = vsel %vm1835_vm1, %v1903_v49, %v1905_v26  ;;  %v1123_v9 = vpop.f32.mrb[76].mxu1  ;;  %v1749_v13 = vpop.permute.xlu1 %1748 }
 0x1e2   : > { %v2323_v20 = vrot.slane %v1992_v30, 4  ;;  %v2460_v27 = vmul.f32 %v1992_v30, %v1992_v30  ;;  %v1993_v63 = vsel %vm1788_vm11, %v1906_v50, 0.0  ;;  %v1485_v3 = vpop.f32.mrb[72].mxu0  ;;  %v3307_v29 = vpop.f32.mrb[77].mxu1  ;;  %vm1792_vm15 = vcmp.eq.s32.totalorder %v1749_v13, 1 }
 0x1e3   : > { %v2995_v18 = vpack.c.bf16 %v1993_v63, %v1992_v30  ;;  %v2325_v33 = vrot.slane %v1993_v63, 4  ;;  %v2461_v51 = vmul.f32 %v1993_v63, %v1993_v63  ;;  %v3465_v41 = vadd.f32 %v1485_v3, %v1115_v16  ;;  %v3403_v31 = vpop.f32.mrb[73].mxu0  ;;  %v1126_v55 = vpop.f32.mrb[78].mxu1 }
 0x1e4   : > { %v2324_v34 = vsel %vm1835_vm1, %v2321_v52, %v2323_v20  ;;  %v2575_v14 = vrot.slane %v2460_v27, 4  ;;  %v1488_v61 = vpop.f32.mrb[74].mxu0  ;;  %v3308_v37 = vpop.f32.mrb[79].mxu1 }
 0x1e5   : > { %v2410_v4 = vadd.f32 %v2409_v45, %v2324_v34  ;;  %3023 = vst [vmem:[%s4469_s12 + $0x98] sm:$0xff] %v2995_v18   ;;  %v2326_v42 = vsel %vm1835_vm1, %v2323_v20, %v2325_v33  ;;  %v2577_v39 = vrot.slane %v2461_v51, 4  ;;  %v1907_v0 = vrot.slane %v3465_v41, 4  ;;  %v3404_v17 = vpop.f32.mrb[75].mxu0  ;;  %v1746_v49 = vpop.permute.xlu0 %1745 }
 0x1e6   : > { %v2576_v53 = vsel %vm1835_vm1, %v2573_v24, %v2575_v14  ;;  %v3466_v12 = vadd.f32 %v1488_v61, %v1118_v5  ;;  %vm1791_vm14 = vcmp.eq.s32.totalorder %v1746_v49, 1 }
 0x1e7   : > { %v2662_v7 = vadd.f32 %v2661_v59, %v2576_v53  ;;  %v2411_v32 = vadd.f32 %v2410_v4, %v2326_v42  ;;  %v2578_v6 = vsel %vm1835_vm1, %v2575_v14, %v2577_v39  ;;  %v1908_v25 = vsel %vm1835_vm1, %v1905_v26, %v1907_v0 }
 0x1e8   : > { %v1994_v28 = vsel %vm1789_vm12, %v1908_v25, 0.0  ;;  %v1909_v15 = vrot.slane %v3466_v12, 4 }
 0x1e9   : > { %v2663_v54 = vadd.f32 %v2662_v7, %v2578_v6  ;;  %v2327_v2 = vrot.slane %v1994_v28, 4  ;;  %v2462_v16 = vmul.f32 %v1994_v28, %v1994_v28  ;;  %v1131_v21 = vpop.f32.mrb[80].mxu1  ;;  %v1752_v37 = vpop.permute.xlu0 %1751 }
 0x1ea   : > { %v1910_v35 = vsel %vm1835_vm1, %v1907_v0, %v1909_v15  ;;  %v1493_v10 = vpop.f32.mrb[76].mxu0  ;;  %v3311_v47 = vpop.f32.mrb[81].mxu1  ;;  %vm1793_vm4 = vcmp.eq.s32.totalorder %v1752_v37, 1 }
 0x1eb   : > { %v2328_v44 = vsel %vm1835_vm1, %v2325_v33, %v2327_v2  ;;  %v2579_v60 = vrot.slane %v2462_v16, 4  ;;  %v1995_v52 = vsel %vm1790_vm13, %v1910_v35, 0.0  ;;  %v3467_v23 = vadd.f32 %v1493_v10, %v1123_v9  ;;  %v3407_v5 = vpop.f32.mrb[77].mxu0  ;;  %v1134_v11 = vpop.f32.mrb[82].mxu1 }
 0x1ec   : > { %v2412_v46 = vadd.f32 %v2411_v32, %v2328_v44  ;;  %v3000_v36 = vpack.c.bf16 %v1995_v52, %v1994_v28  ;;  %v2329_v48 = vrot.slane %v1995_v52, 4  ;;  %v2463_v62 = vmul.f32 %v1995_v52, %v1995_v52  ;;  %v1496_v22 = vpop.f32.mrb[78].mxu0  ;;  %v3312_v8 = vpop.f32.mrb[83].mxu1 }
 0x1ed   : > { %v2580_v1 = vsel %vm1835_vm1, %v2577_v39, %v2579_v60  ;;  %v1911_v19 = vrot.slane %v3467_v23, 4  ;;  %v3468_v45 = vadd.f32 %v1496_v22, %v1126_v55  ;;  %v3408_v24 = vpop.f32.mrb[79].mxu0 }
 0x1ee   : > { %v2664_v40 = vadd.f32 %v2663_v54, %v2580_v1  ;;  %3024 = vst [vmem:[%s4469_s12 + $0xa0] sm:$0xff] %v3000_v36   ;;  %v2330_v26 = vsel %vm1835_vm1, %v2327_v2, %v2329_v48  ;;  %v2581_v57 = vrot.slane %v2463_v62, 4 }
 0x1ef   : > { %v2413_v43 = vadd.f32 %v2412_v46, %v2330_v26  ;;  %v1912_v58 = vsel %vm1835_vm1, %v1909_v15, %v1911_v19  ;;  %v1913_v59 = vrot.slane %v3468_v45, 4 }
 0x1f0   : > { %v2582_v30 = vsel %vm1835_vm1, %v2579_v60, %v2581_v57  ;;  %v1996_v50 = vsel %vm1791_vm14, %v1912_v58, 0.0 }
 0x1f1   : > { %v2665_v9 = vadd.f32 %v2664_v40, %v2582_v30  ;;  %v2331_v20 = vrot.slane %v1996_v50, 4  ;;  %v2464_v27 = vmul.f32 %v1996_v50, %v1996_v50  ;;  %v1914_v63 = vsel %vm1835_vm1, %v1911_v19, %v1913_v59 }
 0x1f2   : > { %v1997_v3 = vsel %vm1792_vm15, %v1914_v63, 0.0  ;;  %v1501_v29 = vpop.f32.mrb[80].mxu0 }
 0x1f3   : > { %v2332_v18 = vsel %vm1835_vm1, %v2329_v48, %v2331_v20  ;;  %v2583_v33 = vrot.slane %v2464_v27, 4  ;;  %v3005_v51 = vpack.c.bf16 %v1997_v3, %v1996_v50  ;;  %v2333_v41 = vrot.slane %v1997_v3, 4  ;;  %v3411_v31 = vpop.f32.mrb[81].mxu0 }
 0x1f4   : > { %v2414_v55 = vadd.f32 %v2413_v43, %v2332_v18  ;;  %v2465_v34 = vmul.f32 %v1997_v3, %v1997_v3  ;;  %v3469_v14 = vadd.f32 %v1501_v29, %v1131_v21  ;;  %v1504_v61 = vpop.f32.mrb[82].mxu0 }
 0x1f5   : > { %v2584_v38 = vsel %vm1835_vm1, %v2581_v57, %v2583_v33  ;;  %3025 = vst [vmem:[%s4469_s12 + $0xa8] sm:$0xff] %v3005_v51   ;;  %v2334_v4 = vsel %vm1835_vm1, %v2331_v20, %v2333_v41  ;;  %v3412_v42 = vpop.f32.mrb[83].mxu0 }
 0x1f6   : > { %v2666_v39 = vadd.f32 %v2665_v9, %v2584_v38  ;;  %v2415_v0 = vadd.f32 %v2414_v55, %v2334_v4  ;;  %v2585_v17 = vrot.slane %v2465_v34, 4  ;;  %v1915_v53 = vrot.slane %v3469_v14, 4 }
 0x1f8   : > { %v2586_v12 = vsel %vm1835_vm1, %v2583_v33, %v2585_v17  ;;  %v1916_v56 = vsel %vm1835_vm1, %v1913_v59, %v1915_v53 }
 0x1f9   : > { %v2667_v7 = vadd.f32 %v2666_v39, %v2586_v12  ;;  %v1998_v32 = vsel %vm1793_vm4, %v1916_v56, 0.0 }
 0x1fa   : > { %v2911_v6 = vpack.c.bf16 %v1998_v32, %v1998_v32  ;;  %v2335_v25 = vrot.slane %v1998_v32, 4  ;;  %v2466_v28 = vmul.f32 %v1998_v32, %v1998_v32 }
 0x1fc   : > { %2209 = vst [vmem:[%s4469_s12 + $0xb0] sm:$0xf] %v2911_v6  ;;  %v2336_v15 = vsel %vm1835_vm1, %v2333_v41, %v2335_v25  ;;  %v2587_v54 = vrot.slane %v2466_v28, 4  ;;  %v2417_v16 = vsel %vm1835_vm1, %v2335_v25, 0.0 }
 0x1fd   : > { %v2416_v2 = vadd.f32 %v2415_v0, %v2336_v15 }
 0x1fe   : > { %v2588_v21 = vsel %vm1835_vm1, %v2585_v17, %v2587_v54  ;;  %v2669_v47 = vsel %vm1835_vm1, %v2587_v54, 0.0 }
 0x1ff   : > { %v2418_v35 = vadd.f32 %v2417_v16, %v2416_v2  ;;  %v2668_v10 = vadd.f32 %v2667_v7, %v2588_v21 }
 0x201   : > { %v2419_v44 = vrot.slane %v2418_v35, 4  ;;  %v2670_v60 = vadd.f32 %v2669_v47, %v2668_v10 }
 0x203   : > { %v2420_v52 = vadd.f32 %v2419_v44, %v2418_v35  ;;  %v2671_v23 = vrot.slane %v2670_v60, 4 }
 0x205   : > { %v2421_v5 = vrot.slane %v2420_v52, 2  ;;  %v2672_v11 = vadd.f32 %v2671_v23, %v2670_v60 }
 0x207   : > { %v2422_v46 = vadd.f32 %v2421_v5, %v2420_v52  ;;  %v2673_v36 = vrot.slane %v2672_v11, 2 }
 0x209   : > { %v2423_v48 = vrot.slane %v2422_v46, 1  ;;  %v2674_v62 = vadd.f32 %v2673_v36, %v2672_v11 }
 0x20b   : > { %v2424_v22 = vadd.f32 %v2423_v48, %v2422_v46  ;;  %v2675_v8 = vrot.slane %v2674_v62, 1 }
 0x20d   : > { %2425 = vst [vmem:[%s208_s18] sm:$0x1] %v2424_v22  ;;  %v2676_v13 = vadd.f32 %v2675_v8, %v2674_v62 }
 0x20f   : > { %2677 = vst [vmem:[%s208_s18 + $0x1] sm:$0x1] %v2676_v13 }
 0x210 PF: > { %s15_s15 = sadd.s32 1, %s3599_s15  }
 0x211   : > { %p12_p4 = scmp.ge.s32.totalorder %s15_s15, 4  }
 0x213   :  { %14 = sbr.rel (!%p12_p4) target bundleno = 1 (0x1), region = 76 }

// kernel: light_res_block.6
= control target key start
LH: loop header
LB: loop body
LE: loop exit
PB: predicated region body
PF: predicated region fallthrough
CT: control target
= control target key end

     0   :  { %s4331_s21 = smov 0   ;;  %s6244_s0 = inlined_call_operand.vmem [shape: bf16[2,396,128], index: 0, kind: input, shape index: {}]   ;;  %s6245_s1 = inlined_call_operand.vmem [shape: f32[396,1], index: 1, kind: input, shape index: {}]   ;;  %s6246_s2 = inlined_call_operand.vmem [shape: f32[1,128], index: 2, kind: input, shape index: {}]   ;;  %s6247_s3 = inlined_call_operand.vmem [shape: f32[1,128], index: 3, kind: input, shape index: {}]   ;;  %s6248_s4 = inlined_call_operand.vmem [shape: bf16[3,128,128], index: 4, kind: input, shape index: {}]   ;;  %s6249_s5 = inlined_call_operand.vmem [shape: bf16[2,396,128], index: 5, kind: output, shape index: {0}]   ;;  %s6250_s6 = inlined_call_operand.vmem [shape: f32[2,2,128], index: 6, kind: output, shape index: {1}]  }
   0x1 LB: > { %s3146_s22 = sadd.s32 4294967295, %s4291_s21   ;;  %p3150_p0 = scmp.ge.s32.totalorder %s4291_s21, 1  ;;  %s4291_s21 = sphi %s4331_s21, %s17_s21  }
   0x2   : > { %p215_p1 = scmp.lt.s32.totalorder %s4291_s21, 3 }
   0x4   : > { %p216_p2 = pnand %p3150_p0, %p215_p1 }
   0x6   : > { %219 = sbr.rel (%p216_p2) target bundleno = 649 (0x289), region = 40 }
   0xd   : > { %v266_v0 = vld [vmem:[%s6245_s1 + $0x20] sm:$0xff]  ;;  %v264_v1 = vld [vmem:[%s6245_s1 + $0x10] sm:$0xff]  ;;  %v267_v2 = vld [vmem:[%s6245_s1 + $0x28] sm:$0xff]  ;;  %v4293_v3 = vmov 0   ;;  %v6251_v9 = vmov 0.0   ;;  %p249_p3 = scmp.lt.s32.totalorder %s3146_s22, 1 }
   0xe   : > { %4066 = vset.pattern.permute.xlu1 %v4293_v3  ;;  %4065 = vset.pattern.permute.xlu0 %v4293_v3  ;;  %vm510_vm0 = vcmp.gt.f32.partialorder %v266_v0, 0.5  ;;  %vm508_vm1 = vcmp.gt.f32.partialorder %v264_v1, 0.5  ;;  %vm511_vm2 = vcmp.gt.f32.partialorder %v267_v2, 0.5  ;;  %v265_v4 = vld [vmem:[%s6245_s1 + $0x18] sm:$0xff]  ;;  %v268_v8 = vld [vmem:[%s6245_s1 + $0x30] sm:$0xff]  ;;  %v271_v12 = vld [vmem:[%s6245_s1 + $0x48] sm:$0xff] }
   0xf   : > { %v832_v5 = vsel %vm510_vm0, 1, %v4293_v3  ;;  %v830_v6 = vsel %vm508_vm1, 1, %v4293_v3  ;;  %vm509_vm3 = vcmp.gt.f32.partialorder %v265_v4, 0.5  ;;  %v269_v7 = vld [vmem:[%s6245_s1 + $0x38] sm:$0xff]  ;;  %3712 = vmatprep.subr.bf16.mxu0 %v6251_v9  ;;  %3612 = vmatprep.subr.bf16.mxu1 %v6251_v9  ;;  %v833_v10 = vsel %vm511_vm2, 1, %v4293_v3  ;;  %v270_v13 = vld [vmem:[%s6245_s1 + $0x40] sm:$0xff] }
  0x10   : > { %883 = vperm.xlu1 %4066, %v832_v5   ;;  %877 = vperm.xlu0 %4065, %v830_v6   ;;  %v831_v11 = vsel %vm509_vm3, 1, %v4293_v3  ;;  %vm513_vm4 = vcmp.gt.f32.partialorder %v269_v7, 0.5  ;;  %vm512_vm5 = vcmp.gt.f32.partialorder %v268_v8, 0.5  ;;  %vm515_vm6 = vcmp.gt.f32.partialorder %v271_v12, 0.5  ;;  %v273_v16 = vld [vmem:[%s6245_s1 + $0x58] sm:$0xff]  ;;  %v272_v17 = vld [vmem:[%s6245_s1 + $0x50] sm:$0xff] }
  0x11   : > { %v835_v14 = vsel %vm513_vm4, 1, %v4293_v3  ;;  %v834_v15 = vsel %vm512_vm5, 1, %v4293_v3  ;;  %vm514_vm7 = vcmp.gt.f32.partialorder %v270_v13, 0.5  ;;  %v837_v18 = vsel %vm515_vm6, 1, %v4293_v3  ;;  %v275_v20 = vld [vmem:[%s6245_s1 + $0x68] sm:$0xff]  ;;  %v274_v21 = vld [vmem:[%s6245_s1 + $0x60] sm:$0xff] }
  0x12   : > { %v836_v19 = vsel %vm514_vm7, 1, %v4293_v3  ;;  %vm517_vm8 = vcmp.gt.f32.partialorder %v273_v16, 0.5  ;;  %vm516_vm9 = vcmp.gt.f32.partialorder %v272_v17, 0.5  ;;  %vm519_vm10 = vcmp.gt.f32.partialorder %v275_v20, 0.5  ;;  %v277_v24 = vld [vmem:[%s6245_s1 + $0x78] sm:$0xff]  ;;  %v276_v25 = vld [vmem:[%s6245_s1 + $0x70] sm:$0xff] }
  0x13   : > { %v839_v22 = vsel %vm517_vm8, 1, %v4293_v3  ;;  %v838_v23 = vsel %vm516_vm9, 1, %v4293_v3  ;;  %vm518_vm11 = vcmp.gt.f32.partialorder %v274_v21, 0.5  ;;  %v279_v26 = vld [vmem:[%s6245_s1 + $0x88] sm:$0xff]  ;;  %v841_v27 = vsel %vm519_vm10, 1, %v4293_v3  ;;  %v278_v29 = vld [vmem:[%s6245_s1 + $0x80] sm:$0xff] }
  0x14   : > { %886 = vperm.xlu1 %4066, %v833_v10   ;;  %880 = vperm.xlu0 %4065, %v831_v11   ;;  %v840_v28 = vsel %vm518_vm11, 1, %v4293_v3  ;;  %vm521_vm12 = vcmp.gt.f32.partialorder %v277_v24, 0.5  ;;  %vm520_vm13 = vcmp.gt.f32.partialorder %v276_v25, 0.5  ;;  %vm523_vm14 = vcmp.gt.f32.partialorder %v279_v26, 0.5  ;;  %v281_v32 = vld [vmem:[%s6245_s1 + $0x98] sm:$0xff]  ;;  %v4067_v33 = vld [vmem:[%s6248_s4] sm:$0xff]  }
  0x15   : > { %v843_v30 = vsel %vm521_vm12, 1, %v4293_v3  ;;  %v842_v31 = vsel %vm520_vm13, 1, %v4293_v3  ;;  %v845_v34 = vsel %vm523_vm14, 1, %v4293_v3  ;;  %vm522_vm15 = vcmp.gt.f32.partialorder %v278_v29, 0.5  ;;  %v280_v35 = vld [vmem:[%s6245_s1 + $0x90] sm:$0xff]  ;;  %v283_v36 = vld [vmem:[%s6245_s1 + $0xa8] sm:$0xff]  ;;  %3713 = vmatpush3.bf16.msra.mxu0 %v4067_v33 }
  0x16   : > { %v4068_v37 = vld [vmem:[%s6248_s4 + $0x8] sm:$0xff]   ;;  %s6468_s22 = smov (!%p249_p3, %s3146_s22), 1  ;;  %3714 = vmatprep.subr.bf16.mxu0 %v6251_v9  ;;  %v4069_v38 = vld [vmem:[%s6248_s4 + $0x40] sm:$0xff]   ;;  %v844_v39 = vsel %vm522_vm15, 1, %v4293_v3  ;;  %vm525_vm0 = vcmp.gt.f32.partialorder %v281_v32, 0.5  ;;  %vm4295_vm1 = vmmov 0  }
  0x17   : > { %s4053_s23 = smul.u32 200, %s6468_s22  ;;  %v282_v40 = vld [vmem:[%s6245_s1 + $0xa0] sm:$0xff]  ;;  %3613 = vmatpush3.bf16.msra.mxu1 %v4069_v38  ;;  %v4071_v41 = vld [vmem:[%s6248_s4 + $0x48] sm:$0xff]   ;;  %3728 = vmatprep.mubr.msk.bf16.mxu0 %vm4295_vm1, %v6251_v9  ;;  %vm524_vm2 = vcmp.gt.f32.partialorder %v280_v35, 0.5  ;;  %v4070_v42 = vld [vmem:[%s6248_s4 + $0x10] sm:$0xff]   ;;  %vm527_vm3 = vcmp.gt.f32.partialorder %v283_v36, 0.5 }
  0x18   : > { %892 = vperm.xlu1 %4066, %v835_v14   ;;  %889 = vperm.xlu0 %4065, %v834_v15   ;;  %v285_v43 = vld [vmem:[%s6245_s1 + $0xb8] sm:$0xff]  ;;  %v847_v44 = vsel %vm525_vm0, 1, %v4293_v3  ;;  %v284_v45 = vld [vmem:[%s6245_s1 + $0xb0] sm:$0xff]  ;;  %v846_v46 = vsel %vm524_vm2, 1, %v4293_v3  ;;  %vm526_vm4 = vcmp.gt.f32.partialorder %v282_v40, 0.5  ;;  %v849_v49 = vsel %vm527_vm3, 1, %v4293_v3 }
  0x19   : > { %3715 = vmatpush3.bf16.msra.mxu0 %v4068_v37  ;;  %3614 = vmatprep.subr.bf16.mxu1 %v6251_v9  ;;  %s4450_s8 = scalar_lea.vmem %s6249_s5, %s4053_s23  ;;  %v4073_v47 = vld [vmem:[%s6248_s4 + $0x50] sm:$0xff]   ;;  %v4072_v48 = vld [vmem:[%s6248_s4 + $0x18] sm:$0xff]   ;;  %s4497_s19 = scalar_lea.vmem %s6244_s0, %s4053_s23  ;;  %vm529_vm5 = vcmp.gt.f32.partialorder %v285_v43, 0.5  ;;  %v287_v50 = vld [vmem:[%s6245_s1 + $0xc8] sm:$0xff]  ;;  %vm528_vm6 = vcmp.gt.f32.partialorder %v284_v45, 0.5  ;;  %v848_v53 = vsel %vm526_vm4, 1, %v4293_v3 }
  0x1a   : > { %3716 = vmatprep.subr.bf16.mxu0 %v6251_v9  ;;  %2381 = vst [vmem:[%s4450_s8] sm:$0xf] %v4293_v3  ;;  %2382 = vst [vmem:[%s4450_s8 + $0x4] sm:$0xf] %v4293_v3  ;;  %3628 = vmatprep.mubr.msk.bf16.mxu1 %vm4295_vm1, %v6251_v9  ;;  %v286_v51 = vld [vmem:[%s6245_s1 + $0xc0] sm:$0xff]  ;;  %v4075_v52 = vld [vmem:[%s6248_s4 + $0x58] sm:$0xff]   ;;  %vm531_vm7 = vcmp.gt.f32.partialorder %v287_v50, 0.5 }
  0x1b   : > { %2383 = vst [vmem:[%s4450_s8 + $0x8] sm:$0xf] %v4293_v3  ;;  %2384 = vst [vmem:[%s4450_s8 + $0xc] sm:$0xf] %v4293_v3  ;;  %3615 = vmatpush3.bf16.msra.mxu1 %v4071_v41  ;;  %v3484_v54 = vld [vmem:[%s4497_s19 + $0x10] sm:$0xff]   ;;  %v4074_v55 = vld [vmem:[%s6248_s4 + $0x20] sm:$0xff]  }
  0x1c   : > { %898 = vperm.xlu1 %4066, %v837_v18   ;;  %895 = vperm.xlu0 %4065, %v836_v19   ;;  %2385 = vst [vmem:[%s4450_s8 + $0x10] sm:$0x3] %v4293_v3  ;;  %2592 = vst [vmem:[%s4450_s8 + $0xb4] sm:$0xf] %v4293_v3  ;;  %v851_v56 = vsel %vm529_vm5, 1, %v4293_v3  ;;  %v850_v57 = vsel %vm528_vm6, 1, %v4293_v3  ;;  %v3302_v62 = vunpack.c.l.bf16 %v3484_v54  ;;  %v3303_v5 = vunpack.c.h.bf16 %v3484_v54 }
  0x1d   : > { %2593 = vst [vmem:[%s4450_s8 + $0xb8] sm:$0xf] %v4293_v3  ;;  %2594 = vst [vmem:[%s4450_s8 + $0xbc] sm:$0xf] %v4293_v3  ;;  %3717 = vmatpush3.bf16.msra.mxu0 %v4070_v42  ;;  %3616 = vmatprep.subr.bf16.mxu1 %v6251_v9  ;;  %v289_v58 = vld [vmem:[%s6245_s1 + $0xd8] sm:$0xff]  ;;  %v3483_v59 = vld [vmem:[%s4497_s19 + $0x8] sm:$0xff]  }
  0x1e   : > { %2595 = vst [vmem:[%s4450_s8 + $0xc0] sm:$0xf] %v4293_v3  ;;  %2596 = vst [vmem:[%s4450_s8 + $0xc4] sm:$0x3] %v4293_v3  ;;  %3718 = vmatprep.subr.bf16.mxu0 %v6251_v9  ;;  %v288_v60 = vld [vmem:[%s6245_s1 + $0xd0] sm:$0xff]  ;;  %vm530_vm8 = vcmp.gt.f32.partialorder %v286_v51, 0.5  ;;  %v3298_v2 = vunpack.c.l.bf16 %v3483_v59  ;;  %v3299_v14 = vunpack.c.h.bf16 %v3483_v59 }
  0x1f   : > { %3617 = vmatpush3.bf16.msra.mxu1 %v4073_v47  ;;  %v4530_v61 = vld [vmem:[%s6246_s2] ss:$0 sm:$0xff]  ;;  %v291_v0 = vld [vmem:[%s6245_s1 + $0xe8] sm:$0xff]  ;;  %v4547_v6 = vld [vmem:[%s4497_s19 + $0x18] sm:$0xff]   ;;  %v853_v7 = vsel %vm531_vm7, 1, %v4293_v3  ;;  %v852_v8 = vsel %vm530_vm8, 1, %v4293_v3 }
  0x20   : > { %904 = vperm.xlu1 %4066, %v839_v22   ;;  %901 = vperm.xlu0 %4065, %v838_v23   ;;  %v4077_v63 = vld [vmem:[%s6248_s4 + $0x60] sm:$0xff]   ;;  %v4076_v1 = vld [vmem:[%s6248_s4 + $0x28] sm:$0xff]   ;;  %vm533_vm9 = vcmp.gt.f32.partialorder %v289_v58, 0.5  ;;  %v293_v10 = vld [vmem:[%s6245_s1 + $0xf8] sm:$0xff]  ;;  %v411_v12 = vmul.f32 %v3302_v62, %v4530_v61  ;;  %vm532_vm10 = vcmp.gt.f32.partialorder %v288_v60, 0.5  ;;  %vm535_vm11 = vcmp.gt.f32.partialorder %v291_v0, 0.5 }
  0x21   : > { %3719 = vmatpush3.bf16.msra.mxu0 %v4072_v48  ;;  %3618 = vmatprep.subr.bf16.mxu1 %v6251_v9  ;;  %v290_v4 = vld [vmem:[%s6245_s1 + $0xe0] sm:$0xff]  ;;  %v292_v11 = vld [vmem:[%s6245_s1 + $0xf0] sm:$0xff]  ;;  %v4079_v15 = vld [vmem:[%s6248_s4 + $0x68] sm:$0xff]   ;;  %v409_v17 = vmul.f32 %v3298_v2, %v4530_v61  ;;  %v3307_v19 = vunpack.c.h.bf16 %v4547_v6  ;;  %v855_v20 = vsel %vm533_vm9, 1, %v4293_v3  ;;  %v412_v22 = vmul.f32 %v3303_v5, %v4530_v61  ;;  %s3153_s27 = sshll.u32 %s6468_s22, 1 }
  0x22   : > { %3720 = vmatprep.subr.bf16.mxu0 %v6251_v9  ;;  %v4562_v13 = vld [vmem:[%s6247_s3] ss:$0 sm:$0xff]  ;;  %vm534_vm12 = vcmp.gt.f32.partialorder %v290_v4, 0.5  ;;  %v295_v16 = vld [vmem:[%s6245_s1 + $0x108] sm:$0xff]  ;;  %v4078_v18 = vld [vmem:[%s6248_s4 + $0x30] sm:$0xff]   ;;  %v854_v23 = vsel %vm532_vm10, 1, %v4293_v3  ;;  %v410_v29 = vmul.f32 %v3299_v14, %v4530_v61  ;;  %s262_s29 = scalar_lea.vmem %s6250_s6, %s3153_s27 }
  0x23   : > { %3619 = vmatpush3.bf16.msra.mxu1 %v4075_v52  ;;  %v294_v21 = vld [vmem:[%s6245_s1 + $0x100] sm:$0xff]  ;;  %vm537_vm13 = vcmp.gt.f32.partialorder %v293_v10, 0.5  ;;  %vm536_vm14 = vcmp.gt.f32.partialorder %v292_v11, 0.5  ;;  %v4586_v24 = vadd.f32 %v4562_v13, %v411_v12  ;;  %v857_v26 = vsel %vm535_vm11, 1, %v4293_v3  ;;  %v4080_v32 = vld [vmem:[%s6248_s4 + $0x38] sm:$0xff]   ;;  %v296_v37 = vld [vmem:[%s6245_s1 + $0x110] sm:$0xff] }
  0x24   : > { %910 = vperm.xlu1 %4066, %v841_v27   ;;  %907 = vperm.xlu0 %4065, %v840_v28   ;;  %v3486_v25 = vld [vmem:[%s4497_s19 + $0x20] sm:$0xff]   ;;  %v856_v27 = vsel %vm534_vm12, 1, %v4293_v3  ;;  %vm539_vm15 = vcmp.gt.f32.partialorder %v295_v16, 0.5  ;;  %v297_v28 = vld [vmem:[%s6245_s1 + $0x118] sm:$0xff]  ;;  %vm538_vm0 = vcmp.gt.f32.partialorder %v294_v21, 0.5  ;;  %v414_v33 = vmul.f32 %v3307_v19, %v4530_v61  ;;  %v3487_v40 = vld [vmem:[%s4497_s19 + $0x28] sm:$0xff]  }
  0x25   : > { %3721 = vmatpush3.bf16.msra.mxu0 %v4074_v55  ;;  %3620 = vmatprep.subr.bf16.mxu1 %v6251_v9  ;;  %v859_v35 = vsel %vm537_vm13, 1, %v4293_v3  ;;  %v858_v36 = vsel %vm536_vm14, 1, %v4293_v3  ;;  %v4617_v38 = vadd.f32 %v4562_v13, %v412_v22  ;;  %v861_v41 = vsel %vm539_vm15, 1, %v4293_v3  ;;  %v299_v47 = vld [vmem:[%s6245_s1 + $0x128] sm:$0xff]  ;;  %v298_v48 = vld [vmem:[%s6245_s1 + $0x120] sm:$0xff]  ;;  %v3488_v59 = vld [vmem:[%s4497_s19 + $0x30] sm:$0xff]  }
  0x26   : > { %3722 = vmatprep.subr.bf16.mxu0 %v6251_v9  ;;  %v556_v42 = vsub.f32 0.0, %v4586_v24  ;;  %v860_v43 = vsel %vm538_vm0, 1, %v4293_v3  ;;  %vm541_vm2 = vcmp.gt.f32.partialorder %v297_v28, 0.5  ;;  %v3310_v45 = vunpack.c.l.bf16 %v3486_v25  ;;  %v301_v60 = vld [vmem:[%s6245_s1 + $0x138] sm:$0xff]  ;;  %v303_v10 = vld [vmem:[%s6245_s1 + $0x148] sm:$0xff]  ;;  %v3490_v28 = vld [vmem:[%s4497_s19 + $0x40] sm:$0xff]  }
  0x27   : > { %3621 = vmatpush3.bf16.msra.mxu1 %v4077_v63  ;;  %v4640_v50 = vadd.f32 %v4562_v13, %v414_v33  ;;  %v3315_v52 = vunpack.c.h.bf16 %v3487_v40  ;;  %vm540_vm3 = vcmp.gt.f32.partialorder %v296_v37, 0.5  ;;  %v3314_v55 = vunpack.c.l.bf16 %v3487_v40  ;;  %v3489_v21 = vld [vmem:[%s4497_s19 + $0x38] sm:$0xff]  }
  0x28   : > { %916 = vperm.xlu1 %4066, %v843_v30   ;;  %913 = vperm.xlu0 %4065, %v842_v31   ;;  %v4081_v30 = vld [vmem:[%s6248_s4 + $0x70] sm:$0xff]   ;;  %v4601_v31 = vadd.f32 %v4562_v13, %v409_v17  ;;  %vm543_vm4 = vcmp.gt.f32.partialorder %v299_v47, 0.5  ;;  %vm542_vm5 = vcmp.gt.f32.partialorder %v298_v48, 0.5  ;;  %v415_v58 = vmul.f32 %v3310_v45, %v4530_v61  ;;  %v302_v17 = vld [vmem:[%s6245_s1 + $0x140] sm:$0xff] }
  0x29   : > { %3723 = vmatpush3.bf16.msra.mxu0 %v4076_v1  ;;  %3622 = vmatprep.subr.bf16.mxu1 %v6251_v9  ;;  %v559_v63 = vsub.f32 0.0, %v4640_v50  ;;  %v418_v1 = vmul.f32 %v3315_v52, %v4530_v61  ;;  %v863_v2 = vsel %vm541_vm2, 1, %v4293_v3  ;;  %v862_v4 = vsel %vm540_vm3, 1, %v4293_v3 }
  0x2a   : > { %3724 = vmatprep.subr.bf16.mxu0 %v6251_v9  ;;  %v3319_v12 = vunpack.c.h.bf16 %v3488_v59  ;;  %v864_v14 = vsel %vm542_vm5, 1, %v4293_v3  ;;  %vm545_vm6 = vcmp.gt.f32.partialorder %v301_v60, 0.5  ;;  %v4680_v16 = vadd.f32 %v4562_v13, %v415_v58 }
  0x2b   : > { %3623 = vmatpush3.bf16.msra.mxu1 %v4079_v15  ;;  %vm547_vm8 = vcmp.gt.f32.partialorder %v303_v10, 0.5  ;;  %vm546_vm9 = vcmp.gt.f32.partialorder %v302_v17, 0.5  ;;  %v3327_v40 = vunpack.c.h.bf16 %v3490_v28  ;;  %v3326_v47 = vunpack.c.l.bf16 %v3490_v28  ;;  %v4761_v28 = vld [vmem:[%s4497_s19 + $0x58] sm:$0xff]  }
  0x2c   : > { %922 = vperm.xlu1 %4066, %v845_v34   ;;  %919 = vperm.xlu0 %4065, %v844_v39   ;;  %v3306_v34 = vunpack.c.l.bf16 %v4547_v6  ;;  %v3311_v39 = vunpack.c.h.bf16 %v3486_v25  ;;  %v417_v6 = vmul.f32 %v3314_v55, %v4530_v61  ;;  %v4695_v25 = vsel %vm545_vm6, 1, %v4293_v3 }
  0x2d   : > { %3725 = vmatpush3.bf16.msra.mxu0 %v4078_v18  ;;  %3624 = vmatprep.subr.bf16.mxu1 %v6251_v9  ;;  %v610_v18 = vmul.f32 1.442695, %v559_v63  ;;  %v868_v48 = vsel %vm546_vm9, 1, %v4293_v3  ;;  %vm1495_vm0 = vcmask 1046528   ;;  %vm1183_vm6 = vcmask 1045504  }
  0x2e   : > { %3726 = vmatprep.subr.bf16.mxu0 %v6251_v9  ;;  %v413_v51 = vmul.f32 %v3306_v34, %v4530_v61  ;;  %v416_v54 = vmul.f32 %v3311_v39, %v4530_v61 }
  0x2f   : > { %3625 = vmatpush3.bf16.msra.mxu1 %v4081_v30  ;;  %v3323_v30 = vunpack.c.h.bf16 %v3489_v21 }
  0x30   : > { %928 = vperm.xlu1 %4066, %v847_v44   ;;  %925 = vperm.xlu0 %4065, %v846_v46   ;;  %v4627_v44 = vadd.f32 %v4562_v13, %v410_v29  ;;  %v4083_v46 = vld [vmem:[%s6248_s4 + $0x78] sm:$0xff]   ;;  %v4655_v0 = vadd.f32 %v4562_v13, %v413_v51  ;;  %v4664_v5 = vadd.f32 %v4562_v13, %v416_v54  ;;  %v560_v29 = vsub.f32 0.0, %v4680_v16 }
  0x31   : > { %3727 = vmatpush3.bf16.msra.mxu0 %v4080_v32  ;;  %3626 = vmatprep.subr.bf16.mxu1 %v6251_v9  ;;  %v305_v32 = vld [vmem:[%s6245_s1 + $0x158] sm:$0xff]  ;;  %v422_v52 = vmul.f32 %v3323_v30, %v4530_v61 }
  0x32   : > { %3812 = vmatprep.subr.bf16.mxu0 %v6251_v9  ;;  %v558_v19 = vsub.f32 0.0, %v4655_v0  ;;  %v561_v22 = vsub.f32 0.0, %v4664_v5  ;;  %vm549_vm10 = vcmp.gt.f32.partialorder %v305_v32, 0.5  ;;  %v612_v51 = vmul.f32 1.442695, %v560_v29 }
  0x33   : > { %3627 = vmatpush3.bf16.msra.mxu1 %v4083_v46 }
  0x34   : > { %934 = vperm.xlu1 %4066, %v849_v49   ;;  %931 = vperm.xlu0 %4065, %v848_v53   ;;  %v554_v49 = vsub.f32 0.0, %v4601_v31  ;;  %v557_v53 = vsub.f32 0.0, %v4617_v38  ;;  %v608_v33 = vmul.f32 1.442695, %v558_v19  ;;  %v614_v37 = vmul.f32 1.442695, %v561_v22 }
  0x35   : > { %3912 = vmatprep.subr.bf16.mxu1 %v6251_v9 }
  0x36   : > { %v600_v62 = vmul.f32 1.442695, %v554_v49  ;;  %v606_v11 = vmul.f32 1.442695, %v557_v53  ;;  %v4724_v49 = vld [vmem:[%s6245_s1 + $0x168] sm:$0xff] }
  0x37   : > { %vm551_vm12 = vcmp.gt.f32.partialorder %v4724_v49, 0.5 }
  0x38   : > { %940 = vperm.xlu1 %4066, %v851_v56   ;;  %937 = vperm.xlu0 %4065, %v850_v57   ;;  %v604_v56 = vmul.f32 1.442695, %v556_v42  ;;  %v555_v57 = vsub.f32 0.0, %v4627_v44  ;;  %v4710_v42 = vsel %vm547_vm8, 1, %v4293_v3  ;;  %vm1824_vm8 = vcmask 1044480  }
  0x3a   : > { %4091 = vpow2.f32 %v604_v56  ;;  %v602_v15 = vmul.f32 1.442695, %v555_v57  ;;  %v4729_v57 = vld [vmem:[%s4497_s19 + $0x50] sm:$0xff]  }
  0x3b   : > { %4093 = vpow2.f32 %v600_v62 }
  0x3c   : > { %946 = vperm.xlu1 %4066, %v853_v7   ;;  %943 = vperm.xlu0 %4065, %v852_v8   ;;  %v4669_v7 = vsel %vm543_vm4, 1, %v4293_v3  ;;  %v300_v8 = vld [vmem:[%s6245_s1 + $0x130] sm:$0xff]  ;;  %4095 = vpow2.f32 %v606_v11 }
  0x3d   : > { %vm544_vm7 = vcmp.gt.f32.partialorder %v300_v8, 0.5  ;;  %4097 = vpow2.f32 %v602_v15  ;;  %v3335_v8 = vunpack.c.h.bf16 %v4729_v57 }
  0x3e   : > { %4099 = vpow2.f32 %v610_v18 }
  0x3f   : > { %4101 = vpow2.f32 %v608_v33  ;;  %v428_v32 = vmul.f32 %v3335_v8, %v4530_v61 }
  0x40   : > { %952 = vperm.xlu1 %4066, %v855_v20   ;;  %949 = vperm.xlu0 %4065, %v854_v23   ;;  %v4687_v20 = vadd.f32 %v4562_v13, %v418_v1  ;;  %v4692_v23 = vadd.f32 %v4562_v13, %v417_v6  ;;  %4103 = vpow2.f32 %v614_v37  ;;  %v423_v1 = vmul.f32 %v3326_v47, %v4530_v61 }
  0x41   : > { %4105 = vpow2.f32 %v612_v51  ;;  %v4740_v6 = vadd.f32 %v4562_v13, %v422_v52 }
  0x42   : > { %v563_v34 = vsub.f32 0.0, %v4687_v20  ;;  %v562_v39 = vsub.f32 0.0, %v4692_v23 }
  0x43   : > { %v567_v30 = vsub.f32 0.0, %v4740_v6 }
  0x44   : > { %958 = vperm.xlu1 %4066, %v857_v26   ;;  %955 = vperm.xlu0 %4065, %v856_v27   ;;  %v420_v26 = vmul.f32 %v3319_v12, %v4530_v61  ;;  %v3318_v27 = vunpack.c.l.bf16 %v3488_v59  ;;  %v4092_v53 = vpop.eup %4091  ;;  %v618_v54 = vmul.f32 1.442695, %v563_v34  ;;  %v616_v58 = vmul.f32 1.442695, %v562_v39 }
  0x45   : > { %v424_v59 = vmul.f32 %v3327_v40, %v4530_v61  ;;  %v4094_v60 = vpop.eup %4093  ;;  %v3339_v40 = vunpack.c.h.bf16 %v4761_v28  ;;  %v626_v52 = vmul.f32 1.442695, %v567_v30 }
  0x46   : > { %v4716_v45 = vadd.f32 %v4562_v13, %v420_v26  ;;  %v419_v46 = vmul.f32 %v3318_v27, %v4530_v61  ;;  %v4096_v10 = vpop.eup %4095  ;;  %4107 = vpow2.f32 %v618_v54  ;;  %v692_v17 = vadd.f32 1.0, %v4094_v60  ;;  %v309_v54 = vld [vmem:[%s6245_s1 + $0x178] sm:$0xff] }
  0x47   : > { %4109 = vpow2.f32 %v616_v58  ;;  %v4752_v18 = vadd.f32 %v4562_v13, %v424_v59  ;;  %v4757_v26 = vadd.f32 %v4562_v13, %v423_v1  ;;  %v695_v29 = vadd.f32 1.0, %v4096_v10  ;;  %v308_v58 = vld [vmem:[%s6245_s1 + $0x170] sm:$0xff] }
  0x48   : > { %964 = vperm.xlu1 %4066, %v859_v35   ;;  %961 = vperm.xlu0 %4065, %v858_v36   ;;  %v3322_v35 = vunpack.c.l.bf16 %v3489_v21  ;;  %v866_v36 = vsel %vm544_vm7, 1, %v4293_v3  ;;  %v565_v62 = vsub.f32 0.0, %v4716_v45  ;;  %v4736_v63 = vadd.f32 %v4562_v13, %v419_v46 }
  0x49   : > { %v569_v39 = vsub.f32 0.0, %v4752_v18  ;;  %v568_v46 = vsub.f32 0.0, %v4757_v26  ;;  %v430_v60 = vmul.f32 %v3339_v40, %v4530_v61  ;;  %vm553_vm14 = vcmp.gt.f32.partialorder %v309_v54, 0.5 }
  0x4a   : > { %v421_v55 = vmul.f32 %v3322_v35, %v4530_v61  ;;  %v622_v21 = vmul.f32 1.442695, %v565_v62  ;;  %v564_v22 = vsub.f32 0.0, %v4736_v63  ;;  %vm552_vm15 = vcmp.gt.f32.partialorder %v308_v58, 0.5  ;;  %v3497_v58 = vld [vmem:[%s4497_s19 + $0x78] sm:$0xff]  }
  0x4b   : > { %v630_v59 = vmul.f32 1.442695, %v569_v39  ;;  %v874_v30 = vsel %vm552_vm15, 1, %v4293_v3 }
  0x4c   : > { %970 = vperm.xlu1 %4066, %v861_v41   ;;  %967 = vperm.xlu0 %4065, %v860_v43   ;;  %v3491_v41 = vld [vmem:[%s4497_s19 + $0x48] sm:$0xff]   ;;  %v304_v43 = vld [vmem:[%s6245_s1 + $0x150] sm:$0xff]  ;;  %v4746_v11 = vadd.f32 %v4562_v13, %v421_v55 }
  0x4d   : > { %v3331_v56 = vunpack.c.h.bf16 %v3491_v41  ;;  %vm548_vm11 = vcmp.gt.f32.partialorder %v304_v43, 0.5  ;;  %v620_v43 = vmul.f32 1.442695, %v564_v22  ;;  %v3338_v22 = vunpack.c.l.bf16 %v4761_v28 }
  0x4e   : > { %v870_v15 = vsel %vm548_vm11, 1, %v4293_v3  ;;  %v566_v34 = vsub.f32 0.0, %v4746_v11 }
  0x4f   : > { %v426_v12 = vmul.f32 %v3331_v56, %v4530_v61 }
  0x50   : > { %976 = vperm.xlu1 %4066, %v863_v2   ;;  %973 = vperm.xlu0 %4065, %v862_v4   ;;  %v3330_v2 = vunpack.c.l.bf16 %v3491_v41  ;;  %v694_v4 = vadd.f32 1.0, %v4092_v53  ;;  %v4781_v53 = vadd.f32 %v4562_v13, %v428_v32 }
  0x51   : > { %v4770_v35 = vadd.f32 %v4562_v13, %v426_v12 }
  0x52   : > { %v425_v27 = vmul.f32 %v3330_v2, %v4530_v61  ;;  %4111 = vrcp.f32 %v694_v4  ;;  %v628_v2 = vmul.f32 1.442695, %v568_v46  ;;  %v573_v10 = vsub.f32 0.0, %v4781_v53 }
  0x53   : > { %4113 = vrcp.f32 %v692_v17  ;;  %v4805_v17 = vadd.f32 %v4562_v13, %v430_v60  ;;  %v429_v46 = vmul.f32 %v3338_v22, %v4530_v61 }
  0x54   : > { %982 = vperm.xlu1 %4066, %v4669_v7   ;;  %979 = vperm.xlu0 %4065, %v864_v14   ;;  %v871_v7 = vsel %vm549_vm10, 1, %v4293_v3  ;;  %v4098_v14 = vpop.eup %4097  ;;  %4115 = vpow2.f32 %v622_v21  ;;  %v4778_v47 = vadd.f32 %v4562_v13, %v425_v27  ;;  %v638_v32 = vmul.f32 1.442695, %v573_v10 }
  0x55   : > { %v4100_v19 = vpop.eup %4099  ;;  %v693_v33 = vadd.f32 1.0, %v4098_v14  ;;  %4117 = vrcp.f32 %v695_v29  ;;  %v875_v29 = vsel %vm553_vm14, 1, %v4293_v3  ;;  %v575_v40 = vsub.f32 0.0, %v4805_v17 }
  0x56   : > { %v697_v37 = vadd.f32 1.0, %v4100_v19  ;;  %v4102_v41 = vpop.eup %4101  ;;  %v570_v49 = vsub.f32 0.0, %v4778_v47  ;;  %v3494_v19 = vld [vmem:[%s4497_s19 + $0x60] sm:$0xff]  }
  0x57   : > { %v4104_v51 = vpop.eup %4103  ;;  %4119 = vrcp.f32 %v693_v33  ;;  %v696_v8 = vadd.f32 1.0, %v4102_v41  ;;  %v3342_v41 = vunpack.c.l.bf16 %v3494_v19  ;;  %v642_v60 = vmul.f32 1.442695, %v575_v40 }
  0x58   : > { %988 = vperm.xlu1 %4066, %v4695_v25   ;;  %985 = vperm.xlu0 %4065, %v866_v36   ;;  %v306_v25 = vld [vmem:[%s6245_s1 + $0x160] sm:$0xff]  ;;  %v3334_v36 = vunpack.c.l.bf16 %v4729_v57  ;;  %v4106_v56 = vpop.eup %4105  ;;  %v873_v57 = vsel %vm551_vm12, 1, %v4293_v3  ;;  %4121 = vrcp.f32 %v697_v37  ;;  %v632_v21 = vmul.f32 1.442695, %v570_v49 }
  0x59   : > { %vm550_vm13 = vcmp.gt.f32.partialorder %v306_v25, 0.5  ;;  %v4108_v62 = vpop.eup %4107  ;;  %4123 = vpow2.f32 %v620_v43  ;;  %v3495_v25 = vld [vmem:[%s4497_s19 + $0x68] sm:$0xff]   ;;  %v3343_v37 = vunpack.c.h.bf16 %v3494_v19  ;;  %v4830_v49 = vadd.f32 %v4562_v13, %v429_v46 }
  0x5a   : > { %v427_v55 = vmul.f32 %v3334_v36, %v4530_v61  ;;  %v872_v1 = vsel %vm550_vm13, 1, %v4293_v3  ;;  %v4110_v4 = vpop.eup %4109  ;;  %4125 = vpow2.f32 %v626_v52  ;;  %v701_v28 = vadd.f32 1.0, %v4108_v62  ;;  %v3496_v52 = vld [vmem:[%s4497_s19 + $0x70] sm:$0xff]  }
  0x5b   : > { %v700_v3 = vadd.f32 1.0, %v4110_v4  ;;  %v431_v62 = vmul.f32 %v3342_v41, %v4530_v61 }
  0x5c   : > { %994 = vperm.xlu1 %4066, %v4710_v42   ;;  %991 = vperm.xlu0 %4065, %v868_v48   ;;  %v624_v42 = vmul.f32 1.442695, %v566_v34  ;;  %v571_v48 = vsub.f32 0.0, %v4770_v35  ;;  %v4802_v14 = vpop.eup %4111  ;;  %v698_v34 = vadd.f32 1.0, %v4106_v56  ;;  %v432_v56 = vmul.f32 %v3343_v37, %v4530_v61 }
  0x5d   : > { %v4809_v27 = vpop.eup %4113 }
  0x5e   : > { %4127 = vpow2.f32 %v624_v42  ;;  %v634_v12 = vmul.f32 1.442695, %v571_v48  ;;  %v4116_v33 = vpop.eup %4115  ;;  %v4834_v22 = vadd.f32 %v4562_v13, %v432_v56 }
  0x5f   : > { %4129 = vpow2.f32 %v630_v59  ;;  %v4817_v39 = vpop.eup %4117  ;;  %v703_v42 = vadd.f32 1.0, %v4116_v33 }
  0x60   : > { %1000 = vperm.xlu1 %4066, %v871_v7   ;;  %997 = vperm.xlu0 %4065, %v870_v15   ;;  %v4800_v7 = vadd.f32 %v4562_v13, %v427_v55  ;;  %v699_v15 = vadd.f32 1.0, %v4104_v51  ;;  %4131 = vpow2.f32 %v628_v2  ;;  %v3347_v51 = vunpack.c.h.bf16 %v3495_v25 }
  0x61   : > { %4133 = vrcp.f32 %v696_v8  ;;  %v4820_v43 = vpop.eup %4119  ;;  %v3350_v8 = vunpack.c.l.bf16 %v3496_v52 }
  0x62   : > { %4135 = vpow2.f32 %v634_v12  ;;  %v572_v36 = vsub.f32 0.0, %v4800_v7  ;;  %v4824_v54 = vpop.eup %4121  ;;  %v434_v4 = vmul.f32 %v3347_v51, %v4530_v61 }
  0x63   : > { %4137 = vrcp.f32 %v699_v15  ;;  %v4124_v48 = vpop.eup %4123  ;;  %v3355_v15 = vunpack.c.h.bf16 %v3497_v58  ;;  %v435_v41 = vmul.f32 %v3350_v8, %v4530_v61 }
  0x64   : > { %1006 = vperm.xlu1 %4066, %v873_v57   ;;  %1003 = vperm.xlu0 %4065, %v872_v1   ;;  %4139 = vpow2.f32 %v632_v21  ;;  %v636_v55 = vmul.f32 1.442695, %v572_v36  ;;  %v3346_v57 = vunpack.c.l.bf16 %v3495_v25  ;;  %v4126_v59 = vpop.eup %4125  ;;  %v3351_v1 = vunpack.c.h.bf16 %v3496_v52 }
  0x65   : > { %4141 = vpow2.f32 %v638_v32  ;;  %v702_v12 = vadd.f32 1.0, %v4124_v48  ;;  %v705_v21 = vadd.f32 1.0, %v4126_v59  ;;  %v4840_v25 = vadd.f32 %v4562_v13, %v431_v62 }
  0x66   : > { %4143 = vrcp.f32 %v698_v34  ;;  %v436_v33 = vmul.f32 %v3351_v1, %v4530_v61  ;;  %v3498_v34 = vld [vmem:[%s4497_s19 + $0x80] sm:$0xff]   ;;  %v4846_v40 = vadd.f32 %v4562_v13, %v434_v4  ;;  %v438_v51 = vmul.f32 %v3355_v15, %v4530_v61 }
  0x67   : > { %4145 = vrcp.f32 %v701_v28  ;;  %v574_v28 = vsub.f32 0.0, %v4830_v49  ;;  %v3354_v52 = vunpack.c.l.bf16 %v3497_v58  ;;  %v577_v48 = vsub.f32 0.0, %v4834_v22 }
  0x68   : > { %1012 = vperm.xlu1 %4066, %v875_v29   ;;  %1009 = vperm.xlu0 %4065, %v874_v30   ;;  %v4128_v2 = vpop.eup %4127  ;;  %4147 = vrcp.f32 %v700_v3  ;;  %v433_v29 = vmul.f32 %v3346_v57, %v4530_v61  ;;  %v3359_v56 = vunpack.c.h.bf16 %v3498_v34  ;;  %v4858_v62 = vadd.f32 %v4562_v13, %v436_v33 }
  0x69   : > { %v4130_v10 = vpop.eup %4129  ;;  %4149 = vrcp.f32 %v703_v42  ;;  %v704_v32 = vadd.f32 1.0, %v4128_v2  ;;  %v640_v58 = vmul.f32 1.442695, %v574_v28  ;;  %v579_v2 = vsub.f32 0.0, %v4846_v40 }
  0x6a   : > { %v4132_v19 = vpop.eup %4131  ;;  %4151 = vpow2.f32 %v636_v55  ;;  %v707_v37 = vadd.f32 1.0, %v4130_v10  ;;  %v4854_v55 = vadd.f32 %v4562_v13, %v433_v29  ;;  %6326 = vst [vmem:[#allocation2_spill] sm:$0xff] %v4858_v62  ;;  %v4864_v4 = vadd.f32 %v4562_v13, %v435_v41 }
  0x6b   : > { %v4837_v30 = vpop.eup %4133  ;;  %4153 = vpow2.f32 %v642_v60  ;;  %v706_v46 = vadd.f32 1.0, %v4132_v19  ;;  %v576_v60 = vsub.f32 0.0, %v4840_v25  ;;  %v437_v15 = vmul.f32 %v3354_v52, %v4530_v61 }
  0x6c   : > { %v4136_v36 = vpop.eup %4135  ;;  %4155 = vrcp.f32 %v702_v12  ;;  %6327 = vst [vmem:[#allocation3_spill] sm:$0xff] %v4864_v4  ;;  %v4869_v12 = vadd.f32 %v4562_v13, %v438_v51  ;;  %v578_v29 = vsub.f32 0.0, %v4854_v55  ;;  %v3358_v33 = vunpack.c.l.bf16 %v3498_v34 }
  0x6d   : > { %v4849_v3 = vpop.eup %4137  ;;  %4157 = vrcp.f32 %v705_v21  ;;  %v709_v59 = vadd.f32 1.0, %v4136_v36  ;;  %v581_v28 = vsub.f32 0.0, %v4858_v62  ;;  %v580_v51 = vsub.f32 0.0, %v4864_v4  ;;  %v3499_v4 = vld [vmem:[%s4497_s19 + $0x88] sm:$0xff]   ;;  %v3500_v62 = vld [vmem:[%s4497_s19 + $0x90] sm:$0xff]  }
  0x6e   : > { %v4140_v42 = vpop.eup %4139  ;;  %4159 = vrcp.f32 %v704_v32  ;;  %6328 = vst [vmem:[#allocation4_spill] sm:$0xff] %v4869_v12  ;;  %v440_v32 = vmul.f32 %v3359_v56, %v4530_v61  ;;  %v4882_v56 = vadd.f32 %v4562_v13, %v437_v15  ;;  %v648_v34 = vmul.f32 1.442695, %v578_v29 }
  0x6f   : > { %v4142_v57 = vpop.eup %4141  ;;  %4161 = vrcp.f32 %v707_v37  ;;  %v708_v10 = vadd.f32 1.0, %v4140_v42  ;;  %v646_v37 = vmul.f32 1.442695, %v577_v48  ;;  %v650_v42 = vmul.f32 1.442695, %v579_v2 }
  0x70   : > { %v4860_v1 = vpop.eup %4143  ;;  %4163 = vrcp.f32 %v706_v46  ;;  %v711_v21 = vadd.f32 1.0, %v4142_v57  ;;  %v644_v46 = vmul.f32 1.442695, %v576_v60  ;;  %v583_v57 = vsub.f32 0.0, %v4869_v12 }
  0x71   : > { %v4866_v8 = vpop.eup %4145  ;;  %4165 = vrcp.f32 %v709_v59  ;;  %v4885_v48 = vadd.f32 %v4562_v13, %v440_v32  ;;  %v439_v59 = vmul.f32 %v3358_v33, %v4530_v61  ;;  %v654_v60 = vmul.f32 1.442695, %v581_v28 }
  0x72   : > { %v4872_v19 = vpop.eup %4147  ;;  %4167 = vpow2.f32 %v640_v58  ;;  %v652_v2 = vmul.f32 1.442695, %v580_v51  ;;  %v658_v12 = vmul.f32 1.442695, %v583_v57  ;;  %v582_v15 = vsub.f32 0.0, %v4882_v56 }
  0x73   : > { %v4876_v36 = vpop.eup %4149  ;;  %4169 = vrcp.f32 %v708_v10  ;;  %v585_v32 = vsub.f32 0.0, %v4885_v48  ;;  %v4892_v33 = vadd.f32 %v4562_v13, %v439_v59  ;;  %v4897_v28 = vmul.f32 %v4802_v14, %v4586_v24 }
  0x74   : > { %v4152_v41 = vpop.eup %4151  ;;  %4171 = vrcp.f32 %v711_v21  ;;  %v3363_v57 = vunpack.c.h.bf16 %v3499_v4  ;;  %v656_v24 = vmul.f32 1.442695, %v582_v15  ;;  %v3362_v14 = vunpack.c.l.bf16 %v3499_v4 }
  0x75   : > { %v4154_v52 = vpop.eup %4153  ;;  %4173 = vpow2.f32 %v646_v37  ;;  %v710_v29 = vadd.f32 1.0, %v4152_v41  ;;  %v4905_v41 = vmul.f32 %v4817_v39, %v4617_v38  ;;  %v3367_v59 = vunpack.c.h.bf16 %v3500_v62 }
  0x76   : > { %v4156_v58 = vpop.eup %4155  ;;  %4175 = vpow2.f32 %v644_v46  ;;  %v4901_v46 = vmul.f32 %v4809_v27, %v4601_v31  ;;  %v713_v51 = vadd.f32 1.0, %v4154_v52  ;;  %v662_v27 = vmul.f32 1.442695, %v585_v32 }
  0x77   : > { %v4158_v9 = vpop.eup %4157  ;;  %4177 = vpow2.f32 %v650_v42  ;;  %v4909_v42 = vmul.f32 %v4820_v43, %v4627_v44  ;;  %v584_v52 = vsub.f32 0.0, %v4892_v33  ;;  %v4914_v39 = vmul.f32 %v4824_v54, %v4640_v50  ;;  %v3501_v54 = vld [vmem:[%s4497_s19 + $0x98] sm:$0xff]  }
  0x78   : > { %v4160_v10 = vpop.eup %4159  ;;  %4179 = vpow2.f32 %v648_v34  ;;  %v4918_v44 = vmul.f32 %v4837_v30, %v4655_v0  ;;  %v4922_v43 = vmul.f32 %v4849_v3, %v4664_v5  ;;  %v4934_v50 = vmul.f32 %v4872_v19, %v4692_v23 }
  0x79   : > { %v4162_v21 = vpop.eup %4161  ;;  %4181 = vpow2.f32 %v654_v60  ;;  %v3366_v60 = vunpack.c.l.bf16 %v3500_v62  ;;  %v4930_v62 = vmul.f32 %v4866_v8, %v4687_v20  ;;  %v442_v0 = vmul.f32 %v3363_v57, %v4530_v61 }
  0x7a   : > { %v4164_v37 = vpop.eup %4163  ;;  %4183 = vpow2.f32 %v652_v2  ;;  %v441_v3 = vmul.f32 %v3362_v14, %v4530_v61  ;;  %v444_v2 = vmul.f32 %v3367_v59, %v4530_v61  ;;  %v660_v20 = vmul.f32 1.442695, %v584_v52 }
  0x7b   : > { %v4166_v34 = vpop.eup %4165  ;;  %4185 = vpow2.f32 %v658_v12  ;;  %v4926_v12 = vmul.f32 %v4860_v1, %v4680_v16  ;;  %v4942_v1 = vmul.f32 %v4876_v36, %v4716_v45  ;;  %v443_v23 = vmul.f32 %v3366_v60, %v4530_v61 }
  0x7c   : > { %v4168_v31 = vpop.eup %4167  ;;  %4187 = vrcp.f32 %v710_v29  ;;  %v4946_v19 = vmul.f32 %v4156_v58, %v4736_v63  ;;  %v4949_v15 = vmul.f32 %v4158_v9, %v4740_v6  ;;  %v3371_v29 = vunpack.c.h.bf16 %v3501_v54 }
  0x7d   : > { %v4170_v38 = vpop.eup %4169  ;;  %4189 = vrcp.f32 %v713_v51  ;;  %v712_v5 = vadd.f32 1.0, %v4168_v31  ;;  %v3370_v32 = vunpack.c.l.bf16 %v3501_v54  ;;  %v4952_v57 = vmul.f32 %v4160_v10, %v4746_v11 }
  0x7e   : > { %v4172_v4 = vpop.eup %4171  ;;  %4191 = vpow2.f32 %v656_v24  ;;  %v4955_v45 = vmul.f32 %v4162_v21, %v4752_v18  ;;  %v4958_v24 = vadd.f32 %v4562_v13, %v442_v0  ;;  %v4961_v58 = vadd.f32 %v4562_v13, %v441_v3 }
  0x7f   : > { %v4174_v30 = vpop.eup %4173  ;;  %4193 = vpow2.f32 %v662_v27  ;;  %v4964_v9 = vadd.f32 %v4562_v13, %v444_v2  ;;  %v4967_v11 = vmul.f32 %v4164_v37, %v4757_v26  ;;  %v4970_v18 = vadd.f32 %v4562_v13, %v443_v23 }
  0x80   : > { %v4176_v16 = vpop.eup %4175  ;;  %v715_v36 = vadd.f32 1.0, %v4174_v30  ;;  %4195 = vrcp.f32 %v712_v5  ;;  %v4973_v59 = vmul.f32 %v4166_v34, %v4770_v35  ;;  %v446_v27 = vmul.f32 %v3371_v29, %v4530_v61  ;;  %v3502_v34 = vld [vmem:[%s4497_s19 + $0xa0] sm:$0xff]  }
  0x81   : > { %v4178_v8 = vpop.eup %4177  ;;  %v714_v63 = vadd.f32 1.0, %v4176_v16  ;;  %4197 = vpow2.f32 %v660_v20  ;;  %v445_v52 = vmul.f32 %v3370_v32, %v4530_v61  ;;  %v4978_v0 = vmul.f32 %v4170_v38, %v4778_v47 }
  0x82   : > { %v4180_v51 = vpop.eup %4179  ;;  %v717_v10 = vadd.f32 1.0, %v4178_v8  ;;  %4199 = vrcp.f32 %v715_v36  ;;  %v587_v37 = vsub.f32 0.0, %v4958_v24  ;;  %v586_v5 = vsub.f32 0.0, %v4961_v58 }
  0x83   : > { %v4182_v14 = vpop.eup %4181  ;;  %v716_v31 = vadd.f32 1.0, %v4180_v51  ;;  %4201 = vrcp.f32 %v714_v63  ;;  %v589_v35 = vsub.f32 0.0, %v4964_v9  ;;  %v4985_v3 = vmul.f32 %v4172_v4, %v4781_v53 }
  0x84   : > { %v4184_v6 = vpop.eup %4183  ;;  %v719_v26 = vadd.f32 1.0, %v4182_v14  ;;  %4203 = vrcp.f32 %v717_v10  ;;  %v588_v47 = vsub.f32 0.0, %v4970_v18  ;;  %v4994_v23 = vadd.f32 %v4562_v13, %v446_v27 }
  0x85   : > { %v4186_v21 = vpop.eup %4185  ;;  %v718_v30 = vadd.f32 1.0, %v4184_v6  ;;  %4205 = vrcp.f32 %v716_v31  ;;  %v4997_v8 = vadd.f32 %v4562_v13, %v445_v52  ;;  %v3375_v29 = vunpack.c.h.bf16 %v3502_v34  ;;  %v5015_v52 = vld [vmem:[%s6246_s2] ss:$0 sm:$0xff] }
  0x86   : > { %v4188_v60 = vpop.eup %4187  ;;  %v721_v61 = vadd.f32 1.0, %v4186_v21  ;;  %4207 = vrcp.f32 %v719_v26  ;;  %v3374_v32 = vunpack.c.l.bf16 %v3502_v34  ;;  %v666_v51 = vmul.f32 1.442695, %v587_v37 }
  0x87   : > { %v4190_v54 = vpop.eup %4189  ;;  %v4991_v20 = vmul.f32 %v4188_v60, %v4800_v7  ;;  %4209 = vrcp.f32 %v718_v30  ;;  %v664_v36 = vmul.f32 1.442695, %v586_v5  ;;  %v5002_v14 = vmul.f32 1.442695, %v589_v35 }
  0x88   : > { %v4192_v38 = vpop.eup %4191  ;;  %v5000_v4 = vmul.f32 %v4190_v54, %v4805_v17  ;;  %4211 = vrcp.f32 %v721_v61  ;;  %v5005_v7 = vmul.f32 1.442695, %v588_v47  ;;  %v591_v21 = vsub.f32 0.0, %v4994_v23 }
  0x89   : > { %v4194_v53 = vpop.eup %4193  ;;  %v720_v17 = vadd.f32 1.0, %v4192_v38  ;;  %v590_v31 = vsub.f32 0.0, %v4997_v8  ;;  %v448_v60 = vmul.f32 %v5015_v52, %v3375_v29  ;;  %v447_v26 = vmul.f32 %v5015_v52, %v3374_v32 }
  0x8a   : > { %v4196_v13 = vpop.eup %4195  ;;  %v723_v10 = vadd.f32 1.0, %v4194_v53  ;;  %4213 = vpow2.f32 %v666_v51  ;;  %v5037_v53 = vmul.f32 1.442695, %v591_v21  ;;  %v5050_v51 = vld [vmem:[%s6247_s3] ss:$0 sm:$0xff] }
  0x8b   : > { %v4198_v27 = vpop.eup %4197  ;;  %v5031_v47 = vmul.f32 %v4196_v13, %v4830_v49  ;;  %4215 = vrcp.f32 %v720_v17  ;;  %v4082_v49 = vld [vmem:[%s6248_s4 + $0x80] sm:$0xff]   ;;  %v5053_v13 = vadd.f32 %v5050_v51, %v448_v60  ;;  %v5056_v17 = vld [vmem:[%s4497_s19 + $0xb0] sm:$0xff]  }
  0x8c   : > { %v4200_v35 = vpop.eup %4199  ;;  %4217 = vrcp.f32 %v723_v10 }
  0x8d   : > { %4219 = vpow2.f32 %v664_v36  ;;  %v6335_v36 = vmov 0.0  }
  0x8f   : > { %v4988_v2 = vpop.permute.xlu1 %883  ;;  %v878_v16 = vpop.permute.xlu0 %877 }
  0x90   : > { %6329 = vst [vmem:[#allocation5_spill] sm:$0xff] %v4988_v2  ;;  %vm1016_vm2 = vcmp.eq.s32.totalorder %v4988_v2, 1  ;;  %vm1014_vm3 = vcmp.eq.s32.totalorder %v878_v16, 1 }
  0x91   : > { %v1062_v37 = vsel %vm1016_vm2, %v4897_v28, 0.0  ;;  %v1060_v54 = vsel %vm1014_vm3, %v4901_v46, 0.0  ;;  %v4202_v28 = vpop.eup %4201  ;;  %v722_v46 = vadd.f32 1.0, %v4198_v27  ;;  %v5063_v27 = vadd.f32 %v5050_v51, %v447_v26 }
  0x92   : > { %v4204_v29 = vpop.eup %4203 }
  0x93   : > { %v5007_v63 = vpop.permute.xlu1 %886  ;;  %v881_v6 = vpop.permute.xlu0 %880  ;;  %4221 = vrcp.f32 %v722_v46 }
  0x94   : > { %6330 = vst [vmem:[#allocation6_spill] sm:$0xff] %v5007_v63  ;;  %vm1017_vm4 = vcmp.eq.s32.totalorder %v5007_v63, 1  ;;  %vm1015_vm5 = vcmp.eq.s32.totalorder %v881_v6, 1  ;;  %v4206_v21 = vpop.eup %4205  ;;  %4223 = vpow2.f32 %v5002_v14  ;;  %v5130_v14 = vmul.f32 %v4204_v29, %v4846_v40 }
  0x95   : > { %v1063_v30 = vsel %vm1017_vm4, %v4905_v41, 0.0  ;;  %v1061_v5 = vsel %vm1015_vm5, %v4909_v42, 0.0  ;;  %v5039_v41 = vmul.f32 1.442695, %v590_v31  ;;  %v3503_v42 = vld [vmem:[%s4497_s19 + $0xa8] sm:$0xff]   ;;  %4225 = vpow2.f32 %v5005_v7 }
  0x96   : > { %v5028_v34 = vpack.c.bf16 %v1063_v30, %v1062_v37  ;;  %v1106_v61 = vpack.c.bf16 %v1061_v5, %v1060_v54  ;;  %v5065_v37 = vpop.eup %4207  ;;  %v3379_v30 = vunpack.c.h.bf16 %v3503_v42  ;;  %4227 = vpow2.f32 %v5037_v53 }
  0x97   : > { %v5033_v38 = vpop.permute.xlu1 %892  ;;  %v5035_v16 = vpop.permute.xlu0 %889  ;;  %4229 = vpow2.f32 %v5039_v41 }
  0x98   : > { %6331 = vst [vmem:[#allocation7_spill] sm:$0xff] %v5033_v38  ;;  %6332 = vst [vmem:[#allocation8_spill] sm:$0xff] %v5035_v16  ;;  %v6258_v32 = vrot.slane %v5028_v34, 1  ;;  %v1496_v6 = vrot.slane %v1106_v61, 1  ;;  %vm1019_vm7 = vcmp.eq.s32.totalorder %v5033_v38, 1  ;;  %vm1018_vm9 = vcmp.eq.s32.totalorder %v5035_v16, 1  ;;  %v5073_v5 = vpop.eup %4209 }
  0x99   : > { %v1065_v31 = vsel %vm1019_vm7, %v4914_v39, 0.0  ;;  %v1064_v60 = vsel %vm1018_vm9, %v4918_v44, 0.0  ;;  %v5082_v61 = vmul.f32 %v4200_v35, %v4834_v22  ;;  %v3378_v38 = vunpack.c.l.bf16 %v3503_v42  ;;  %v5085_v16 = vpop.eup %4211 }
  0x9a   : > { %v1498_v54 = vsel %vm1495_vm0, %v1496_v6, %v6258_v32  ;;  %v5075_v39 = vpack.c.bf16 %v1065_v31, %v1064_v60  ;;  %v4084_v6 = vld [vmem:[%s6248_s4 + $0x88] sm:$0xff]   ;;  %v593_v22 = vsub.f32 0.0, %v5053_v13  ;;  %v1184_v35 = vrot.slane %v5028_v34, 2  ;;  %v5121_v46 = vpop.eup %4213 }
  0x9b   : > { %v5077_v10 = vpop.permute.xlu1 %898  ;;  %v5079_v26 = vpop.permute.xlu0 %895  ;;  %3729 = vmatmul.mubr.bf16.vlgmr.msra.gmra.mrb[0].mxu0 %v1498_v54  ;;  %v5108_v54 = vmul.f32 %v4202_v28, %v4840_v25  ;;  %v592_v44 = vsub.f32 0.0, %v5063_v27  ;;  %v4085_v28 = vld [vmem:[%s6248_s4 + $0x90] sm:$0xff]   ;;  %v6339_v29 = vrot.slane %v5028_v34, 1 }
  0x9c   : > { %6333 = vst [vmem:[#allocation9_spill] sm:$0xff] %v5077_v10  ;;  %6334 = vst [vmem:[#allocation10_spill] sm:$0xff] %v5079_v26  ;;  %vm1021_vm10 = vcmp.eq.s32.totalorder %v5077_v10, 1  ;;  %vm1020_vm11 = vcmp.eq.s32.totalorder %v5079_v26, 1  ;;  %3813 = vmatpush3.bf16.msra.mxu0 %v4082_v49  ;;  %3732 = vmatprep.mubr.msk.bf16.mxu0 %vm4295_vm1, %v6335_v36  ;;  %v6259_v31 = vrot.slane %v5075_v39, 2  ;;  %v6338_v40 = vrot.slane %v5075_v39, 1 }
  0x9d   : > { %v1067_v42 = vsel %vm1021_vm10, %v4922_v43, 0.0  ;;  %v1066_v49 = vsel %vm1020_vm11, %v4926_v12, 0.0  ;;  %3814 = vmatprep.subr.bf16.mxu0 %v6335_v36 }
  0x9e   : > { %v5104_v60 = vpack.c.bf16 %v1067_v42, %v1066_v49  ;;  %v1186_v12 = vsel %vm1183_vm6, %v1184_v35, %v6259_v31  ;;  %v450_v42 = vmul.f32 %v5015_v52, %v3379_v30  ;;  %v449_v49 = vmul.f32 %v5015_v52, %v3378_v38  ;;  %v5132_v30 = vpop.eup %4215 }
  0x9f   : > { %v5111_v32 = vpop.permute.xlu1 %904  ;;  %v5113_v43 = vpop.permute.xlu0 %901  ;;  %3629 = vmatmul.mubr.bf16.vlgmr.msra.gmra.mrb[0].mxu1 %v1186_v12  ;;  %v1825_v38 = vrot.slane %v5075_v39, 3  ;;  %v678_v31 = vmul.f32 1.442695, %v593_v22  ;;  %v5306_v63 = vmul.f32 %v5132_v30, %v4882_v56 }
  0xa0   : > { %6336 = vst [vmem:[#allocation11_spill] sm:$0xff] %v5111_v32  ;;  %6337 = vst [vmem:[#allocation12_spill] sm:$0xff] %v5113_v43  ;;  %vm1023_vm12 = vcmp.eq.s32.totalorder %v5111_v32, 1  ;;  %vm1022_vm13 = vcmp.eq.s32.totalorder %v5113_v43, 1  ;;  %3815 = vmatpush3.bf16.msra.mxu0 %v4084_v6  ;;  %v4277_v6 = vld [vmem:[%s6248_s4] sm:$0xff]   ;;  %3632 = vmatprep.mubr.msk.bf16.mxu1 %vm4295_vm1, %v6335_v36  ;;  %v5157_v25 = vpop.eup %4217  ;;  %v6262_v34 = vrot.slane %v5104_v60, 2  ;;  %v5182_v53 = vadd.f32 %v5050_v51, %v450_v42 }
  0xa1   : > { %v1069_v35 = vsel %vm1023_vm12, %v4930_v62, 0.0  ;;  %v1068_v12 = vsel %vm1022_vm13, %v4934_v50, 0.0  ;;  %3920 = vmatpush3.bf16.msra.mxu1 %v4277_v6  ;;  %v1500_v62 = vsel %vm1495_vm0, %v6339_v29, %v6338_v40  ;;  %3816 = vmatprep.subr.bf16.mxu0 %v6335_v36  ;;  %v5155_v50 = vmul.f32 %v4206_v21, %v4854_v55  ;;  %v5172_v21 = vpop.eup %4219  ;;  %v6343_v42 = vld [vmem:[#allocation2_spill] sm:$0xff]  ;;  %v6344_v29 = vld [vmem:[#allocation3_spill] sm:$0xff] }
  0xa2   : > { %3913 = vmatprep.subr.bf16.mxu1 %v6335_v36  ;;  %v676_v6 = vmul.f32 1.442695, %v592_v44  ;;  %v5159_v32 = vpack.c.bf16 %v1069_v35, %v1068_v12  ;;  %v6342_v40 = vrot.slane %v5104_v60, 3  ;;  %v4086_v44 = vld [vmem:[%s6248_s4 + $0x98] sm:$0xff]   ;;  %v5185_v22 = vadd.f32 %v5050_v51, %v449_v49  ;;  %v5202_v49 = vpop.eup %4221 }
  0xa3   : > { %v5161_v7 = vpop.permute.xlu1 %910  ;;  %v5163_v43 = vpop.permute.xlu0 %907  ;;  %3733 = vmatmul.mubr.bf16.gmra.mrb[4].mxu0 %v1500_v62  ;;  %v5199_v12 = vmul.f32 %v5065_v37, %v6343_v42  ;;  %v6345_v62 = vunpack.c.h.bf16 %v5056_v17  ;;  %4231 = vpow2.f32 %v678_v31 }
  0xa4   : > { %6340 = vst [vmem:[#allocation13_spill] sm:$0xff] %v5161_v7  ;;  %6341 = vst [vmem:[#allocation14_spill] sm:$0xff] %v5163_v43  ;;  %v5170_v55 = vsel %vm1824_vm8, %v1825_v38, %v6342_v40  ;;  %vm1025_vm14 = vcmp.eq.s32.totalorder %v5161_v7, 1  ;;  %vm1024_vm15 = vcmp.eq.s32.totalorder %v5163_v43, 1  ;;  %3736 = vmatprep.mubr.msk.bf16.mxu0 %vm4295_vm1, %v6335_v36  ;;  %3817 = vmatpush3.bf16.msra.mxu0 %v4085_v28  ;;  %v4278_v28 = vld [vmem:[%s6248_s4 + $0x8] sm:$0xff]   ;;  %v6350_v7 = vrot.slane %v5104_v60, 3 }
  0xa5   : > { %v1071_v38 = vsel %vm1025_vm14, %v4942_v1, 0.0  ;;  %v1070_v35 = vsel %vm1024_vm15, %v4946_v19, 0.0  ;;  %3921 = vmatpush3.bf16.msra.mxu1 %v4278_v28  ;;  %3818 = vmatprep.subr.bf16.mxu0 %v6335_v36  ;;  %v5207_v19 = vmul.f32 %v5073_v5, %v6344_v29  ;;  %v452_v40 = vmul.f32 %v5015_v52, %v6345_v62  ;;  %v5233_v62 = vpop.eup %4223 }
  0xa6   : > { %3914 = vmatprep.subr.bf16.mxu1 %v6335_v36  ;;  %v3382_v28 = vunpack.c.l.bf16 %v5056_v17  ;;  %v5214_v37 = vpack.c.bf16 %v1071_v38, %v1070_v35  ;;  %v6348_v1 = vrot.slane %v5075_v39, 2  ;;  %v1828_v29 = vrot.slane %v5159_v32, 3  ;;  %v4087_v17 = vld [vmem:[%s6248_s4 + $0xa0] sm:$0xff]   ;;  %v5269_v10 = vpop.eup %4225 }
  0xa7   : > { %v5216_v42 = vpop.permute.xlu1 %916  ;;  %v5218_v41 = vpop.permute.xlu0 %913  ;;  %v595_v38 = vsub.f32 0.0, %v5182_v53  ;;  %v594_v35 = vsub.f32 0.0, %v5185_v22  ;;  %4233 = vpow2.f32 %v676_v6 }
  0xa8   : > { %6346 = vst [vmem:[#allocation2_spill] sm:$0xff] %v5216_v42  ;;  %6347 = vst [vmem:[#allocation3_spill] sm:$0xff] %v5218_v41  ;;  %v1188_v5 = vsel %vm1183_vm6, %v6348_v1, %v6262_v34  ;;  %vm6268_vm3 = vcmp.eq.s32.totalorder %v5216_v42, 1  ;;  %vm6269_vm5 = vcmp.eq.s32.totalorder %v5218_v41, 1  ;;  %3819 = vmatpush3.bf16.msra.mxu0 %v4086_v44  ;;  %v6349_v44 = vld [vmem:[#allocation4_spill] sm:$0xff]  ;;  %v5249_v34 = vld [vmem:[%s4497_s19 + $0xb8] sm:$0xff]   ;;  %v5254_v42 = vsel %vm1824_vm8, %v6350_v7, %v1828_v29 }
  0xa9   : > { %3633 = vmatmul.mubr.bf16.gmra.mrb[4].mxu1 %v1188_v5  ;;  %v1073_v31 = vsel %vm6268_vm3, %v4949_v15, 0.0  ;;  %v1072_v1 = vsel %vm6269_vm5, %v4952_v57, 0.0  ;;  %3820 = vmatprep.subr.bf16.mxu0 %v6335_v36  ;;  %v5246_v5 = vmul.f32 %v5085_v16, %v6349_v44  ;;  %v6351_v57 = vrot.slane %v5104_v60, 1  ;;  %v4279_v16 = vld [vmem:[%s6248_s4 + $0x10] sm:$0xff]  }
  0xaa   : > { %3636 = vmatprep.mubr.msk.bf16.mxu1 %vm4295_vm1, %v6335_v36  ;;  %v5256_v15 = vpack.c.bf16 %v1073_v31, %v1072_v1  ;;  %v6352_v41 = vrot.slane %v5075_v39, 1  ;;  %3922 = vmatpush3.bf16.msra.mxu1 %v4279_v16  ;;  %v5267_v44 = vadd.f32 %v5050_v51, %v452_v40  ;;  %v451_v1 = vmul.f32 %v5015_v52, %v3382_v28 }
  0xab   : > { %v5271_v7 = vpop.permute.xlu1 %922  ;;  %v5273_v31 = vpop.permute.xlu0 %919  ;;  %3915 = vmatprep.subr.bf16.mxu1 %v6335_v36  ;;  %v1830_v6 = vrot.slane %v5214_v37, 3  ;;  %v682_v40 = vmul.f32 1.442695, %v595_v38 }
  0xac   : > { %v1502_v43 = vsel %vm1495_vm0, %v6352_v41, %v6351_v57  ;;  %6353 = vst [vmem:[#allocation4_spill] sm:$0xff] %v5271_v7  ;;  %6354 = vst [vmem:[#allocation15_spill] sm:$0xff] %v5273_v31  ;;  %v725_v41 = vadd.f32 1.0, %v5121_v46  ;;  %vm6274_vm3 = vcmp.eq.s32.totalorder %v5271_v7, 1  ;;  %vm6275_vm5 = vcmp.eq.s32.totalorder %v5273_v31, 1  ;;  %3821 = vmatpush3.bf16.msra.mxu0 %v4087_v17  ;;  %v5288_v57 = vpop.eup %4227 }
  0xad   : > { %3737 = vmatmul.mubr.bf16.gmra.mrb[8].mxu0 %v1502_v43  ;;  %v4088_v43 = vld [vmem:[%s6248_s4 + $0xa8] sm:$0xff]   ;;  %v3387_v46 = vunpack.c.h.bf16 %v5249_v34  ;;  %v1075_v28 = vsel %vm6274_vm3, %v4955_v45, 0.0  ;;  %v1074_v16 = vsel %vm6275_vm5, %v4967_v11, 0.0  ;;  %3822 = vmatprep.subr.bf16.mxu0 %v6335_v36  ;;  %v5298_v17 = vsel %vm1824_vm8, %v1828_v29, %v1830_v6  ;;  %v4280_v11 = vld [vmem:[%s6248_s4 + $0x18] sm:$0xff]   ;;  %v5311_v7 = vpop.eup %4229 }
  0xae   : > { %3740 = vmatprep.mubr.msk.bf16.mxu0 %vm4295_vm1, %v6335_v36  ;;  %v1832_v39 = vrot.slane %v5256_v15, 3  ;;  %v5301_v38 = vpack.c.bf16 %v1075_v28, %v1074_v16  ;;  %v680_v45 = vmul.f32 1.442695, %v594_v35  ;;  %3923 = vmatpush3.bf16.msra.mxu1 %v4280_v11  ;;  %v6356_v28 = vrot.slane %v5159_v32, 2  ;;  %v4089_v11 = vld [vmem:[%s6248_s4 + $0xb0] sm:$0xff]  }
  0xaf   : > { %v5313_v29 = vpop.permute.xlu1 %928  ;;  %v5315_v31 = vpop.permute.xlu0 %925  ;;  %v6357_v16 = vrot.slane %v5104_v60, 2  ;;  %v597_v56 = vsub.f32 0.0, %v5267_v44  ;;  %v5324_v30 = vadd.f32 %v5050_v51, %v451_v1  ;;  %3916 = vmatprep.subr.bf16.mxu1 %v6335_v36  ;;  %v3386_v1 = vunpack.c.l.bf16 %v5249_v34 }
  0xb0   : > { %6355 = vst [vmem:[#allocation16_spill] sm:$0xff] %v5313_v29  ;;  %v5328_v35 = vsel %vm1824_vm8, %v1830_v6, %v1832_v39  ;;  %vm6278_vm3 = vcmp.eq.s32.totalorder %v5313_v29, 1  ;;  %vm6279_vm5 = vcmp.eq.s32.totalorder %v5315_v31, 1  ;;  %3823 = vmatpush3.bf16.msra.mxu0 %v4088_v43  ;;  %4235 = vrcp.f32 %v725_v41 }
  0xb1   : > { %v1190_v26 = vsel %vm1183_vm6, %v6357_v16, %v6356_v28  ;;  %v454_v28 = vmul.f32 %v5015_v52, %v3387_v46  ;;  %v5337_v16 = vpop.eup %4231  ;;  %v1077_v6 = vsel %vm6278_vm3, %v4973_v59, 0.0  ;;  %v1076_v2 = vsel %vm6279_vm5, %v4978_v0, 0.0  ;;  %3824 = vmatprep.subr.bf16.mxu0 %v6335_v36  ;;  %v4281_v0 = vld [vmem:[%s6248_s4 + $0x20] sm:$0xff]  }
  0xb2   : > { %3637 = vmatmul.mubr.bf16.gmra.mrb[8].mxu1 %v1190_v26  ;;  %v724_v26 = vadd.f32 1.0, %v5172_v21  ;;  %v5349_v43 = vpack.c.bf16 %v1077_v6, %v1076_v2  ;;  %v6358_v34 = vrot.slane %v5159_v32, 1  ;;  %v6359_v46 = vrot.slane %v5104_v60, 1 }
  0xb3   : > { %3640 = vmatprep.mubr.msk.bf16.mxu1 %vm4295_vm1, %v6335_v36  ;;  %4237 = vpow2.f32 %v682_v40  ;;  %3924 = vmatpush3.bf16.msra.mxu1 %v4281_v0  ;;  %v1834_v41 = vrot.slane %v5301_v38, 3  ;;  %v5360_v29 = vpop.permute.xlu1 %934  ;;  %v5362_v21 = vpop.permute.xlu0 %931  ;;  %v6282_v2 = vrot.slane %v5214_v37, 2  ;;  %v686_v6 = vmul.f32 1.442695, %v597_v56  ;;  %v4090_v56 = vld [vmem:[%s6248_s4 + $0xb8] sm:$0xff]  }
  0xb4   : > { %v1504_v59 = vsel %vm1495_vm0, %v6359_v46, %v6358_v34  ;;  %6360 = vst [vmem:[#allocation17_spill] sm:$0xff] %v5360_v29  ;;  %6361 = vst [vmem:[#allocation18_spill] sm:$0xff] %v5362_v21  ;;  %4239 = vpow2.f32 %v680_v45  ;;  %v596_v60 = vsub.f32 0.0, %v5324_v30  ;;  %3917 = vmatprep.subr.bf16.mxu1 %v6335_v36  ;;  %v5367_v40 = vpop.eup %4233  ;;  %vm6280_vm3 = vcmp.eq.s32.totalorder %v5360_v29, 1  ;;  %3825 = vmatpush3.bf16.msra.mxu0 %v4089_v11 }
  0xb5   : > { %3741 = vmatmul.mubr.bf16.gmra.mrb[12].mxu0 %v1504_v59  ;;  %vm6281_vm5 = vcmp.eq.s32.totalorder %v5362_v21, 1  ;;  %v5374_v34 = vadd.f32 %v5050_v51, %v454_v28  ;;  %v453_v45 = vmul.f32 %v5015_v52, %v3386_v1  ;;  %v1079_v46 = vsel %vm6280_vm3, %v4985_v3, 0.0  ;;  %3826 = vmatprep.subr.bf16.mxu0 %v6335_v36  ;;  %v4282_v3 = vld [vmem:[%s6248_s4 + $0x28] sm:$0xff]  }
  0xb6   : > { %3744 = vmatprep.mubr.msk.bf16.mxu0 %vm4295_vm1, %v6335_v36  ;;  %v1078_v59 = vsel %vm6281_vm5, %v4991_v20, 0.0  ;;  %4241 = vrcp.f32 %v724_v26  ;;  %v5388_v11 = vsel %vm1824_vm8, %v1832_v39, %v1834_v41  ;;  %v727_v1 = vadd.f32 1.0, %v5233_v62 }
  0xb7   : > { %v5390_v28 = vpack.c.bf16 %v1079_v46, %v1078_v59  ;;  %3925 = vmatpush3.bf16.msra.mxu1 %v4282_v3  ;;  %v1836_v0 = vrot.slane %v5349_v43, 3  ;;  %v5398_v20 = vpop.permute.xlu1 %940  ;;  %v5400_v26 = vpop.permute.xlu0 %937  ;;  %v6364_v39 = vrot.slane %v5159_v32, 2  ;;  %v726_v59 = vadd.f32 1.0, %v5269_v10 }
  0xb8   : > { %6362 = vst [vmem:[#allocation19_spill] sm:$0xff] %v5398_v20  ;;  %6363 = vst [vmem:[#allocation20_spill] sm:$0xff] %v5400_v26  ;;  %4243 = vpow2.f32 %v686_v6  ;;  %v5408_v62 = vmul.f32 1.442695, %v596_v60  ;;  %3918 = vmatprep.subr.bf16.mxu1 %v6335_v36  ;;  %vm6283_vm3 = vcmp.eq.s32.totalorder %v5398_v20, 1  ;;  %vm6284_vm5 = vcmp.eq.s32.totalorder %v5400_v26, 1  ;;  %3827 = vmatpush3.bf16.msra.mxu0 %v4090_v56 }
  0xb9   : > { %v1192_v46 = vsel %vm1183_vm6, %v6364_v39, %v6282_v2  ;;  %v599_v3 = vsub.f32 0.0, %v5374_v34  ;;  %v5415_v52 = vadd.f32 %v5050_v51, %v453_v45  ;;  %v1081_v10 = vsel %vm6283_vm3, %v5000_v4, 0.0 }
  0xba   : > { %3641 = vmatmul.mubr.bf16.gmra.mrb[12].mxu1 %v1192_v46  ;;  %v1080_v6 = vsel %vm6284_vm5, %v5031_v47, 0.0  ;;  %v5426_v60 = vsel %vm1824_vm8, %v1834_v41, %v1836_v0  ;;  %v1838_v39 = vrot.slane %v5390_v28, 3  ;;  %v6365_v51 = vrot.slane %v5214_v37, 1  ;;  %v4283_v47 = vld [vmem:[%s6248_s4 + $0x30] sm:$0xff]   ;;  %v5440_v41 = vpop.eup %4235 }
  0xbb   : > { %3644 = vmatprep.mubr.msk.bf16.mxu1 %vm4295_vm1, %v6335_v36  ;;  %v5429_v46 = vpack.c.bf16 %v1081_v10, %v1080_v6  ;;  %v6366_v45 = vrot.slane %v5159_v32, 1  ;;  %4245 = vrcp.f32 %v727_v1  ;;  %v729_v56 = vadd.f32 1.0, %v5288_v57  ;;  %3926 = vmatpush3.bf16.msra.mxu1 %v4283_v47  ;;  %v5442_v2 = vpop.permute.xlu1 %946  ;;  %v5444_v10 = vpop.permute.xlu0 %943 }
  0xbc   : > { %6367 = vst [vmem:[#allocation21_spill] sm:$0xff] %v5442_v2  ;;  %6368 = vst [vmem:[#allocation22_spill] sm:$0xff] %v5444_v10  ;;  %v5450_v57 = vsel %vm1824_vm8, %v1836_v0, %v1838_v39  ;;  %3919 = vmatprep.subr.bf16.mxu1 %v6335_v36  ;;  %vm6291_vm3 = vcmp.eq.s32.totalorder %v5442_v2, 1  ;;  %vm6292_vm5 = vcmp.eq.s32.totalorder %v5444_v10, 1  ;;  %4247 = vrcp.f32 %v726_v59  ;;  %v4284_v59 = vld [vmem:[%s6248_s4 + $0x38] sm:$0xff]  }
  0xbd   : > { %v1506_v4 = vsel %vm1495_vm0, %v6366_v45, %v6365_v51  ;;  %v5453_v51 = vpop.eup %4237  ;;  %v6288_v45 = vrot.slane %v5429_v46, 2  ;;  %v1083_v0 = vsel %vm6291_vm3, %v5082_v61, 0.0  ;;  %v1082_v6 = vsel %vm6292_vm5, %v5108_v54, 0.0 }
  0xbe   : > { %3745 = vmatmul.mubr.bf16.gmra.mrb[16].mxu0 %v1506_v4  ;;  %v5461_v47 = vpop.eup %4239  ;;  %v1840_v1 = vrot.slane %v5429_v46, 3  ;;  %v5470_v32 = vpack.c.bf16 %v1083_v0, %v1082_v6  ;;  %v6369_v4 = vrot.slane %v5390_v28, 2  ;;  %v6370_v61 = vrot.slane %v5429_v46, 1 }
  0xbf   : > { %3748 = vmatprep.mubr.msk.bf16.mxu0 %vm4295_vm1, %v6335_v36  ;;  %v6371_v2 = vrot.slane %v5390_v28, 1  ;;  %3927 = vmatpush3.bf16.msra.mxu1 %v4284_v59  ;;  %v5492_v0 = vpop.permute.xlu1 %952  ;;  %v5494_v20 = vpop.permute.xlu0 %949  ;;  %v5510_v59 = vmul.f32 %v5157_v25, %v4885_v48  ;;  %4249 = vrcp.f32 %v729_v56  ;;  %v6376_v25 = vrot.slane %v5256_v15, 1 }
  0xc0   : > { %v5478_v26 = vsel %vm1183_vm6, %v6369_v4, %v6288_v45  ;;  %v5490_v6 = vpop.eup %4241  ;;  %6372 = vst [vmem:[#allocation23_spill] sm:$0xff] %v5492_v0  ;;  %6373 = vst [vmem:[#allocation24_spill] sm:$0xff] %v5494_v20  ;;  %v6374_v4 = vrot.slane %v5256_v15, 2  ;;  %v6375_v45 = vrot.slane %v5214_v37, 2  ;;  %v5504_v29 = vsel %vm1824_vm8, %v1838_v39, %v1840_v1 }
  0xc1   : > { %v5485_v54 = vsel %vm1495_vm0, %v6371_v2, %v6370_v61  ;;  %v728_v2 = vadd.f32 1.0, %v5311_v7  ;;  %v598_v61 = vsub.f32 0.0, %v5415_v52  ;;  %vm6296_vm3 = vcmp.eq.s32.totalorder %v5492_v0, 1 }
  0xc2   : > { %v1194_v10 = vsel %vm1183_vm6, %v6375_v45, %v6374_v4  ;;  %vm6297_vm5 = vcmp.eq.s32.totalorder %v5494_v20, 1  ;;  %v5512_v21 = vpop.eup %4243  ;;  %v1085_v7 = vsel %vm6296_vm3, %v5130_v14, 0.0  ;;  %v1842_v45 = vrot.slane %v5470_v32, 3 }
  0xc3   : > { %3645 = vmatmul.mubr.bf16.gmra.mrb[16].mxu1 %v1194_v10  ;;  %v1084_v39 = vsel %vm6297_vm5, %v5155_v50, 0.0  ;;  %v731_v10 = vadd.f32 1.0, %v5337_v16  ;;  %v6377_v56 = vrot.slane %v5214_v37, 1  ;;  %4251 = vpow2.f32 %v5408_v62  ;;  %v5532_v0 = vpop.permute.xlu1 %958  ;;  %v5534_v50 = vpop.permute.xlu0 %955 }
  0xc4   : > { %3648 = vmatprep.mubr.msk.bf16.mxu1 %vm4295_vm1, %v6335_v36  ;;  %v5524_v48 = vpack.c.bf16 %v1085_v7, %v1084_v39  ;;  %v690_v14 = vmul.f32 1.442695, %v599_v3  ;;  %6378 = vst [vmem:[#allocation25_spill] sm:$0xff] %v5532_v0  ;;  %4253 = vrcp.f32 %v728_v2  ;;  %v688_v20 = vmul.f32 1.442695, %v598_v61 }
  0xc5   : > { %v1508_v4 = vsel %vm1495_vm0, %v6377_v56, %v6376_v25  ;;  %v5538_v7 = vsel %vm1824_vm8, %v1840_v1, %v1842_v45  ;;  %v4246_v39 = vpop.eup %4245  ;;  %vm6299_vm3 = vcmp.eq.s32.totalorder %v5532_v0, 1  ;;  %vm6300_vm5 = vcmp.eq.s32.totalorder %v5534_v50, 1 }
  0xc6   : > { %3749 = vmatmul.mubr.bf16.gmra.mrb[20].mxu0 %v1508_v4  ;;  %v1519_v37 = vrot.slane %v5524_v48, 1  ;;  %v6301_v62 = vrot.slane %v5470_v32, 1  ;;  %v1087_v3 = vsel %vm6299_vm3, %v5199_v12, 0.0  ;;  %v1086_v1 = vsel %vm6300_vm5, %v5207_v19, 0.0  ;;  %v4248_v16 = vpop.eup %4247 }
  0xc7   : > { %3752 = vmatprep.mubr.msk.bf16.mxu0 %vm4295_vm1, %v6335_v36  ;;  %v730_v2 = vadd.f32 1.0, %v5367_v40  ;;  %v1844_v61 = vrot.slane %v5524_v48, 3  ;;  %v5554_v25 = vpack.c.bf16 %v1087_v3, %v1086_v1  ;;  %4255 = vpow2.f32 %v690_v14  ;;  %v5562_v12 = vpop.permute.xlu1 %964  ;;  %v5564_v0 = vpop.permute.xlu0 %961 }
  0xc8   : > { %v5560_v4 = vsel %vm1495_vm0, %v6301_v62, %v1519_v37  ;;  %6379 = vst [vmem:[#allocation26_spill] sm:$0xff] %v5562_v12  ;;  %6380 = vst [vmem:[#allocation27_spill] sm:$0xff] %v5564_v0  ;;  %v6381_v19 = vrot.slane %v5301_v38, 2  ;;  %v6382_v40 = vrot.slane %v5256_v15, 2  ;;  %v814_v1 = vmul.f32 %v5202_v49, %v4892_v33 }
  0xc9   : > { %4257 = vpow2.f32 %v688_v20  ;;  %v5574_v14 = vsel %vm1824_vm8, %v1842_v45, %v1844_v61  ;;  %vm6303_vm3 = vcmp.eq.s32.totalorder %v5562_v12, 1  ;;  %vm6304_vm5 = vcmp.eq.s32.totalorder %v5564_v0, 1  ;;  %v4250_v45 = vpop.eup %4249 }
  0xca   : > { %v1196_v3 = vsel %vm1183_vm6, %v6382_v40, %v6381_v19  ;;  %4259 = vrcp.f32 %v731_v10  ;;  %v1846_v62 = vrot.slane %v5554_v25, 3  ;;  %v1089_v56 = vsel %vm6303_vm3, %v5246_v5, 0.0 }
  0xcb   : > { %3649 = vmatmul.mubr.bf16.gmra.mrb[20].mxu1 %v1196_v3  ;;  %v1088_v33 = vsel %vm6304_vm5, %v5306_v63, 0.0  ;;  %v733_v49 = vadd.f32 1.0, %v5453_v51  ;;  %v1521_v20 = vrot.slane %v5554_v25, 1  ;;  %v6383_v10 = vrot.slane %v5301_v38, 1  ;;  %v5599_v63 = vpop.permute.xlu1 %970  ;;  %v5601_v12 = vpop.permute.xlu0 %967 }
  0xcc   : > { %3652 = vmatprep.mubr.msk.bf16.mxu1 %vm4295_vm1, %v6335_v36  ;;  %v5589_v19 = vpack.c.bf16 %v1089_v56, %v1088_v33  ;;  %v6384_v40 = vrot.slane %v5256_v15, 1  ;;  %4261 = vrcp.f32 %v730_v2  ;;  %v5597_v3 = vsel %vm1824_vm8, %v1844_v61, %v1846_v62  ;;  %6385 = vst [vmem:[#allocation28_spill] sm:$0xff] %v5599_v63  ;;  %6386 = vst [vmem:[#allocation29_spill] sm:$0xff] %v5601_v12 }
  0xcd   : > { %v817_v51 = vmul.f32 %v5440_v41, %v4958_v24  ;;  %v816_v56 = vmul.f32 %v5490_v6, %v4961_v58  ;;  %v5609_v15 = vsel %vm1495_vm0, %v1519_v37, %v1521_v20  ;;  %v4252_v2 = vpop.eup %4251  ;;  %vm6306_vm3 = vcmp.eq.s32.totalorder %v5599_v63, 1 }
  0xce   : > { %v1510_v5 = vsel %vm1495_vm0, %v6384_v40, %v6383_v10  ;;  %vm6307_vm5 = vcmp.eq.s32.totalorder %v5601_v12, 1  ;;  %v732_v61 = vadd.f32 1.0, %v5461_v47  ;;  %v1848_v24 = vrot.slane %v5589_v19, 3  ;;  %v4254_v41 = vpop.eup %4253 }
  0xcf   : > { %3753 = vmatmul.mubr.bf16.gmra.mrb[24].mxu0 %v1510_v5  ;;  %v1091_v58 = vsel %vm6306_vm3, %v5510_v59, 0.0  ;;  %v1090_v6 = vsel %vm6307_vm5, %v814_v1, 0.0  ;;  %4263 = vrcp.f32 %v733_v49  ;;  %v1523_v37 = vrot.slane %v5589_v19, 1  ;;  %v5630_v33 = vpop.permute.xlu1 %976  ;;  %v5632_v0 = vpop.permute.xlu0 %973 }
  0xd0   : > { %3756 = vmatprep.mubr.msk.bf16.mxu0 %vm4295_vm1, %v6335_v36  ;;  %v5623_v10 = vpack.c.bf16 %v1091_v58, %v1090_v6  ;;  %v735_v5 = vadd.f32 1.0, %v5512_v21  ;;  %v5628_v47 = vsel %vm1824_vm8, %v1846_v62, %v1848_v24  ;;  %6387 = vst [vmem:[#allocation30_spill] sm:$0xff] %v5630_v33  ;;  %v6388_v59 = vrot.slane %v5349_v43, 2 }
  0xd1   : > { %v6389_v1 = vrot.slane %v5301_v38, 2  ;;  %v819_v58 = vmul.f32 %v4246_v39, %v4964_v9  ;;  %v734_v6 = vadd.f32 1.0, %v4252_v2  ;;  %v5641_v40 = vsel %vm1495_vm0, %v1521_v20, %v1523_v37  ;;  %v4256_v21 = vpop.eup %4255 }
  0xd2   : > { %vm6311_vm3 = vcmp.eq.s32.totalorder %v5630_v33, 1  ;;  %vm6312_vm5 = vcmp.eq.s32.totalorder %v5632_v0, 1  ;;  %4265 = vrcp.f32 %v732_v61  ;;  %v1850_v62 = vrot.slane %v5623_v10, 3 }
  0xd3   : > { %v1198_v49 = vsel %vm1183_vm6, %v6389_v1, %v6388_v59  ;;  %v4258_v63 = vpop.eup %4257  ;;  %v1093_v12 = vsel %vm6311_vm3, %v817_v51, 0.0  ;;  %v1092_v9 = vsel %vm6312_vm5, %v816_v56, 0.0  ;;  %v818_v39 = vmul.f32 %v4248_v16, %v4970_v18  ;;  %v5664_v56 = vpop.permute.xlu1 %982 }
  0xd4   : > { %3653 = vmatmul.mubr.bf16.gmra.mrb[24].mxu1 %v1198_v49  ;;  %v1525_v20 = vrot.slane %v5623_v10, 1  ;;  %v4260_v2 = vpop.eup %4259  ;;  %v5654_v59 = vpack.c.bf16 %v1093_v12, %v1092_v9  ;;  %v6390_v61 = vrot.slane %v5349_v43, 1  ;;  %v6391_v1 = vrot.slane %v5301_v38, 1  ;;  %v5666_v18 = vpop.permute.xlu0 %979 }
  0xd5   : > { %3656 = vmatprep.mubr.msk.bf16.mxu1 %vm4295_vm1, %v6335_v36  ;;  %4267 = vrcp.f32 %v735_v5  ;;  %v5662_v51 = vsel %vm1824_vm8, %v1848_v24, %v1850_v62  ;;  %v821_v16 = vmul.f32 %v4250_v45, %v4994_v23  ;;  %v737_v12 = vadd.f32 1.0, %v4256_v21 }
  0xd6   : > { %v1512_v49 = vsel %vm1495_vm0, %v6391_v1, %v6390_v61  ;;  %4269 = vrcp.f32 %v734_v6  ;;  %v5670_v9 = vsel %vm1495_vm0, %v1523_v37, %v1525_v20  ;;  %v4262_v33 = vpop.eup %4261  ;;  %vm6313_vm3 = vcmp.eq.s32.totalorder %v5664_v56, 1 }
  0xd7   : > { %3757 = vmatmul.mubr.bf16.gmra.mrb[28].mxu0 %v1512_v49  ;;  %vm6314_vm5 = vcmp.eq.s32.totalorder %v5666_v18, 1  ;;  %v736_v38 = vadd.f32 1.0, %v4258_v63  ;;  %v1852_v24 = vrot.slane %v5654_v59, 3  ;;  %v1095_v5 = vsel %vm6313_vm3, %v819_v58, 0.0  ;;  %v5688_v1 = vpop.permute.xlu1 %988 }
  0xd8   : > { %3760 = vmatprep.mubr.msk.bf16.mxu0 %vm4295_vm1, %v6335_v36  ;;  %v1094_v23 = vsel %vm6314_vm5, %v818_v39, 0.0  ;;  %v820_v45 = vmul.f32 %v4254_v41, %v4997_v8  ;;  %v1527_v37 = vrot.slane %v5654_v59, 1  ;;  %6392 = vst [vmem:[#allocation31_spill] sm:$0xff] %v5688_v1  ;;  %v5690_v63 = vpop.permute.xlu0 %985  ;;  %v6393_v49 = vrot.slane %v5390_v28, 2 }
  0xd9   : > { %v5683_v6 = vpack.c.bf16 %v1095_v5, %v1094_v23  ;;  %v5686_v21 = vsel %vm1824_vm8, %v1850_v62, %v1852_v24  ;;  %v4264_v61 = vpop.eup %4263  ;;  %v6394_v58 = vrot.slane %v5349_v43, 2  ;;  %v823_v8 = vmul.f32 %v4260_v2, %v5053_v13 }
  0xda   : > { %4271 = vrcp.f32 %v737_v12  ;;  %v5699_v41 = vsel %vm1495_vm0, %v1525_v20, %v1527_v37  ;;  %vm6315_vm3 = vcmp.eq.s32.totalorder %v5688_v1, 1  ;;  %vm6316_vm5 = vcmp.eq.s32.totalorder %v5690_v63, 1 }
  0xdb   : > { %v1200_v39 = vsel %vm1183_vm6, %v6394_v58, %v6393_v49  ;;  %4273 = vrcp.f32 %v736_v38  ;;  %v1854_v62 = vrot.slane %v5683_v6, 3  ;;  %v1097_v5 = vsel %vm6315_vm3, %v821_v16, 0.0 }
  0xdc   : > { %3657 = vmatmul.mubr.bf16.gmra.mrb[28].mxu1 %v1200_v39  ;;  %v1096_v23 = vsel %vm6316_vm5, %v820_v45, 0.0  ;;  %v822_v13 = vmul.f32 %v4262_v33, %v5063_v27  ;;  %v1529_v20 = vrot.slane %v5683_v6, 1  ;;  %v4266_v2 = vpop.eup %4265  ;;  %v6395_v38 = vrot.slane %v5390_v28, 1  ;;  %v5722_v45 = vpop.permute.xlu1 %994 }
  0xdd   : > { %3660 = vmatprep.mubr.msk.bf16.mxu1 %vm4295_vm1, %v6335_v36  ;;  %v5712_v12 = vpack.c.bf16 %v1097_v5, %v1096_v23  ;;  %v6396_v49 = vrot.slane %v5349_v43, 1  ;;  %v5720_v16 = vsel %vm1824_vm8, %v1852_v24, %v1854_v62  ;;  %6397 = vst [vmem:[#allocation32_spill] sm:$0xff] %v5722_v45  ;;  %v5724_v27 = vpop.permute.xlu0 %991  ;;  %vm6318_vm3 = vcmp.eq.s32.totalorder %v5722_v45, 1 }
  0xde   : > { %v5727_v33 = vsel %vm1495_vm0, %v1527_v37, %v1529_v20  ;;  %vm6319_vm5 = vcmp.eq.s32.totalorder %v5724_v27, 1  ;;  %v825_v43 = vmul.f32 %v4264_v61, %v5182_v53  ;;  %v1099_v5 = vsel %vm6318_vm3, %v823_v8, 0.0 }
  0xdf   : > { %v1514_v58 = vsel %vm1495_vm0, %v6396_v49, %v6395_v38  ;;  %v4268_v39 = vpop.eup %4267  ;;  %v1856_v28 = vrot.slane %v5712_v12, 3  ;;  %v1098_v37 = vsel %vm6319_vm5, %v822_v13, 0.0  ;;  %v824_v23 = vmul.f32 %v4266_v2, %v5185_v22 }
  0xe0   : > { %3761 = vmatmul.mubr.bf16.gmra.mrb[32].mxu0 %v1514_v58  ;;  %v4270_v24 = vpop.eup %4269  ;;  %v1531_v38 = vrot.slane %v5712_v12, 1  ;;  %v5741_v49 = vpack.c.bf16 %v1099_v5, %v1098_v37  ;;  %v5746_v61 = vpop.permute.xlu1 %1000  ;;  %v827_v22 = vmul.f32 %v4268_v39, %v5267_v44 }
  0xe1   : > { %3764 = vmatprep.mubr.msk.bf16.mxu0 %vm4295_vm1, %v6335_v36  ;;  %v5744_v53 = vsel %vm1824_vm8, %v1854_v62, %v1856_v28  ;;  %6398 = vst [vmem:[#allocation33_spill] sm:$0xff] %v5746_v61  ;;  %v5748_v58 = vpop.permute.xlu0 %997  ;;  %vm6321_vm3 = vcmp.eq.s32.totalorder %v5746_v61, 1 }
  0xe2   : > { %6399 = vst [vmem:[#allocation34_spill] sm:$0xff] %v5748_v58  ;;  %v5751_v1 = vsel %vm1495_vm0, %v1529_v20, %v1531_v38  ;;  %vm6322_vm5 = vcmp.eq.s32.totalorder %v5748_v58, 1  ;;  %v1858_v8 = vrot.slane %v5741_v49, 3  ;;  %v1101_v62 = vsel %vm6321_vm3, %v825_v43, 0.0 }
  0xe3   : > { %v1100_v2 = vsel %vm6322_vm5, %v824_v23, 0.0  ;;  %v826_v20 = vmul.f32 %v4270_v24, %v5324_v30  ;;  %v1533_v5 = vrot.slane %v5741_v49, 1  ;;  %v1203_v43 = vrot.slane %v5470_v32, 2 }
  0xe4   : > { %3661 = vmatmul.mubr.bf16.gmra.mrb[32].mxu1 %v5478_v26  ;;  %v4272_v13 = vpop.eup %4271  ;;  %v5766_v26 = vpack.c.bf16 %v1101_v62, %v1100_v2  ;;  %v5769_v44 = vsel %vm1824_vm8, %v1856_v28, %v1858_v8  ;;  %v1007_v39 = vpop.permute.xlu1 %1006 }
  0xe5   : > { %3664 = vmatprep.mubr.msk.bf16.mxu1 %vm4295_vm1, %v6335_v36  ;;  %v4274_v37 = vpop.eup %4273  ;;  %v5771_v45 = vpop.permute.xlu0 %1003  ;;  %v5776_v30 = vsel %vm1495_vm0, %v1531_v38, %v1533_v5  ;;  %vm1057_vm3 = vcmp.eq.s32.totalorder %v1007_v39, 1  ;;  %v829_v24 = vmul.f32 %v4272_v13, %v5374_v34  ;;  %v6400_v13 = vrot.slane %v5429_v46, 2 }
  0xe6   : > { %vm6325_vm5 = vcmp.eq.s32.totalorder %v5771_v45, 1  ;;  %v1860_v28 = vrot.slane %v5766_v26, 3  ;;  %v1103_v23 = vsel %vm1057_vm3, %v827_v22, 0.0  ;;  %v1535_v2 = vrot.slane %v5766_v26, 1 }
  0xe7   : > { %v1102_v62 = vsel %vm6325_vm5, %v826_v20, 0.0  ;;  %v1204_v58 = vsel %vm1183_vm6, %v6400_v13, %v1203_v43 }
  0xe8   : > { %3765 = vmatmul.mubr.bf16.gmra.mrb[36].mxu0 %v5485_v54  ;;  %v828_v54 = vmul.f32 %v4274_v37, %v5415_v52  ;;  %v5787_v38 = vpack.c.bf16 %v1103_v23, %v1102_v62  ;;  %v5790_v39 = vsel %vm1824_vm8, %v1858_v8, %v1860_v28  ;;  %v1013_v61 = vpop.permute.xlu1 %1012  ;;  %v5798_v22 = vsel %vm1495_vm0, %v1533_v5, %v1535_v2 }
  0xe9   : > { %3768 = vmatprep.mubr.msk.bf16.mxu0 %vm4295_vm1, %v6335_v36  ;;  %v1010_v34 = vpop.permute.xlu0 %1009  ;;  %vm1059_vm3 = vcmp.eq.s32.totalorder %v1013_v61, 1  ;;  %v6401_v23 = vrot.slane %v5470_v32, 1  ;;  %v6402_v62 = vrot.slane %v5429_v46, 1  ;;  %v1205_v61 = vrot.slane %v5524_v48, 2 }
  0xea   : > { %v1862_v52 = vrot.slane %v5787_v38, 3  ;;  %vm1058_vm5 = vcmp.eq.s32.totalorder %v1010_v34, 1  ;;  %v1105_v20 = vsel %vm1059_vm3, %v829_v24, 0.0  ;;  %v1207_v46 = vrot.slane %v5554_v25, 2 }
  0xeb   : > { %v1104_v37 = vsel %vm1058_vm5, %v828_v54, 0.0  ;;  %v1518_v13 = vsel %vm1495_vm0, %v6402_v62, %v6401_v23  ;;  %v1206_v32 = vsel %vm1183_vm6, %v1203_v43, %v1205_v61  ;;  %v1209_v43 = vrot.slane %v5589_v19, 2 }
  0xec   : > { %3665 = vmatmul.mubr.bf16.gmra.mrb[36].mxu1 %v1204_v58  ;;  %v1128_v8 = vpack.c.bf16 %v1105_v20, %v1104_v37  ;;  %v5809_v5 = vsel %vm1824_vm8, %v1860_v28, %v1862_v52  ;;  %v1208_v48 = vsel %vm1183_vm6, %v1205_v61, %v1207_v46  ;;  %v1211_v25 = vrot.slane %v5623_v10, 2 }
  0xed   : > { %3668 = vmatprep.mubr.msk.bf16.mxu1 %vm4295_vm1, %v6335_v36  ;;  %v1213_v19 = vrot.slane %v5654_v59, 2  ;;  %v1215_v10 = vrot.slane %v5683_v6, 2  ;;  %v1217_v59 = vrot.slane %v5712_v12, 2  ;;  %v1219_v6 = vrot.slane %v5741_v49, 2 }
  0xee   : > { %v5812_v34 = vrot.slane %v1128_v8, 3  ;;  %v1221_v12 = vrot.slane %v5766_v26, 2  ;;  %v1223_v49 = vrot.slane %v5787_v38, 2  ;;  %vm6440_vm3 = vcmp.eq.s32.totalorder %v5534_v50, 1 }
  0xf0   : > { %3769 = vmatmul.mubr.bf16.gmra.mrb[40].mxu0 %v1518_v13  ;;  %v5818_v58 = vsel %vm1824_vm8, %v1862_v52, %v5812_v34 }
  0xf1   : > { %3828 = vmatprep.mubr.msk.bf16.mxu0 %vm4295_vm1, %v6335_v36 }
  0xf4   : > { %3669 = vmatmul.mubr.bf16.gmra.mrb[40].mxu1 %v1206_v32 }
  0xf5   : > { %3672 = vmatprep.mubr.msk.bf16.mxu1 %vm4295_vm1, %v6335_v36 }
  0xf8   : > { %3829 = vmatmul.mubr.bf16.vlgmr.msra.gmra.mrb[0].mxu0 %v5170_v55  ;;  %v1210_v55 = vsel %vm1183_vm6, %v1207_v46, %v1209_v43 }
  0xf9   : > { %3832 = vmatprep.mubr.msk.bf16.mxu0 %vm4295_vm1, %v6335_v36 }
  0xfc   : > { %3673 = vmatmul.mubr.bf16.gmra.mrb[44].mxu1 %v1208_v48 }
  0xfd   : > { %3676 = vmatprep.mubr.msk.bf16.mxu1 %vm4295_vm1, %v6335_v36 }
 0x100   : > { %3833 = vmatmul.mubr.bf16.gmra.mrb[4].mxu0 %v5254_v42  ;;  %v1212_v42 = vsel %vm1183_vm6, %v1209_v43, %v1211_v25 }
 0x101   : > { %3836 = vmatprep.mubr.msk.bf16.mxu0 %vm4295_vm1, %v6335_v36 }
 0x104   : > { %3677 = vmatmul.mubr.bf16.gmra.mrb[48].mxu1 %v1210_v55 }
 0x105   : > { %3680 = vmatprep.mubr.msk.bf16.mxu1 %vm4295_vm1, %v6335_v36 }
 0x108   : > { %3837 = vmatmul.mubr.bf16.gmra.mrb[8].mxu0 %v5298_v17  ;;  %v1214_v17 = vsel %vm1183_vm6, %v1211_v25, %v1213_v19 }
 0x109   : > { %3840 = vmatprep.mubr.msk.bf16.mxu0 %vm4295_vm1, %v6335_v36 }
 0x10c   : > { %3681 = vmatmul.mubr.bf16.gmra.mrb[52].mxu1 %v1212_v42 }
 0x10d   : > { %3684 = vmatprep.mubr.msk.bf16.mxu1 %vm4295_vm1, %v6335_v36 }
 0x110   : > { %3841 = vmatmul.mubr.bf16.gmra.mrb[12].mxu0 %v5328_v35  ;;  %v1216_v35 = vsel %vm1183_vm6, %v1213_v19, %v1215_v10 }
 0x111   : > { %3844 = vmatprep.mubr.msk.bf16.mxu0 %vm4295_vm1, %v6335_v36 }
 0x114   : > { %3685 = vmatmul.mubr.bf16.gmra.mrb[56].mxu1 %v1214_v17 }
 0x115   : > { %3688 = vmatprep.mubr.msk.bf16.mxu1 %vm4295_vm1, %v6335_v36 }
 0x118   : > { %3845 = vmatmul.mubr.bf16.gmra.mrb[16].mxu0 %v5388_v11  ;;  %v1218_v11 = vsel %vm1183_vm6, %v1215_v10, %v1217_v59 }
 0x119   : > { %3848 = vmatprep.mubr.msk.bf16.mxu0 %vm4295_vm1, %v6335_v36 }
 0x11c   : > { %3689 = vmatmul.mubr.bf16.gmra.mrb[60].mxu1 %v1216_v35 }
 0x11d   : > { %3692 = vmatprep.mubr.msk.bf16.mxu1 %vm4295_vm1, %v6335_v36 }
 0x120   : > { %3849 = vmatmul.mubr.bf16.gmra.mrb[20].mxu0 %v5426_v60  ;;  %v1220_v60 = vsel %vm1183_vm6, %v1217_v59, %v1219_v6 }
 0x121   : > { %3852 = vmatprep.mubr.msk.bf16.mxu0 %vm4295_vm1, %v6335_v36 }
 0x124   : > { %3693 = vmatmul.mubr.bf16.gmra.mrb[64].mxu1 %v1218_v11 }
 0x125   : > { %3696 = vmatprep.mubr.msk.bf16.mxu1 %vm4295_vm1, %v6335_v36 }
 0x128   : > { %3853 = vmatmul.mubr.bf16.gmra.mrb[24].mxu0 %v5450_v57  ;;  %v1222_v57 = vsel %vm1183_vm6, %v1219_v6, %v1221_v12 }
 0x129   : > { %3856 = vmatprep.mubr.msk.bf16.mxu0 %vm4295_vm1, %v6335_v36 }
 0x12c   : > { %3697 = vmatmul.mubr.bf16.gmra.mrb[68].mxu1 %v1220_v60 }
 0x12d   : > { %3700 = vmatprep.mubr.msk.bf16.mxu1 %vm4295_vm1, %v6335_v36 }
 0x130   : > { %3857 = vmatmul.mubr.bf16.gmra.mrb[28].mxu0 %v5504_v29  ;;  %v1224_v29 = vsel %vm1183_vm6, %v1221_v12, %v1223_v49 }
 0x131   : > { %3860 = vmatprep.mubr.msk.bf16.mxu0 %vm4295_vm1, %v6335_v36 }
 0x134   : > { %3701 = vmatmul.mubr.bf16.gmra.mrb[72].mxu1 %v1222_v57 }
 0x135   : > { %3704 = vmatprep.mubr.msk.bf16.mxu1 %vm4295_vm1, %v6335_v36 }
 0x138   : > { %3861 = vmatmul.mubr.bf16.gmra.mrb[32].mxu0 %v5538_v7 }
 0x139   : > { %3864 = vmatprep.mubr.msk.bf16.mxu0 %vm4295_vm1, %v6335_v36 }
 0x13c   : > { %3705 = vmatmul.mubr.bf16.gmra.mrb[76].mxu1 %v1224_v29 }
 0x13d   : > { %3708 = vmatprep.mubr.msk.bf16.mxu1 %vm4295_vm1, %v6335_v36 }
 0x140   : > { %3865 = vmatmul.mubr.bf16.gmra.mrb[36].mxu0 %v5574_v14 }
 0x141   : > { %3868 = vmatprep.mubr.msk.bf16.mxu0 %vm4295_vm1, %v6335_v36 }
 0x144   : > { %3709 = vmatmul.mubr.bf16.gmra.mrb[80].mxu1 %v1223_v49 }
 0x145   : > { %3772 = vmatprep.mubr.msk.bf16.mxu1 %vm4295_vm1, %v6335_v36 }
 0x148   : > { %3869 = vmatmul.mubr.bf16.gmra.mrb[40].mxu0 %v5597_v3 }
 0x149   : > { %3872 = vmatprep.mubr.msk.bf16.mxu0 %vm4295_vm1, %v6335_v36 }
 0x14c   : > { %3773 = vmatmul.mubr.bf16.vlgmr.msra.gmra.mrb[44].mxu1 %v5560_v4 }
 0x14d   : > { %3776 = vmatprep.mubr.msk.bf16.mxu1 %vm4295_vm1, %v6335_v36 }
 0x150   : > { %3873 = vmatmul.mubr.bf16.gmra.mrb[44].mxu0 %v5628_v47 }
 0x151   : > { %3876 = vmatprep.mubr.msk.bf16.mxu0 %vm4295_vm1, %v6335_v36 }
 0x154   : > { %3777 = vmatmul.mubr.bf16.gmra.mrb[48].mxu1 %v5609_v15 }
 0x155   : > { %3780 = vmatprep.mubr.msk.bf16.mxu1 %vm4295_vm1, %v6335_v36 }
 0x158   : > { %3877 = vmatmul.mubr.bf16.gmra.mrb[48].mxu0 %v5662_v51 }
 0x159   : > { %3880 = vmatprep.mubr.msk.bf16.mxu0 %vm4295_vm1, %v6335_v36 }
 0x15c   : > { %3781 = vmatmul.mubr.bf16.gmra.mrb[52].mxu1 %v5641_v40 }
 0x15d   : > { %3784 = vmatprep.mubr.msk.bf16.mxu1 %vm4295_vm1, %v6335_v36 }
 0x160   : > { %3881 = vmatmul.mubr.bf16.gmra.mrb[52].mxu0 %v5686_v21 }
 0x161   : > { %3884 = vmatprep.mubr.msk.bf16.mxu0 %vm4295_vm1, %v6335_v36 }
 0x164   : > { %3785 = vmatmul.mubr.bf16.gmra.mrb[56].mxu1 %v5670_v9 }
 0x165   : > { %3788 = vmatprep.mubr.msk.bf16.mxu1 %vm4295_vm1, %v6335_v36 }
 0x168   : > { %3885 = vmatmul.mubr.bf16.gmra.mrb[56].mxu0 %v5720_v16 }
 0x169   : > { %3888 = vmatprep.mubr.msk.bf16.mxu0 %vm4295_vm1, %v6335_v36 }
 0x16c   : > { %3789 = vmatmul.mubr.bf16.gmra.mrb[60].mxu1 %v5699_v41 }
 0x16d   : > { %3792 = vmatprep.mubr.msk.bf16.mxu1 %vm4295_vm1, %v6335_v36 }
 0x170   : > { %3889 = vmatmul.mubr.bf16.gmra.mrb[60].mxu0 %v5744_v53 }
 0x171   : > { %3892 = vmatprep.mubr.msk.bf16.mxu0 %vm4295_vm1, %v6335_v36 }
 0x172   : > { %v1328_v7 = vpop.f32.mrb[0].mxu1 }
 0x173   : > { %v3630_v4 = vpop.f32.mrb[1].mxu1 }
 0x174   : > { %3793 = vmatmul.mubr.bf16.gmra.mrb[64].mxu1 %v5727_v33  ;;  %v1331_v14 = vpop.f32.mrb[2].mxu1 }
 0x175   : > { %3796 = vmatprep.mubr.msk.bf16.mxu1 %vm4295_vm1, %v6335_v36  ;;  %v3631_v3 = vpop.f32.mrb[3].mxu1 }
 0x178   : > { %3893 = vmatmul.mubr.bf16.gmra.mrb[64].mxu0 %v5769_v44 }
 0x179   : > { %3896 = vmatprep.mubr.msk.bf16.mxu0 %vm4295_vm1, %v6335_v36 }
 0x17c   : > { %3797 = vmatmul.mubr.bf16.gmra.mrb[68].mxu1 %v5751_v1  ;;  %v5933_v15 = vpop.f32.mrb[4].mxu1 }
 0x17d   : > { %3800 = vmatprep.mubr.msk.bf16.mxu1 %vm4295_vm1, %v6335_v36  ;;  %v3634_v40 = vpop.f32.mrb[5].mxu1 }
 0x17e   : > { %v5938_v47 = vpop.f32.mrb[6].mxu1 }
 0x17f   : > { %v3635_v51 = vpop.f32.mrb[7].mxu1 }
 0x180   : > { %3897 = vmatmul.mubr.bf16.gmra.mrb[68].mxu0 %v5790_v39 }
 0x181   : > { %3900 = vmatprep.mubr.msk.bf16.mxu0 %vm4295_vm1, %v6335_v36 }
 0x184   : > { %3801 = vmatmul.mubr.bf16.gmra.mrb[72].mxu1 %v5776_v30 }
 0x185   : > { %3804 = vmatprep.mubr.msk.bf16.mxu1 %vm4295_vm1, %v6335_v36  ;;  %v5943_v9 = vpop.f32.mrb[8].mxu1 }
 0x186   : > { %v3638_v21 = vpop.f32.mrb[9].mxu1 }
 0x187   : > { %v5948_v1 = vpop.f32.mrb[10].mxu1 }
 0x188   : > { %3901 = vmatmul.mubr.bf16.gmra.mrb[72].mxu0 %v5809_v5  ;;  %v3639_v41 = vpop.f32.mrb[11].mxu1 }
 0x189   : > { %3904 = vmatprep.mubr.msk.bf16.mxu0 %vm4295_vm1, %v6335_v36 }
 0x18c   : > { %3805 = vmatmul.mubr.bf16.gmra.mrb[76].mxu1 %v5798_v22 }
 0x18d   : > { %3808 = vmatprep.mubr.msk.bf16.mxu1 %vm4295_vm1, %v6335_v36  ;;  %v5953_v16 = vpop.f32.mrb[12].mxu1 }
 0x18e   : > { %v3642_v33 = vpop.f32.mrb[13].mxu1 }
 0x18f   : > { %v5958_v53 = vpop.f32.mrb[14].mxu1 }
 0x190   : > { %3905 = vmatmul.mubr.bf16.gmra.mrb[76].mxu0 %v5818_v58  ;;  %v3643_v44 = vpop.f32.mrb[15].mxu1 }
 0x191   : > { %3908 = vmatprep.mubr.msk.bf16.mxu0 %vm4295_vm1, %v6335_v36  ;;  %vm2217_vm1 = vcmask 1043456  }
 0x194   : > { %3809 = vmatmul.mubr.bf16.gmra.mrb[80].mxu1 %v1535_v2 }
 0x196   : > { %v5962_v30 = vpop.f32.mrb[16].mxu1 }
 0x197   : > { %v3646_v24 = vpop.f32.mrb[17].mxu1 }
 0x198   : > { %3909 = vmatmul.mubr.bf16.gmra.mrb[80].mxu0 %v5812_v34  ;;  %v5965_v28 = vpop.f32.mrb[18].mxu1 }
 0x199   : > { %v3647_v54 = vpop.f32.mrb[19].mxu1 }
 0x19e   : > { %v5967_v38 = vpop.f32.mrb[20].mxu1 }
 0x19f   : > { %v3650_v39 = vpop.f32.mrb[21].mxu1 }
 0x1a0   : > { %v5969_v22 = vpop.f32.mrb[22].mxu1 }
 0x1a1   : > { %v3651_v36 = vpop.f32.mrb[23].mxu1 }
 0x1a7   : > { %v5971_v52 = vpop.f32.mrb[24].mxu1 }
 0x1a8   : > { %v3654_v20 = vpop.f32.mrb[25].mxu1 }
 0x1a9   : > { %v5973_v37 = vpop.f32.mrb[26].mxu1 }
 0x1aa   : > { %v3655_v26 = vpop.f32.mrb[27].mxu1 }
 0x1af   : > { %v5975_v2 = vpop.f32.mrb[28].mxu1 }
 0x1b0   : > { %v3658_v8 = vpop.f32.mrb[29].mxu1 }
 0x1b1   : > { %v5977_v23 = vpop.f32.mrb[30].mxu1 }
 0x1b2   : > { %v3659_v62 = vpop.f32.mrb[31].mxu1 }
 0x1b7   : > { %v5979_v13 = vpop.f32.mrb[32].mxu1 }
 0x1b8   : > { %v3662_v5 = vpop.f32.mrb[33].mxu1 }
 0x1b9   : > { %v5981_v61 = vpop.f32.mrb[34].mxu1 }
 0x1ba   : > { %v3663_v34 = vpop.f32.mrb[35].mxu1 }
 0x1bf   : > { %v5983_v58 = vpop.f32.mrb[36].mxu1 }
 0x1c0   : > { %v3666_v32 = vpop.f32.mrb[37].mxu1 }
 0x1c1   : > { %v5985_v46 = vpop.f32.mrb[38].mxu1 }
 0x1c2   : > { %v3667_v48 = vpop.f32.mrb[39].mxu1 }
 0x1c7   : > { %v5987_v43 = vpop.f32.mrb[40].mxu1 }
 0x1c8   : > { %v3670_v55 = vpop.f32.mrb[41].mxu1 }
 0x1c9   : > { %v5989_v25 = vpop.f32.mrb[42].mxu1 }
 0x1ca   : > { %v3671_v42 = vpop.f32.mrb[43].mxu1 }
 0x1cb   : > { %v1969_v19 = vpop.f32.mrb[0].mxu0 }
 0x1cc   : > { %v3928_v17 = vadd.f32 %v1969_v19, %v1328_v7  ;;  %v3830_v10 = vpop.f32.mrb[1].mxu0 }
 0x1cd   : > { %v1972_v35 = vpop.f32.mrb[2].mxu0 }
 0x1ce   : > { %v2218_v59 = vrot.slane %v3928_v17, 4  ;;  %v3929_v11 = vadd.f32 %v1972_v35, %v1331_v14  ;;  %v3831_v6 = vpop.f32.mrb[3].mxu0 }
 0x1d0   : > { %v2340_v12 = vsel %vm1016_vm2, %v2218_v59, 0.0  ;;  %v2219_v57 = vrot.slane %v3929_v11, 4 }
 0x1d1   : > { %v3255_v49 = vpack.c.bf16 %v2340_v12, %v2340_v12  ;;  %v2808_v29 = vmul.f32 %v2340_v12, %v2340_v12  ;;  %v2638_v3 = vrot.slane %v2340_v12, 4 }
 0x1d2   : > { %v2220_v4 = vsel %vm2217_vm1, %v2218_v59, %v2219_v57 }
 0x1d3   : > { %2551 = vst [vmem:[%s4450_s8 + $0x10] sm:$0xc] %v3255_v49  ;;  %v2341_v7 = vsel %vm1017_vm4, %v2220_v4, 0.0  ;;  %v1977_v51 = vpop.f32.mrb[4].mxu0  ;;  %v2890_v24 = vrot.slane %v2808_v29, 4 }
 0x1d4   : > { %v3256_v21 = vpack.c.bf16 %v2341_v7, %v2341_v7  ;;  %v2639_v41 = vrot.slane %v2341_v7, 4  ;;  %v2809_v14 = vmul.f32 %v2341_v7, %v2341_v7  ;;  %v3930_v33 = vadd.f32 %v1977_v51, %v5933_v15  ;;  %v3834_v44 = vpop.f32.mrb[5].mxu0 }
 0x1d5   : > { %v1980_v54 = vpop.f32.mrb[6].mxu0 }
 0x1d6   : > { %2552 = vst [vmem:[%s4450_s8 + $0x14] sm:$0xf] %v3256_v21  ;;  %v2640_v39 = vsel %vm2217_vm1, %v2638_v3, %v2639_v41  ;;  %v2891_v36 = vrot.slane %v2809_v14, 4  ;;  %v2221_v20 = vrot.slane %v3930_v33, 4  ;;  %v3931_v26 = vadd.f32 %v1980_v54, %v5938_v47  ;;  %v3835_v8 = vpop.f32.mrb[7].mxu0 }
 0x1d8   : > { %v2892_v62 = vsel %vm2217_vm1, %v2890_v24, %v2891_v36  ;;  %v2222_v5 = vsel %vm2217_vm1, %v2219_v57, %v2221_v20  ;;  %v2223_v34 = vrot.slane %v3931_v26, 4 }
 0x1d9   : > { %v2342_v48 = vsel %vm1018_vm9, %v2222_v5, 0.0 }
 0x1da   : > { %v2641_v15 = vrot.slane %v2342_v48, 4  ;;  %v2810_v55 = vmul.f32 %v2342_v48, %v2342_v48  ;;  %v2224_v42 = vsel %vm2217_vm1, %v2221_v20, %v2223_v34 }
 0x1db   : > { %v2343_v17 = vsel %vm1019_vm7, %v2224_v42, 0.0  ;;  %v1985_v10 = vpop.f32.mrb[8].mxu0  ;;  %vm6421_vm7 = vcmp.eq.s32.totalorder %v5315_v31, 1 }
 0x1dc   : > { %v2642_v47 = vsel %vm2217_vm1, %v2639_v41, %v2641_v15  ;;  %v2893_v35 = vrot.slane %v2810_v55, 4  ;;  %v3391_v59 = vpack.c.bf16 %v2343_v17, %v2342_v48  ;;  %v2643_v11 = vrot.slane %v2343_v17, 4  ;;  %v3838_v6 = vpop.f32.mrb[9].mxu0 }
 0x1dd   : > { %v2760_v60 = vadd.f32 %v2642_v47, %v2640_v39  ;;  %v2811_v12 = vmul.f32 %v2343_v17, %v2343_v17  ;;  %v3932_v57 = vadd.f32 %v1985_v10, %v5943_v9  ;;  %v1988_v49 = vpop.f32.mrb[10].mxu0 }
 0x1de   : > { %v2894_v29 = vsel %vm2217_vm1, %v2891_v36, %v2893_v35  ;;  %3506 = vst [vmem:[%s4450_s8 + $0x18] sm:$0xff] %v3391_v59   ;;  %v2644_v4 = vsel %vm2217_vm1, %v2641_v15, %v2643_v11  ;;  %v3933_v3 = vadd.f32 %v1988_v49, %v5948_v1  ;;  %v3839_v40 = vpop.f32.mrb[11].mxu0 }
 0x1df   : > { %v3012_v7 = vadd.f32 %v2894_v29, %v2892_v62  ;;  %v2761_v51 = vadd.f32 %v2760_v60, %v2644_v4  ;;  %v2895_v21 = vrot.slane %v2811_v12, 4  ;;  %v2225_v41 = vrot.slane %v3932_v57, 4 }
 0x1e0   : > { %v2227_v14 = vrot.slane %v3933_v3, 4 }
 0x1e1   : > { %v2896_v33 = vsel %vm2217_vm1, %v2893_v35, %v2895_v21  ;;  %v2226_v44 = vsel %vm2217_vm1, %v2223_v34, %v2225_v41 }
 0x1e2   : > { %v3013_v24 = vadd.f32 %v3012_v7, %v2896_v33  ;;  %v2344_v54 = vsel %vm1020_vm11, %v2226_v44, 0.0  ;;  %v2228_v39 = vsel %vm2217_vm1, %v2225_v41, %v2227_v14 }
 0x1e3   : > { %v2645_v36 = vrot.slane %v2344_v54, 4  ;;  %v2812_v20 = vmul.f32 %v2344_v54, %v2344_v54  ;;  %v2345_v26 = vsel %vm1021_vm10, %v2228_v39, 0.0  ;;  %v1993_v8 = vpop.f32.mrb[12].mxu0 }
 0x1e4   : > { %v3396_v62 = vpack.c.bf16 %v2345_v26, %v2344_v54  ;;  %v2647_v5 = vrot.slane %v2345_v26, 4  ;;  %v2813_v32 = vmul.f32 %v2345_v26, %v2345_v26  ;;  %v3934_v48 = vadd.f32 %v1993_v8, %v5953_v16  ;;  %v3842_v15 = vpop.f32.mrb[13].mxu0 }
 0x1e5   : > { %v2646_v34 = vsel %vm2217_vm1, %v2643_v11, %v2645_v36  ;;  %v2897_v55 = vrot.slane %v2812_v20, 4  ;;  %v1996_v42 = vpop.f32.mrb[14].mxu0 }
 0x1e6   : > { %v2762_v19 = vadd.f32 %v2761_v51, %v2646_v34  ;;  %3507 = vst [vmem:[%s4450_s8 + $0x20] sm:$0xff] %v3396_v62   ;;  %v2648_v17 = vsel %vm2217_vm1, %v2645_v36, %v2647_v5  ;;  %v2899_v10 = vrot.slane %v2813_v32, 4  ;;  %v2229_v47 = vrot.slane %v3934_v48, 4  ;;  %v3843_v35 = vpop.f32.mrb[15].mxu0 }
 0x1e7   : > { %v2898_v59 = vsel %vm2217_vm1, %v2895_v21, %v2897_v55  ;;  %v3935_v6 = vadd.f32 %v1996_v42, %v5958_v53 }
 0x1e8   : > { %v3014_v60 = vadd.f32 %v3013_v24, %v2898_v59  ;;  %v2763_v12 = vadd.f32 %v2762_v19, %v2648_v17  ;;  %v2900_v16 = vsel %vm2217_vm1, %v2897_v55, %v2899_v10  ;;  %v2230_v57 = vsel %vm2217_vm1, %v2227_v14, %v2229_v47 }
 0x1e9   : > { %v2346_v49 = vsel %vm1022_vm13, %v2230_v57, 0.0  ;;  %v2231_v29 = vrot.slane %v3935_v6, 4 }
 0x1ea   : > { %v3015_v4 = vadd.f32 %v3014_v60, %v2900_v16  ;;  %v2649_v3 = vrot.slane %v2346_v49, 4  ;;  %v2814_v40 = vmul.f32 %v2346_v49, %v2346_v49 }
 0x1eb   : > { %v2232_v7 = vsel %vm2217_vm1, %v2229_v47, %v2231_v29  ;;  %v2001_v51 = vpop.f32.mrb[16].mxu0 }
 0x1ec   : > { %v2650_v21 = vsel %vm2217_vm1, %v2647_v5, %v2649_v3  ;;  %v2901_v53 = vrot.slane %v2814_v40, 4  ;;  %v2347_v33 = vsel %vm1023_vm12, %v2232_v7, 0.0  ;;  %v3936_v44 = vadd.f32 %v2001_v51, %v5962_v30  ;;  %v3846_v14 = vpop.f32.mrb[17].mxu0 }
 0x1ed   : > { %v2764_v24 = vadd.f32 %v2763_v12, %v2650_v21  ;;  %v3401_v9 = vpack.c.bf16 %v2347_v33, %v2346_v49  ;;  %v2651_v54 = vrot.slane %v2347_v33, 4  ;;  %v2815_v39 = vmul.f32 %v2347_v33, %v2347_v33  ;;  %v2004_v36 = vpop.f32.mrb[18].mxu0 }
 0x1ee   : > { %v2902_v20 = vsel %vm2217_vm1, %v2899_v10, %v2901_v53  ;;  %v2233_v1 = vrot.slane %v3936_v44, 4  ;;  %v3937_v26 = vadd.f32 %v2004_v36, %v5965_v28  ;;  %v3847_v8 = vpop.f32.mrb[19].mxu0 }
 0x1ef   : > { %v3016_v62 = vadd.f32 %v3015_v4, %v2902_v20  ;;  %3508 = vst [vmem:[%s4450_s8 + $0x28] sm:$0xff] %v3401_v9   ;;  %v2652_v5 = vsel %vm2217_vm1, %v2649_v3, %v2651_v54  ;;  %v2903_v32 = vrot.slane %v2815_v39, 4 }
 0x1f0   : > { %v2765_v48 = vadd.f32 %v2764_v24, %v2652_v5  ;;  %v2234_v30 = vsel %vm2217_vm1, %v2231_v29, %v2233_v1  ;;  %v2235_v15 = vrot.slane %v3937_v26, 4 }
 0x1f1   : > { %v2904_v34 = vsel %vm2217_vm1, %v2901_v53, %v2903_v32  ;;  %v2348_v42 = vsel %vm1024_vm15, %v2234_v30, 0.0 }
 0x1f2   : > { %v3017_v19 = vadd.f32 %v3016_v62, %v2904_v34  ;;  %v2653_v17 = vrot.slane %v2348_v42, 4  ;;  %v2816_v10 = vmul.f32 %v2348_v42, %v2348_v42  ;;  %v2236_v28 = vsel %vm2217_vm1, %v2233_v1, %v2235_v15 }
 0x1f3   : > { %v2349_v35 = vsel %vm1025_vm14, %v2236_v28, 0.0  ;;  %v2009_v59 = vpop.f32.mrb[20].mxu0 }
 0x1f4   : > { %v2654_v6 = vsel %vm2217_vm1, %v2651_v54, %v2653_v17  ;;  %v2905_v60 = vrot.slane %v2816_v10, 4  ;;  %v3406_v12 = vpack.c.bf16 %v2349_v35, %v2348_v42  ;;  %v2655_v16 = vrot.slane %v2349_v35, 4  ;;  %v3850_v57 = vpop.f32.mrb[21].mxu0 }
 0x1f5   : > { %v2766_v11 = vadd.f32 %v2765_v48, %v2654_v6  ;;  %v2817_v49 = vmul.f32 %v2349_v35, %v2349_v35  ;;  %v3938_v29 = vadd.f32 %v2009_v59, %v5967_v38  ;;  %v2012_v4 = vpop.f32.mrb[22].mxu0  ;;  %v6413_v38 = vld [vmem:[#allocation3_spill] sm:$0xff] }
 0x1f6   : > { %v2906_v3 = vsel %vm2217_vm1, %v2903_v32, %v2905_v60  ;;  %3509 = vst [vmem:[%s4450_s8 + $0x30] sm:$0xff] %v3406_v12   ;;  %v2656_v40 = vsel %vm2217_vm1, %v2653_v17, %v2655_v16  ;;  %v3939_v7 = vadd.f32 %v2012_v4, %v5969_v22  ;;  %v3851_v51 = vpop.f32.mrb[23].mxu0  ;;  %vm6414_vm0 = vcmp.eq.s32.totalorder %v6413_v38, 1  ;;  %v6415_v22 = vld [vmem:[#allocation2_spill] sm:$0xff] }
 0x1f7   : > { %v3018_v21 = vadd.f32 %v3017_v19, %v2906_v3  ;;  %v2767_v53 = vadd.f32 %v2766_v11, %v2656_v40  ;;  %v2907_v41 = vrot.slane %v2817_v49, 4  ;;  %v2237_v33 = vrot.slane %v3938_v29, 4  ;;  %v6419_v40 = vld [vmem:[#allocation4_spill] sm:$0xff] }
 0x1f8   : > { %v2239_v44 = vrot.slane %v3939_v7, 4  ;;  %vm6416_vm2 = vcmp.eq.s32.totalorder %v6415_v22, 1  ;;  %vm6420_vm6 = vcmp.eq.s32.totalorder %v6419_v40, 1 }
 0x1f9   : > { %v2908_v14 = vsel %vm2217_vm1, %v2905_v60, %v2907_v41  ;;  %v2238_v24 = vsel %vm2217_vm1, %v2235_v15, %v2237_v33  ;;  %v6417_v60 = vld [vmem:[#allocation15_spill] sm:$0xff] }
 0x1fa   : > { %v3019_v9 = vadd.f32 %v3018_v21, %v2908_v14  ;;  %v2350_v54 = vsel %vm6414_vm0, %v2238_v24, 0.0  ;;  %v2240_v39 = vsel %vm2217_vm1, %v2237_v33, %v2239_v44  ;;  %vm6418_vm4 = vcmp.eq.s32.totalorder %v6417_v60, 1 }
 0x1fb   : > { %v2657_v36 = vrot.slane %v2350_v54, 4  ;;  %v2818_v20 = vmul.f32 %v2350_v54, %v2350_v54  ;;  %v2351_v1 = vsel %vm6416_vm2, %v2240_v39, 0.0  ;;  %v2017_v26 = vpop.f32.mrb[24].mxu0 }
 0x1fc   : > { %v3411_v8 = vpack.c.bf16 %v2351_v1, %v2350_v54  ;;  %v2659_v62 = vrot.slane %v2351_v1, 4  ;;  %v2819_v5 = vmul.f32 %v2351_v1, %v2351_v1  ;;  %v3940_v32 = vadd.f32 %v2017_v26, %v5971_v52  ;;  %v3854_v48 = vpop.f32.mrb[25].mxu0 }
 0x1fd   : > { %v2658_v30 = vsel %vm2217_vm1, %v2655_v16, %v2657_v36  ;;  %v2909_v15 = vrot.slane %v2818_v20, 4  ;;  %v2020_v34 = vpop.f32.mrb[26].mxu0  ;;  %v6422_v48 = vld [vmem:[#allocation16_spill] sm:$0xff] }
 0x1fe   : > { %v2768_v55 = vadd.f32 %v2767_v53, %v2658_v30  ;;  %3510 = vst [vmem:[%s4450_s8 + $0x38] sm:$0xff] %v3411_v8   ;;  %v2660_v42 = vsel %vm2217_vm1, %v2657_v36, %v2659_v62  ;;  %v2911_v19 = vrot.slane %v2819_v5, 4  ;;  %v2241_v17 = vrot.slane %v3940_v32, 4  ;;  %v3855_v10 = vpop.f32.mrb[27].mxu0 }
 0x1ff   : > { %v2910_v28 = vsel %vm2217_vm1, %v2907_v41, %v2909_v15  ;;  %v3941_v47 = vadd.f32 %v2020_v34, %v5973_v37  ;;  %vm6423_vm8 = vcmp.eq.s32.totalorder %v6422_v48, 1 }
 0x200   : > { %v3020_v35 = vadd.f32 %v3019_v9, %v2910_v28  ;;  %v2769_v59 = vadd.f32 %v2768_v55, %v2660_v42  ;;  %v2912_v52 = vsel %vm2217_vm1, %v2909_v15, %v2911_v19  ;;  %v2242_v6 = vsel %vm2217_vm1, %v2239_v44, %v2241_v17 }
 0x201   : > { %v2352_v12 = vsel %vm6418_vm4, %v2242_v6, 0.0  ;;  %v2243_v16 = vrot.slane %v3941_v47, 4 }
 0x202   : > { %v3021_v57 = vadd.f32 %v3020_v35, %v2912_v52  ;;  %v2661_v11 = vrot.slane %v2352_v12, 4  ;;  %v2820_v49 = vmul.f32 %v2352_v12, %v2352_v12 }
 0x203   : > { %v2244_v29 = vsel %vm2217_vm1, %v2241_v17, %v2243_v16  ;;  %v2025_v4 = vpop.f32.mrb[28].mxu0 }
 0x204   : > { %v2662_v3 = vsel %vm2217_vm1, %v2659_v62, %v2661_v11  ;;  %v2913_v37 = vrot.slane %v2820_v49, 4  ;;  %v2353_v7 = vsel %vm6420_vm6, %v2244_v29, 0.0  ;;  %v3942_v51 = vadd.f32 %v2025_v4, %v5975_v2  ;;  %v3858_v21 = vpop.f32.mrb[29].mxu0 }
 0x205   : > { %v2770_v53 = vadd.f32 %v2769_v59, %v2662_v3  ;;  %v3416_v41 = vpack.c.bf16 %v2353_v7, %v2352_v12  ;;  %v2663_v33 = vrot.slane %v2353_v7, 4  ;;  %v2821_v44 = vmul.f32 %v2353_v7, %v2353_v7  ;;  %v2028_v14 = vpop.f32.mrb[30].mxu0 }
 0x206   : > { %v2914_v24 = vsel %vm2217_vm1, %v2911_v19, %v2913_v37  ;;  %v2245_v9 = vrot.slane %v3942_v51, 4  ;;  %v3943_v38 = vadd.f32 %v2028_v14, %v5977_v23  ;;  %v3859_v54 = vpop.f32.mrb[31].mxu0 }
 0x207   : > { %v3022_v39 = vadd.f32 %v3021_v57, %v2914_v24  ;;  %3511 = vst [vmem:[%s4450_s8 + $0x40] sm:$0xff] %v3416_v41   ;;  %v2664_v36 = vsel %vm2217_vm1, %v2661_v11, %v2663_v33  ;;  %v2915_v20 = vrot.slane %v2821_v44, 4 }
 0x208   : > { %v2771_v22 = vadd.f32 %v2770_v53, %v2664_v36  ;;  %v2246_v2 = vsel %vm2217_vm1, %v2243_v16, %v2245_v9  ;;  %v2247_v1 = vrot.slane %v3943_v38, 4 }
 0x209   : > { %v2916_v26 = vsel %vm2217_vm1, %v2913_v37, %v2915_v20  ;;  %v2354_v8 = vsel %vm6421_vm7, %v2246_v2, 0.0 }
 0x20a   : > { %v3023_v62 = vadd.f32 %v3022_v39, %v2916_v26  ;;  %v2665_v5 = vrot.slane %v2354_v8, 4  ;;  %v2822_v32 = vmul.f32 %v2354_v8, %v2354_v8  ;;  %v2248_v23 = vsel %vm2217_vm1, %v2245_v9, %v2247_v1 }
 0x20b   : > { %v2355_v30 = vsel %vm6423_vm8, %v2248_v23, 0.0  ;;  %v2033_v15 = vpop.f32.mrb[32].mxu0  ;;  %vm6451_vm8 = vcmp.eq.s32.totalorder %v5632_v0, 1 }
 0x20c   : > { %v2666_v34 = vsel %vm2217_vm1, %v2663_v33, %v2665_v5  ;;  %v2917_v55 = vrot.slane %v2822_v32, 4  ;;  %v3421_v42 = vpack.c.bf16 %v2355_v30, %v2354_v8  ;;  %v2667_v19 = vrot.slane %v2355_v30, 4  ;;  %v3862_v17 = vpop.f32.mrb[33].mxu0 }
 0x20d   : > { %v2772_v10 = vadd.f32 %v2771_v22, %v2666_v34  ;;  %v2823_v28 = vmul.f32 %v2355_v30, %v2355_v30  ;;  %v3944_v31 = vadd.f32 %v2033_v15, %v5979_v13  ;;  %v2036_v47 = vpop.f32.mrb[34].mxu0  ;;  %v6424_v13 = vld [vmem:[#allocation18_spill] sm:$0xff] }
 0x20e   : > { %v2918_v35 = vsel %vm2217_vm1, %v2915_v20, %v2917_v55  ;;  %3512 = vst [vmem:[%s4450_s8 + $0x48] sm:$0xff] %v3421_v42   ;;  %v2668_v59 = vsel %vm2217_vm1, %v2665_v5, %v2667_v19  ;;  %v3945_v52 = vadd.f32 %v2036_v47, %v5981_v61  ;;  %v3863_v6 = vpop.f32.mrb[35].mxu0  ;;  %vm6425_vm9 = vcmp.eq.s32.totalorder %v6424_v13, 1  ;;  %v6426_v61 = vld [vmem:[#allocation17_spill] sm:$0xff]  ;;  %v6428_v5 = vld [vmem:[#allocation20_spill] sm:$0xff] }
 0x20f   : > { %v3024_v60 = vadd.f32 %v3023_v62, %v2918_v35  ;;  %v2773_v12 = vadd.f32 %v2772_v10, %v2668_v59  ;;  %v2919_v16 = vrot.slane %v2823_v28, 4  ;;  %v2249_v57 = vrot.slane %v3944_v31, 4 }
 0x210   : > { %v2251_v11 = vrot.slane %v3945_v52, 4  ;;  %vm6427_vm10 = vcmp.eq.s32.totalorder %v6426_v61, 1  ;;  %vm6429_vm11 = vcmp.eq.s32.totalorder %v6428_v5, 1 }
 0x211   : > { %v2920_v49 = vsel %vm2217_vm1, %v2917_v55, %v2919_v16  ;;  %v2250_v29 = vsel %vm2217_vm1, %v2247_v1, %v2249_v57 }
 0x212   : > { %v3025_v4 = vadd.f32 %v3024_v60, %v2920_v49  ;;  %v2356_v3 = vsel %vm6425_vm9, %v2250_v29, 0.0  ;;  %v2252_v37 = vsel %vm2217_vm1, %v2249_v57, %v2251_v11 }
 0x213   : > { %v2669_v40 = vrot.slane %v2356_v3, 4  ;;  %v2824_v7 = vmul.f32 %v2356_v3, %v2356_v3  ;;  %v2357_v51 = vsel %vm6427_vm10, %v2252_v37, 0.0  ;;  %v2041_v21 = vpop.f32.mrb[36].mxu0  ;;  %v6432_v37 = vld [vmem:[#allocation22_spill] sm:$0xff]  ;;  %vm6454_vm10 = vcmp.eq.s32.totalorder %v5666_v18, 1 }
 0x214   : > { %v3426_v53 = vpack.c.bf16 %v2357_v51, %v2356_v3  ;;  %v2671_v41 = vrot.slane %v2357_v51, 4  ;;  %v2825_v33 = vmul.f32 %v2357_v51, %v2357_v51  ;;  %v3946_v44 = vadd.f32 %v2041_v21, %v5983_v58  ;;  %v3866_v14 = vpop.f32.mrb[37].mxu0 }
 0x215   : > { %v2670_v24 = vsel %vm2217_vm1, %v2667_v19, %v2669_v40  ;;  %v2921_v9 = vrot.slane %v2824_v7, 4  ;;  %v2044_v38 = vpop.f32.mrb[38].mxu0  ;;  %v6430_v19 = vld [vmem:[#allocation19_spill] sm:$0xff]  ;;  %vm6433_vm13 = vcmp.eq.s32.totalorder %v6432_v37, 1 }
 0x216   : > { %v2774_v54 = vadd.f32 %v2773_v12, %v2670_v24  ;;  %3513 = vst [vmem:[%s4450_s8 + $0x50] sm:$0xff] %v3426_v53   ;;  %v2672_v39 = vsel %vm2217_vm1, %v2669_v40, %v2671_v41  ;;  %v2923_v36 = vrot.slane %v2825_v33, 4  ;;  %v2253_v20 = vrot.slane %v3946_v44, 4  ;;  %v3867_v22 = vpop.f32.mrb[39].mxu0 }
 0x217   : > { %v2922_v2 = vsel %vm2217_vm1, %v2919_v16, %v2921_v9  ;;  %v3947_v1 = vadd.f32 %v2044_v38, %v5985_v46  ;;  %vm6431_vm12 = vcmp.eq.s32.totalorder %v6430_v19, 1 }
 0x218   : > { %v3026_v26 = vadd.f32 %v3025_v4, %v2922_v2  ;;  %v2775_v8 = vadd.f32 %v2774_v54, %v2672_v39  ;;  %v2924_v58 = vsel %vm2217_vm1, %v2921_v9, %v2923_v36  ;;  %v2254_v62 = vsel %vm2217_vm1, %v2251_v11, %v2253_v20 }
 0x219   : > { %v2358_v32 = vsel %vm6429_vm11, %v2254_v62, 0.0  ;;  %v2255_v23 = vrot.slane %v3947_v1, 4  ;;  %vm6455_vm11 = vcmp.eq.s32.totalorder %v5664_v56, 1 }
 0x21a   : > { %v3027_v48 = vadd.f32 %v3026_v26, %v2924_v58  ;;  %v2673_v30 = vrot.slane %v2358_v32, 4  ;;  %v2826_v15 = vmul.f32 %v2358_v32, %v2358_v32 }
 0x21b   : > { %v2256_v34 = vsel %vm2217_vm1, %v2253_v20, %v2255_v23  ;;  %v2049_v55 = vpop.f32.mrb[40].mxu0 }
 0x21c   : > { %v2674_v42 = vsel %vm2217_vm1, %v2671_v41, %v2673_v30  ;;  %v2925_v46 = vrot.slane %v2826_v15, 4  ;;  %v2359_v17 = vsel %vm6431_vm12, %v2256_v34, 0.0  ;;  %v3948_v10 = vadd.f32 %v2049_v55, %v5987_v43  ;;  %v3870_v28 = vpop.f32.mrb[41].mxu0  ;;  %v6434_v41 = vld [vmem:[#allocation21_spill] sm:$0xff] }
 0x21d   : > { %v2776_v31 = vadd.f32 %v2775_v8, %v2674_v42  ;;  %v3431_v47 = vpack.c.bf16 %v2359_v17, %v2358_v32  ;;  %v2675_v35 = vrot.slane %v2359_v17, 4  ;;  %v2827_v59 = vmul.f32 %v2359_v17, %v2359_v17  ;;  %v2052_v52 = vpop.f32.mrb[42].mxu0 }
 0x21e   : > { %v2926_v6 = vsel %vm2217_vm1, %v2923_v36, %v2925_v46  ;;  %v2257_v60 = vrot.slane %v3948_v10, 4  ;;  %v3949_v12 = vadd.f32 %v2052_v52, %v5989_v25  ;;  %v3871_v16 = vpop.f32.mrb[43].mxu0  ;;  %vm6435_vm14 = vcmp.eq.s32.totalorder %v6434_v41, 1 }
 0x21f   : > { %v3028_v57 = vadd.f32 %v3027_v48, %v2926_v6  ;;  %3514 = vst [vmem:[%s4450_s8 + $0x58] sm:$0xff] %v3431_v47   ;;  %v2676_v11 = vsel %vm2217_vm1, %v2673_v30, %v2675_v35  ;;  %v2927_v49 = vrot.slane %v2827_v59, 4  ;;  %v1728_v13 = vpop.f32.mrb[44].mxu1  ;;  %v6438_v47 = vld [vmem:[#allocation23_spill] sm:$0xff]  ;;  %vm6456_vm12 = vcmp.eq.s32.totalorder %v5690_v63, 1 }
 0x220   : > { %v2777_v29 = vadd.f32 %v2776_v31, %v2676_v11  ;;  %v2258_v43 = vsel %vm2217_vm1, %v2255_v23, %v2257_v60  ;;  %v2259_v4 = vrot.slane %v3949_v12, 4  ;;  %v3774_v7 = vpop.f32.mrb[45].mxu1  ;;  %vm6439_vm5 = vcmp.eq.s32.totalorder %v6438_v47, 1 }
 0x221   : > { %v2928_v3 = vsel %vm2217_vm1, %v2925_v46, %v2927_v49  ;;  %v2360_v40 = vsel %vm6433_vm13, %v2258_v43, 0.0  ;;  %v1731_v53 = vpop.f32.mrb[46].mxu1  ;;  %v6436_v46 = vld [vmem:[#allocation24_spill] sm:$0xff] }
 0x222   : > { %v3029_v61 = vadd.f32 %v3028_v57, %v2928_v3  ;;  %v2677_v51 = vrot.slane %v2360_v40, 4  ;;  %v2828_v25 = vmul.f32 %v2360_v40, %v2360_v40  ;;  %v2260_v21 = vsel %vm2217_vm1, %v2257_v60, %v2259_v4  ;;  %v3775_v44 = vpop.f32.mrb[47].mxu1 }
 0x223   : > { %v2361_v33 = vsel %vm6435_vm14, %v2260_v21, 0.0  ;;  %v2057_v14 = vpop.f32.mrb[44].mxu0  ;;  %vm6437_vm15 = vcmp.eq.s32.totalorder %v6436_v46, 1  ;;  %vm6459_vm14 = vcmp.eq.s32.totalorder %v5724_v27, 1 }
 0x224   : > { %v2678_v24 = vsel %vm2217_vm1, %v2675_v35, %v2677_v51  ;;  %v2929_v9 = vrot.slane %v2828_v25, 4  ;;  %v3436_v38 = vpack.c.bf16 %v2361_v33, %v2360_v40  ;;  %v2679_v54 = vrot.slane %v2361_v33, 4  ;;  %v3874_v39 = vpop.f32.mrb[45].mxu0 }
 0x225   : > { %v2778_v36 = vadd.f32 %v2777_v29, %v2678_v24  ;;  %v2829_v20 = vmul.f32 %v2361_v33, %v2361_v33  ;;  %v3950_v22 = vadd.f32 %v2057_v14, %v1728_v13  ;;  %v2060_v2 = vpop.f32.mrb[46].mxu0 }
 0x226   : > { %v2930_v1 = vsel %vm2217_vm1, %v2927_v49, %v2929_v9  ;;  %3515 = vst [vmem:[%s4450_s8 + $0x60] sm:$0xff] %v3436_v38   ;;  %v2680_v26 = vsel %vm2217_vm1, %v2677_v51, %v2679_v54  ;;  %v3951_v8 = vadd.f32 %v2060_v2, %v1731_v53  ;;  %v3875_v58 = vpop.f32.mrb[47].mxu0  ;;  %v6441_v2 = vld [vmem:[#allocation25_spill] sm:$0xff] }
 0x227   : > { %v3030_v62 = vadd.f32 %v3029_v61, %v2930_v1  ;;  %v2779_v5 = vadd.f32 %v2778_v36, %v2680_v26  ;;  %v2931_v32 = vrot.slane %v2829_v20, 4  ;;  %v2261_v23 = vrot.slane %v3950_v22, 4  ;;  %v1736_v30 = vpop.f32.mrb[48].mxu1 }
 0x228   : > { %v2263_v48 = vrot.slane %v3951_v8, 4  ;;  %v3778_v55 = vpop.f32.mrb[49].mxu1  ;;  %vm6442_vm0 = vcmp.eq.s32.totalorder %v6441_v2, 1 }
 0x229   : > { %v2932_v15 = vsel %vm2217_vm1, %v2929_v9, %v2931_v32  ;;  %v2262_v34 = vsel %vm2217_vm1, %v2259_v4, %v2261_v23  ;;  %v1739_v10 = vpop.f32.mrb[50].mxu1 }
 0x22a   : > { %v3031_v42 = vadd.f32 %v3030_v62, %v2932_v15  ;;  %v2362_v19 = vsel %vm6437_vm15, %v2262_v34, 0.0  ;;  %v2264_v17 = vsel %vm2217_vm1, %v2261_v23, %v2263_v48  ;;  %v3779_v59 = vpop.f32.mrb[51].mxu1 }
 0x22b   : > { %v2681_v28 = vrot.slane %v2362_v19, 4  ;;  %v2830_v31 = vmul.f32 %v2362_v19, %v2362_v19  ;;  %v2363_v35 = vsel %vm6439_vm5, %v2264_v17, 0.0  ;;  %v2065_v52 = vpop.f32.mrb[48].mxu0 }
 0x22c   : > { %v3441_v6 = vpack.c.bf16 %v2363_v35, %v2362_v19  ;;  %v2683_v60 = vrot.slane %v2363_v35, 4  ;;  %v2831_v12 = vmul.f32 %v2363_v35, %v2363_v35  ;;  %v3952_v16 = vadd.f32 %v2065_v52, %v1736_v30  ;;  %v3878_v57 = vpop.f32.mrb[49].mxu0 }
 0x22d   : > { %v2682_v11 = vsel %vm2217_vm1, %v2679_v54, %v2681_v28  ;;  %v2933_v49 = vrot.slane %v2830_v31, 4  ;;  %v2068_v29 = vpop.f32.mrb[50].mxu0  ;;  %v6443_v31 = vld [vmem:[#allocation27_spill] sm:$0xff] }
 0x22e   : > { %v2780_v43 = vadd.f32 %v2779_v5, %v2682_v11  ;;  %3516 = vst [vmem:[%s4450_s8 + $0x68] sm:$0xff] %v3441_v6   ;;  %v2684_v4 = vsel %vm2217_vm1, %v2681_v28, %v2683_v60  ;;  %v2935_v13 = vrot.slane %v2831_v12, 4  ;;  %v2265_v3 = vrot.slane %v3952_v16, 4  ;;  %v3879_v37 = vpop.f32.mrb[51].mxu0  ;;  %v6445_v16 = vld [vmem:[#allocation26_spill] sm:$0xff] }
 0x22f   : > { %v2934_v40 = vsel %vm2217_vm1, %v2931_v32, %v2933_v49  ;;  %v3953_v7 = vadd.f32 %v2068_v29, %v1739_v10  ;;  %v1744_v53 = vpop.f32.mrb[52].mxu1  ;;  %vm6444_vm2 = vcmp.eq.s32.totalorder %v6443_v31, 1  ;;  %vm6446_vm4 = vcmp.eq.s32.totalorder %v6445_v16, 1 }
 0x230   : > { %v3032_v61 = vadd.f32 %v3031_v42, %v2934_v40  ;;  %v2781_v51 = vadd.f32 %v2780_v43, %v2684_v4  ;;  %v2936_v25 = vsel %vm2217_vm1, %v2933_v49, %v2935_v13  ;;  %v2266_v21 = vsel %vm2217_vm1, %v2263_v48, %v2265_v3  ;;  %v3782_v44 = vpop.f32.mrb[53].mxu1 }
 0x231   : > { %v2364_v41 = vsel %vm6440_vm3, %v2266_v21, 0.0  ;;  %v2267_v33 = vrot.slane %v3953_v7, 4  ;;  %v1747_v38 = vpop.f32.mrb[54].mxu1 }
 0x232   : > { %v3033_v14 = vadd.f32 %v3032_v61, %v2936_v25  ;;  %v2685_v24 = vrot.slane %v2364_v41, 4  ;;  %v2832_v9 = vmul.f32 %v2364_v41, %v2364_v41  ;;  %v3783_v39 = vpop.f32.mrb[55].mxu1 }
 0x233   : > { %v2268_v54 = vsel %vm2217_vm1, %v2265_v3, %v2267_v33  ;;  %v2073_v36 = vpop.f32.mrb[52].mxu0 }
 0x234   : > { %v2686_v20 = vsel %vm2217_vm1, %v2683_v60, %v2685_v24  ;;  %v2937_v22 = vrot.slane %v2832_v9, 4  ;;  %v2365_v1 = vsel %vm6442_vm0, %v2268_v54, 0.0  ;;  %v3954_v26 = vadd.f32 %v2073_v36, %v1744_v53  ;;  %v3882_v50 = vpop.f32.mrb[53].mxu0 }
 0x235   : > { %v2782_v8 = vadd.f32 %v2781_v51, %v2686_v20  ;;  %v3446_v58 = vpack.c.bf16 %v2365_v1, %v2364_v41  ;;  %v2687_v62 = vrot.slane %v2365_v1, 4  ;;  %v2833_v5 = vmul.f32 %v2365_v1, %v2365_v1  ;;  %v2076_v32 = vpop.f32.mrb[54].mxu0  ;;  %v6447_v20 = vld [vmem:[#allocation29_spill] sm:$0xff] }
 0x236   : > { %v2938_v23 = vsel %vm2217_vm1, %v2935_v13, %v2937_v22  ;;  %v2269_v48 = vrot.slane %v3954_v26, 4  ;;  %v3955_v30 = vadd.f32 %v2076_v32, %v1747_v38  ;;  %v3883_v15 = vpop.f32.mrb[55].mxu0  ;;  %vm6448_vm6 = vcmp.eq.s32.totalorder %v6447_v20, 1 }
 0x237   : > { %v3034_v34 = vadd.f32 %v3033_v14, %v2938_v23  ;;  %3517 = vst [vmem:[%s4450_s8 + $0x70] sm:$0xff] %v3446_v58   ;;  %v2688_v55 = vsel %vm2217_vm1, %v2685_v24, %v2687_v62  ;;  %v2939_v42 = vrot.slane %v2833_v5, 4  ;;  %v1752_v10 = vpop.f32.mrb[56].mxu1  ;;  %vm6466_vm0 = vcmp.eq.s32.totalorder %v5771_v45, 1 }
 0x238   : > { %v2783_v46 = vadd.f32 %v2782_v8, %v2688_v55  ;;  %v2270_v19 = vsel %vm2217_vm1, %v2267_v33, %v2269_v48  ;;  %v2271_v17 = vrot.slane %v3955_v30, 4  ;;  %v3786_v35 = vpop.f32.mrb[57].mxu1  ;;  %v6449_v8 = vld [vmem:[#allocation28_spill] sm:$0xff] }
 0x239   : > { %v2940_v28 = vsel %vm2217_vm1, %v2937_v22, %v2939_v42  ;;  %v2366_v47 = vsel %vm6444_vm2, %v2270_v19, 0.0  ;;  %v1755_v12 = vpop.f32.mrb[58].mxu1  ;;  %vm6450_vm7 = vcmp.eq.s32.totalorder %v6449_v8, 1 }
 0x23a   : > { %v3035_v59 = vadd.f32 %v3034_v34, %v2940_v28  ;;  %v2689_v52 = vrot.slane %v2366_v47, 4  ;;  %v2834_v6 = vmul.f32 %v2366_v47, %v2366_v47  ;;  %v2272_v60 = vsel %vm2217_vm1, %v2269_v48, %v2271_v17  ;;  %v3787_v11 = vpop.f32.mrb[59].mxu1 }
 0x23b   : > { %v2367_v57 = vsel %vm6446_vm4, %v2272_v60, 0.0  ;;  %v2081_v49 = vpop.f32.mrb[56].mxu0 }
 0x23c   : > { %v2690_v29 = vsel %vm2217_vm1, %v2687_v62, %v2689_v52  ;;  %v2941_v43 = vrot.slane %v2834_v6, 4  ;;  %v3451_v4 = vpack.c.bf16 %v2367_v57, %v2366_v47  ;;  %v2691_v13 = vrot.slane %v2367_v57, 4  ;;  %v3886_v3 = vpop.f32.mrb[57].mxu0 }
 0x23d   : > { %v2784_v37 = vadd.f32 %v2783_v46, %v2690_v29  ;;  %v2835_v40 = vmul.f32 %v2367_v57, %v2367_v57  ;;  %v3956_v7 = vadd.f32 %v2081_v49, %v1752_v10  ;;  %v2084_v61 = vpop.f32.mrb[58].mxu0 }
 0x23e   : > { %v2942_v51 = vsel %vm2217_vm1, %v2939_v42, %v2941_v43  ;;  %3518 = vst [vmem:[%s4450_s8 + $0x78] sm:$0xff] %v3451_v4   ;;  %v2692_v25 = vsel %vm2217_vm1, %v2689_v52, %v2691_v13  ;;  %v3957_v21 = vadd.f32 %v2084_v61, %v1755_v12  ;;  %v3887_v53 = vpop.f32.mrb[59].mxu0 }
 0x23f   : > { %v3036_v41 = vadd.f32 %v3035_v59, %v2942_v51  ;;  %v2785_v33 = vadd.f32 %v2784_v37, %v2692_v25  ;;  %v2943_v44 = vrot.slane %v2835_v40, 4  ;;  %v2273_v14 = vrot.slane %v3956_v7, 4  ;;  %v1760_v9 = vpop.f32.mrb[60].mxu1  ;;  %v6452_v7 = vld [vmem:[#allocation30_spill] sm:$0xff] }
 0x240   : > { %v2275_v24 = vrot.slane %v3957_v21, 4  ;;  %v3790_v39 = vpop.f32.mrb[61].mxu1  ;;  %vm6453_vm9 = vcmp.eq.s32.totalorder %v6452_v7, 1 }
 0x241   : > { %v2944_v38 = vsel %vm2217_vm1, %v2941_v43, %v2943_v44  ;;  %v2274_v54 = vsel %vm2217_vm1, %v2271_v17, %v2273_v14  ;;  %v1763_v1 = vpop.f32.mrb[62].mxu1 }
 0x242   : > { %v3037_v36 = vadd.f32 %v3036_v41, %v2944_v38  ;;  %v2368_v22 = vsel %vm6448_vm6, %v2274_v54, 0.0  ;;  %v2276_v2 = vsel %vm2217_vm1, %v2273_v14, %v2275_v24  ;;  %v3791_v62 = vpop.f32.mrb[63].mxu1 }
 0x243   : > { %v2693_v26 = vrot.slane %v2368_v22, 4  ;;  %v2836_v50 = vmul.f32 %v2368_v22, %v2368_v22  ;;  %v2369_v58 = vsel %vm6450_vm7, %v2276_v2, 0.0  ;;  %v2089_v5 = vpop.f32.mrb[60].mxu0 }
 0x244   : > { %v3456_v32 = vpack.c.bf16 %v2369_v58, %v2368_v22  ;;  %v2695_v23 = vrot.slane %v2369_v58, 4  ;;  %v2837_v48 = vmul.f32 %v2369_v58, %v2369_v58  ;;  %v3958_v30 = vadd.f32 %v2089_v5, %v1760_v9  ;;  %v3890_v15 = vpop.f32.mrb[61].mxu0 }
 0x245   : > { %v2694_v34 = vsel %vm2217_vm1, %v2691_v13, %v2693_v26  ;;  %v2945_v55 = vrot.slane %v2836_v50, 4  ;;  %v2092_v42 = vpop.f32.mrb[62].mxu0 }
 0x246   : > { %v2786_v46 = vadd.f32 %v2785_v33, %v2694_v34  ;;  %3519 = vst [vmem:[%s4450_s8 + $0x80] sm:$0xff] %v3456_v32   ;;  %v2696_v19 = vsel %vm2217_vm1, %v2693_v26, %v2695_v23  ;;  %v2947_v17 = vrot.slane %v2837_v48, 4  ;;  %v2277_v10 = vrot.slane %v3958_v30, 4  ;;  %v3891_v28 = vpop.f32.mrb[63].mxu0 }
 0x247   : > { %v2946_v31 = vsel %vm2217_vm1, %v2943_v44, %v2945_v55  ;;  %v3959_v47 = vadd.f32 %v2092_v42, %v1763_v1  ;;  %v1768_v60 = vpop.f32.mrb[64].mxu1 }
 0x248   : > { %v3038_v35 = vadd.f32 %v3037_v36, %v2946_v31  ;;  %v2787_v59 = vadd.f32 %v2786_v46, %v2696_v19  ;;  %v2948_v52 = vsel %vm2217_vm1, %v2945_v55, %v2947_v17  ;;  %v2278_v6 = vsel %vm2217_vm1, %v2275_v24, %v2277_v10  ;;  %v3794_v57 = vpop.f32.mrb[65].mxu1 }
 0x249   : > { %v2370_v12 = vsel %vm6451_vm8, %v2278_v6, 0.0  ;;  %v2279_v16 = vrot.slane %v3959_v47, 4  ;;  %v1771_v43 = vpop.f32.mrb[66].mxu1 }
 0x24a   : > { %v3039_v11 = vadd.f32 %v3038_v35, %v2948_v52  ;;  %v2697_v49 = vrot.slane %v2370_v12, 4  ;;  %v2838_v29 = vmul.f32 %v2370_v12, %v2370_v12  ;;  %v3795_v13 = vpop.f32.mrb[67].mxu1 }
 0x24b   : > { %v2280_v4 = vsel %vm2217_vm1, %v2277_v10, %v2279_v16  ;;  %v2097_v3 = vpop.f32.mrb[64].mxu0 }
 0x24c   : > { %v2698_v37 = vsel %vm2217_vm1, %v2695_v23, %v2697_v49  ;;  %v2949_v40 = vrot.slane %v2838_v29, 4  ;;  %v2371_v61 = vsel %vm6453_vm9, %v2280_v4, 0.0  ;;  %v3960_v51 = vadd.f32 %v2097_v3, %v1768_v60  ;;  %v3894_v0 = vpop.f32.mrb[65].mxu0 }
 0x24d   : > { %v2788_v25 = vadd.f32 %v2787_v59, %v2698_v37  ;;  %v3461_v21 = vpack.c.bf16 %v2371_v61, %v2370_v12  ;;  %v2699_v53 = vrot.slane %v2371_v61, 4  ;;  %v2839_v41 = vmul.f32 %v2371_v61, %v2371_v61  ;;  %v2100_v33 = vpop.f32.mrb[66].mxu0  ;;  %v6457_v37 = vld [vmem:[#allocation31_spill] sm:$0xff] }
 0x24e   : > { %v2950_v44 = vsel %vm2217_vm1, %v2947_v17, %v2949_v40  ;;  %v2281_v14 = vrot.slane %v3960_v51, 4  ;;  %v3961_v24 = vadd.f32 %v2100_v33, %v1771_v43  ;;  %v3895_v9 = vpop.f32.mrb[67].mxu0  ;;  %vm6458_vm13 = vcmp.eq.s32.totalorder %v6457_v37, 1 }
 0x24f   : > { %v3040_v38 = vadd.f32 %v3039_v11, %v2950_v44  ;;  %3520 = vst [vmem:[%s4450_s8 + $0x88] sm:$0xff] %v3461_v21   ;;  %v2700_v54 = vsel %vm2217_vm1, %v2697_v49, %v2699_v53  ;;  %v2951_v39 = vrot.slane %v2839_v41, 4  ;;  %v1776_v2 = vpop.f32.mrb[68].mxu1 }
 0x250   : > { %v2789_v36 = vadd.f32 %v2788_v25, %v2700_v54  ;;  %v2282_v20 = vsel %vm2217_vm1, %v2279_v16, %v2281_v14  ;;  %v2283_v22 = vrot.slane %v3961_v24, 4  ;;  %v3798_v50 = vpop.f32.mrb[69].mxu1 }
 0x251   : > { %v2952_v1 = vsel %vm2217_vm1, %v2949_v40, %v2951_v39  ;;  %v2372_v26 = vsel %vm6454_vm10, %v2282_v20, 0.0  ;;  %v1779_v32 = vpop.f32.mrb[70].mxu1 }
 0x252   : > { %v3041_v8 = vadd.f32 %v3040_v38, %v2952_v1  ;;  %v2701_v58 = vrot.slane %v2372_v26, 4  ;;  %v2840_v62 = vmul.f32 %v2372_v26, %v2372_v26  ;;  %v2284_v5 = vsel %vm2217_vm1, %v2281_v14, %v2283_v22  ;;  %v3799_v48 = vpop.f32.mrb[71].mxu1 }
 0x253   : > { %v2373_v23 = vsel %vm6455_vm11, %v2284_v5, 0.0  ;;  %v2105_v30 = vpop.f32.mrb[68].mxu0 }
 0x254   : > { %v2702_v15 = vsel %vm2217_vm1, %v2699_v53, %v2701_v58  ;;  %v2953_v34 = vrot.slane %v2840_v62, 4  ;;  %v3466_v55 = vpack.c.bf16 %v2373_v23, %v2372_v26  ;;  %v2703_v42 = vrot.slane %v2373_v23, 4  ;;  %v3898_v18 = vpop.f32.mrb[69].mxu0 }
 0x255   : > { %v2790_v46 = vadd.f32 %v2789_v36, %v2702_v15  ;;  %v2841_v19 = vmul.f32 %v2373_v23, %v2373_v23  ;;  %v3962_v17 = vadd.f32 %v2105_v30, %v1776_v2  ;;  %v2108_v10 = vpop.f32.mrb[70].mxu0 }
 0x256   : > { %v2954_v28 = vsel %vm2217_vm1, %v2951_v39, %v2953_v34  ;;  %3521 = vst [vmem:[%s4450_s8 + $0x90] sm:$0xff] %v3466_v55   ;;  %v2704_v31 = vsel %vm2217_vm1, %v2701_v58, %v2703_v42  ;;  %v3963_v47 = vadd.f32 %v2108_v10, %v1779_v32  ;;  %v3899_v56 = vpop.f32.mrb[71].mxu0  ;;  %v6460_v55 = vld [vmem:[#allocation32_spill] sm:$0xff] }
 0x257   : > { %v3042_v35 = vadd.f32 %v3041_v8, %v2954_v28  ;;  %v2791_v59 = vadd.f32 %v2790_v46, %v2704_v31  ;;  %v2955_v52 = vrot.slane %v2841_v19, 4  ;;  %v2285_v6 = vrot.slane %v3962_v17, 4  ;;  %v1784_v12 = vpop.f32.mrb[72].mxu1 }
 0x258   : > { %v2287_v60 = vrot.slane %v3963_v47, 4  ;;  %v3802_v11 = vpop.f32.mrb[73].mxu1  ;;  %vm6461_vm15 = vcmp.eq.s32.totalorder %v6460_v55, 1 }
 0x259   : > { %v2956_v16 = vsel %vm2217_vm1, %v2953_v34, %v2955_v52  ;;  %v2286_v57 = vsel %vm2217_vm1, %v2283_v22, %v2285_v6  ;;  %v1787_v4 = vpop.f32.mrb[74].mxu1 }
 0x25a   : > { %v3043_v49 = vadd.f32 %v3042_v35, %v2956_v16  ;;  %v2374_v29 = vsel %vm6456_vm12, %v2286_v57, 0.0  ;;  %v2288_v43 = vsel %vm2217_vm1, %v2285_v6, %v2287_v60  ;;  %v3803_v7 = vpop.f32.mrb[75].mxu1 }
 0x25b   : > { %v2705_v13 = vrot.slane %v2374_v29, 4  ;;  %v2842_v3 = vmul.f32 %v2374_v29, %v2374_v29  ;;  %v2375_v40 = vsel %vm6458_vm13, %v2288_v43, 0.0  ;;  %v2113_v61 = vpop.f32.mrb[72].mxu0  ;;  %v6464_v7 = vld [vmem:[#allocation33_spill] sm:$0xff] }
 0x25c   : > { %v3471_v51 = vpack.c.bf16 %v2375_v40, %v2374_v29  ;;  %v2707_v0 = vrot.slane %v2375_v40, 4  ;;  %v2843_v25 = vmul.f32 %v2375_v40, %v2375_v40  ;;  %v3964_v21 = vadd.f32 %v2113_v61, %v1784_v12  ;;  %v3902_v53 = vpop.f32.mrb[73].mxu0 }
 0x25d   : > { %v2706_v41 = vsel %vm2217_vm1, %v2703_v42, %v2705_v13  ;;  %v2957_v63 = vrot.slane %v2842_v3, 4  ;;  %v2116_v33 = vpop.f32.mrb[74].mxu0  ;;  %vm6465_vm3 = vcmp.eq.s32.totalorder %v6464_v7, 1 }
 0x25e   : > { %v2792_v44 = vadd.f32 %v2791_v59, %v2706_v41  ;;  %3522 = vst [vmem:[%s4450_s8 + $0x98] sm:$0xff] %v3471_v51   ;;  %v2708_v14 = vsel %vm2217_vm1, %v2705_v13, %v2707_v0  ;;  %v2959_v24 = vrot.slane %v2843_v25, 4  ;;  %v2289_v9 = vrot.slane %v3964_v21, 4  ;;  %v3903_v38 = vpop.f32.mrb[75].mxu0 }
 0x25f   : > { %v2958_v54 = vsel %vm2217_vm1, %v2955_v52, %v2957_v63  ;;  %v3965_v39 = vadd.f32 %v2116_v33, %v1787_v4  ;;  %v1792_v1 = vpop.f32.mrb[76].mxu1 }
 0x260   : > { %v3044_v36 = vadd.f32 %v3043_v49, %v2958_v54  ;;  %v2793_v20 = vadd.f32 %v2792_v44, %v2708_v14  ;;  %v2960_v22 = vsel %vm2217_vm1, %v2957_v63, %v2959_v24  ;;  %v2290_v2 = vsel %vm2217_vm1, %v2287_v60, %v2289_v9  ;;  %v3806_v8 = vpop.f32.mrb[77].mxu1  ;;  %v6462_v49 = vld [vmem:[#allocation34_spill] sm:$0xff] }
 0x261   : > { %v2376_v26 = vsel %vm6459_vm14, %v2290_v2, 0.0  ;;  %v2291_v50 = vrot.slane %v3965_v39, 4  ;;  %v1795_v32 = vpop.f32.mrb[78].mxu1  ;;  %vm6463_vm5 = vcmp.eq.s32.totalorder %v6462_v49, 1 }
 0x262   : > { %v3045_v58 = vadd.f32 %v3044_v36, %v2960_v22  ;;  %v2709_v62 = vrot.slane %v2376_v26, 4  ;;  %v2844_v5 = vmul.f32 %v2376_v26, %v2376_v26  ;;  %v3807_v48 = vpop.f32.mrb[79].mxu1 }
 0x263   : > { %v2292_v23 = vsel %vm2217_vm1, %v2289_v9, %v2291_v50  ;;  %v2121_v30 = vpop.f32.mrb[76].mxu0 }
 0x264   : > { %v2710_v15 = vsel %vm2217_vm1, %v2707_v0, %v2709_v62  ;;  %v2961_v34 = vrot.slane %v2844_v5, 4  ;;  %v2377_v42 = vsel %vm6461_vm15, %v2292_v23, 0.0  ;;  %v3966_v18 = vadd.f32 %v2121_v30, %v1792_v1  ;;  %v3906_v27 = vpop.f32.mrb[77].mxu0 }
 0x265   : > { %v2794_v46 = vadd.f32 %v2793_v20, %v2710_v15  ;;  %v3476_v19 = vpack.c.bf16 %v2377_v42, %v2376_v26  ;;  %v2711_v17 = vrot.slane %v2377_v42, 4  ;;  %v2845_v10 = vmul.f32 %v2377_v42, %v2377_v42  ;;  %v2124_v28 = vpop.f32.mrb[78].mxu0 }
 0x266   : > { %v2962_v31 = vsel %vm2217_vm1, %v2959_v24, %v2961_v34  ;;  %v2293_v47 = vrot.slane %v3966_v18, 4  ;;  %v3967_v56 = vadd.f32 %v2124_v28, %v1795_v32  ;;  %v3907_v35 = vpop.f32.mrb[79].mxu0 }
 0x267   : > { %v3046_v59 = vadd.f32 %v3045_v58, %v2962_v31  ;;  %3523 = vst [vmem:[%s4450_s8 + $0xa0] sm:$0xff] %v3476_v19   ;;  %v2712_v52 = vsel %vm2217_vm1, %v2709_v62, %v2711_v17  ;;  %v2963_v6 = vrot.slane %v2845_v10, 4  ;;  %v1800_v57 = vpop.f32.mrb[80].mxu1 }
 0x268   : > { %v2795_v60 = vadd.f32 %v2794_v46, %v2712_v52  ;;  %v2294_v12 = vsel %vm2217_vm1, %v2291_v50, %v2293_v47  ;;  %v2295_v16 = vrot.slane %v3967_v56, 4  ;;  %v3810_v43 = vpop.f32.mrb[81].mxu1 }
 0x269   : > { %v2964_v11 = vsel %vm2217_vm1, %v2961_v34, %v2963_v6  ;;  %v2378_v29 = vsel %vm6463_vm5, %v2294_v12, 0.0  ;;  %v1803_v40 = vpop.f32.mrb[82].mxu1 }
 0x26a   : > { %v3047_v4 = vadd.f32 %v3046_v59, %v2964_v11  ;;  %v2713_v13 = vrot.slane %v2378_v29, 4  ;;  %v2846_v3 = vmul.f32 %v2378_v29, %v2378_v29  ;;  %v2296_v37 = vsel %vm2217_vm1, %v2293_v47, %v2295_v16  ;;  %v3811_v51 = vpop.f32.mrb[83].mxu1 }
 0x26b   : > { %v2379_v61 = vsel %vm6465_vm3, %v2296_v37, 0.0  ;;  %v2129_v0 = vpop.f32.mrb[80].mxu0 }
 0x26c   : > { %v2714_v25 = vsel %vm2217_vm1, %v2711_v17, %v2713_v13  ;;  %v2965_v21 = vrot.slane %v2846_v3, 4  ;;  %v3481_v53 = vpack.c.bf16 %v2379_v61, %v2378_v29  ;;  %v2715_v41 = vrot.slane %v2379_v61, 4  ;;  %v3910_v63 = vpop.f32.mrb[81].mxu0 }
 0x26d   : > { %v2796_v33 = vadd.f32 %v2795_v60, %v2714_v25  ;;  %v2847_v44 = vmul.f32 %v2379_v61, %v2379_v61  ;;  %v3968_v14 = vadd.f32 %v2129_v0, %v1800_v57  ;;  %v2132_v24 = vpop.f32.mrb[82].mxu0 }
 0x26e   : > { %v2966_v9 = vsel %vm2217_vm1, %v2963_v6, %v2965_v21  ;;  %3524 = vst [vmem:[%s4450_s8 + $0xa8] sm:$0xff] %v3481_v53   ;;  %v2716_v38 = vsel %vm2217_vm1, %v2713_v13, %v2715_v41  ;;  %v3911_v54 = vpop.f32.mrb[83].mxu0 }
 0x26f   : > { %v3048_v39 = vadd.f32 %v3047_v4, %v2966_v9  ;;  %v2797_v36 = vadd.f32 %v2796_v33, %v2716_v38  ;;  %v2967_v20 = vrot.slane %v2847_v44, 4  ;;  %v2297_v22 = vrot.slane %v3968_v14, 4 }
 0x271   : > { %v2968_v2 = vsel %vm2217_vm1, %v2965_v21, %v2967_v20  ;;  %v2298_v1 = vsel %vm2217_vm1, %v2295_v16, %v2297_v22 }
 0x272   : > { %v3049_v26 = vadd.f32 %v3048_v39, %v2968_v2  ;;  %v2380_v50 = vsel %vm6466_vm0, %v2298_v1, 0.0 }
 0x273   : > { %v3295_v8 = vpack.c.bf16 %v2380_v50, %v2380_v50  ;;  %v2717_v58 = vrot.slane %v2380_v50, 4  ;;  %v2848_v62 = vmul.f32 %v2380_v50, %v2380_v50 }
 0x275   : > { %2591 = vst [vmem:[%s4450_s8 + $0xb0] sm:$0xf] %v3295_v8  ;;  %v2718_v5 = vsel %vm2217_vm1, %v2715_v41, %v2717_v58  ;;  %v2969_v32 = vrot.slane %v2848_v62, 4  ;;  %v2799_v48 = vsel %vm2217_vm1, %v2717_v58, 0.0 }
 0x276   : > { %v2798_v23 = vadd.f32 %v2797_v36, %v2718_v5 }
 0x277   : > { %v2970_v30 = vsel %vm2217_vm1, %v2967_v20, %v2969_v32  ;;  %v3051_v55 = vsel %vm2217_vm1, %v2969_v32, 0.0 }
 0x278   : > { %v2800_v15 = vadd.f32 %v2799_v48, %v2798_v23  ;;  %v3050_v34 = vadd.f32 %v3049_v26, %v2970_v30 }
 0x27a   : > { %v2801_v42 = vrot.slane %v2800_v15, 4  ;;  %v3052_v45 = vadd.f32 %v3051_v55, %v3050_v34 }
 0x27c   : > { %v2802_v18 = vadd.f32 %v2801_v42, %v2800_v15  ;;  %v3053_v27 = vrot.slane %v3052_v45, 4 }
 0x27e   : > { %v2803_v46 = vrot.slane %v2802_v18, 2  ;;  %v3054_v19 = vadd.f32 %v3053_v27, %v3052_v45 }
 0x280   : > { %v2804_v17 = vadd.f32 %v2803_v46, %v2802_v18  ;;  %v3055_v10 = vrot.slane %v3054_v19, 2 }
 0x282   : > { %v2805_v28 = vrot.slane %v2804_v17, 1  ;;  %v3056_v31 = vadd.f32 %v3055_v10, %v3054_v19 }
 0x284   : > { %v2806_v47 = vadd.f32 %v2805_v28, %v2804_v17  ;;  %v3057_v56 = vrot.slane %v3056_v31, 1 }
 0x286   : > { %2807 = vst [vmem:[%s262_s29] sm:$0x1] %v2806_v47  ;;  %v3058_v35 = vadd.f32 %v3057_v56, %v3056_v31 }
 0x288   : > { %3059 = vst [vmem:[%s262_s29 + $0x1] sm:$0x1] %v3058_v35 }
 0x289 PF: > { %s17_s21 = sadd.s32 1, %s4291_s21  }
 0x28a   : > { %p14_p4 = scmp.ge.s32.totalorder %s17_s21, 4  }
 0x28c   :  { %16 = sbr.rel (!%p14_p4) target bundleno = 1 (0x1), region = 84 }

// kernel: light_res_block.5
= control target key start
LH: loop header
LB: loop body
LE: loop exit
PB: predicated region body
PF: predicated region fallthrough
CT: control target
= control target key end

     0   :  { %s8163_s21 = smov 0   ;;  %s10870_s0 = inlined_call_operand.vmem [shape: bf16[2,396,128], index: 0, kind: input, shape index: {}]   ;;  %s10871_s1 = inlined_call_operand.vmem [shape: f32[396,1], index: 1, kind: input, shape index: {}]   ;;  %s10872_s2 = inlined_call_operand.vmem [shape: f32[1,128], index: 2, kind: input, shape index: {}]   ;;  %s10873_s3 = inlined_call_operand.vmem [shape: f32[1,128], index: 3, kind: input, shape index: {}]   ;;  %s10874_s4 = inlined_call_operand.vmem [shape: bf16[9,128,128], index: 4, kind: input, shape index: {}]   ;;  %s10875_s5 = inlined_call_operand.vmem [shape: bf16[2,396,128], index: 5, kind: output, shape index: {0}]   ;;  %s10876_s6 = inlined_call_operand.vmem [shape: f32[2,2,128], index: 6, kind: output, shape index: {1}]  }
   0x1 LB: > { %s5508_s22 = sadd.s32 4294967295, %s8123_s21   ;;  %p5512_p0 = scmp.ge.s32.totalorder %s8123_s21, 1  ;;  %s8123_s21 = sphi %s8163_s21, %s17_s21  }
   0x2   : > { %p215_p1 = scmp.lt.s32.totalorder %s8123_s21, 3 }
   0x4   : > { %p216_p2 = pnand %p5512_p0, %p215_p1 }
   0x6   : > { %219 = sbr.rel (%p216_p2) target bundleno = 1150 (0x47e), region = 40 }
   0xd   : > { %v268_v0 = vld [vmem:[%s10871_s1 + $0x30] sm:$0xff]  ;;  %v266_v1 = vld [vmem:[%s10871_s1 + $0x20] sm:$0xff]  ;;  %v269_v2 = vld [vmem:[%s10871_s1 + $0x38] sm:$0xff]  ;;  %v8125_v3 = vmov 0   ;;  %v10878_v9 = vmov 0.0   ;;  %p249_p3 = scmp.lt.s32.totalorder %s5508_s22, 1 }
   0xe   : > { %7850 = vset.pattern.permute.xlu1 %v8125_v3  ;;  %7849 = vset.pattern.permute.xlu0 %v8125_v3  ;;  %vm512_vm0 = vcmp.gt.f32.partialorder %v268_v0, 0.5  ;;  %vm510_vm1 = vcmp.gt.f32.partialorder %v266_v1, 0.5  ;;  %vm513_vm2 = vcmp.gt.f32.partialorder %v269_v2, 0.5  ;;  %v267_v4 = vld [vmem:[%s10871_s1 + $0x28] sm:$0xff]  ;;  %v265_v7 = vld [vmem:[%s10871_s1 + $0x18] sm:$0xff]  ;;  %v264_v8 = vld [vmem:[%s10871_s1 + $0x10] sm:$0xff] }
   0xf   : > { %v834_v5 = vsel %vm512_vm0, 1, %v8125_v3  ;;  %v832_v6 = vsel %vm510_vm1, 1, %v8125_v3  ;;  %vm511_vm3 = vcmp.gt.f32.partialorder %v267_v4, 0.5  ;;  %6692 = vmatprep.subr.bf16.mxu0 %v10878_v9  ;;  %6292 = vmatprep.subr.bf16.mxu1 %v10878_v9  ;;  %v835_v10 = vsel %vm513_vm2, 1, %v8125_v3  ;;  %v271_v12 = vld [vmem:[%s10871_s1 + $0x48] sm:$0xff]  ;;  %v270_v13 = vld [vmem:[%s10871_s1 + $0x40] sm:$0xff] }
  0x10   : > { %889 = vperm.xlu1 %7850, %v834_v5   ;;  %883 = vperm.xlu0 %7849, %v832_v6   ;;  %v833_v11 = vsel %vm511_vm3, 1, %v8125_v3  ;;  %vm509_vm4 = vcmp.gt.f32.partialorder %v265_v7, 0.5  ;;  %vm508_vm5 = vcmp.gt.f32.partialorder %v264_v8, 0.5  ;;  %vm515_vm6 = vcmp.gt.f32.partialorder %v271_v12, 0.5  ;;  %v273_v16 = vld [vmem:[%s10871_s1 + $0x58] sm:$0xff]  ;;  %v272_v17 = vld [vmem:[%s10871_s1 + $0x50] sm:$0xff] }
  0x11   : > { %v831_v14 = vsel %vm509_vm4, 1, %v8125_v3  ;;  %v830_v15 = vsel %vm508_vm5, 1, %v8125_v3  ;;  %vm514_vm7 = vcmp.gt.f32.partialorder %v270_v13, 0.5  ;;  %v837_v18 = vsel %vm515_vm6, 1, %v8125_v3  ;;  %v275_v20 = vld [vmem:[%s10871_s1 + $0x68] sm:$0xff]  ;;  %v274_v21 = vld [vmem:[%s10871_s1 + $0x60] sm:$0xff] }
  0x12   : > { %v836_v19 = vsel %vm514_vm7, 1, %v8125_v3  ;;  %vm517_vm8 = vcmp.gt.f32.partialorder %v273_v16, 0.5  ;;  %vm516_vm9 = vcmp.gt.f32.partialorder %v272_v17, 0.5  ;;  %vm519_vm10 = vcmp.gt.f32.partialorder %v275_v20, 0.5  ;;  %v277_v24 = vld [vmem:[%s10871_s1 + $0x78] sm:$0xff]  ;;  %v276_v25 = vld [vmem:[%s10871_s1 + $0x70] sm:$0xff] }
  0x13   : > { %v839_v22 = vsel %vm517_vm8, 1, %v8125_v3  ;;  %v838_v23 = vsel %vm516_vm9, 1, %v8125_v3  ;;  %vm518_vm11 = vcmp.gt.f32.partialorder %v274_v21, 0.5  ;;  %v279_v26 = vld [vmem:[%s10871_s1 + $0x88] sm:$0xff]  ;;  %v278_v27 = vld [vmem:[%s10871_s1 + $0x80] sm:$0xff]  ;;  %v841_v28 = vsel %vm519_vm10, 1, %v8125_v3 }
  0x14   : > { %892 = vperm.xlu1 %7850, %v835_v10   ;;  %886 = vperm.xlu0 %7849, %v833_v11   ;;  %v840_v29 = vsel %vm518_vm11, 1, %v8125_v3  ;;  %vm521_vm12 = vcmp.gt.f32.partialorder %v277_v24, 0.5  ;;  %vm520_vm13 = vcmp.gt.f32.partialorder %v276_v25, 0.5  ;;  %vm523_vm14 = vcmp.gt.f32.partialorder %v279_v26, 0.5  ;;  %v281_v30 = vld [vmem:[%s10871_s1 + $0x98] sm:$0xff]  ;;  %v280_v33 = vld [vmem:[%s10871_s1 + $0x90] sm:$0xff] }
  0x15   : > { %vm522_vm15 = vcmp.gt.f32.partialorder %v278_v27, 0.5  ;;  %v843_v31 = vsel %vm521_vm12, 1, %v8125_v3  ;;  %v842_v32 = vsel %vm520_vm13, 1, %v8125_v3  ;;  %v7851_v34 = vld [vmem:[%s10874_s4 + $0x100] sm:$0xff]   ;;  %v845_v35 = vsel %vm523_vm14, 1, %v8125_v3  ;;  %v283_v37 = vld [vmem:[%s10871_s1 + $0xa8] sm:$0xff] }
  0x16   : > { %v844_v36 = vsel %vm522_vm15, 1, %v8125_v3  ;;  %6693 = vmatpush3.bf16.msra.mxu0 %v7851_v34  ;;  %v7852_v38 = vld [vmem:[%s10874_s4 + $0x108] sm:$0xff]   ;;  %s11301_s22 = smov (!%p249_p3, %s5508_s22), 1  ;;  %v7853_v39 = vld [vmem:[%s10874_s4 + $0x40] sm:$0xff]   ;;  %vm525_vm0 = vcmp.gt.f32.partialorder %v281_v30, 0.5  ;;  %vm524_vm1 = vcmp.gt.f32.partialorder %v280_v33, 0.5 }
  0x17   : > { %6694 = vmatprep.subr.bf16.mxu0 %v10878_v9  ;;  %v282_v40 = vld [vmem:[%s10871_s1 + $0xa0] sm:$0xff]  ;;  %s7837_s25 = smul.u32 200, %s11301_s22  ;;  %6293 = vmatpush3.bf16.msra.mxu1 %v7853_v39  ;;  %v7855_v41 = vld [vmem:[%s10874_s4 + $0x48] sm:$0xff]   ;;  %vm8127_vm2 = vmmov 0   ;;  %v7854_v42 = vld [vmem:[%s10874_s4 + $0x110] sm:$0xff]   ;;  %vm527_vm3 = vcmp.gt.f32.partialorder %v283_v37, 0.5 }
  0x18   : > { %880 = vperm.xlu1 %7850, %v831_v14   ;;  %877 = vperm.xlu0 %7849, %v830_v15   ;;  %v847_v43 = vsel %vm525_vm0, 1, %v8125_v3  ;;  %v846_v44 = vsel %vm524_vm1, 1, %v8125_v3  ;;  %vm526_vm4 = vcmp.gt.f32.partialorder %v282_v40, 0.5  ;;  %v7857_v45 = vld [vmem:[%s10874_s4 + $0x50] sm:$0xff]   ;;  %v285_v46 = vld [vmem:[%s10871_s1 + $0xb8] sm:$0xff]  ;;  %v849_v49 = vsel %vm527_vm3, 1, %v8125_v3 }
  0x19   : > { %6708 = vmatprep.mubr.msk.bf16.mxu0 %vm8127_vm2, %v10878_v9  ;;  %6294 = vmatprep.subr.bf16.mxu1 %v10878_v9  ;;  %s8282_s8 = scalar_lea.vmem %s10875_s5, %s7837_s25  ;;  %v7856_v47 = vld [vmem:[%s10874_s4 + $0x118] sm:$0xff]   ;;  %v284_v48 = vld [vmem:[%s10871_s1 + $0xb0] sm:$0xff]  ;;  %v848_v50 = vsel %vm526_vm4, 1, %v8125_v3  ;;  %vm529_vm5 = vcmp.gt.f32.partialorder %v285_v46, 0.5  ;;  %v7858_v52 = vld [vmem:[%s10874_s4 + $0x120] sm:$0xff]   ;;  %s8441_s13 = scalar_lea.vmem %s10870_s0, %s7837_s25 }
  0x1a   : > { %6695 = vmatpush3.bf16.msra.mxu0 %v7852_v38  ;;  %4743 = vst [vmem:[%s8282_s8] sm:$0xf] %v8125_v3  ;;  %4744 = vst [vmem:[%s8282_s8 + $0x4] sm:$0xf] %v8125_v3  ;;  %6308 = vmatprep.mubr.msk.bf16.mxu1 %vm8127_vm2, %v10878_v9  ;;  %v7859_v51 = vld [vmem:[%s10874_s4 + $0x58] sm:$0xff]   ;;  %vm528_vm6 = vcmp.gt.f32.partialorder %v284_v48, 0.5  ;;  %v287_v53 = vld [vmem:[%s10871_s1 + $0xc8] sm:$0xff] }
  0x1b   : > { %6696 = vmatprep.subr.bf16.mxu0 %v10878_v9  ;;  %4745 = vst [vmem:[%s8282_s8 + $0x8] sm:$0xf] %v8125_v3  ;;  %4746 = vst [vmem:[%s8282_s8 + $0xc] sm:$0xf] %v8125_v3  ;;  %6295 = vmatpush3.bf16.msra.mxu1 %v7855_v41  ;;  %v286_v54 = vld [vmem:[%s10871_s1 + $0xc0] sm:$0xff]  ;;  %v851_v55 = vsel %vm529_vm5, 1, %v8125_v3 }
  0x1c   : > { %898 = vperm.xlu1 %7850, %v837_v18   ;;  %895 = vperm.xlu0 %7849, %v836_v19   ;;  %4747 = vst [vmem:[%s8282_s8 + $0x10] sm:$0x3] %v8125_v3  ;;  %4954 = vst [vmem:[%s8282_s8 + $0xb4] sm:$0xf] %v8125_v3  ;;  %v850_v56 = vsel %vm528_vm6, 1, %v8125_v3  ;;  %v7861_v57 = vld [vmem:[%s10874_s4 + $0x60] sm:$0xff]  }
  0x1d   : > { %4955 = vst [vmem:[%s8282_s8 + $0xb8] sm:$0xf] %v8125_v3  ;;  %4956 = vst [vmem:[%s8282_s8 + $0xbc] sm:$0xf] %v8125_v3  ;;  %6296 = vmatprep.subr.bf16.mxu1 %v10878_v9  ;;  %vm531_vm7 = vcmp.gt.f32.partialorder %v287_v53, 0.5  ;;  %vm530_vm8 = vcmp.gt.f32.partialorder %v286_v54, 0.5 }
  0x1e   : > { %4957 = vst [vmem:[%s8282_s8 + $0xc0] sm:$0xf] %v8125_v3  ;;  %4958 = vst [vmem:[%s8282_s8 + $0xc4] sm:$0x3] %v8125_v3  ;;  %6697 = vmatpush3.bf16.msra.mxu0 %v7854_v42  ;;  %v289_v58 = vld [vmem:[%s10871_s1 + $0xd8] sm:$0xff]  ;;  %v7860_v59 = vld [vmem:[%s10874_s4 + $0x128] sm:$0xff]  }
  0x1f   : > { %6698 = vmatprep.subr.bf16.mxu0 %v10878_v9  ;;  %6297 = vmatpush3.bf16.msra.mxu1 %v7857_v45  ;;  %v288_v60 = vld [vmem:[%s10871_s1 + $0xd0] sm:$0xff]  ;;  %v853_v61 = vsel %vm531_vm7, 1, %v8125_v3  ;;  %v852_v62 = vsel %vm530_vm8, 1, %v8125_v3  ;;  %vm533_vm9 = vcmp.gt.f32.partialorder %v289_v58, 0.5  ;;  %v7863_v63 = vld [vmem:[%s10874_s4 + $0x68] sm:$0xff]   ;;  %v290_v2 = vld [vmem:[%s10871_s1 + $0xe0] sm:$0xff] }
  0x20   : > { %904 = vperm.xlu1 %7850, %v839_v22   ;;  %901 = vperm.xlu0 %7849, %v838_v23   ;;  %vm532_vm10 = vcmp.gt.f32.partialorder %v288_v60, 0.5  ;;  %v7862_v0 = vld [vmem:[%s10874_s4 + $0x130] sm:$0xff]   ;;  %v291_v1 = vld [vmem:[%s10871_s1 + $0xe8] sm:$0xff]  ;;  %v855_v4 = vsel %vm533_vm9, 1, %v8125_v3  ;;  %vm534_vm12 = vcmp.gt.f32.partialorder %v290_v2, 0.5  ;;  %v7864_v7 = vld [vmem:[%s10874_s4 + $0x138] sm:$0xff]  }
  0x21   : > { %6298 = vmatprep.subr.bf16.mxu1 %v10878_v9  ;;  %v854_v5 = vsel %vm532_vm10, 1, %v8125_v3  ;;  %v7865_v6 = vld [vmem:[%s10874_s4 + $0x70] sm:$0xff]   ;;  %vm535_vm11 = vcmp.gt.f32.partialorder %v291_v1, 0.5  ;;  %v293_v8 = vld [vmem:[%s10871_s1 + $0xf8] sm:$0xff]  ;;  %v856_v12 = vsel %vm534_vm12, 1, %v8125_v3  ;;  %v295_v14 = vld [vmem:[%s10871_s1 + $0x108] sm:$0xff] }
  0x22   : > { %6699 = vmatpush3.bf16.msra.mxu0 %v7856_v47  ;;  %v292_v10 = vld [vmem:[%s10871_s1 + $0xf0] sm:$0xff]  ;;  %v857_v11 = vsel %vm535_vm11, 1, %v8125_v3  ;;  %v7867_v13 = vld [vmem:[%s10874_s4 + $0x78] sm:$0xff]   ;;  %vm537_vm13 = vcmp.gt.f32.partialorder %v293_v8, 0.5  ;;  %v294_v15 = vld [vmem:[%s10871_s1 + $0x100] sm:$0xff]  ;;  %vm539_vm15 = vcmp.gt.f32.partialorder %v295_v14, 0.5 }
  0x23   : > { %6700 = vmatprep.subr.bf16.mxu0 %v10878_v9  ;;  %6299 = vmatpush3.bf16.msra.mxu1 %v7859_v51  ;;  %vm536_vm14 = vcmp.gt.f32.partialorder %v292_v10, 0.5  ;;  %v859_v16 = vsel %vm537_vm13, 1, %v8125_v3  ;;  %vm538_vm0 = vcmp.gt.f32.partialorder %v294_v15, 0.5  ;;  %v297_v18 = vld [vmem:[%s10871_s1 + $0x118] sm:$0xff]  ;;  %v296_v19 = vld [vmem:[%s10871_s1 + $0x110] sm:$0xff]  ;;  %v299_v20 = vld [vmem:[%s10871_s1 + $0x128] sm:$0xff] }
  0x24   : > { %910 = vperm.xlu1 %7850, %v841_v28   ;;  %907 = vperm.xlu0 %7849, %v840_v29   ;;  %v858_v17 = vsel %vm536_vm14, 1, %v8125_v3  ;;  %v861_v21 = vsel %vm539_vm15, 1, %v8125_v3  ;;  %v860_v22 = vsel %vm538_vm0, 1, %v8125_v3  ;;  %vm541_vm1 = vcmp.gt.f32.partialorder %v297_v18, 0.5  ;;  %v298_v23 = vld [vmem:[%s10871_s1 + $0x120] sm:$0xff]  ;;  %v301_v25 = vld [vmem:[%s10871_s1 + $0x138] sm:$0xff] }
  0x25   : > { %6300 = vmatprep.subr.bf16.mxu1 %v10878_v9  ;;  %vm540_vm3 = vcmp.gt.f32.partialorder %v296_v19, 0.5  ;;  %vm543_vm4 = vcmp.gt.f32.partialorder %v299_v20, 0.5  ;;  %v863_v24 = vsel %vm541_vm1, 1, %v8125_v3  ;;  %vm542_vm5 = vcmp.gt.f32.partialorder %v298_v23, 0.5  ;;  %v300_v27 = vld [vmem:[%s10871_s1 + $0x130] sm:$0xff]  ;;  %v303_v28 = vld [vmem:[%s10871_s1 + $0x148] sm:$0xff] }
  0x26   : > { %6701 = vmatpush3.bf16.msra.mxu0 %v7858_v52  ;;  %v862_v26 = vsel %vm540_vm3, 1, %v8125_v3  ;;  %v865_v29 = vsel %vm543_vm4, 1, %v8125_v3  ;;  %v302_v30 = vld [vmem:[%s10871_s1 + $0x140] sm:$0xff]  ;;  %vm545_vm6 = vcmp.gt.f32.partialorder %v301_v25, 0.5  ;;  %vm544_vm7 = vcmp.gt.f32.partialorder %v300_v27, 0.5  ;;  %v305_v33 = vld [vmem:[%s10871_s1 + $0x158] sm:$0xff] }
  0x27   : > { %6702 = vmatprep.subr.bf16.mxu0 %v10878_v9  ;;  %6301 = vmatpush3.bf16.msra.mxu1 %v7861_v57  ;;  %vm547_vm8 = vcmp.gt.f32.partialorder %v303_v28, 0.5  ;;  %vm546_vm9 = vcmp.gt.f32.partialorder %v302_v30, 0.5  ;;  %v304_v34 = vld [vmem:[%s10871_s1 + $0x150] sm:$0xff]  ;;  %v866_v37 = vsel %vm544_vm7, 1, %v8125_v3  ;;  %v307_v40 = vld [vmem:[%s10871_s1 + $0x168] sm:$0xff]  ;;  %vm549_vm10 = vcmp.gt.f32.partialorder %v305_v33, 0.5 }
  0x28   : > { %916 = vperm.xlu1 %7850, %v843_v31   ;;  %913 = vperm.xlu0 %7849, %v842_v32   ;;  %v864_v31 = vsel %vm542_vm5, 1, %v8125_v3  ;;  %v867_v32 = vsel %vm545_vm6, 1, %v8125_v3  ;;  %v869_v38 = vsel %vm547_vm8, 1, %v8125_v3  ;;  %v868_v39 = vsel %vm546_vm9, 1, %v8125_v3  ;;  %v306_v45 = vld [vmem:[%s10871_s1 + $0x160] sm:$0xff]  ;;  %v5989_v51 = vld [vmem:[%s8441_s13 + $0x8] sm:$0xff]  }
  0x29   : > { %6302 = vmatprep.subr.bf16.mxu1 %v10878_v9  ;;  %vm548_vm11 = vcmp.gt.f32.partialorder %v304_v34, 0.5  ;;  %v8469_v47 = vld [vmem:[%s10873_s3] ss:$0 sm:$0xff]  ;;  %vm551_vm12 = vcmp.gt.f32.partialorder %v307_v40, 0.5  ;;  %v871_v52 = vsel %vm549_vm10, 1, %v8125_v3  ;;  %vm550_vm13 = vcmp.gt.f32.partialorder %v306_v45, 0.5 }
  0x2a   : > { %6703 = vmatpush3.bf16.msra.mxu0 %v7860_v59  ;;  %v870_v53 = vsel %vm548_vm11, 1, %v8125_v3  ;;  %v309_v54 = vld [vmem:[%s10871_s1 + $0x178] sm:$0xff]  ;;  %v5805_v59 = vunpack.c.h.bf16 %v5989_v51  ;;  %v873_v60 = vsel %vm551_vm12, 1, %v8125_v3  ;;  %v5992_v1 = vld [vmem:[%s8441_s13 + $0x20] sm:$0xff]   ;;  %v5993_v8 = vld [vmem:[%s8441_s13 + $0x28] sm:$0xff]   ;;  %vm2677_vm0 = vcmask 1045504  }
  0x2b   : > { %6704 = vmatprep.subr.bf16.mxu0 %v10878_v9  ;;  %6303 = vmatpush3.bf16.msra.mxu1 %v7863_v63  ;;  %v872_v63 = vsel %vm550_vm13, 1, %v8125_v3  ;;  %vm553_vm14 = vcmp.gt.f32.partialorder %v309_v54, 0.5  ;;  %v5816_v14 = vunpack.c.l.bf16 %v5992_v1  ;;  %v5821_v18 = vunpack.c.h.bf16 %v5993_v8  ;;  %v5994_v30 = vld [vmem:[%s8441_s13 + $0x30] sm:$0xff]   ;;  %v5996_v54 = vld [vmem:[%s8441_s13 + $0x40] sm:$0xff]   ;;  %s5515_s17 = sshll.u32 %s11301_s22, 1 }
  0x2c   : > { %922 = vperm.xlu1 %7850, %v845_v35   ;;  %919 = vperm.xlu0 %7849, %v844_v36   ;;  %v5991_v35 = vld [vmem:[%s8441_s13 + $0x18] sm:$0xff]   ;;  %v5990_v36 = vld [vmem:[%s8441_s13 + $0x10] sm:$0xff]   ;;  %v875_v10 = vsel %vm553_vm14, 1, %v8125_v3  ;;  %vm1183_vm6 = vcmask 1046528   ;;  %s262_s18 = scalar_lea.vmem %s10876_s6, %s5515_s17 }
  0x2d   : > { %6304 = vmatprep.subr.bf16.mxu1 %v10878_v9  ;;  %v5812_v41 = vunpack.c.l.bf16 %v5991_v35  ;;  %v5808_v42 = vunpack.c.l.bf16 %v5990_v36  ;;  %v5809_v46 = vunpack.c.h.bf16 %v5990_v36 }
  0x2e   : > { %6705 = vmatpush3.bf16.msra.mxu0 %v7862_v0 }
  0x2f   : > { %6706 = vmatprep.subr.bf16.mxu0 %v10878_v9  ;;  %6305 = vmatpush3.bf16.msra.mxu1 %v7865_v6 }
  0x30   : > { %928 = vperm.xlu1 %7850, %v847_v43   ;;  %925 = vperm.xlu0 %7849, %v846_v44   ;;  %v8461_v43 = vld [vmem:[%s10872_s2] ss:$0 sm:$0xff]  ;;  %v5813_v44 = vunpack.c.h.bf16 %v5991_v35 }
  0x31   : > { %6306 = vmatprep.subr.bf16.mxu1 %v10878_v9  ;;  %v413_v48 = vmul.f32 %v5812_v41, %v8461_v43 }
  0x32   : > { %6707 = vmatpush3.bf16.msra.mxu0 %v7864_v7 }
  0x33   : > { %6792 = vmatprep.subr.bf16.mxu0 %v10878_v9  ;;  %6307 = vmatpush3.bf16.msra.mxu1 %v7867_v13  ;;  %v8485_v57 = vadd.f32 %v8469_v47, %v413_v48 }
  0x34   : > { %934 = vperm.xlu1 %7850, %v849_v49   ;;  %931 = vperm.xlu0 %7849, %v848_v50   ;;  %v411_v49 = vmul.f32 %v5808_v42, %v8461_v43  ;;  %v414_v50 = vmul.f32 %v5813_v44, %v8461_v43 }
  0x35   : > { %6392 = vmatprep.subr.bf16.mxu1 %v10878_v9  ;;  %v558_v2 = vsub.f32 0.0, %v8485_v57 }
  0x36   : > { %v8488_v58 = vadd.f32 %v8469_v47, %v411_v49 }
  0x37   : > { %v608_v15 = vmul.f32 1.442695, %v558_v2 }
  0x38   : > { %940 = vperm.xlu1 %7850, %v851_v55   ;;  %937 = vperm.xlu0 %7849, %v850_v56   ;;  %v412_v55 = vmul.f32 %v5809_v46, %v8461_v43  ;;  %v308_v56 = vld [vmem:[%s10871_s1 + $0x170] sm:$0xff]  ;;  %v5995_v46 = vld [vmem:[%s8441_s13 + $0x38] sm:$0xff]  }
  0x39   : > { %vm552_vm15 = vcmp.gt.f32.partialorder %v308_v56, 0.5  ;;  %7923 = vpow2.f32 %v608_v15 }
  0x3a   : > { %v8496_v0 = vadd.f32 %v8469_v47, %v412_v55 }
  0x3c   : > { %946 = vperm.xlu1 %7850, %v853_v61   ;;  %943 = vperm.xlu0 %7849, %v852_v62   ;;  %v8492_v61 = vadd.f32 %v8469_v47, %v414_v50  ;;  %v5804_v62 = vunpack.c.l.bf16 %v5989_v51  ;;  %v557_v13 = vsub.f32 0.0, %v8496_v0 }
  0x3e   : > { %v559_v6 = vsub.f32 0.0, %v8492_v61  ;;  %v409_v7 = vmul.f32 %v5804_v62, %v8461_v43 }
  0x40   : > { %952 = vperm.xlu1 %7850, %v855_v4   ;;  %949 = vperm.xlu0 %7849, %v854_v5   ;;  %v556_v4 = vsub.f32 0.0, %v8488_v58  ;;  %v410_v5 = vmul.f32 %v5805_v59, %v8461_v43  ;;  %v610_v19 = vmul.f32 1.442695, %v559_v6  ;;  %v8512_v20 = vadd.f32 %v8469_v47, %v409_v7 }
  0x41   : > { %v5828_v59 = vunpack.c.l.bf16 %v5995_v46 }
  0x42   : > { %v554_v25 = vsub.f32 0.0, %v8512_v20 }
  0x43   : > { %v7924_v49 = vpop.eup %7923 }
  0x44   : > { %958 = vperm.xlu1 %7850, %v857_v11   ;;  %955 = vperm.xlu0 %7849, %v856_v12   ;;  %v874_v11 = vsel %vm552_vm15, 1, %v8125_v3  ;;  %v5817_v12 = vunpack.c.h.bf16 %v5992_v1  ;;  %v5820_v3 = vunpack.c.l.bf16 %v5993_v8  ;;  %v600_v33 = vmul.f32 1.442695, %v554_v25 }
  0x45   : > { %v696_v62 = vadd.f32 1.0, %v7924_v49 }
  0x46   : > { %v417_v28 = vmul.f32 %v5820_v3, %v8461_v43 }
  0x48   : > { %964 = vperm.xlu1 %7850, %v859_v16   ;;  %961 = vperm.xlu0 %7849, %v858_v17   ;;  %v604_v16 = vmul.f32 1.442695, %v556_v4  ;;  %v8509_v17 = vadd.f32 %v8469_v47, %v410_v5  ;;  %v8532_v35 = vadd.f32 %v8469_v47, %v417_v28  ;;  %v5833_v4 = vunpack.c.h.bf16 %v5996_v54  ;;  %v5998_v5 = vld [vmem:[%s8441_s13 + $0x50] sm:$0xff]  }
  0x4a   : > { %v555_v23 = vsub.f32 0.0, %v8509_v17  ;;  %7925 = vpow2.f32 %v604_v16  ;;  %v562_v41 = vsub.f32 0.0, %v8532_v35  ;;  %v424_v3 = vmul.f32 %v5833_v4, %v8461_v43 }
  0x4b   : > { %7927 = vpow2.f32 %v610_v19  ;;  %v5841_v19 = vunpack.c.h.bf16 %v5998_v5 }
  0x4c   : > { %970 = vperm.xlu1 %7850, %v861_v21   ;;  %967 = vperm.xlu0 %7849, %v860_v22   ;;  %v416_v21 = vmul.f32 %v5817_v12, %v8461_v43  ;;  %v415_v22 = vmul.f32 %v5816_v14, %v8461_v43  ;;  %v616_v50 = vmul.f32 1.442695, %v562_v41  ;;  %v421_v14 = vmul.f32 %v5828_v59, %v8461_v43 }
  0x4e   : > { %v8520_v27 = vadd.f32 %v8469_v47, %v416_v21 }
  0x50   : > { %976 = vperm.xlu1 %7850, %v863_v24   ;;  %973 = vperm.xlu0 %7849, %v862_v26   ;;  %v418_v24 = vmul.f32 %v5821_v18, %v8461_v43  ;;  %v606_v26 = vmul.f32 1.442695, %v557_v13  ;;  %v561_v34 = vsub.f32 0.0, %v8520_v27 }
  0x52   : > { %7929 = vpow2.f32 %v606_v26  ;;  %v614_v40 = vmul.f32 1.442695, %v561_v34 }
  0x54   : > { %982 = vperm.xlu1 %7850, %v865_v29   ;;  %979 = vperm.xlu0 %7849, %v864_v31   ;;  %v8524_v29 = vadd.f32 %v8469_v47, %v415_v22  ;;  %v602_v31 = vmul.f32 1.442695, %v555_v23  ;;  %v7926_v51 = vpop.eup %7925  ;;  %v5840_v22 = vunpack.c.l.bf16 %v5998_v5 }
  0x55   : > { %v7928_v55 = vpop.eup %7927  ;;  %v694_v2 = vadd.f32 1.0, %v7926_v51 }
  0x56   : > { %v560_v36 = vsub.f32 0.0, %v8524_v29  ;;  %7931 = vpow2.f32 %v602_v31  ;;  %v697_v7 = vadd.f32 1.0, %v7928_v55 }
  0x57   : > { %7933 = vpow2.f32 %v600_v33  ;;  %v8560_v33 = vadd.f32 %v8469_v47, %v421_v14 }
  0x58   : > { %988 = vperm.xlu1 %7850, %v867_v32   ;;  %985 = vperm.xlu0 %7849, %v866_v37   ;;  %v8528_v32 = vadd.f32 %v8469_v47, %v418_v24  ;;  %v5825_v37 = vunpack.c.h.bf16 %v5994_v30  ;;  %v612_v42 = vmul.f32 1.442695, %v560_v36  ;;  %7935 = vpow2.f32 %v614_v40 }
  0x59   : > { %v428_v36 = vmul.f32 %v5841_v19, %v8461_v43  ;;  %v566_v49 = vsub.f32 0.0, %v8560_v33 }
  0x5a   : > { %v420_v44 = vmul.f32 %v5825_v37, %v8461_v43  ;;  %7937 = vpow2.f32 %v612_v42  ;;  %v8565_v37 = vadd.f32 %v8469_v47, %v424_v3  ;;  %v8572_v42 = vld [vmem:[%s8441_s13 + $0x58] sm:$0xff]  }
  0x5b   : > { %v8583_v51 = vadd.f32 %v8469_v47, %v428_v36  ;;  %v5845_v59 = vunpack.c.h.bf16 %v8572_v42 }
  0x5c   : > { %994 = vperm.xlu1 %7850, %v869_v38   ;;  %991 = vperm.xlu0 %7849, %v868_v39   ;;  %v563_v38 = vsub.f32 0.0, %v8528_v32  ;;  %v5824_v39 = vunpack.c.l.bf16 %v5994_v30 }
  0x5e   : > { %v419_v45 = vmul.f32 %v5824_v39, %v8461_v43  ;;  %v618_v48 = vmul.f32 1.442695, %v563_v38  ;;  %v427_v38 = vmul.f32 %v5840_v22, %v8461_v43 }
  0x60   : > { %1000 = vperm.xlu1 %7850, %v871_v52   ;;  %997 = vperm.xlu0 %7849, %v870_v53   ;;  %v8541_v52 = vadd.f32 %v8469_v47, %v420_v44  ;;  %v5829_v53 = vunpack.c.h.bf16 %v5995_v46  ;;  %v8545_v56 = vadd.f32 %v8469_v47, %v419_v45  ;;  %7939 = vpow2.f32 %v618_v48 }
  0x61   : > { %7941 = vpow2.f32 %v616_v50  ;;  %v8587_v55 = vadd.f32 %v8469_v47, %v427_v38 }
  0x62   : > { %v565_v8 = vsub.f32 0.0, %v8541_v52  ;;  %v564_v13 = vsub.f32 0.0, %v8545_v56  ;;  %7943 = vrcp.f32 %v696_v62 }
  0x63   : > { %7945 = vrcp.f32 %v694_v2 }
  0x64   : > { %1006 = vperm.xlu1 %7850, %v873_v60   ;;  %1003 = vperm.xlu0 %7849, %v872_v63   ;;  %v7930_v60 = vpop.eup %7929  ;;  %v5997_v63 = vld [vmem:[%s8441_s13 + $0x48] sm:$0xff]   ;;  %7947 = vrcp.f32 %v697_v7  ;;  %v622_v23 = vmul.f32 1.442695, %v565_v8  ;;  %v620_v26 = vmul.f32 1.442695, %v564_v13  ;;  %v573_v8 = vsub.f32 0.0, %v8583_v51 }
  0x65   : > { %v7932_v1 = vpop.eup %7931  ;;  %v695_v12 = vadd.f32 1.0, %v7930_v60  ;;  %v5837_v15 = vunpack.c.h.bf16 %v5997_v63  ;;  %v5836_v18 = vunpack.c.l.bf16 %v5997_v63  ;;  %v430_v13 = vmul.f32 %v5845_v59, %v8461_v43 }
  0x66   : > { %v7934_v6 = vpop.eup %7933  ;;  %v693_v16 = vadd.f32 1.0, %v7932_v1 }
  0x67   : > { %v692_v21 = vadd.f32 1.0, %v7934_v6  ;;  %v7936_v25 = vpop.eup %7935  ;;  %7949 = vrcp.f32 %v695_v12  ;;  %v426_v30 = vmul.f32 %v5837_v15, %v8461_v43  ;;  %v425_v34 = vmul.f32 %v5836_v18, %v8461_v43 }
  0x68   : > { %1012 = vperm.xlu1 %7850, %v875_v10   ;;  %1009 = vperm.xlu0 %7849, %v874_v11   ;;  %v422_v10 = vmul.f32 %v5829_v53, %v8461_v43  ;;  %v5832_v11 = vunpack.c.l.bf16 %v5996_v54  ;;  %v7938_v31 = vpop.eup %7937  ;;  %7951 = vrcp.f32 %v693_v16  ;;  %v699_v40 = vadd.f32 1.0, %v7936_v25 }
  0x69   : > { %7953 = vrcp.f32 %v692_v21  ;;  %v698_v45 = vadd.f32 1.0, %v7938_v31  ;;  %v8576_v48 = vadd.f32 %v8469_v47, %v426_v30  ;;  %v8580_v50 = vadd.f32 %v8469_v47, %v425_v34  ;;  %v6000_v30 = vld [vmem:[%s8441_s13 + $0x60] sm:$0xff]  }
  0x6a   : > { %v423_v24 = vmul.f32 %v5832_v11, %v8461_v43  ;;  %v8556_v28 = vadd.f32 %v8469_v47, %v422_v10  ;;  %v7940_v39 = vpop.eup %7939  ;;  %7955 = vpow2.f32 %v622_v23  ;;  %v569_v54 = vsub.f32 0.0, %v8565_v37 }
  0x6b   : > { %v7942_v44 = vpop.eup %7941  ;;  %7957 = vpow2.f32 %v620_v26  ;;  %v701_v53 = vadd.f32 1.0, %v7940_v39  ;;  %v571_v4 = vsub.f32 0.0, %v8576_v48  ;;  %v624_v6 = vmul.f32 1.442695, %v566_v49 }
  0x6c   : > { %v8569_v41 = vadd.f32 %v8469_v47, %v423_v24  ;;  %v567_v46 = vsub.f32 0.0, %v8556_v28  ;;  %v7944_v60 = vpop.eup %7943  ;;  %7959 = vrcp.f32 %v699_v40  ;;  %v700_v62 = vadd.f32 1.0, %v7942_v44 }
  0x6d   : > { %v7946_v1 = vpop.eup %7945  ;;  %7961 = vrcp.f32 %v698_v45  ;;  %v570_v7 = vsub.f32 0.0, %v8580_v50  ;;  %v630_v11 = vmul.f32 1.442695, %v569_v54  ;;  %v572_v12 = vsub.f32 0.0, %v8587_v55  ;;  %v8628_v54 = vld [vmem:[%s8441_s13 + $0x68] sm:$0xff]  }
  0x6e   : > { %v568_v63 = vsub.f32 0.0, %v8569_v41  ;;  %v626_v2 = vmul.f32 1.442695, %v567_v46  ;;  %v7948_v5 = vpop.eup %7947  ;;  %7963 = vrcp.f32 %v701_v53  ;;  %v788_v19 = vmul.f32 %v7944_v60, %v8485_v57 }
  0x6f   : > { %7965 = vrcp.f32 %v700_v62  ;;  %v786_v3 = vmul.f32 %v7946_v1, %v8488_v58  ;;  %v634_v22 = vmul.f32 1.442695, %v571_v4  ;;  %v789_v24 = vmul.f32 %v7948_v5, %v8492_v61 }
  0x70   : > { %v628_v15 = vmul.f32 1.442695, %v568_v63  ;;  %7967 = vpow2.f32 %v626_v2  ;;  %v632_v25 = vmul.f32 1.442695, %v570_v7  ;;  %v638_v26 = vmul.f32 1.442695, %v573_v8 }
  0x71   : > { %v7950_v10 = vpop.eup %7949  ;;  %7969 = vpow2.f32 %v624_v6  ;;  %v636_v36 = vmul.f32 1.442695, %v572_v12  ;;  %v8606_v57 = vadd.f32 %v8469_v47, %v430_v13  ;;  %v5844_v40 = vunpack.c.l.bf16 %v8572_v42 }
  0x72   : > { %v7952_v14 = vpop.eup %7951  ;;  %v787_v34 = vmul.f32 %v7950_v10, %v8496_v0  ;;  %7971 = vpow2.f32 %v630_v11  ;;  %v5849_v44 = vunpack.c.h.bf16 %v6000_v30  ;;  %v5848_v6 = vunpack.c.l.bf16 %v6000_v30 }
  0x73   : > { %v7954_v16 = vpop.eup %7953  ;;  %v785_v58 = vmul.f32 %v7952_v14, %v8509_v17  ;;  %7973 = vpow2.f32 %v628_v15  ;;  %v575_v62 = vsub.f32 0.0, %v8606_v57  ;;  %v429_v4 = vmul.f32 %v5844_v40, %v8461_v43  ;;  %v7866_v15 = vld [vmem:[%s10874_s4 + $0x140] sm:$0xff]  }
  0x74   : > { %v7956_v23 = vpop.eup %7955  ;;  %v784_v39 = vmul.f32 %v7954_v16, %v8512_v20  ;;  %7975 = vpow2.f32 %v634_v22  ;;  %v432_v5 = vmul.f32 %v5849_v44, %v8461_v43  ;;  %v5853_v11 = vunpack.c.h.bf16 %v8628_v54 }
  0x75   : > { %v7958_v31 = vpop.eup %7957  ;;  %v703_v0 = vadd.f32 1.0, %v7956_v23  ;;  %7977 = vpow2.f32 %v632_v25  ;;  %v8655_v30 = vadd.f32 %v8469_v47, %v429_v4 }
  0x76   : > { %v7960_v45 = vpop.eup %7959  ;;  %v702_v46 = vadd.f32 1.0, %v7958_v31  ;;  %v431_v31 = vmul.f32 %v5848_v6, %v8461_v43  ;;  %v434_v44 = vmul.f32 %v5853_v11, %v8461_v43 }
  0x77   : > { %v7962_v17 = vpop.eup %7961  ;;  %7979 = vrcp.f32 %v703_v0  ;;  %v791_v8 = vmul.f32 %v7960_v45, %v8520_v27  ;;  %v7869_v0 = vld [vmem:[%s10874_s4 + $0x148] sm:$0xff]  }
  0x78   : > { %v7964_v63 = vpop.eup %7963  ;;  %v790_v10 = vmul.f32 %v7962_v17, %v8524_v29  ;;  %7981 = vrcp.f32 %v702_v46  ;;  %v642_v29 = vmul.f32 1.442695, %v575_v62  ;;  %v7868_v62 = vld [vmem:[%s10874_s4] sm:$0xff]  }
  0x79   : > { %v7966_v7 = vpop.eup %7965  ;;  %7983 = vpow2.f32 %v638_v26  ;;  %v793_v46 = vmul.f32 %v7964_v63, %v8528_v32  ;;  %v8690_v32 = vadd.f32 %v8469_v47, %v431_v31 }
  0x7a   : > { %v7968_v12 = vpop.eup %7967  ;;  %7985 = vpow2.f32 %v636_v36  ;;  %v792_v17 = vmul.f32 %v7966_v7, %v8532_v35  ;;  %v6002_v35 = vld [vmem:[%s8441_s13 + $0x70] sm:$0xff]   ;;  %v8703_v7 = vadd.f32 %v8469_v47, %v434_v44 }
  0x7b   : > { %v7970_v16 = vpop.eup %7969  ;;  %v705_v26 = vadd.f32 1.0, %v7968_v12  ;;  %7987 = vpow2.f32 %v642_v29  ;;  %v5857_v12 = vunpack.c.h.bf16 %v6002_v35 }
  0x7c   : > { %v704_v40 = vadd.f32 1.0, %v7970_v16  ;;  %v574_v16 = vsub.f32 0.0, %v8655_v30 }
  0x7d   : > { %7989 = vrcp.f32 %v705_v26  ;;  %v576_v26 = vsub.f32 0.0, %v8690_v32 }
  0x7e   : > { %7991 = vrcp.f32 %v704_v40 }
  0x8f   : > { %v8596_v18 = vpop.permute.xlu1 %889  ;;  %v8599_v21 = vpop.permute.xlu0 %883 }
  0x90   : > { %11040 = vst [vmem:[#allocation2_spill] sm:$0xff] %v8596_v18  ;;  %11041 = vst [vmem:[#allocation3_spill] sm:$0xff] %v8599_v21  ;;  %vm1018_vm1 = vcmp.eq.s32.totalorder %v8596_v18, 1  ;;  %vm1016_vm3 = vcmp.eq.s32.totalorder %v8599_v21, 1 }
  0x91   : > { %v1064_v49 = vsel %vm1018_vm1, %v788_v19, 0.0  ;;  %v1062_v53 = vsel %vm1016_vm3, %v786_v3, 0.0  ;;  %v7972_v3 = vpop.eup %7971 }
  0x93   : > { %v8611_v61 = vpop.permute.xlu1 %892  ;;  %v8613_v38 = vpop.permute.xlu0 %886 }
  0x94   : > { %11042 = vst [vmem:[#allocation4_spill] sm:$0xff] %v8611_v61  ;;  %11043 = vst [vmem:[#allocation5_spill] sm:$0xff] %v8613_v38  ;;  %vm1019_vm4 = vcmp.eq.s32.totalorder %v8611_v61, 1  ;;  %vm1017_vm5 = vcmp.eq.s32.totalorder %v8613_v38, 1 }
  0x95   : > { %v1065_v20 = vsel %vm1019_vm4, %v789_v24, 0.0  ;;  %v1063_v42 = vsel %vm1017_vm5, %v787_v34, 0.0  ;;  %v7974_v34 = vpop.eup %7973 }
  0x96   : > { %v8630_v59 = vpack.c.bf16 %v1065_v20, %v1064_v49  ;;  %v8632_v60 = vpack.c.bf16 %v1063_v42, %v1062_v53  ;;  %v8670_v45 = vpop.eup %7975  ;;  %v706_v44 = vadd.f32 1.0, %v7974_v34 }
  0x97   : > { %v881_v1 = vpop.permute.xlu1 %880  ;;  %v878_v2 = vpop.permute.xlu0 %877 }
  0x98   : > { %11044 = vst [vmem:[#allocation6_spill] sm:$0xff] %v8630_v59  ;;  %vm1015_vm7 = vcmp.eq.s32.totalorder %v881_v1, 1  ;;  %vm1014_vm8 = vcmp.eq.s32.totalorder %v878_v2, 1  ;;  %v2678_v13 = vrot.slane %v8632_v60, 2  ;;  %v2679_v14 = vrot.slane %v8630_v59, 2  ;;  %v7978_v63 = vpop.eup %7977 }
  0x99   : > { %v1061_v19 = vsel %vm1015_vm7, %v785_v58, 0.0  ;;  %v1060_v27 = vsel %vm1014_vm8, %v784_v39, 0.0  ;;  %v1185_v42 = vrot.slane %v8632_v60, 1  ;;  %v8687_v1 = vadd.f32 %v8469_v47, %v432_v5  ;;  %v7980_v4 = vpop.eup %7979  ;;  %v7870_v5 = vld [vmem:[%s10874_s4 + $0x150] sm:$0xff]  }
  0x9a   : > { %v8645_v22 = vpack.c.bf16 %v1061_v19, %v1060_v27  ;;  %v2680_v25 = vsel %vm2677_vm0, %v2678_v13, %v2679_v14  ;;  %v5852_v2 = vunpack.c.l.bf16 %v8628_v54  ;;  %v7871_v19 = vld [vmem:[%s10874_s4 + $0x8] sm:$0xff]   ;;  %v5856_v27 = vunpack.c.l.bf16 %v6002_v35 }
  0x9b   : > { %v8647_v23 = vpop.permute.xlu1 %898  ;;  %v8649_v24 = vpop.permute.xlu0 %895  ;;  %6709 = vmatmul.mubr.bf16.vlgmr.msra.gmra.mrb[0].mxu0 %v2680_v25  ;;  %v707_v25 = vadd.f32 1.0, %v7972_v3  ;;  %v577_v31 = vsub.f32 0.0, %v8687_v1  ;;  %v1187_v40 = vrot.slane %v8630_v59, 1  ;;  %v7872_v3 = vld [vmem:[%s10874_s4 + $0x158] sm:$0xff]  }
  0x9c   : > { %11045 = vst [vmem:[#allocation7_spill] sm:$0xff] %v8647_v23  ;;  %11046 = vst [vmem:[#allocation8_spill] sm:$0xff] %v8649_v24  ;;  %vm10981_vm9 = vcmp.eq.s32.totalorder %v8647_v23, 1  ;;  %vm1020_vm10 = vcmp.eq.s32.totalorder %v8649_v24, 1  ;;  %6793 = vmatpush3.bf16.msra.mxu0 %v7866_v15  ;;  %6712 = vmatprep.mubr.msk.bf16.mxu0 %vm8127_vm2, %v10878_v9  ;;  %v1184_v49 = vrot.slane %v8645_v22, 1 }
  0x9d   : > { %v1067_v58 = vsel %vm10981_vm9, %v791_v8, 0.0  ;;  %v1066_v39 = vsel %vm1020_vm10, %v790_v10, 0.0  ;;  %6794 = vmatprep.subr.bf16.mxu0 %v10878_v9  ;;  %v7982_v8 = vpop.eup %7981  ;;  %7993 = vrcp.f32 %v707_v25 }
  0x9e   : > { %v8672_v36 = vpack.c.bf16 %v1067_v58, %v1066_v39  ;;  %v1186_v6 = vsel %vm1183_vm6, %v1184_v49, %v1185_v42  ;;  %v7984_v29 = vpop.eup %7983  ;;  %v433_v58 = vmul.f32 %v5852_v2, %v8461_v43  ;;  %v794_v49 = vmul.f32 %v7982_v8, %v8545_v56  ;;  %v7874_v2 = vld [vmem:[%s10874_s4 + $0x10] sm:$0xff]  }
  0x9f   : > { %v8678_v53 = vpop.permute.xlu1 %904  ;;  %v8680_v20 = vpop.permute.xlu0 %901  ;;  %6309 = vmatmul.mubr.bf16.vlgmr.msra.gmra.mrb[0].mxu1 %v1186_v6  ;;  %v435_v56 = vmul.f32 %v5856_v27, %v8461_v43  ;;  %7995 = vrcp.f32 %v706_v44  ;;  %v8786_v44 = vmul.f32 1.442695, %v576_v26 }
  0xa0   : > { %11047 = vst [vmem:[#allocation9_spill] sm:$0xff] %v8672_v36  ;;  %11048 = vst [vmem:[#allocation10_spill] sm:$0xff] %v8678_v53  ;;  %vm10979_vm11 = vcmp.eq.s32.totalorder %v8678_v53, 1  ;;  %vm10980_vm12 = vcmp.eq.s32.totalorder %v8680_v20, 1  ;;  %6795 = vmatpush3.bf16.msra.mxu0 %v7869_v0  ;;  %v2681_v11 = vrot.slane %v8672_v36, 2  ;;  %6393 = vmatpush3.bf16.msra.mxu1 %v7868_v62  ;;  %v579_v62 = vsub.f32 0.0, %v8703_v7 }
  0xa1   : > { %11049 = vst [vmem:[#allocation11_spill] sm:$0xff] %v8680_v20  ;;  %v1069_v10 = vsel %vm10979_vm11, %v793_v46, 0.0  ;;  %v1068_v54 = vsel %vm10980_vm12, %v792_v17, 0.0  ;;  %6796 = vmatprep.subr.bf16.mxu0 %v10878_v9  ;;  %6312 = vmatprep.mubr.msk.bf16.mxu1 %vm8127_vm2, %v10878_v9  ;;  %v7986_v46 = vpop.eup %7985  ;;  %v795_v17 = vmul.f32 %v7980_v4, %v8541_v52  ;;  %v709_v52 = vadd.f32 1.0, %v8670_v45  ;;  %v8881_v53 = vld [vmem:[%s8441_s13 + $0x88] sm:$0xff]  }
  0xa2   : > { %6394 = vmatprep.subr.bf16.mxu1 %v10878_v9  ;;  %v8725_v39 = vpack.c.bf16 %v1069_v10, %v1068_v54  ;;  %v2682_v0 = vsel %vm2677_vm0, %v2679_v14, %v2681_v11  ;;  %v436_v14 = vmul.f32 %v5857_v12, %v8461_v43  ;;  %v708_v4 = vadd.f32 1.0, %v7978_v63  ;;  %v8765_v54 = vld [vmem:[%s8441_s13 + $0x78] sm:$0xff]   ;;  %v7873_v63 = vld [vmem:[%s10874_s4 + $0x160] sm:$0xff]  }
  0xa3   : > { %v8711_v13 = vpop.permute.xlu1 %910  ;;  %v8713_v15 = vpop.permute.xlu0 %907  ;;  %6713 = vmatmul.mubr.bf16.gmra.mrb[4].mxu0 %v2682_v0  ;;  %v8755_v6 = vadd.f32 %v8469_v47, %v433_v58  ;;  %v1188_v45 = vsel %vm1183_vm6, %v1185_v42, %v1187_v40  ;;  %v640_v10 = vmul.f32 1.442695, %v574_v16  ;;  %v8774_v42 = vmul.f32 1.442695, %v577_v31 }
  0xa4   : > { %11050 = vst [vmem:[#allocation12_spill] sm:$0xff] %v8711_v13  ;;  %11051 = vst [vmem:[#allocation13_spill] sm:$0xff] %v8713_v15  ;;  %6797 = vmatpush3.bf16.msra.mxu0 %v7870_v5  ;;  %vm10937_vm13 = vcmp.eq.s32.totalorder %v8711_v13, 1  ;;  %vm10978_vm14 = vcmp.eq.s32.totalorder %v8713_v15, 1  ;;  %6716 = vmatprep.mubr.msk.bf16.mxu0 %vm8127_vm2, %v10878_v9  ;;  %v7988_v5 = vpop.eup %7987  ;;  %v10877_v8 = vrot.slane %v8725_v39, 2  ;;  %v8777_v25 = vadd.f32 %v8469_v47, %v436_v14 }
  0xa5   : > { %11052 = vst [vmem:[#allocation14_spill] sm:$0xff] %v8725_v39  ;;  %6798 = vmatprep.subr.bf16.mxu0 %v10878_v9  ;;  %6395 = vmatpush3.bf16.msra.mxu1 %v7871_v19  ;;  %v7990_v12 = vpop.eup %7989  ;;  %v1071_v19 = vsel %vm10937_vm13, %v795_v17, 0.0  ;;  %v1070_v27 = vsel %vm10978_vm14, %v794_v49, 0.0  ;;  %7997 = vrcp.f32 %v709_v52  ;;  %v8791_v31 = vadd.f32 %v8469_v47, %v435_v56  ;;  %v7877_v17 = vld [vmem:[%s10874_s4 + $0x18] sm:$0xff]  }
  0xa6   : > { %6396 = vmatprep.subr.bf16.mxu1 %v10878_v9  ;;  %v7992_v16 = vpop.eup %7991  ;;  %7999 = vrcp.f32 %v708_v4  ;;  %v711_v49 = vadd.f32 1.0, %v7984_v29  ;;  %v578_v14 = vsub.f32 0.0, %v8755_v6  ;;  %v8799_v26 = vpack.c.bf16 %v1071_v19, %v1070_v27  ;;  %v7875_v29 = vld [vmem:[%s10874_s4 + $0x168] sm:$0xff]  }
  0xa7   : > { %v8743_v34 = vpop.permute.xlu1 %916  ;;  %v8745_v35 = vpop.permute.xlu0 %913  ;;  %6313 = vmatmul.mubr.bf16.gmra.mrb[4].mxu1 %v1188_v45  ;;  %v5861_v45 = vunpack.c.h.bf16 %v8765_v54  ;;  %v10880_v52 = vrot.slane %v8672_v36, 1  ;;  %v710_v56 = vadd.f32 1.0, %v7986_v46  ;;  %v796_v4 = vmul.f32 %v7992_v16, %v8560_v33  ;;  %v7880_v33 = vld [vmem:[%s10874_s4 + $0x20] sm:$0xff]  }
  0xa8   : > { %11053 = vst [vmem:[#allocation15_spill] sm:$0xff] %v8743_v34  ;;  %11054 = vst [vmem:[#allocation16_spill] sm:$0xff] %v8745_v35  ;;  %6799 = vmatpush3.bf16.msra.mxu0 %v7872_v3  ;;  %6316 = vmatprep.mubr.msk.bf16.mxu1 %vm8127_vm2, %v10878_v9  ;;  %v8788_v3 = vmul.f32 1.442695, %v579_v62  ;;  %v2684_v62 = vsel %vm2677_vm0, %v2681_v11, %v10877_v8  ;;  %v713_v19 = vadd.f32 1.0, %v7988_v5  ;;  %v581_v27 = vsub.f32 0.0, %v8777_v25 }
  0xa9   : > { %6800 = vmatprep.subr.bf16.mxu0 %v10878_v9  ;;  %6397 = vmatpush3.bf16.msra.mxu1 %v7874_v2  ;;  %11057 = vst [vmem:[#allocation19_spill] sm:$0xff] %v8799_v26  ;;  %v797_v2 = vmul.f32 %v7990_v12, %v8556_v28  ;;  %v6008_v11 = vld [vmem:[%s8441_s13 + $0xa0] sm:$0xff]   ;;  %vm10888_vm15 = vcmp.eq.s32.totalorder %v8743_v34, 1  ;;  %vm10936_vm7 = vcmp.eq.s32.totalorder %v8745_v35, 1  ;;  %8001 = vpow2.f32 %v640_v10 }
  0xaa   : > { %6398 = vmatprep.subr.bf16.mxu1 %v10878_v9  ;;  %v580_v28 = vsub.f32 0.0, %v8791_v31  ;;  %8003 = vrcp.f32 %v711_v49  ;;  %v8827_v5 = vmul.f32 1.442695, %v578_v14  ;;  %v438_v12 = vmul.f32 %v5861_v45, %v8461_v43  ;;  %v8840_v8 = vld [vmem:[%s8441_s13 + $0x80] sm:$0xff]   ;;  %v7994_v14 = vpop.eup %7993 }
  0xab   : > { %v8780_v58 = vpop.permute.xlu1 %922  ;;  %v8782_v0 = vpop.permute.xlu0 %919  ;;  %6717 = vmatmul.mubr.bf16.gmra.mrb[8].mxu0 %v2684_v62  ;;  %v5860_v16 = vunpack.c.l.bf16 %v8765_v54  ;;  %v6009_v62 = vld [vmem:[%s8441_s13 + $0xa8] sm:$0xff]   ;;  %v1190_v10 = vsel %vm1183_vm6, %v1187_v40, %v10880_v52  ;;  %8005 = vrcp.f32 %v710_v56  ;;  %v5881_v49 = vunpack.c.h.bf16 %v6008_v11  ;;  %v7876_v54 = vld [vmem:[%s10874_s4 + $0x170] sm:$0xff]  }
  0xac   : > { %11055 = vst [vmem:[#allocation17_spill] sm:$0xff] %v8780_v58  ;;  %11056 = vst [vmem:[#allocation18_spill] sm:$0xff] %v8782_v0  ;;  %6801 = vmatpush3.bf16.msra.mxu0 %v7873_v63  ;;  %6720 = vmatprep.mubr.msk.bf16.mxu0 %vm8127_vm2, %v10878_v9  ;;  %v1073_v45 = vsel %vm10888_vm15, %v797_v2, 0.0  ;;  %8007 = vrcp.f32 %v713_v19  ;;  %v5880_v40 = vunpack.c.l.bf16 %v6008_v11  ;;  %v11060_v56 = vmov 0.0   ;;  %v7996_v52 = vpop.eup %7995  ;;  %v7882_v19 = vld [vmem:[%s10874_s4 + $0x28] sm:$0xff]  }
  0xad   : > { %6802 = vmatprep.subr.bf16.mxu0 %v10878_v9  ;;  %6399 = vmatpush3.bf16.msra.mxu1 %v7877_v17  ;;  %8009 = vpow2.f32 %v8774_v42  ;;  %v8857_v2 = vmul.f32 1.442695, %v581_v27  ;;  %v8859_v34 = vmul.f32 1.442695, %v580_v28  ;;  %v8865_v11 = vadd.f32 %v8469_v47, %v438_v12 }
  0xae   : > { %6400 = vmatprep.subr.bf16.mxu1 %v10878_v9  ;;  %v1072_v9 = vsel %vm10936_vm7, %v796_v4, 0.0  ;;  %v5885_v4 = vunpack.c.h.bf16 %v6009_v62  ;;  %v5865_v35 = vunpack.c.h.bf16 %v8840_v8  ;;  %v5884_v13 = vunpack.c.l.bf16 %v6009_v62  ;;  %v7878_v62 = vld [vmem:[%s10874_s4 + $0x178] sm:$0xff]  }
  0xaf   : > { %v8817_v46 = vpop.permute.xlu1 %928  ;;  %v8819_v63 = vpop.permute.xlu0 %925  ;;  %6317 = vmatmul.mubr.bf16.gmra.mrb[8].mxu1 %v1190_v10  ;;  %11063 = vst [vmem:[#allocation24_spill] sm:$0xff] %v8865_v11  ;;  %v437_v10 = vmul.f32 %v5860_v16, %v8461_v43  ;;  %v8872_v27 = vpack.c.bf16 %v1073_v45, %v1072_v9  ;;  %v11065_v28 = vrot.slane %v8799_v26, 2  ;;  %v10890_v12 = vrot.slane %v8725_v39, 1 }
  0xb0   : > { %11058 = vst [vmem:[#allocation20_spill] sm:$0xff] %v8817_v46  ;;  %11059 = vst [vmem:[#allocation21_spill] sm:$0xff] %v8819_v63  ;;  %6803 = vmatpush3.bf16.msra.mxu0 %v7875_v29  ;;  %6320 = vmatprep.mubr.msk.bf16.mxu1 %vm8127_vm2, %v11060_v56  ;;  %v8870_v42 = vpop.eup %7997  ;;  %v448_v16 = vmul.f32 %v5881_v49, %v8461_v43  ;;  %v799_v9 = vmul.f32 %v7994_v14, %v8565_v37  ;;  %v5864_v23 = vunpack.c.l.bf16 %v8840_v8  ;;  %v8909_v8 = vld [vmem:[%s10872_s2] ss:$0 sm:$0xff] }
  0xb1   : > { %6804 = vmatprep.subr.bf16.mxu0 %v11060_v56  ;;  %6401 = vmatpush3.bf16.msra.mxu1 %v7880_v33  ;;  %11064 = vst [vmem:[#allocation25_spill] sm:$0xff] %v8872_v27  ;;  %v11066_v33 = vrot.slane %v8725_v39, 2  ;;  %v8000_v20 = vpop.eup %7999  ;;  %v798_v45 = vmul.f32 %v7996_v52, %v8569_v41  ;;  %vm10893_vm8 = vcmp.eq.s32.totalorder %v8780_v58, 1  ;;  %vm10894_vm15 = vcmp.eq.s32.totalorder %v8782_v0, 1  ;;  %v7884_v41 = vld [vmem:[%s10874_s4 + $0x30] sm:$0xff]  }
  0xb2   : > { %6402 = vmatprep.subr.bf16.mxu1 %v11060_v56  ;;  %8011 = vpow2.f32 %v8786_v44  ;;  %v450_v37 = vmul.f32 %v5885_v4, %v8461_v43  ;;  %v440_v52 = vmul.f32 %v8909_v8, %v5865_v35  ;;  %v449_v44 = vmul.f32 %v8909_v8, %v5884_v13 }
  0xb3   : > { %v8850_v17 = vpop.permute.xlu1 %934  ;;  %v8852_v29 = vpop.permute.xlu0 %931  ;;  %v2686_v15 = vsel %vm2677_vm0, %v11066_v33, %v11065_v28  ;;  %v447_v28 = vmul.f32 %v5880_v40, %v8461_v43  ;;  %v11069_v40 = vrot.slane %v8672_v36, 1  ;;  %v8923_v24 = vadd.f32 %v8469_v47, %v448_v16 }
  0xb4   : > { %11061 = vst [vmem:[#allocation22_spill] sm:$0xff] %v8850_v17  ;;  %11062 = vst [vmem:[#allocation23_spill] sm:$0xff] %v8852_v29  ;;  %6805 = vmatpush3.bf16.msra.mxu0 %v7876_v54  ;;  %v8002_v43 = vpop.eup %8001  ;;  %v1075_v13 = vsel %vm10893_vm8, %v799_v9, 0.0  ;;  %v1074_v14 = vsel %vm10894_vm15, %v798_v45, 0.0  ;;  %8013 = vpow2.f32 %v8788_v3  ;;  %v439_v45 = vmul.f32 %v8909_v8, %v5864_v23 }
  0xb5   : > { %6721 = vmatmul.mubr.bf16.gmra.mrb[12].mxu0 %v2686_v15  ;;  %6806 = vmatprep.subr.bf16.mxu0 %v11060_v56  ;;  %v583_v15 = vsub.f32 0.0, %v8865_v11  ;;  %v1192_v4 = vsel %vm1183_vm6, %v11069_v40, %v10890_v12  ;;  %v8925_v35 = vpop.eup %8003  ;;  %v8935_v40 = vld [vmem:[%s10873_s3] ss:$0 sm:$0xff]  ;;  %8015 = vpow2.f32 %v8827_v5  ;;  %v712_v12 = vadd.f32 1.0, %v8002_v43  ;;  %v9029_v11 = vld [vmem:[%s8441_s13 + $0x90] sm:$0xff]  }
  0xb6   : > { %6724 = vmatprep.mubr.msk.bf16.mxu0 %vm8127_vm2, %v11060_v56  ;;  %6403 = vmatpush3.bf16.msra.mxu1 %v7882_v19  ;;  %v8938_v47 = vadd.f32 %v8935_v40, %v447_v28  ;;  %v8941_v16 = vpop.eup %8005  ;;  %v8951_v3 = vadd.f32 %v8935_v40, %v437_v10  ;;  %v8955_v28 = vadd.f32 %v8935_v40, %v450_v37  ;;  %v11075_v37 = vrot.slane %v8872_v27, 2 }
  0xb7   : > { %v8894_v49 = vpop.permute.xlu1 %940  ;;  %v8896_v54 = vpop.permute.xlu0 %937  ;;  %6404 = vmatprep.subr.bf16.mxu1 %v11060_v56  ;;  %6321 = vmatmul.mubr.bf16.gmra.mrb[12].mxu1 %v1192_v4  ;;  %v7886_v4 = vld [vmem:[%s10874_s4 + $0x38] sm:$0xff]   ;;  %v658_v19 = vmul.f32 1.442695, %v583_v15  ;;  %v8963_v58 = vadd.f32 %v8935_v40, %v440_v52  ;;  %v8966_v5 = vadd.f32 %v8935_v40, %v449_v44  ;;  %v8969_v10 = vpack.c.bf16 %v1075_v13, %v1074_v14 }
  0xb8   : > { %11067 = vst [vmem:[#allocation26_spill] sm:$0xff] %v8894_v49  ;;  %11068 = vst [vmem:[#allocation27_spill] sm:$0xff] %v8896_v54  ;;  %6807 = vmatpush3.bf16.msra.mxu0 %v7878_v62  ;;  %6324 = vmatprep.mubr.msk.bf16.mxu1 %vm8127_vm2, %v11060_v56  ;;  %v8960_v33 = vpop.eup %8007  ;;  %v10899_v43 = vrot.slane %v8799_v26, 1  ;;  %v593_v15 = vsub.f32 0.0, %v8923_v24  ;;  %v801_v52 = vmul.f32 %v8870_v42, %v8576_v48  ;;  %8017 = vpow2.f32 %v8857_v2 }
  0xb9   : > { %6892 = vmatprep.subr.bf16.mxu0 %v11060_v56  ;;  %11072 = vst [vmem:[#allocation30_spill] sm:$0xff] %v8951_v3  ;;  %11073 = vst [vmem:[#allocation31_spill] sm:$0xff] %v8963_v58  ;;  %v8010_v23 = vpop.eup %8009  ;;  %v800_v44 = vmul.f32 %v8000_v20, %v8580_v50  ;;  %v592_v14 = vsub.f32 0.0, %v8938_v47  ;;  %vm10905_vm8 = vcmp.eq.s32.totalorder %v8817_v46, 1  ;;  %vm10906_vm15 = vcmp.eq.s32.totalorder %v8819_v63, 1 }
  0xba   : > { %6405 = vmatpush3.bf16.msra.mxu1 %v7884_v41  ;;  %11074 = vst [vmem:[#allocation32_spill] sm:$0xff] %v8969_v10  ;;  %v11076_v41 = vrot.slane %v8799_v26, 2  ;;  %v582_v48 = vsub.f32 0.0, %v8951_v3  ;;  %v595_v50 = vsub.f32 0.0, %v8955_v28  ;;  %v715_v20 = vadd.f32 1.0, %v8010_v23 }
  0xbb   : > { %v8943_v62 = vpop.permute.xlu1 %946  ;;  %v8945_v9 = vpop.permute.xlu0 %943  ;;  %6406 = vmatprep.subr.bf16.mxu1 %v11060_v56  ;;  %8019 = vpow2.f32 %v8859_v34  ;;  %v594_v2 = vsub.f32 0.0, %v8966_v5  ;;  %v678_v23 = vmul.f32 1.442695, %v593_v15  ;;  %v1077_v34 = vsel %vm10905_vm8, %v801_v52, 0.0 }
  0xbc   : > { %11070 = vst [vmem:[#allocation28_spill] sm:$0xff] %v8943_v62  ;;  %11071 = vst [vmem:[#allocation29_spill] sm:$0xff] %v8945_v9  ;;  %v2688_v0 = vsel %vm2677_vm0, %v11076_v41, %v11075_v37  ;;  %v8012_v42 = vpop.eup %8011  ;;  %8021 = vrcp.f32 %v712_v12  ;;  %v11079_v41 = vrot.slane %v8725_v39, 1  ;;  %v585_v18 = vsub.f32 0.0, %v8963_v58 }
  0xbd   : > { %6725 = vmatmul.mubr.bf16.gmra.mrb[16].mxu0 %v2688_v0  ;;  %v8995_v0 = vadd.f32 %v8935_v40, %v439_v45  ;;  %v1076_v45 = vsel %vm10906_vm15, %v800_v44, 0.0  ;;  %v676_v38 = vmul.f32 1.442695, %v592_v14  ;;  %8023 = vpow2.f32 %v658_v19 }
  0xbe   : > { %6728 = vmatprep.mubr.msk.bf16.mxu0 %vm8127_vm2, %v11060_v56  ;;  %6407 = vmatpush3.bf16.msra.mxu1 %v7886_v4  ;;  %v1194_v61 = vsel %vm1183_vm6, %v11079_v41, %v10899_v43  ;;  %v656_v15 = vmul.f32 1.442695, %v582_v48  ;;  %v11082_v41 = vunpack.c.h.bf16 %v8881_v53  ;;  %v682_v43 = vmul.f32 1.442695, %v595_v50  ;;  %v8014_v44 = vpop.eup %8013 }
  0xbf   : > { %v8985_v13 = vpop.permute.xlu1 %952  ;;  %v8987_v37 = vpop.permute.xlu0 %949  ;;  %6492 = vmatprep.subr.bf16.mxu1 %v11060_v56  ;;  %6325 = vmatmul.mubr.bf16.gmra.mrb[16].mxu1 %v1194_v61  ;;  %8025 = vrcp.f32 %v715_v20  ;;  %v714_v61 = vadd.f32 1.0, %v8012_v42  ;;  %v584_v14 = vsub.f32 0.0, %v8995_v0  ;;  %v680_v4 = vmul.f32 1.442695, %v594_v2 }
  0xc0   : > { %11077 = vst [vmem:[#allocation33_spill] sm:$0xff] %v8985_v13  ;;  %11078 = vst [vmem:[#allocation34_spill] sm:$0xff] %v8987_v37  ;;  %6328 = vmatprep.mubr.msk.bf16.mxu1 %vm8127_vm2, %v11060_v56  ;;  %v442_v52 = vmul.f32 %v8909_v8, %v11082_v41  ;;  %v8016_v46 = vpop.eup %8015  ;;  %v9020_v63 = vpack.c.bf16 %v1077_v34, %v1076_v45  ;;  %v11084_v58 = vrot.slane %v8969_v10, 2  ;;  %v11085_v3 = vrot.slane %v8872_v27, 2 }
  0xc1   : > { %v10907_v48 = vrot.slane %v8872_v27, 1  ;;  %8027 = vpow2.f32 %v678_v23  ;;  %v803_v50 = vmul.f32 %v8925_v35, %v8583_v51  ;;  %v802_v20 = vmul.f32 %v8941_v16, %v8587_v55 }
  0xc2   : > { %11083 = vst [vmem:[#allocation37_spill] sm:$0xff] %v9020_v63  ;;  %v2690_v19 = vsel %vm2677_vm0, %v11085_v3, %v11084_v58  ;;  %v11086_v2 = vunpack.c.l.bf16 %v8881_v53  ;;  %8029 = vpow2.f32 %v676_v38  ;;  %vm10909_vm8 = vcmp.eq.s32.totalorder %v8850_v17, 1  ;;  %v8018_v55 = vpop.eup %8017 }
  0xc3   : > { %v9010_v12 = vpop.permute.xlu1 %958  ;;  %v9012_v21 = vpop.permute.xlu0 %955  ;;  %vm10910_vm15 = vcmp.eq.s32.totalorder %v8852_v29, 1  ;;  %v9047_v51 = vadd.f32 %v8935_v40, %v442_v52  ;;  %8031 = vpow2.f32 %v682_v43  ;;  %v662_v53 = vmul.f32 1.442695, %v585_v18 }
  0xc4   : > { %11080 = vst [vmem:[#allocation35_spill] sm:$0xff] %v9010_v12  ;;  %11081 = vst [vmem:[#allocation36_spill] sm:$0xff] %v9012_v21  ;;  %v441_v42 = vmul.f32 %v8909_v8, %v11086_v2  ;;  %v5873_v35 = vunpack.c.h.bf16 %v9029_v11  ;;  %8033 = vpow2.f32 %v680_v4  ;;  %v11090_v38 = vrot.slane %v8799_v26, 1  ;;  %v9073_v2 = vld [vmem:[%s8441_s13 + $0xb0] sm:$0xff]  }
  0xc5   : > { %6729 = vmatmul.mubr.bf16.gmra.mrb[20].mxu0 %v2690_v19  ;;  %11089 = vst [vmem:[#allocation40_spill] sm:$0xff] %v9047_v51  ;;  %8035 = vrcp.f32 %v714_v61  ;;  %v10911_v23 = vrot.slane %v9020_v63, 2  ;;  %v8020_v34 = vpop.eup %8019  ;;  %v1079_v45 = vsel %vm10909_vm8, %v803_v50, 0.0  ;;  %v1078_v18 = vsel %vm10910_vm15, %v802_v20, 0.0 }
  0xc6   : > { %6732 = vmatprep.mubr.msk.bf16.mxu0 %vm8127_vm2, %v11060_v56  ;;  %v1196_v16 = vsel %vm1183_vm6, %v11090_v38, %v10907_v48  ;;  %v660_v43 = vmul.f32 1.442695, %v584_v14  ;;  %v9061_v4 = vadd.f32 %v8935_v40, %v441_v42  ;;  %v8022_v41 = vpop.eup %8021  ;;  %8037 = vpow2.f32 %v656_v15 }
  0xc7   : > { %v9040_v58 = vpop.permute.xlu1 %964  ;;  %v9042_v3 = vpop.permute.xlu0 %961  ;;  %6329 = vmatmul.mubr.bf16.gmra.mrb[20].mxu1 %v1196_v16  ;;  %v587_v19 = vsub.f32 0.0, %v9047_v51  ;;  %v717_v50 = vadd.f32 1.0, %v8014_v44  ;;  %8039 = vpow2.f32 %v662_v53  ;;  %v444_v20 = vmul.f32 %v8909_v8, %v5873_v35 }
  0xc8   : > { %11087 = vst [vmem:[#allocation38_spill] sm:$0xff] %v9040_v58  ;;  %11088 = vst [vmem:[#allocation39_spill] sm:$0xff] %v9042_v3  ;;  %6332 = vmatprep.mubr.msk.bf16.mxu1 %vm8127_vm2, %v11060_v56  ;;  %v5872_v14 = vunpack.c.l.bf16 %v9029_v11  ;;  %v8024_v42 = vpop.eup %8023  ;;  %v9075_v15 = vpack.c.bf16 %v1079_v45, %v1078_v18  ;;  %v716_v38 = vadd.f32 1.0, %v8016_v46  ;;  %v11095_v16 = vrot.slane %v8969_v10, 2  ;;  %v9088_v45 = vld [vmem:[%s8441_s13 + $0x98] sm:$0xff]  }
  0xc9   : > { %11091 = vst [vmem:[#allocation41_spill] sm:$0xff] %v9061_v4  ;;  %v10920_v44 = vrot.slane %v8969_v10, 1  ;;  %v8026_v17 = vpop.eup %8025  ;;  %v805_v53 = vmul.f32 %v8960_v33, %v8606_v57  ;;  %v804_v11 = vmul.f32 %v8022_v41, %v8655_v30  ;;  %8041 = vpow2.f32 %v660_v43 }
  0xca   : > { %11094 = vst [vmem:[#allocation44_spill] sm:$0xff] %v9075_v15  ;;  %v2692_v48 = vsel %vm2677_vm0, %v11095_v16, %v10911_v23  ;;  %v586_v35 = vsub.f32 0.0, %v9061_v4  ;;  %vm10925_vm8 = vcmp.eq.s32.totalorder %v8894_v49, 1  ;;  %vm10926_vm15 = vcmp.eq.s32.totalorder %v8896_v54, 1  ;;  %v6011_v4 = vld [vmem:[%s8441_s13 + $0xb8] sm:$0xff]  }
  0xcb   : > { %v9063_v52 = vpop.permute.xlu1 %970  ;;  %v9065_v61 = vpop.permute.xlu0 %967  ;;  %v9094_v16 = vmul.f32 1.442695, %v587_v19  ;;  %v5889_v57 = vunpack.c.h.bf16 %v9073_v2  ;;  %8043 = vrcp.f32 %v717_v50  ;;  %v719_v33 = vadd.f32 1.0, %v8018_v55 }
  0xcc   : > { %11092 = vst [vmem:[#allocation42_spill] sm:$0xff] %v9063_v52  ;;  %11093 = vst [vmem:[#allocation43_spill] sm:$0xff] %v9065_v61  ;;  %v8028_v46 = vpop.eup %8027  ;;  %v443_v43 = vmul.f32 %v8909_v8, %v5872_v14  ;;  %8045 = vrcp.f32 %v716_v38  ;;  %v11098_v19 = vrot.slane %v8872_v27, 1  ;;  %v1081_v55 = vsel %vm10925_vm8, %v805_v53, 0.0 }
  0xcd   : > { %6733 = vmatmul.mubr.bf16.gmra.mrb[24].mxu0 %v2692_v48  ;;  %v8030_v30 = vpop.eup %8029  ;;  %v9102_v48 = vadd.f32 %v8935_v40, %v444_v20  ;;  %v1080_v20 = vsel %vm10926_vm15, %v804_v11, 0.0  ;;  %v9117_v14 = vmul.f32 1.442695, %v586_v35  ;;  %v731_v38 = vadd.f32 1.0, %v8028_v46 }
  0xce   : > { %6736 = vmatprep.mubr.msk.bf16.mxu0 %vm8127_vm2, %v11060_v56  ;;  %v8032_v41 = vpop.eup %8031  ;;  %v1198_v29 = vsel %vm1183_vm6, %v11098_v19, %v10920_v44  ;;  %v718_v27 = vadd.f32 1.0, %v8020_v34  ;;  %v5876_v44 = vunpack.c.l.bf16 %v9088_v45  ;;  %v452_v53 = vmul.f32 %v8909_v8, %v5889_v57 }
  0xcf   : > { %v9092_v18 = vpop.permute.xlu1 %976  ;;  %v9096_v23 = vpop.permute.xlu0 %973  ;;  %6333 = vmatmul.mubr.bf16.gmra.mrb[24].mxu1 %v1198_v29  ;;  %8047 = vrcp.f32 %v719_v33  ;;  %v733_v11 = vadd.f32 1.0, %v8032_v41  ;;  %v5888_v35 = vunpack.c.l.bf16 %v9073_v2  ;;  %v5893_v29 = vunpack.c.h.bf16 %v6011_v4 }
  0xd0   : > { %11096 = vst [vmem:[#allocation45_spill] sm:$0xff] %v9092_v18  ;;  %11097 = vst [vmem:[#allocation46_spill] sm:$0xff] %v9096_v23  ;;  %v5877_v18 = vunpack.c.h.bf16 %v9088_v45  ;;  %v8034_v50 = vpop.eup %8033  ;;  %6336 = vmatprep.mubr.msk.bf16.mxu1 %vm8127_vm2, %v11060_v56  ;;  %v730_v23 = vadd.f32 1.0, %v8030_v30  ;;  %v9128_v49 = vpack.c.bf16 %v1081_v55, %v1080_v20  ;;  %v11102_v34 = vrot.slane %v9075_v15, 2 }
  0xd1   : > { %v8036_v51 = vpop.eup %8035  ;;  %v11103_v54 = vrot.slane %v9020_v63, 2  ;;  %v732_v45 = vadd.f32 1.0, %v8034_v50  ;;  %v807_v57 = vmul.f32 %v8026_v17, %v8687_v1  ;;  %v721_v41 = vadd.f32 1.0, %v8024_v42 }
  0xd2   : > { %v8038_v46 = vpop.eup %8037  ;;  %11101 = vst [vmem:[#allocation49_spill] sm:$0xff] %v9128_v49  ;;  %v806_v33 = vmul.f32 %v8036_v51, %v8690_v32  ;;  %8049 = vrcp.f32 %v731_v38  ;;  %vm10927_vm8 = vcmp.eq.s32.totalorder %v8943_v62, 1  ;;  %vm10928_vm15 = vcmp.eq.s32.totalorder %v8945_v9, 1 }
  0xd3   : > { %v9119_v61 = vpop.permute.xlu1 %982  ;;  %v9121_v19 = vpop.permute.xlu0 %979  ;;  %8051 = vrcp.f32 %v730_v23  ;;  %v451_v32 = vmul.f32 %v8909_v8, %v5888_v35  ;;  %v454_v17 = vmul.f32 %v8909_v8, %v5893_v29  ;;  %v5892_v51 = vunpack.c.l.bf16 %v6011_v4 }
  0xd4   : > { %11099 = vst [vmem:[#allocation47_spill] sm:$0xff] %v9119_v61  ;;  %11100 = vst [vmem:[#allocation48_spill] sm:$0xff] %v9121_v19  ;;  %v2694_v19 = vsel %vm2677_vm0, %v11103_v54, %v11102_v34  ;;  %v1199_v61 = vrot.slane %v9020_v63, 1  ;;  %v8040_v30 = vpop.eup %8039  ;;  %v9143_v54 = vadd.f32 %v8935_v40, %v452_v53  ;;  %8053 = vrcp.f32 %v733_v11 }
  0xd5   : > { %6737 = vmatmul.mubr.bf16.gmra.mrb[28].mxu0 %v2694_v19  ;;  %v8042_v2 = vpop.eup %8041  ;;  %v589_v42 = vsub.f32 0.0, %v9102_v48  ;;  %v11106_v23 = vrot.slane %v8969_v10, 1  ;;  %v10930_v20 = vrot.slane %v9128_v49, 2  ;;  %8055 = vrcp.f32 %v732_v45 }
  0xd6   : > { %6740 = vmatprep.mubr.msk.bf16.mxu0 %vm8127_vm2, %v11060_v56  ;;  %v8044_v38 = vpop.eup %8043  ;;  %v1083_v19 = vsel %vm10927_vm8, %v807_v57, 0.0  ;;  %v1082_v53 = vsel %vm10928_vm15, %v806_v33, 0.0  ;;  %8057 = vrcp.f32 %v718_v27  ;;  %v446_v4 = vmul.f32 %v8909_v8, %v5877_v18 }
  0xd7   : > { %v9145_v50 = vpop.permute.xlu1 %988  ;;  %v9147_v1 = vpop.permute.xlu0 %985  ;;  %v1200_v55 = vsel %vm1183_vm6, %v11106_v23, %v1199_v61  ;;  %8059 = vrcp.f32 %v721_v41  ;;  %v720_v35 = vadd.f32 1.0, %v8038_v46  ;;  %v9164_v29 = vadd.f32 %v8935_v40, %v443_v43 }
  0xd8   : > { %11104 = vst [vmem:[#allocation50_spill] sm:$0xff] %v9145_v50  ;;  %11105 = vst [vmem:[#allocation51_spill] sm:$0xff] %v9147_v1  ;;  %6337 = vmatmul.mubr.bf16.gmra.mrb[28].mxu1 %v1200_v55  ;;  %v8046_v11 = vpop.eup %8045  ;;  %v445_v34 = vmul.f32 %v8909_v8, %v5876_v44  ;;  %v597_v45 = vsub.f32 0.0, %v9143_v54  ;;  %v9171_v57 = vadd.f32 %v8935_v40, %v451_v32  ;;  %v723_v46 = vadd.f32 1.0, %v8040_v30 }
  0xd9   : > { %6340 = vmatprep.mubr.msk.bf16.mxu1 %vm8127_vm2, %v11060_v56  ;;  %v9174_v27 = vadd.f32 %v8935_v40, %v454_v17  ;;  %v453_v18 = vmul.f32 %v8909_v8, %v5892_v51  ;;  %v9177_v33 = vpack.c.bf16 %v1083_v19, %v1082_v53  ;;  %v11108_v44 = vrot.slane %v9075_v15, 2  ;;  %v9185_v23 = vpop.eup %8047 }
  0xda   : > { %v10929_v41 = vrot.slane %v9075_v15, 1  ;;  %v809_v32 = vmul.f32 %v8044_v38, %v8703_v7  ;;  %v808_v17 = vmul.f32 %v8046_v11, %v8755_v6  ;;  %8061 = vpow2.f32 %v9094_v16 }
  0xdb   : > { %11107 = vst [vmem:[#allocation52_spill] sm:$0xff] %v9177_v33  ;;  %v2696_v43 = vsel %vm2677_vm0, %v11108_v44, %v10930_v20  ;;  %v9191_v8 = vadd.f32 %v8935_v40, %v446_v4  ;;  %v9193_v30 = vpop.permute.xlu1 %994  ;;  %v9195_v51 = vpop.permute.xlu0 %991  ;;  %vm10934_vm8 = vcmp.eq.s32.totalorder %v8985_v13, 1  ;;  %vm10935_vm15 = vcmp.eq.s32.totalorder %v8987_v37, 1 }
  0xdc   : > { %11109 = vst [vmem:[#allocation53_spill] sm:$0xff] %v9193_v30  ;;  %11110 = vst [vmem:[#allocation54_spill] sm:$0xff] %v9195_v51  ;;  %8063 = vrcp.f32 %v720_v35  ;;  %v722_v55 = vadd.f32 1.0, %v8042_v2  ;;  %v8050_v7 = vpop.eup %8049  ;;  %v686_v6 = vmul.f32 1.442695, %v597_v45  ;;  %v596_v16 = vsub.f32 0.0, %v9171_v57 }
  0xdd   : > { %6741 = vmatmul.mubr.bf16.gmra.mrb[32].mxu0 %v2696_v43  ;;  %v599_v38 = vsub.f32 0.0, %v9174_v27  ;;  %v9204_v19 = vadd.f32 %v8935_v40, %v453_v18  ;;  %v8052_v53 = vpop.eup %8051  ;;  %8065 = vrcp.f32 %v723_v46  ;;  %v1202_v2 = vsel %vm1183_vm6, %v1199_v61, %v10929_v41 }
  0xde   : > { %6744 = vmatprep.mubr.msk.bf16.mxu0 %vm8127_vm2, %v11060_v56  ;;  %v10938_v4 = vrot.slane %v9177_v33, 2  ;;  %v8054_v11 = vpop.eup %8053  ;;  %v1085_v35 = vsel %vm10934_vm8, %v809_v32, 0.0  ;;  %v1084_v45 = vsel %vm10935_vm15, %v808_v17, 0.0  ;;  %8067 = vpow2.f32 %v9117_v14 }
  0xdf   : > { %v670_v18 = vmul.f32 1.442695, %v589_v42  ;;  %v8056_v46 = vpop.eup %8055  ;;  %8069 = vrcp.f32 %v722_v55  ;;  %v588_v44 = vsub.f32 0.0, %v9164_v29  ;;  %v591_v43 = vsub.f32 0.0, %v9191_v8  ;;  %v9226_v41 = vpop.permute.xlu1 %1000 }
  0xe0   : > { %6341 = vmatmul.mubr.bf16.gmra.mrb[32].mxu1 %v1202_v2  ;;  %v9220_v61 = vadd.f32 %v8935_v40, %v445_v34  ;;  %v9224_v32 = vpop.eup %8057  ;;  %11111 = vst [vmem:[#allocation55_spill] sm:$0xff] %v9226_v41  ;;  %v9228_v17 = vpop.permute.xlu0 %997  ;;  %8071 = vpow2.f32 %v686_v6  ;;  %v684_v14 = vmul.f32 1.442695, %v596_v16  ;;  %v690_v42 = vmul.f32 1.442695, %v599_v38 }
  0xe1   : > { %6344 = vmatprep.mubr.msk.bf16.mxu1 %vm8127_vm2, %v11060_v56  ;;  %11112 = vst [vmem:[#allocation56_spill] sm:$0xff] %v9228_v17  ;;  %v598_v55 = vsub.f32 0.0, %v9204_v19  ;;  %v9231_v2 = vpop.eup %8059  ;;  %v9234_v20 = vshrl.u32 %v8632_v60, 16  ;;  %v9236_v40 = vpack.c.bf16 %v1085_v35, %v1084_v45  ;;  %v11114_v34 = vrot.slane %v9128_v49, 2 }
  0xe2   : > { %v1203_v37 = vrot.slane %v9128_v49, 1  ;;  %v823_v6 = vmul.f32 %v8050_v7, %v8923_v24  ;;  %v822_v16 = vmul.f32 %v8052_v53, %v8938_v47  ;;  %v825_v38 = vmul.f32 %v8054_v11, %v8955_v28 }
  0xe3   : > { %11113 = vst [vmem:[#allocation57_spill] sm:$0xff] %v9236_v40  ;;  %v2698_v13 = vsel %vm2677_vm0, %v11114_v34, %v10938_v4  ;;  %v824_v62 = vmul.f32 %v8056_v46, %v8966_v5  ;;  %vm10947_vm8 = vcmp.eq.s32.totalorder %v9193_v30, 1  ;;  %vm10951_vm15 = vcmp.eq.s32.totalorder %v9195_v51, 1 }
  0xe4   : > { %vm10945_vm7 = vcmp.eq.s32.totalorder %v9226_v41, 1  ;;  %vm10946_vm13 = vcmp.eq.s32.totalorder %v9228_v17, 1  ;;  %v8062_v35 = vpop.eup %8061  ;;  %v9255_v24 = vshll.u32 %v8630_v59, 16  ;;  %v9258_v47 = vshrl.u32 %v8630_v59, 16 }
  0xe5   : > { %6745 = vmatmul.mubr.bf16.gmra.mrb[36].mxu0 %v2698_v13  ;;  %v9261_v28 = vshll.u32 %v8632_v60, 16  ;;  %v688_v5 = vmul.f32 1.442695, %v598_v55  ;;  %v590_v7 = vsub.f32 0.0, %v9220_v61  ;;  %8073 = vpow2.f32 %v684_v14 }
  0xe6   : > { %6748 = vmatprep.mubr.msk.bf16.mxu0 %vm8127_vm2, %v11060_v56  ;;  %11115 = vst [vmem:[#allocation58_spill] sm:$0xff] %v9255_v24  ;;  %11116 = vst [vmem:[#allocation59_spill] sm:$0xff] %v9258_v47  ;;  %v9263_v13 = vpop.eup %8063  ;;  %v11117_v53 = vrot.slane %v9075_v15, 1  ;;  %v1099_v46 = vsel %vm10947_vm8, %v823_v6, 0.0  ;;  %v1098_v34 = vsel %vm10951_vm15, %v822_v16, 0.0  ;;  %v1101_v60 = vsel %vm10945_vm7, %v825_v38, 0.0 }
  0xe7   : > { %v1100_v55 = vsel %vm10946_vm13, %v824_v62, 0.0  ;;  %v9278_v14 = vpop.eup %8065  ;;  %v668_v4 = vmul.f32 1.442695, %v588_v44  ;;  %v674_v9 = vmul.f32 1.442695, %v591_v43  ;;  %8075 = vpow2.f32 %v690_v42 }
  0xe8   : > { %v1204_v11 = vsel %vm1183_vm6, %v11117_v53, %v1203_v37  ;;  %v3047_v6 = vrot.slane %v9234_v20, 2  ;;  %v8068_v53 = vpop.eup %8067  ;;  %8077 = vpow2.f32 %v688_v5  ;;  %v3048_v16 = vrot.slane %v9261_v28, 3 }
  0xe9   : > { %6345 = vmatmul.mubr.bf16.gmra.mrb[36].mxu1 %v1204_v11  ;;  %v3050_v38 = vrot.slane %v9258_v47, 2  ;;  %v3051_v45 = vrot.slane %v9255_v24, 3  ;;  %v9286_v62 = vpop.eup %8069  ;;  %v9288_v11 = vpack.c.bf16 %v1099_v46, %v1098_v34  ;;  %v9290_v44 = vpack.c.bf16 %v1101_v60, %v1100_v55  ;;  %v11131_v47 = vld [vmem:[#allocation24_spill] sm:$0xff] }
  0xea   : > { %6348 = vmatprep.mubr.msk.bf16.mxu1 %vm8127_vm2, %v11060_v56  ;;  %v11120_v43 = vrot.slane %v9236_v40, 2  ;;  %v11121_v42 = vrot.slane %v9177_v33, 2  ;;  %v1205_v5 = vrot.slane %v9177_v33, 1  ;;  %v8072_v17 = vpop.eup %8071  ;;  %8079 = vpow2.f32 %v670_v18 }
  0xeb   : > { %11118 = vst [vmem:[#allocation60_spill] sm:$0xff] %v9288_v11  ;;  %11119 = vst [vmem:[#allocation61_spill] sm:$0xff] %v9290_v44  ;;  %v672_v30 = vmul.f32 1.442695, %v590_v7  ;;  %v10948_v51 = vshrl.u32 %v8645_v22, 16  ;;  %v10949_v59 = vshll.u32 %v8645_v22, 16  ;;  %8081 = vpow2.f32 %v668_v4 }
  0xec   : > { %v2700_v41 = vsel %vm2677_vm0, %v11121_v42, %v11120_v43  ;;  %vm3046_vm7 = vsmask.f32 5376  ;;  %v9303_v46 = vshll.u32 %v8672_v36, 16  ;;  %v9306_v34 = vshrl.u32 %v8672_v36, 16 }
  0xed   : > { %6749 = vmatmul.mubr.bf16.gmra.mrb[40].mxu0 %v2700_v41  ;;  %v3049_v60 = vor.u32 %v3048_v16, %v3047_v6  ;;  %v9308_v55 = vor.u32 %v3051_v45, %v3050_v38  ;;  %8083 = vpow2.f32 %v674_v9  ;;  %v9311_v41 = vshll.u32 %v9288_v11, 16  ;;  %v7881_v38 = vld [vmem:[%s10874_s4 + $0x188] sm:$0xff]  }
  0xee   : > { %6808 = vmatprep.mubr.msk.bf16.mxu0 %vm8127_vm2, %v11060_v56  ;;  %11122 = vst [vmem:[#allocation62_spill] sm:$0xff] %v9303_v46  ;;  %11123 = vst [vmem:[#allocation63_spill] sm:$0xff] %v9306_v34  ;;  %v9314_v18 = vshll.u32 %v9290_v44, 16  ;;  %v1206_v4 = vsel %vm1183_vm6, %v1203_v37, %v1205_v5  ;;  %v811_v7 = vmul.f32 %v9185_v23, %v8777_v25  ;;  %v725_v42 = vadd.f32 1.0, %v8062_v35  ;;  %v7879_v25 = vld [vmem:[%s10874_s4 + $0x180] sm:$0xff]  }
  0xef   : > { %v810_v43 = vmul.f32 %v9224_v32, %v8791_v31  ;;  %8085 = vpow2.f32 %v672_v30  ;;  %v8074_v45 = vpop.eup %8073  ;;  %v9323_v9 = vrot.slane %v10948_v51, 1  ;;  %vm10964_vm13 = vcmp.eq.s32.totalorder %v9010_v12, 1 }
  0xf0   : > { %vm10965_vm8 = vcmp.eq.s32.totalorder %v9012_v21, 1  ;;  %v724_v6 = vadd.f32 1.0, %v8068_v53  ;;  %v9334_v31 = vrot.slane %v10949_v59, 2  ;;  %v3053_v37 = vsel %vm3046_vm7, %v3049_v60, %v9308_v55 }
  0xf1   : > { %6349 = vmatmul.mubr.bf16.gmra.mrb[40].mxu1 %v1206_v4  ;;  %11124 = vst [vmem:[#allocation64_spill] sm:$0xff] %v9323_v9  ;;  %v3054_v23 = vrot.slane %v9306_v34, 2  ;;  %v3055_v30 = vrot.slane %v9303_v46, 3  ;;  %v8076_v32 = vpop.eup %8075  ;;  %v9341_v35 = vshrl.u32 %v9288_v11, 16  ;;  %v1207_v53 = vrot.slane %v9236_v40, 1 }
  0xf2   : > { %6352 = vmatprep.mubr.msk.bf16.mxu1 %vm8127_vm2, %v11060_v56  ;;  %11125 = vst [vmem:[#allocation65_spill] sm:$0xff] %v9334_v31  ;;  %v10954_v16 = vrot.slane %v9311_v41, 1  ;;  %v8078_v4 = vpop.eup %8077  ;;  %v1087_v51 = vsel %vm10964_vm13, %v811_v7, 0.0  ;;  %v1086_v60 = vsel %vm10965_vm8, %v810_v43, 0.0  ;;  %8087 = vrcp.f32 %v725_v42 }
  0xf3   : > { %11126 = vst [vmem:[#allocation66_spill] sm:$0xff] %v9341_v35  ;;  %v735_v59 = vadd.f32 1.0, %v8072_v17  ;;  %8089 = vrcp.f32 %v724_v6  ;;  %v734_v36 = vadd.f32 1.0, %v8074_v45  ;;  %vm1494_vm15 = vsmask.f32 7424 }
  0xf4   : > { %v1653_v7 = vor.u32 %v9341_v35, %v10954_v16  ;;  %v8080_v12 = vpop.eup %8079  ;;  %v9359_v43 = vshll.u32 %v8725_v39, 16  ;;  %v9362_v17 = vshrl.u32 %v8725_v39, 16  ;;  %v737_v42 = vadd.f32 1.0, %v8076_v32  ;;  %v11132_v32 = vld [vmem:[#allocation30_spill] sm:$0xff] }
  0xf5   : > { %6809 = vmatmul.mubr.bf16.vlgmr.msra.gmra.mrb[0].mxu0 %v3053_v37  ;;  %v8082_v6 = vpop.eup %8081  ;;  %v1208_v37 = vsel %vm1183_vm6, %v1205_v5, %v1207_v53  ;;  %v3056_v21 = vor.u32 %v3055_v30, %v3054_v23  ;;  %v11129_v16 = vrot.slane %v9314_v18, 1  ;;  %v813_v39 = vmul.f32 %v9231_v2, %v11131_v47 }
  0xf6   : > { %6893 = vmatpush3.bf16.msra.mxu0 %v7879_v25  ;;  %6812 = vmatprep.mubr.msk.bf16.mxu0 %vm8127_vm2, %v11060_v56  ;;  %11127 = vst [vmem:[#allocation67_spill] sm:$0xff] %v9359_v43  ;;  %v9367_v25 = vpack.c.bf16 %v1087_v51, %v1086_v60  ;;  %v812_v46 = vmul.f32 %v9263_v13, %v11132_v32  ;;  %8091 = vrcp.f32 %v735_v59  ;;  %v736_v24 = vadd.f32 1.0, %v8078_v4  ;;  %v7883_v51 = vld [vmem:[%s10874_s4 + $0x190] sm:$0xff]  }
  0xf7   : > { %6894 = vmatprep.subr.bf16.mxu0 %v11060_v56  ;;  %v9373_v34 = vsel %vm1494_vm15, %v1653_v7, %v11129_v16  ;;  %v8084_v45 = vpop.eup %8083  ;;  %vm10966_vm13 = vcmp.eq.s32.totalorder %v9040_v58, 1  ;;  %vm10967_vm8 = vcmp.eq.s32.totalorder %v9042_v3, 1  ;;  %8093 = vrcp.f32 %v734_v36  ;;  %v11135_v7 = vld [vmem:[#allocation31_spill] sm:$0xff]  ;;  %v9420_v58 = vpop.permute.xlu0 %1003 }
  0xf8   : > { %11128 = vst [vmem:[#allocation68_spill] sm:$0xff] %v9367_v25  ;;  %11130 = vst [vmem:[#allocation69_spill] sm:$0xff] %v9373_v34  ;;  %8095 = vrcp.f32 %v737_v42  ;;  %v9389_v59 = vsel %vm3046_vm7, %v9308_v55, %v3056_v21  ;;  %v1209_v47 = vrot.slane %v9367_v25, 1  ;;  %v3058_v36 = vrot.slane %v9362_v17, 2  ;;  %v7885_v55 = vld [vmem:[%s10874_s4 + $0x198] sm:$0xff]  }
  0xf9   : > { %6353 = vmatmul.mubr.bf16.gmra.mrb[44].mxu1 %v1208_v37  ;;  %v8086_v2 = vpop.eup %8085  ;;  %v3059_v13 = vrot.slane %v9359_v43, 3  ;;  %v1089_v5 = vsel %vm10966_vm13, %v813_v39, 0.0  ;;  %v1088_v23 = vsel %vm10967_vm8, %v812_v46, 0.0  ;;  %8097 = vrcp.f32 %v736_v24  ;;  %11137 = vst [vmem:[#allocation31_spill] sm:$0xff] %v9420_v58  ;;  %v11143_v34 = vld [vmem:[#allocation45_spill] sm:$0xff] }
  0xfa   : > { %6356 = vmatprep.mubr.msk.bf16.mxu1 %vm8127_vm2, %v11060_v56  ;;  %6895 = vmatpush3.bf16.msra.mxu0 %v7881_v38  ;;  %v727_v30 = vadd.f32 1.0, %v8080_v12  ;;  %v9405_v38 = vshll.u32 %v8799_v26, 16  ;;  %v726_v39 = vadd.f32 1.0, %v8082_v6  ;;  %v9409_v24 = vshrl.u32 %v8799_v26, 16  ;;  %v11136_v6 = vld [vmem:[#allocation43_spill] sm:$0xff]  ;;  %v11142_v26 = vld [vmem:[#allocation41_spill] sm:$0xff] }
  0xfb   : > { %6896 = vmatprep.subr.bf16.mxu0 %v11060_v56  ;;  %v9411_v12 = vpack.c.bf16 %v1089_v5, %v1088_v23  ;;  %v1210_v4 = vsel %vm1183_vm6, %v1207_v53, %v1209_v47  ;;  %v3060_v60 = vor.u32 %v3059_v13, %v3058_v36  ;;  %v815_v42 = vmul.f32 %v9278_v14, %v11135_v7  ;;  %v7887_v14 = vld [vmem:[%s10874_s4 + $0x1a0] sm:$0xff]  }
  0xfc   : > { %v8088_v16 = vpop.eup %8087  ;;  %11133 = vst [vmem:[#allocation24_spill] sm:$0xff] %v9405_v38  ;;  %v814_v37 = vmul.f32 %v9286_v62, %v8995_v0  ;;  %vm10975_vm13 = vcmp.eq.s32.totalorder %v9063_v52, 1  ;;  %vm10977_vm8 = vcmp.eq.s32.totalorder %v11136_v6, 1  ;;  %8099 = vrcp.f32 %v727_v30  ;;  %v11141_v6 = vld [vmem:[#allocation40_spill] sm:$0xff] }
  0xfd   : > { %6813 = vmatmul.mubr.bf16.gmra.mrb[4].mxu0 %v9389_v59  ;;  %v8090_v46 = vpop.eup %8089  ;;  %11134 = vst [vmem:[#allocation30_spill] sm:$0xff] %v9411_v12  ;;  %v729_v32 = vadd.f32 1.0, %v8084_v45  ;;  %8101 = vrcp.f32 %v726_v39  ;;  %v728_v0 = vadd.f32 1.0, %v8086_v2  ;;  %v9429_v36 = vsel %vm3046_vm7, %v3056_v21, %v3060_v60  ;;  %v7889_v21 = vld [vmem:[%s10874_s4 + $0x1a8] sm:$0xff]   ;;  %v11138_v39 = vld [vmem:[#allocation25_spill] sm:$0xff] }
  0xfe   : > { %6816 = vmatprep.mubr.msk.bf16.mxu0 %vm8127_vm2, %v11060_v56  ;;  %6897 = vmatpush3.bf16.msra.mxu0 %v7883_v51  ;;  %v1007_v51 = vpop.permute.xlu1 %1006  ;;  %v1211_v45 = vrot.slane %v9411_v12, 1  ;;  %v3062_v13 = vrot.slane %v9409_v24, 2  ;;  %v3063_v5 = vrot.slane %v9405_v38, 3  ;;  %v1091_v30 = vsel %vm10975_vm13, %v815_v42, 0.0 }
  0xff   : > { %6898 = vmatprep.subr.bf16.mxu0 %v11060_v56  ;;  %8103 = vrcp.f32 %v729_v32  ;;  %v9449_v7 = vshrl.u32 %v11138_v39, 16  ;;  %v1010_v32 = vpop.permute.xlu0 %1009  ;;  %v817_v3 = vmul.f32 %v8088_v16, %v11141_v6  ;;  %v816_v9 = vmul.f32 %v8090_v46, %v11142_v26  ;;  %v7891_v26 = vld [vmem:[%s10874_s4 + $0x1b0] sm:$0xff]  }
 0x100   : > { %v8092_v53 = vpop.eup %8091  ;;  %8105 = vrcp.f32 %v728_v0  ;;  %v3064_v52 = vor.u32 %v3063_v5, %v3062_v13  ;;  %vm1047_vm13 = vcmp.eq.s32.totalorder %v11143_v34, 1  ;;  %vm1057_vm14 = vcmp.eq.s32.totalorder %v1007_v51, 1  ;;  %v7893_v13 = vld [vmem:[%s10874_s4 + $0x1b8] sm:$0xff]  }
 0x101   : > { %6357 = vmatmul.mubr.bf16.gmra.mrb[48].mxu1 %v1210_v4  ;;  %v8094_v62 = vpop.eup %8093  ;;  %v9445_v4 = vshll.u32 %v11138_v39, 16  ;;  %v827_v31 = vmul.f32 %v8092_v53, %v9143_v54  ;;  %v11144_v39 = vld [vmem:[#allocation46_spill] sm:$0xff]  ;;  %vm10982_vm11 = vcmp.eq.s32.totalorder %v9420_v58, 1  ;;  %vm1058_vm9 = vcmp.eq.s32.totalorder %v1010_v32, 1 }
 0x102   : > { %6360 = vmatprep.mubr.msk.bf16.mxu1 %vm8127_vm2, %v11060_v56  ;;  %6899 = vmatpush3.bf16.msra.mxu0 %v7885_v55  ;;  %v8096_v23 = vpop.eup %8095  ;;  %v1090_v55 = vsel %vm10977_vm8, %v814_v37, 0.0  ;;  %v1013_v37 = vpop.permute.xlu1 %1012  ;;  %v826_v0 = vmul.f32 %v8094_v62, %v9171_v57  ;;  %vm1046_vm8 = vcmp.eq.s32.totalorder %v11144_v39, 1  ;;  %v9470_v57 = vsel %vm3046_vm7, %v3060_v60, %v3064_v52 }
 0x103   : > { %6900 = vmatprep.subr.bf16.mxu0 %v11060_v56  ;;  %v8098_v2 = vpop.eup %8097  ;;  %11139 = vst [vmem:[#allocation70_spill] sm:$0xff] %v9445_v4  ;;  %v9451_v42 = vpack.c.bf16 %v1091_v30, %v1090_v55  ;;  %v829_v30 = vmul.f32 %v8096_v23, %v9174_v27  ;;  %vm1059_vm12 = vcmp.eq.s32.totalorder %v1013_v37, 1  ;;  %v1093_v46 = vsel %vm1047_vm13, %v817_v3, 0.0 }
 0x104   : > { %v828_v55 = vmul.f32 %v8098_v2, %v9204_v19  ;;  %v3066_v19 = vrot.slane %v9449_v7, 2  ;;  %v1092_v6 = vsel %vm1046_vm8, %v816_v9, 0.0  ;;  %v1103_v51 = vsel %vm1057_vm14, %v827_v31, 0.0 }
 0x105   : > { %6817 = vmatmul.mubr.bf16.gmra.mrb[8].mxu0 %v9429_v36  ;;  %11140 = vst [vmem:[#allocation71_spill] sm:$0xff] %v9451_v42  ;;  %v1213_v27 = vrot.slane %v9451_v42, 1  ;;  %v1102_v60 = vsel %vm10982_vm11, %v826_v0, 0.0  ;;  %v1105_v53 = vsel %vm1059_vm12, %v829_v30, 0.0  ;;  %v9488_v3 = vshll.u32 %v8969_v10, 16  ;;  %v11148_v30 = vld [vmem:[#allocation47_spill] sm:$0xff] }
 0x106   : > { %6820 = vmatprep.mubr.msk.bf16.mxu0 %vm8127_vm2, %v11060_v56  ;;  %6901 = vmatpush3.bf16.msra.mxu0 %v7887_v14  ;;  %v1212_v14 = vsel %vm1183_vm6, %v1209_v47, %v1211_v45  ;;  %v8100_v54 = vpop.eup %8099  ;;  %v3067_v47 = vrot.slane %v9445_v4, 3  ;;  %v1104_v62 = vsel %vm1058_vm9, %v828_v55, 0.0  ;;  %v9492_v31 = vshrl.u32 %v8969_v10, 16  ;;  %v11149_v55 = vld [vmem:[#allocation48_spill] sm:$0xff] }
 0x107   : > { %6902 = vmatprep.subr.bf16.mxu0 %v11060_v56  ;;  %v8102_v16 = vpop.eup %8101  ;;  %v9494_v5 = vpack.c.bf16 %v1093_v46, %v1092_v6  ;;  %v1214_v23 = vsel %vm1183_vm6, %v1211_v45, %v1213_v27  ;;  %v819_v37 = vmul.f32 %v8100_v54, %v9102_v48  ;;  %v9501_v0 = vpack.c.bf16 %v1105_v53, %v1104_v62 }
 0x108   : > { %v818_v32 = vmul.f32 %v8102_v16, %v9164_v29  ;;  %vm10983_vm9 = vcmp.eq.s32.totalorder %v11148_v30, 1  ;;  %vm1048_vm12 = vcmp.eq.s32.totalorder %v11149_v55, 1  ;;  %v3070_v29 = vrot.slane %v9492_v31, 2 }
 0x109   : > { %6361 = vmatmul.mubr.bf16.gmra.mrb[52].mxu1 %v1212_v14  ;;  %v8104_v9 = vpop.eup %8103  ;;  %11145 = vst [vmem:[#allocation40_spill] sm:$0xff] %v9494_v5  ;;  %v9499_v14 = vpack.c.bf16 %v1103_v51, %v1102_v60  ;;  %11147 = vst [vmem:[#allocation72_spill] sm:$0xff] %v9501_v0  ;;  %v1215_v48 = vrot.slane %v9494_v5, 1  ;;  %v1095_v54 = vsel %vm10983_vm9, %v819_v37, 0.0  ;;  %v10984_v16 = vrot.slane %v9501_v0, 3 }
 0x10a   : > { %6364 = vmatprep.mubr.msk.bf16.mxu1 %vm8127_vm2, %v11060_v56  ;;  %6903 = vmatpush3.bf16.msra.mxu0 %v7889_v21  ;;  %v3068_v21 = vor.u32 %v3067_v47, %v3066_v19  ;;  %v8106_v2 = vpop.eup %8105  ;;  %v1094_v19 = vsel %vm1048_vm12, %v818_v32, 0.0  ;;  %vm3775_vm14 = vcmask 1044480   ;;  %v9534_v6 = vshrl.u32 %v9020_v63, 16 }
 0x10b   : > { %6904 = vmatprep.subr.bf16.mxu0 %v11060_v56  ;;  %11146 = vst [vmem:[#allocation41_spill] sm:$0xff] %v9499_v14  ;;  %v10985_v47 = vrot.slane %v9499_v14, 3  ;;  %v9536_v51 = vpack.c.bf16 %v1095_v54, %v1094_v19  ;;  %v1216_v60 = vsel %vm1183_vm6, %v1213_v27, %v1215_v48  ;;  %v821_v62 = vmul.f32 %v8104_v9, %v9191_v8 }
 0x10c   : > { %v9509_v45 = vsel %vm3046_vm7, %v3064_v52, %v3068_v21  ;;  %v9524_v52 = vshll.u32 %v9020_v63, 16  ;;  %vm10989_vm11 = vcmp.eq.s32.totalorder %v9145_v50, 1  ;;  %vm1050_vm9 = vcmp.eq.s32.totalorder %v9147_v1, 1 }
 0x10d   : > { %6821 = vmatmul.mubr.bf16.gmra.mrb[12].mxu0 %v9470_v57  ;;  %v9531_v46 = vsel %vm3775_vm14, %v10985_v47, %v10984_v16  ;;  %11152 = vst [vmem:[#allocation75_spill] sm:$0xff] %v9536_v51  ;;  %v1217_v37 = vrot.slane %v9536_v51, 1  ;;  %v3074_v27 = vrot.slane %v9534_v6, 2  ;;  %v1097_v8 = vsel %vm10989_vm11, %v821_v62, 0.0 }
 0x10e   : > { %6824 = vmatprep.mubr.msk.bf16.mxu0 %vm8127_vm2, %v11060_v56  ;;  %6905 = vmatpush3.bf16.msra.mxu0 %v7891_v26  ;;  %v3071_v26 = vrot.slane %v9488_v3, 3  ;;  %11150 = vst [vmem:[#allocation73_spill] sm:$0xff] %v9524_v52  ;;  %11151 = vst [vmem:[#allocation74_spill] sm:$0xff] %v9531_v46  ;;  %v3075_v32 = vrot.slane %v9524_v52, 3  ;;  %v9559_v9 = vshll.u32 %v9075_v15, 16  ;;  %v4217_v1 = vrot.slane %v9314_v18, 4 }
 0x10f   : > { %6906 = vmatprep.subr.bf16.mxu0 %v11060_v56  ;;  %vm4144_vm11 = vsmask.f32 4352  ;;  %v9616_v55 = vshll.u32 %v9177_v33, 16  ;;  %v9619_v34 = vshrl.u32 %v9177_v33, 16  ;;  %v11155_v39 = vshrl.u32 %v9501_v0, 16 }
 0x110   : > { %v3072_v53 = vor.u32 %v3071_v26, %v3070_v29  ;;  %v1218_v29 = vsel %vm1183_vm6, %v1215_v48, %v1217_v37  ;;  %v3076_v26 = vor.u32 %v3075_v32, %v3074_v27  ;;  %v3079_v62 = vrot.slane %v9559_v9, 3 }
 0x111   : > { %6365 = vmatmul.mubr.bf16.gmra.mrb[56].mxu1 %v1214_v23  ;;  %v9580_v48 = vshrl.u32 %v9128_v49, 16  ;;  %v4224_v46 = vrot.slane %v11155_v39, 3 }
 0x112   : > { %6368 = vmatprep.mubr.msk.bf16.mxu1 %vm8127_vm2, %v11060_v56  ;;  %6907 = vmatpush3.bf16.msra.mxu0 %v7893_v13  ;;  %v820_v13 = vmul.f32 %v8106_v2, %v9220_v61  ;;  %v9546_v23 = vsel %vm3046_vm7, %v3068_v21, %v3072_v53  ;;  %v9562_v21 = vshrl.u32 %v9075_v15, 16  ;;  %v9570_v54 = vsel %vm3046_vm7, %v3072_v53, %v3076_v26 }
 0x113   : > { %6992 = vmatprep.subr.bf16.mxu0 %v11060_v56  ;;  %v9585_v53 = vshrl.u32 %v9290_v44, 16 }
 0x114   : > { %v1096_v61 = vsel %vm1050_vm9, %v820_v13, 0.0  ;;  %v9577_v13 = vshll.u32 %v9128_v49, 16 }
 0x115   : > { %6825 = vmatmul.mubr.bf16.gmra.mrb[16].mxu0 %v9509_v45  ;;  %v9564_v2 = vpack.c.bf16 %v1097_v8, %v1096_v61  ;;  %v9589_v8 = vshrl.u32 %v9499_v14, 16  ;;  %v9592_v61 = vshll.u32 %v9499_v14, 16  ;;  %v4216_v50 = vrot.slane %v9585_v53, 3 }
 0x116   : > { %6828 = vmatprep.mubr.msk.bf16.mxu0 %vm8127_vm2, %v11060_v56  ;;  %v3083_v16 = vrot.slane %v9577_v13, 3  ;;  %v11156_v14 = vshll.u32 %v9501_v0, 16 }
 0x117   : > { %11153 = vst [vmem:[#allocation76_spill] sm:$0xff] %v9564_v2  ;;  %v1219_v19 = vrot.slane %v9564_v2, 1  ;;  %v4218_v47 = vor.u32 %v4217_v1, %v4216_v50  ;;  %v4220_v30 = vrot.slane %v9589_v8, 3 }
 0x119   : > { %6369 = vmatmul.mubr.bf16.gmra.mrb[60].mxu1 %v1216_v60  ;;  %v3078_v60 = vrot.slane %v9562_v21, 2  ;;  %v1220_v27 = vsel %vm1183_vm6, %v1217_v37, %v1219_v19  ;;  %v4212_v37 = vrot.slane %v9341_v35, 3 }
 0x11a   : > { %6372 = vmatprep.mubr.msk.bf16.mxu1 %vm8127_vm2, %v11060_v56 }
 0x11b   : > { %v3080_v32 = vor.u32 %v3079_v62, %v3078_v60  ;;  %v4213_v60 = vrot.slane %v9311_v41, 4 }
 0x11d   : > { %6829 = vmatmul.mubr.bf16.gmra.mrb[20].mxu0 %v9546_v23  ;;  %v9603_v62 = vsel %vm3046_vm7, %v3076_v26, %v3080_v32  ;;  %v9611_v58 = vor.u32 %v4213_v60, %v4212_v37  ;;  %v4221_v26 = vrot.slane %v9592_v61, 4 }
 0x11e   : > { %6832 = vmatprep.mubr.msk.bf16.mxu0 %vm8127_vm2, %v11060_v56 }
 0x11f   : > { %11154 = vst [vmem:[#allocation77_spill] sm:$0xff] %v9611_v58  ;;  %v9628_v50 = vsel %vm4144_vm11, %v9611_v58, %v4218_v47  ;;  %v4222_v1 = vor.u32 %v4221_v26, %v4220_v30  ;;  %v3086_v30 = vrot.slane %v9619_v34, 2 }
 0x120   : > { %11157 = vst [vmem:[#allocation78_spill] sm:$0xff] %v9628_v50  ;;  %v1505_v50 = vrot.slane %v9261_v28, 1 }
 0x121   : > { %6373 = vmatmul.mubr.bf16.gmra.mrb[64].mxu1 %v1218_v29  ;;  %v3082_v29 = vrot.slane %v9580_v48, 2  ;;  %v9635_v33 = vsel %vm4144_vm11, %v4218_v47, %v4222_v1  ;;  %v9651_v47 = vshll.u32 %v9236_v40, 16 }
 0x122   : > { %6376 = vmatprep.mubr.msk.bf16.mxu1 %vm8127_vm2, %v11060_v56  ;;  %11159 = vst [vmem:[#allocation80_spill] sm:$0xff] %v9635_v33  ;;  %v1509_v58 = vor.u32 %v9234_v20, %v1505_v50 }
 0x123   : > { %v3084_v60 = vor.u32 %v3083_v16, %v3082_v29  ;;  %v1223_v16 = vrot.slane %v9290_v44, 1 }
 0x125   : > { %6833 = vmatmul.mubr.bf16.gmra.mrb[24].mxu0 %v9570_v54 }
 0x126   : > { %6836 = vmatprep.mubr.msk.bf16.mxu0 %vm8127_vm2, %v11060_v56 }
 0x129   : > { %6377 = vmatmul.mubr.bf16.gmra.mrb[68].mxu1 %v1220_v27  ;;  %v1221_v27 = vrot.slane %v9288_v11, 1  ;;  %v4225_v11 = vrot.slane %v11156_v14, 4  ;;  %v9642_v14 = vsel %vm3046_vm7, %v3080_v32, %v3084_v60 }
 0x12a   : > { %6380 = vmatprep.mubr.msk.bf16.mxu1 %vm8127_vm2, %v11060_v56 }
 0x12b   : > { %v1222_v37 = vsel %vm1183_vm6, %v1219_v19, %v1221_v27  ;;  %v9630_v49 = vor.u32 %v4225_v11, %v4224_v46  ;;  %v3087_v11 = vrot.slane %v9616_v55, 3  ;;  %v9654_v46 = vshrl.u32 %v9236_v40, 16  ;;  %v11167_v40 = vld [vmem:[#allocation62_spill] sm:$0xff] }
 0x12c   : > { %v1224_v19 = vsel %vm1183_vm6, %v1221_v27, %v1223_v16  ;;  %vm1948_vm6 = vsmask.f32 6400 }
 0x12d   : > { %6837 = vmatmul.mubr.bf16.gmra.mrb[28].mxu0 %v9603_v62  ;;  %11158 = vst [vmem:[#allocation79_spill] sm:$0xff] %v9630_v49  ;;  %v9639_v39 = vsel %vm4144_vm11, %v4222_v1, %v9630_v49  ;;  %v3088_v32 = vor.u32 %v3087_v11, %v3086_v30  ;;  %v3090_v26 = vrot.slane %v9654_v46, 2  ;;  %v11161_v1 = vshll.u32 %v8645_v22, 16 }
 0x12e   : > { %6840 = vmatprep.mubr.msk.bf16.mxu0 %vm8127_vm2, %v11060_v56  ;;  %11160 = vst [vmem:[#allocation81_spill] sm:$0xff] %v9639_v39  ;;  %v9670_v30 = vshll.u32 %v9367_v25, 16  ;;  %v9673_v11 = vshrl.u32 %v9367_v25, 16 }
 0x12f   : > { %v9660_v29 = vsel %vm3046_vm7, %v3084_v60, %v3088_v32  ;;  %v1500_v27 = vrot.slane %v11161_v1, 1 }
 0x130   : > { %11162 = vst [vmem:[#allocation82_spill] sm:$0xff] %v9670_v30  ;;  %v3094_v33 = vrot.slane %v9673_v11, 2  ;;  %v3095_v1 = vrot.slane %v9670_v30, 3 }
 0x131   : > { %6381 = vmatmul.mubr.bf16.gmra.mrb[72].mxu1 %v1222_v37  ;;  %v3091_v37 = vrot.slane %v9651_v47, 3 }
 0x132   : > { %6384 = vmatprep.mubr.msk.bf16.mxu1 %vm8127_vm2, %v11060_v56 }
 0x133   : > { %v3092_v60 = vor.u32 %v3091_v37, %v3090_v26  ;;  %v3096_v37 = vor.u32 %v3095_v1, %v3094_v33  ;;  %v11165_v33 = vld [vmem:[#allocation58_spill] sm:$0xff] }
 0x134   : > { %v1513_v1 = vrot.slane %v11165_v33, 1 }
 0x135   : > { %6841 = vmatmul.mubr.bf16.gmra.mrb[32].mxu0 %v9642_v14  ;;  %v9680_v39 = vsel %vm3046_vm7, %v3088_v32, %v3092_v60  ;;  %v9695_v32 = vshrl.u32 %v9411_v12, 16 }
 0x136   : > { %6844 = vmatprep.mubr.msk.bf16.mxu0 %vm8127_vm2, %v11060_v56 }
 0x137   : > { %v3098_v44 = vrot.slane %v9695_v32, 2 }
 0x139   : > { %6385 = vmatmul.mubr.bf16.gmra.mrb[76].mxu1 %v1224_v19  ;;  %v11163_v19 = vshrl.u32 %v8645_v22, 16  ;;  %v9692_v22 = vshll.u32 %v9411_v12, 16 }
 0x13a   : > { %6388 = vmatprep.mubr.msk.bf16.mxu1 %vm8127_vm2, %v11060_v56 }
 0x13b   : > { %v1501_v49 = vor.u32 %v1500_v27, %v11163_v19  ;;  %11164 = vst [vmem:[#allocation83_spill] sm:$0xff] %v9692_v22  ;;  %v7890_v27 = vld [vmem:[%s10874_s4 + $0x88] sm:$0xff]   ;;  %v9705_v19 = vsel %vm3046_vm7, %v3092_v60, %v3096_v37  ;;  %v9722_v60 = vshrl.u32 %v9451_v42, 16 }
 0x13d   : > { %6845 = vmatmul.mubr.bf16.gmra.mrb[36].mxu0 %v9660_v29  ;;  %v1506_v26 = vsel %vm1494_vm15, %v1501_v49, %v1505_v50  ;;  %v3099_v49 = vrot.slane %v9692_v22, 3  ;;  %v9719_v50 = vshll.u32 %v9451_v42, 16  ;;  %v1521_v42 = vrot.slane %v11167_v40, 1 }
 0x13e   : > { %6848 = vmatprep.mubr.msk.bf16.mxu0 %vm8127_vm2, %v11060_v56  ;;  %v3102_v15 = vrot.slane %v9722_v60, 2 }
 0x13f   : > { %11166 = vst [vmem:[#allocation58_spill] sm:$0xff] %v9719_v50  ;;  %v3100_v12 = vor.u32 %v3099_v49, %v3098_v44  ;;  %v11168_v44 = vld [vmem:[#allocation59_spill] sm:$0xff] }
 0x140   : > { %v1517_v49 = vor.u32 %v11168_v44, %v1513_v1 }
 0x141   : > { %6389 = vmatmul.mubr.bf16.gmra.mrb[80].mxu1 %v1223_v16  ;;  %v7888_v16 = vld [vmem:[%s10874_s4 + $0x80] sm:$0xff]   ;;  %v9732_v25 = vsel %vm3046_vm7, %v3096_v37, %v3100_v12  ;;  %v9746_v37 = vshll.u32 %v9494_v5, 16 }
 0x142   : > { %6408 = vmatprep.mubr.msk.bf16.mxu1 %vm8127_vm2, %v11060_v56  ;;  %v1522_v63 = vsel %vm1494_vm15, %v1517_v49, %v1521_v42  ;;  %v7900_v49 = vld [vmem:[%s10874_s4 + $0xb0] sm:$0xff]  }
 0x143   : > { %11169 = vst [vmem:[#allocation59_spill] sm:$0xff] %v9746_v37 }
 0x145   : > { %6849 = vmatmul.mubr.bf16.gmra.mrb[40].mxu0 %v9680_v39 }
 0x146   : > { %6852 = vmatprep.mubr.msk.bf16.mxu0 %vm8127_vm2, %v11060_v56 }
 0x149   : > { %6409 = vmatmul.mubr.bf16.vlgmr.msra.gmra.mrb[0].mxu1 %v1506_v26  ;;  %v1514_v26 = vsel %vm1494_vm15, %v1509_v58, %v1513_v1  ;;  %v3103_v58 = vrot.slane %v9719_v50, 3  ;;  %v7898_v1 = vld [vmem:[%s10874_s4 + $0xa8] sm:$0xff]  }
 0x14a   : > { %6493 = vmatpush3.bf16.msra.mxu1 %v7888_v16  ;;  %6412 = vmatprep.mubr.msk.bf16.mxu1 %vm8127_vm2, %v11060_v56  ;;  %v7892_v16 = vld [vmem:[%s10874_s4 + $0x90] sm:$0xff]  }
 0x14b   : > { %6494 = vmatprep.subr.bf16.mxu1 %v11060_v56  ;;  %v3104_v10 = vor.u32 %v3103_v58, %v3102_v15  ;;  %v3107_v15 = vrot.slane %v9746_v37, 3 }
 0x14d   : > { %6853 = vmatmul.mubr.bf16.gmra.mrb[44].mxu0 %v9705_v19 }
 0x14e   : > { %6856 = vmatprep.mubr.msk.bf16.mxu0 %vm8127_vm2, %v11060_v56  ;;  %6495 = vmatpush3.bf16.msra.mxu1 %v7890_v27  ;;  %v7894_v27 = vld [vmem:[%s10874_s4 + $0x98] sm:$0xff]  }
 0x14f   : > { %6496 = vmatprep.subr.bf16.mxu1 %v11060_v56 }
 0x151   : > { %6413 = vmatmul.mubr.bf16.gmra.mrb[4].mxu1 %v1514_v26  ;;  %v9749_v26 = vshrl.u32 %v9494_v5, 16  ;;  %v1529_v5 = vrot.slane %v9359_v43, 1 }
 0x152   : > { %6416 = vmatprep.mubr.msk.bf16.mxu1 %vm8127_vm2, %v11060_v56  ;;  %6497 = vmatpush3.bf16.msra.mxu1 %v7892_v16  ;;  %v7896_v16 = vld [vmem:[%s10874_s4 + $0xa0] sm:$0xff]  }
 0x153   : > { %6498 = vmatprep.subr.bf16.mxu1 %v11060_v56  ;;  %v3106_v0 = vrot.slane %v9749_v26, 2 }
 0x155   : > { %6857 = vmatmul.mubr.bf16.gmra.mrb[48].mxu0 %v9732_v25 }
 0x156   : > { %6860 = vmatprep.mubr.msk.bf16.mxu0 %vm8127_vm2, %v11060_v56  ;;  %6499 = vmatpush3.bf16.msra.mxu1 %v7894_v27  ;;  %v9759_v27 = vsel %vm3046_vm7, %v3100_v12, %v3104_v10  ;;  %v9773_v12 = vshll.u32 %v9536_v51, 16 }
 0x157   : > { %6500 = vmatprep.subr.bf16.mxu1 %v11060_v56  ;;  %11170 = vst [vmem:[#allocation84_spill] sm:$0xff] %v9759_v27 }
 0x159   : > { %6417 = vmatmul.mubr.bf16.gmra.mrb[8].mxu1 %v1522_v63  ;;  %v11171_v63 = vld [vmem:[#allocation63_spill] sm:$0xff] }
 0x15a   : > { %6420 = vmatprep.mubr.msk.bf16.mxu1 %vm8127_vm2, %v11060_v56  ;;  %6501 = vmatpush3.bf16.msra.mxu1 %v7896_v16  ;;  %v1525_v58 = vor.u32 %v11171_v63, %v1521_v42  ;;  %v9776_v16 = vshrl.u32 %v9536_v51, 16  ;;  %v7902_v42 = vld [vmem:[%s10874_s4 + $0xb8] sm:$0xff]   ;;  %v1537_v51 = vrot.slane %v9405_v38, 1 }
 0x15b   : > { %6502 = vmatprep.subr.bf16.mxu1 %v11060_v56 }
 0x15c   : > { %v1530_v43 = vsel %vm1494_vm15, %v1525_v58, %v1529_v5  ;;  %v3110_v40 = vrot.slane %v9776_v16, 2 }
 0x15d   : > { %6861 = vmatmul.mubr.bf16.gmra.mrb[52].mxu0 %v9759_v27  ;;  %v3108_v27 = vor.u32 %v3107_v15, %v3106_v0  ;;  %v3111_v0 = vrot.slane %v9773_v12, 3  ;;  %v9797_v15 = vshll.u32 %v9564_v2, 16 }
 0x15e   : > { %6864 = vmatprep.mubr.msk.bf16.mxu0 %vm8127_vm2, %v11060_v56  ;;  %6503 = vmatpush3.bf16.msra.mxu1 %v7898_v1 }
 0x15f   : > { %6504 = vmatprep.subr.bf16.mxu1 %v11060_v56  ;;  %v9786_v1 = vsel %vm3046_vm7, %v3104_v10, %v3108_v27  ;;  %11173 = vst [vmem:[#allocation85_spill] sm:$0xff] %v9797_v15  ;;  %v9800_v10 = vshrl.u32 %v9564_v2, 16  ;;  %v1541_v2 = vor.u32 %v9409_v24, %v1537_v51 }
 0x160   : > { %11172 = vst [vmem:[#allocation63_spill] sm:$0xff] %v9786_v1 }
 0x161   : > { %6421 = vmatmul.mubr.bf16.gmra.mrb[12].mxu1 %v1530_v43  ;;  %v1533_v43 = vor.u32 %v9362_v17, %v1529_v5  ;;  %11174 = vst [vmem:[#allocation86_spill] sm:$0xff] %v9800_v10  ;;  %v3114_v38 = vrot.slane %v9800_v10, 2 }
 0x162   : > { %6424 = vmatprep.mubr.msk.bf16.mxu1 %vm8127_vm2, %v11060_v56  ;;  %6505 = vmatpush3.bf16.msra.mxu1 %v7900_v49  ;;  %v3112_v49 = vor.u32 %v3111_v0, %v3110_v40 }
 0x163   : > { %6506 = vmatprep.subr.bf16.mxu1 %v11060_v56  ;;  %v1538_v58 = vsel %vm1494_vm15, %v1533_v43, %v1537_v51  ;;  %v1553_v43 = vrot.slane %v9488_v3, 1 }
 0x164   : > { %v9806_v5 = vsel %vm3046_vm7, %v3108_v27, %v3112_v49 }
 0x165   : > { %6865 = vmatmul.mubr.bf16.gmra.mrb[56].mxu0 %v9786_v1  ;;  %v3115_v1 = vrot.slane %v9797_v15, 3 }
 0x166   : > { %6868 = vmatprep.mubr.msk.bf16.mxu0 %vm8127_vm2, %v11060_v56  ;;  %6507 = vmatpush3.bf16.msra.mxu1 %v7902_v42  ;;  %v1545_v42 = vrot.slane %v9445_v4, 1  ;;  %v3119_v4 = vrot.slane %v9311_v41, 3 }
 0x167   : > { %6592 = vmatprep.subr.bf16.mxu1 %v11060_v56  ;;  %v3116_v0 = vor.u32 %v3115_v1, %v3114_v38 }
 0x168   : > { %v1546_v40 = vsel %vm1494_vm15, %v1541_v2, %v1545_v42  ;;  %v1549_v51 = vor.u32 %v9449_v7, %v1545_v42  ;;  %v1557_v42 = vor.u32 %v9492_v31, %v1553_v43 }
 0x169   : > { %6425 = vmatmul.mubr.bf16.gmra.mrb[16].mxu1 %v1538_v58  ;;  %v9819_v27 = vsel %vm3046_vm7, %v3112_v49, %v3116_v0  ;;  %v3118_v58 = vrot.slane %v9341_v35, 2  ;;  %v1561_v49 = vrot.slane %v9524_v52, 1  ;;  %v3123_v35 = vrot.slane %v9314_v18, 3 }
 0x16a   : > { %6428 = vmatprep.mubr.msk.bf16.mxu1 %vm8127_vm2, %v11060_v56  ;;  %v1554_v38 = vsel %vm1494_vm15, %v1549_v51, %v1553_v43  ;;  %v1569_v51 = vrot.slane %v9559_v9, 1  ;;  %v3127_v52 = vrot.slane %v9592_v61, 3 }
 0x16b   : > { %v3120_v2 = vor.u32 %v3119_v4, %v3118_v58  ;;  %v1562_v4 = vsel %vm1494_vm15, %v1557_v42, %v1561_v49  ;;  %v1565_v43 = vor.u32 %v9534_v6, %v1561_v49  ;;  %v1577_v42 = vrot.slane %v9577_v13, 1 }
 0x16c   : > { %v1573_v49 = vor.u32 %v9562_v21, %v1569_v51 }
 0x16d   : > { %6869 = vmatmul.mubr.bf16.gmra.mrb[60].mxu0 %v9806_v5  ;;  %v9832_v1 = vsel %vm3046_vm7, %v3116_v0, %v3120_v2 }
 0x16e   : > { %6872 = vmatprep.mubr.msk.bf16.mxu0 %vm8127_vm2, %v11060_v56 }
 0x171   : > { %6429 = vmatmul.mubr.bf16.gmra.mrb[20].mxu1 %v1546_v40  ;;  %v3122_v40 = vrot.slane %v9585_v53, 2 }
 0x172   : > { %6432 = vmatprep.mubr.msk.bf16.mxu1 %vm8127_vm2, %v11060_v56 }
 0x173   : > { %v3124_v58 = vor.u32 %v3123_v35, %v3122_v40  ;;  %v1570_v35 = vsel %vm1494_vm15, %v1565_v43, %v1569_v51  ;;  %v1593_v43 = vrot.slane %v9651_v47, 1 }
 0x175   : > { %6873 = vmatmul.mubr.bf16.gmra.mrb[64].mxu0 %v9819_v27  ;;  %v9845_v0 = vsel %vm3046_vm7, %v3120_v2, %v3124_v58 }
 0x176   : > { %6876 = vmatprep.mubr.msk.bf16.mxu0 %vm8127_vm2, %v11060_v56 }
 0x179   : > { %6433 = vmatmul.mubr.bf16.gmra.mrb[24].mxu1 %v1554_v38  ;;  %v3126_v38 = vrot.slane %v9589_v8, 2 }
 0x17a   : > { %6436 = vmatprep.mubr.msk.bf16.mxu1 %vm8127_vm2, %v11060_v56 }
 0x17b   : > { %v9855_v40 = vor.u32 %v3127_v52, %v3126_v38  ;;  %v1578_v52 = vsel %vm1494_vm15, %v1573_v49, %v1577_v42  ;;  %v7895_v38 = vld [vmem:[%s10874_s4 + $0x1c0] sm:$0xff]  }
 0x17d   : > { %6877 = vmatmul.mubr.bf16.gmra.mrb[68].mxu0 %v9832_v1  ;;  %v9861_v2 = vsel %vm3046_vm7, %v3124_v58, %v9855_v40  ;;  %v1581_v58 = vor.u32 %v9580_v48, %v1577_v42  ;;  %v7897_v42 = vld [vmem:[%s10874_s4 + $0x1c8] sm:$0xff]  }
 0x17e   : > { %6880 = vmatprep.mubr.msk.bf16.mxu0 %vm8127_vm2, %v11060_v56 }
 0x181   : > { %6437 = vmatmul.mubr.bf16.gmra.mrb[28].mxu1 %v1562_v4  ;;  %v1585_v4 = vrot.slane %v9616_v55, 1 }
 0x182   : > { %6440 = vmatprep.mubr.msk.bf16.mxu1 %vm8127_vm2, %v11060_v56 }
 0x183   : > { %v1586_v51 = vsel %vm1494_vm15, %v1581_v58, %v1585_v4  ;;  %v7901_v58 = vld [vmem:[%s10874_s4 + $0x1d8] sm:$0xff]  }
 0x185   : > { %6881 = vmatmul.mubr.bf16.gmra.mrb[72].mxu0 %v9845_v0 }
 0x186   : > { %6884 = vmatprep.mubr.msk.bf16.mxu0 %vm8127_vm2, %v11060_v56 }
 0x189   : > { %6441 = vmatmul.mubr.bf16.gmra.mrb[32].mxu1 %v1570_v35  ;;  %v1589_v35 = vor.u32 %v9619_v34, %v1585_v4  ;;  %v1597_v4 = vor.u32 %v9654_v46, %v1593_v43 }
 0x18a   : > { %6444 = vmatprep.mubr.msk.bf16.mxu1 %vm8127_vm2, %v11060_v56 }
 0x18b   : > { %v1594_v49 = vsel %vm1494_vm15, %v1589_v35, %v1593_v43  ;;  %v7905_v35 = vld [vmem:[%s10874_s4 + $0x1e8] sm:$0xff]  }
 0x18d   : > { %6885 = vmatmul.mubr.bf16.gmra.mrb[76].mxu0 %v9861_v2 }
 0x18e   : > { %6888 = vmatprep.mubr.msk.bf16.mxu0 %vm8127_vm2, %v11060_v56 }
 0x191   : > { %6445 = vmatmul.mubr.bf16.gmra.mrb[36].mxu1 %v1578_v52  ;;  %v1601_v52 = vrot.slane %v9670_v30, 1 }
 0x192   : > { %6448 = vmatprep.mubr.msk.bf16.mxu1 %vm8127_vm2, %v11060_v56 }
 0x193   : > { %v1605_v43 = vor.u32 %v9673_v11, %v1601_v52 }
 0x195   : > { %6889 = vmatmul.mubr.bf16.gmra.mrb[80].mxu0 %v9855_v40 }
 0x196   : > { %6908 = vmatprep.mubr.msk.bf16.mxu0 %vm8127_vm2, %v11060_v56 }
 0x199   : > { %6449 = vmatmul.mubr.bf16.gmra.mrb[40].mxu1 %v1586_v51  ;;  %v1602_v51 = vsel %vm1494_vm15, %v1597_v4, %v1601_v52  ;;  %v7909_v52 = vld [vmem:[%s10874_s4 + $0x1f8] sm:$0xff]  }
 0x19a   : > { %6452 = vmatprep.mubr.msk.bf16.mxu1 %vm8127_vm2, %v11060_v56 }
 0x19d   : > { %6909 = vmatmul.mubr.bf16.vlgmr.msra.gmra.mrb[0].mxu0 %v9389_v59  ;;  %v7899_v59 = vld [vmem:[%s10874_s4 + $0x1d0] sm:$0xff]  }
 0x19e   : > { %6993 = vmatpush3.bf16.msra.mxu0 %v7895_v38  ;;  %6912 = vmatprep.mubr.msk.bf16.mxu0 %vm8127_vm2, %v11060_v56  ;;  %v1609_v38 = vrot.slane %v9692_v22, 1 }
 0x19f   : > { %6994 = vmatprep.subr.bf16.mxu0 %v11060_v56 }
 0x1a1   : > { %6453 = vmatmul.mubr.bf16.gmra.mrb[44].mxu1 %v1594_v49  ;;  %v1617_v49 = vrot.slane %v9719_v50, 1 }
 0x1a2   : > { %6456 = vmatprep.mubr.msk.bf16.mxu1 %vm8127_vm2, %v11060_v56  ;;  %6995 = vmatpush3.bf16.msra.mxu0 %v7897_v42  ;;  %v1610_v42 = vsel %vm1494_vm15, %v1605_v43, %v1609_v38  ;;  %v1641_v43 = vrot.slane %v9797_v15, 1 }
 0x1a3   : > { %6996 = vmatprep.subr.bf16.mxu0 %v11060_v56 }
 0x1a5   : > { %6913 = vmatmul.mubr.bf16.gmra.mrb[4].mxu0 %v9429_v36  ;;  %v7903_v36 = vld [vmem:[%s10874_s4 + $0x1e0] sm:$0xff]  }
 0x1a6   : > { %6916 = vmatprep.mubr.msk.bf16.mxu0 %vm8127_vm2, %v11060_v56  ;;  %6997 = vmatpush3.bf16.msra.mxu0 %v7899_v59  ;;  %v1613_v59 = vor.u32 %v9695_v32, %v1609_v38 }
 0x1a7   : > { %6998 = vmatprep.subr.bf16.mxu0 %v11060_v56 }
 0x1a8   : > { %v1618_v4 = vsel %vm1494_vm15, %v1613_v59, %v1617_v49 }
 0x1a9   : > { %6457 = vmatmul.mubr.bf16.gmra.mrb[48].mxu1 %v1602_v51 }
 0x1aa   : > { %6460 = vmatprep.mubr.msk.bf16.mxu1 %vm8127_vm2, %v11060_v56  ;;  %6999 = vmatpush3.bf16.msra.mxu0 %v7901_v58  ;;  %v1621_v58 = vor.u32 %v9722_v60, %v1617_v49  ;;  %v11176_v49 = vld [vmem:[#allocation69_spill] sm:$0xff] }
 0x1ab   : > { %7000 = vmatprep.subr.bf16.mxu0 %v11060_v56 }
 0x1ad   : > { %6917 = vmatmul.mubr.bf16.gmra.mrb[8].mxu0 %v9470_v57  ;;  %v7907_v57 = vld [vmem:[%s10874_s4 + $0x1f0] sm:$0xff]  }
 0x1ae   : > { %6920 = vmatprep.mubr.msk.bf16.mxu0 %vm8127_vm2, %v11060_v56  ;;  %7001 = vmatpush3.bf16.msra.mxu0 %v7903_v36  ;;  %v1633_v36 = vrot.slane %v9773_v12, 1 }
 0x1af   : > { %7002 = vmatprep.subr.bf16.mxu0 %v11060_v56 }
 0x1b1   : > { %6461 = vmatmul.mubr.bf16.gmra.mrb[52].mxu1 %v1610_v42  ;;  %v1645_v42 = vor.u32 %v9800_v10, %v1641_v43 }
 0x1b2   : > { %6464 = vmatprep.mubr.msk.bf16.mxu1 %vm8127_vm2, %v11060_v56  ;;  %7003 = vmatpush3.bf16.msra.mxu0 %v7905_v35  ;;  %v1637_v35 = vor.u32 %v9776_v16, %v1633_v36 }
 0x1b3   : > { %7004 = vmatprep.subr.bf16.mxu0 %v11060_v56 }
 0x1b5   : > { %6921 = vmatmul.mubr.bf16.gmra.mrb[12].mxu0 %v9509_v45  ;;  %v1625_v45 = vrot.slane %v9746_v37, 1 }
 0x1b6   : > { %6924 = vmatprep.mubr.msk.bf16.mxu0 %vm8127_vm2, %v11060_v56  ;;  %7005 = vmatpush3.bf16.msra.mxu0 %v7907_v57 }
 0x1b7   : > { %7006 = vmatprep.subr.bf16.mxu0 %v11060_v56  ;;  %v1626_v51 = vsel %vm1494_vm15, %v1621_v58, %v1625_v45  ;;  %v1629_v38 = vor.u32 %v9749_v26, %v1625_v45  ;;  %v11178_v45 = vld [vmem:[#allocation65_spill] sm:$0xff]  ;;  %v11179_v58 = vld [vmem:[#allocation64_spill] sm:$0xff] }
 0x1b9   : > { %6465 = vmatmul.mubr.bf16.gmra.mrb[56].mxu1 %v1618_v4 }
 0x1ba   : > { %6468 = vmatprep.mubr.msk.bf16.mxu1 %vm8127_vm2, %v11060_v56  ;;  %7007 = vmatpush3.bf16.msra.mxu0 %v7909_v52  ;;  %v1953_v52 = vrot.slane %v9261_v28, 2  ;;  %v1957_v28 = vrot.slane %v11165_v33, 2 }
 0x1bb   : > { %7092 = vmatprep.subr.bf16.mxu0 %v11060_v56 }
 0x1bd   : > { %6925 = vmatmul.mubr.bf16.gmra.mrb[16].mxu0 %v9546_v23  ;;  %v1634_v23 = vsel %vm1494_vm15, %v1629_v38, %v1633_v36 }
 0x1be   : > { %6928 = vmatprep.mubr.msk.bf16.mxu0 %vm8127_vm2, %v11060_v56 }
 0x1c1   : > { %6469 = vmatmul.mubr.bf16.gmra.mrb[60].mxu1 %v1626_v51  ;;  %v11180_v51 = vor.u32 %v11178_v45, %v11179_v58  ;;  %v11184_v45 = vld [vmem:[#allocation63_spill] sm:$0xff]  ;;  %v7916_v58 = vld [vmem:[%s10874_s4 + $0xf0] sm:$0xff]  }
 0x1c2   : > { %6472 = vmatprep.mubr.msk.bf16.mxu1 %vm8127_vm2, %v11060_v56 }
 0x1c5   : > { %6929 = vmatmul.mubr.bf16.gmra.mrb[20].mxu0 %v9570_v54  ;;  %v1642_v54 = vsel %vm1494_vm15, %v1637_v35, %v1641_v43  ;;  %v1960_v35 = vrot.slane %v11171_v63, 1 }
 0x1c6   : > { %6932 = vmatprep.mubr.msk.bf16.mxu0 %vm8127_vm2, %v11060_v56 }
 0x1c9   : > { %6473 = vmatmul.mubr.bf16.gmra.mrb[64].mxu1 %v1634_v23  ;;  %v7908_v23 = vld [vmem:[%s10874_s4 + $0xd0] sm:$0xff]  }
 0x1ca   : > { %6476 = vmatprep.mubr.msk.bf16.mxu1 %vm8127_vm2, %v11060_v56 }
 0x1cd   : > { %6933 = vmatmul.mubr.bf16.gmra.mrb[24].mxu0 %v9603_v62  ;;  %v11175_v62 = vrot.slane %v9311_v41, 1 }
 0x1ce   : > { %6936 = vmatprep.mubr.msk.bf16.mxu0 %vm8127_vm2, %v11060_v56 }
 0x1cf   : > { %v1650_v57 = vsel %vm1494_vm15, %v1645_v42, %v11175_v62 }
 0x1d1   : > { %6477 = vmatmul.mubr.bf16.gmra.mrb[68].mxu1 %v1642_v54  ;;  %v11181_v54 = vld [vmem:[#allocation62_spill] sm:$0xff] }
 0x1d2   : > { %6480 = vmatprep.mubr.msk.bf16.mxu1 %vm8127_vm2, %v11060_v56  ;;  %v1961_v42 = vrot.slane %v11181_v54, 2 }
 0x1d4   : > { %v1962_v62 = vor.u32 %v1961_v42, %v1960_v35  ;;  %v1972_v35 = vrot.slane %v9449_v7, 1  ;;  %v11186_v42 = vld [vmem:[#allocation70_spill] sm:$0xff] }
 0x1d5   : > { %6937 = vmatmul.mubr.bf16.gmra.mrb[28].mxu0 %v9642_v14  ;;  %v11177_v14 = vrot.slane %v9314_v18, 1 }
 0x1d6   : > { %6940 = vmatprep.mubr.msk.bf16.mxu0 %vm8127_vm2, %v11060_v56 }
 0x1d7   : > { %v1661_v59 = vor.u32 %v9585_v53, %v11177_v14 }
 0x1d9   : > { %6481 = vmatmul.mubr.bf16.gmra.mrb[72].mxu1 %v1650_v57  ;;  %v11182_v57 = vld [vmem:[#allocation84_spill] sm:$0xff] }
 0x1da   : > { %6484 = vmatprep.mubr.msk.bf16.mxu1 %vm8127_vm2, %v11060_v56 }
 0x1dd   : > { %6941 = vmatmul.mubr.bf16.gmra.mrb[32].mxu0 %v9660_v29  ;;  %v1952_v29 = vrot.slane %v9234_v20, 1  ;;  %v1956_v20 = vrot.slane %v11168_v44, 1 }
 0x1de   : > { %6944 = vmatprep.mubr.msk.bf16.mxu0 %vm8127_vm2, %v11060_v56 }
 0x1df   : > { %v1954_v4 = vor.u32 %v1953_v52, %v1952_v29  ;;  %v1958_v38 = vor.u32 %v1957_v28, %v1956_v20  ;;  %v11183_v29 = vld [vmem:[#allocation67_spill] sm:$0xff]  ;;  %v11185_v20 = vld [vmem:[#allocation24_spill] sm:$0xff] }
 0x1e0   : > { %v1965_v52 = vrot.slane %v11183_v29, 2  ;;  %v1969_v28 = vrot.slane %v11185_v20, 2 }
 0x1e1   : > { %6485 = vmatmul.mubr.bf16.gmra.mrb[76].mxu1 %v11176_v49  ;;  %v1955_v36 = vsel %vm1948_vm6, %v11180_v51, %v1954_v4  ;;  %v10018_v43 = vsel %vm1948_vm6, %v1954_v4, %v1958_v38  ;;  %v7912_v49 = vld [vmem:[%s10874_s4 + $0xe0] sm:$0xff]   ;;  %v10037_v14 = vsel %vm1948_vm6, %v1958_v38, %v1962_v62  ;;  %v7914_v4 = vld [vmem:[%s10874_s4 + $0xe8] sm:$0xff]  }
 0x1e2   : > { %6488 = vmatprep.mubr.msk.bf16.mxu1 %vm8127_vm2, %v11060_v56 }
 0x1e5   : > { %6945 = vmatmul.mubr.bf16.gmra.mrb[36].mxu0 %v9680_v39  ;;  %v7904_v39 = vld [vmem:[%s10874_s4 + $0xc0] sm:$0xff]  }
 0x1e6   : > { %6948 = vmatprep.mubr.msk.bf16.mxu0 %vm8127_vm2, %v11060_v56 }
 0x1e9   : > { %6489 = vmatmul.mubr.bf16.gmra.mrb[80].mxu1 %v1661_v59  ;;  %v1964_v59 = vrot.slane %v9362_v17, 1 }
 0x1ea   : > { %6508 = vmatprep.mubr.msk.bf16.mxu1 %vm8127_vm2, %v11060_v56 }
 0x1ed   : > { %6949 = vmatmul.mubr.bf16.gmra.mrb[40].mxu0 %v9705_v19  ;;  %v7906_v19 = vld [vmem:[%s10874_s4 + $0xc8] sm:$0xff]  }
 0x1ee   : > { %6952 = vmatprep.mubr.msk.bf16.mxu0 %vm8127_vm2, %v11060_v56 }
 0x1f1   : > { %6509 = vmatmul.mubr.bf16.vlgmr.msra.gmra.mrb[0].mxu1 %v1955_v36  ;;  %v1968_v36 = vrot.slane %v9409_v24, 1 }
 0x1f2   : > { %6593 = vmatpush3.bf16.msra.mxu1 %v7904_v39  ;;  %6512 = vmatprep.mubr.msk.bf16.mxu1 %vm8127_vm2, %v11060_v56  ;;  %v1966_v39 = vor.u32 %v1965_v52, %v1964_v59  ;;  %v1980_v52 = vrot.slane %v9534_v6, 1 }
 0x1f3   : > { %6594 = vmatprep.subr.bf16.mxu1 %v11060_v56  ;;  %v1970_v38 = vor.u32 %v1969_v28, %v1968_v36  ;;  %v1985_v36 = vrot.slane %v9559_v9, 2 }
 0x1f4   : > { %v10056_v51 = vsel %vm1948_vm6, %v1962_v62, %v1966_v39 }
 0x1f5   : > { %6953 = vmatmul.mubr.bf16.gmra.mrb[44].mxu0 %v9732_v25  ;;  %v7910_v25 = vld [vmem:[%s10874_s4 + $0xd8] sm:$0xff]  }
 0x1f6   : > { %6956 = vmatprep.mubr.msk.bf16.mxu0 %vm8127_vm2, %v11060_v56  ;;  %6595 = vmatpush3.bf16.msra.mxu1 %v7906_v19  ;;  %v7918_v19 = vld [vmem:[%s10874_s4 + $0xf8] sm:$0xff]  }
 0x1f7   : > { %6596 = vmatprep.subr.bf16.mxu1 %v11060_v56 }
 0x1f9   : > { %6513 = vmatmul.mubr.bf16.gmra.mrb[4].mxu1 %v10018_v43 }
 0x1fa   : > { %6516 = vmatprep.mubr.msk.bf16.mxu1 %vm8127_vm2, %v11060_v56  ;;  %6597 = vmatpush3.bf16.msra.mxu1 %v7908_v23  ;;  %v10072_v23 = vsel %vm1948_vm6, %v1966_v39, %v1970_v38 }
 0x1fb   : > { %6598 = vmatprep.subr.bf16.mxu1 %v11060_v56 }
 0x1fd   : > { %6957 = vmatmul.mubr.bf16.gmra.mrb[48].mxu0 %v11182_v57  ;;  %v1976_v57 = vrot.slane %v9492_v31, 1 }
 0x1fe   : > { %6960 = vmatprep.mubr.msk.bf16.mxu0 %vm8127_vm2, %v11060_v56  ;;  %6599 = vmatpush3.bf16.msra.mxu1 %v7910_v25  ;;  %v1973_v25 = vrot.slane %v11186_v42, 2 }
 0x1ff   : > { %6600 = vmatprep.subr.bf16.mxu1 %v11060_v56 }
 0x200   : > { %v1974_v62 = vor.u32 %v1973_v25, %v1972_v35 }
 0x201   : > { %6517 = vmatmul.mubr.bf16.gmra.mrb[8].mxu1 %v10037_v14 }
 0x202   : > { %6520 = vmatprep.mubr.msk.bf16.mxu1 %vm8127_vm2, %v11060_v56  ;;  %6601 = vmatpush3.bf16.msra.mxu1 %v7912_v49  ;;  %v1977_v49 = vrot.slane %v9488_v3, 2 }
 0x203   : > { %6602 = vmatprep.subr.bf16.mxu1 %v11060_v56 }
 0x204   : > { %v1978_v59 = vor.u32 %v1977_v49, %v1976_v57  ;;  %v1988_v49 = vrot.slane %v9580_v48, 1 }
 0x205   : > { %6961 = vmatmul.mubr.bf16.gmra.mrb[52].mxu0 %v11184_v45 }
 0x206   : > { %6964 = vmatprep.mubr.msk.bf16.mxu0 %vm8127_vm2, %v11060_v56  ;;  %6603 = vmatpush3.bf16.msra.mxu1 %v7914_v4  ;;  %v11187_v4 = vld [vmem:[#allocation73_spill] sm:$0xff] }
 0x207   : > { %6604 = vmatprep.subr.bf16.mxu1 %v11060_v56  ;;  %v1981_v39 = vrot.slane %v11187_v4, 2 }
 0x209   : > { %6521 = vmatmul.mubr.bf16.gmra.mrb[12].mxu1 %v10056_v51  ;;  %v1982_v45 = vor.u32 %v1981_v39, %v1980_v52 }
 0x20a   : > { %6524 = vmatprep.mubr.msk.bf16.mxu1 %vm8127_vm2, %v11060_v56  ;;  %6605 = vmatpush3.bf16.msra.mxu1 %v7916_v58  ;;  %v1984_v58 = vrot.slane %v9562_v21, 1 }
 0x20b   : > { %6606 = vmatprep.subr.bf16.mxu1 %v11060_v56 }
 0x20c   : > { %v1986_v28 = vor.u32 %v1985_v36, %v1984_v58  ;;  %v1993_v58 = vrot.slane %v9616_v55, 2 }
 0x20d   : > { %6965 = vmatmul.mubr.bf16.gmra.mrb[56].mxu0 %v9806_v5  ;;  %v10083_v5 = vsel %vm1948_vm6, %v1970_v38, %v1974_v62 }
 0x20e   : > { %6968 = vmatprep.mubr.msk.bf16.mxu0 %vm8127_vm2, %v11060_v56  ;;  %6607 = vmatpush3.bf16.msra.mxu1 %v7918_v19  ;;  %v11188_v19 = vld [vmem:[#allocation72_spill] sm:$0xff] }
 0x20f   : > { %7192 = vmatprep.subr.bf16.mxu1 %v11060_v56  ;;  %v11189_v38 = vshrl.u32 %v11188_v19, 16 }
 0x211   : > { %6525 = vmatmul.mubr.bf16.gmra.mrb[16].mxu1 %v10072_v23  ;;  %v3460_v35 = vrot.slane %v11189_v38, 2  ;;  %v11191_v38 = vld [vmem:[#allocation9_spill] sm:$0xff] }
 0x212   : > { %6528 = vmatprep.mubr.msk.bf16.mxu1 %vm8127_vm2, %v11060_v56 }
 0x215   : > { %6969 = vmatmul.mubr.bf16.gmra.mrb[60].mxu0 %v9819_v27  ;;  %v10094_v27 = vsel %vm1948_vm6, %v1974_v62, %v1978_v59  ;;  %v10120_v62 = vsel %vm1948_vm6, %v1982_v45, %v1986_v28 }
 0x216   : > { %6972 = vmatprep.mubr.msk.bf16.mxu0 %vm8127_vm2, %v11060_v56 }
 0x219   : > { %6529 = vmatmul.mubr.bf16.gmra.mrb[20].mxu1 %v10083_v5 }
 0x21a   : > { %6532 = vmatprep.mubr.msk.bf16.mxu1 %vm8127_vm2, %v11060_v56 }
 0x21d   : > { %6973 = vmatmul.mubr.bf16.gmra.mrb[64].mxu0 %v9832_v1  ;;  %v10105_v1 = vsel %vm1948_vm6, %v1978_v59, %v1982_v45  ;;  %v1989_v59 = vrot.slane %v9577_v13, 2  ;;  %v1992_v45 = vrot.slane %v9619_v34, 1 }
 0x21e   : > { %6976 = vmatprep.mubr.msk.bf16.mxu0 %vm8127_vm2, %v11060_v56 }
 0x21f   : > { %v1994_v36 = vor.u32 %v1993_v58, %v1992_v45  ;;  %v11193_v58 = vld [vmem:[#allocation14_spill] sm:$0xff] }
 0x221   : > { %6533 = vmatmul.mubr.bf16.gmra.mrb[24].mxu1 %v10094_v27 }
 0x222   : > { %6536 = vmatprep.mubr.msk.bf16.mxu1 %vm8127_vm2, %v11060_v56 }
 0x225   : > { %6977 = vmatmul.mubr.bf16.gmra.mrb[68].mxu0 %v9845_v0  ;;  %v11190_v0 = vshll.u32 %v11188_v19, 16 }
 0x226   : > { %6980 = vmatprep.mubr.msk.bf16.mxu0 %vm8127_vm2, %v11060_v56 }
 0x227   : > { %v3463_v25 = vrot.slane %v11190_v0, 3  ;;  %v1997_v0 = vrot.slane %v9651_v47, 2 }
 0x229   : > { %6537 = vmatmul.mubr.bf16.gmra.mrb[28].mxu1 %v10105_v1  ;;  %v3464_v57 = vor.u32 %v3463_v25, %v3460_v35  ;;  %v1996_v35 = vrot.slane %v9654_v46, 1  ;;  %v11192_v25 = vld [vmem:[#allocation6_spill] sm:$0xff] }
 0x22a   : > { %6540 = vmatprep.mubr.msk.bf16.mxu1 %vm8127_vm2, %v11060_v56 }
 0x22b   : > { %v3465_v52 = vsel %vm3046_vm7, %v9855_v40, %v3464_v57 }
 0x22d   : > { %6981 = vmatmul.mubr.bf16.gmra.mrb[72].mxu0 %v9861_v2  ;;  %v1990_v2 = vor.u32 %v1989_v59, %v1988_v49  ;;  %v3776_v49 = vrot.slane %v11192_v25, 3  ;;  %v2000_v25 = vrot.slane %v9673_v11, 1 }
 0x22e   : > { %6984 = vmatprep.mubr.msk.bf16.mxu0 %vm8127_vm2, %v11060_v56 }
 0x22f   : > { %v10132_v39 = vsel %vm1948_vm6, %v1986_v28, %v1990_v2  ;;  %v10142_v40 = vsel %vm1948_vm6, %v1990_v2, %v1994_v36  ;;  %v3777_v28 = vrot.slane %v11191_v38, 3  ;;  %v7913_v2 = vld [vmem:[%s10874_s4 + $0x208] sm:$0xff]   ;;  %v3779_v38 = vrot.slane %v11193_v58, 3 }
 0x231   : > { %6541 = vmatmul.mubr.bf16.gmra.mrb[32].mxu1 %v10120_v62  ;;  %v3778_v59 = vsel %vm3775_vm14, %v3776_v49, %v3777_v28 }
 0x232   : > { %6544 = vmatprep.mubr.msk.bf16.mxu1 %vm8127_vm2, %v11060_v56 }
 0x235   : > { %6985 = vmatmul.mubr.bf16.gmra.mrb[76].mxu0 %v3465_v52  ;;  %v1998_v52 = vor.u32 %v1997_v0, %v1996_v35  ;;  %v2001_v35 = vrot.slane %v9670_v30, 2  ;;  %v7915_v0 = vld [vmem:[%s10874_s4 + $0x210] sm:$0xff]   ;;  %v2004_v30 = vrot.slane %v9695_v32, 1 }
 0x236   : > { %6988 = vmatprep.mubr.msk.bf16.mxu0 %vm8127_vm2, %v11060_v56 }
 0x237   : > { %v10162_v45 = vsel %vm1948_vm6, %v1994_v36, %v1998_v52  ;;  %v3780_v36 = vsel %vm3775_vm14, %v3777_v28, %v3779_v38  ;;  %v2002_v49 = vor.u32 %v2001_v35, %v2000_v25  ;;  %v2005_v28 = vrot.slane %v9692_v22, 2  ;;  %v7919_v25 = vld [vmem:[%s10874_s4 + $0x220] sm:$0xff]  }
 0x238   : > { %v2008_v22 = vrot.slane %v9722_v60, 1 }
 0x239   : > { %6545 = vmatmul.mubr.bf16.gmra.mrb[36].mxu1 %v10132_v39  ;;  %v2006_v35 = vor.u32 %v2005_v28, %v2004_v30  ;;  %v2009_v30 = vrot.slane %v9719_v50, 2  ;;  %v2012_v50 = vrot.slane %v9749_v26, 1 }
 0x23a   : > { %6548 = vmatprep.mubr.msk.bf16.mxu1 %vm8127_vm2, %v11060_v56 }
 0x23b   : > { %v2010_v28 = vor.u32 %v2009_v30, %v2008_v22  ;;  %v2013_v22 = vrot.slane %v9746_v37, 2  ;;  %v2017_v37 = vrot.slane %v9773_v12, 2 }
 0x23d   : > { %6989 = vmatmul.mubr.bf16.gmra.mrb[80].mxu0 %v3464_v57  ;;  %v7911_v57 = vld [vmem:[%s10874_s4 + $0x200] sm:$0xff]   ;;  %v2014_v30 = vor.u32 %v2013_v22, %v2012_v50 }
 0x23e   : > { %7008 = vmatprep.mubr.msk.bf16.mxu0 %vm8127_vm2, %v11060_v56 }
 0x241   : > { %6549 = vmatmul.mubr.bf16.gmra.mrb[40].mxu1 %v10142_v40 }
 0x242   : > { %6552 = vmatprep.mubr.msk.bf16.mxu1 %vm8127_vm2, %v11060_v56 }
 0x245   : > { %7009 = vmatmul.mubr.bf16.vlgmr.msra.gmra.mrb[0].mxu0 %v3778_v59  ;;  %v10182_v59 = vsel %vm1948_vm6, %v1998_v52, %v2002_v49 }
 0x246   : > { %7093 = vmatpush3.bf16.msra.mxu0 %v7911_v57  ;;  %7012 = vmatprep.mubr.msk.bf16.mxu0 %vm8127_vm2, %v11060_v56  ;;  %v7917_v57 = vld [vmem:[%s10874_s4 + $0x218] sm:$0xff]  }
 0x247   : > { %7094 = vmatprep.subr.bf16.mxu0 %v11060_v56 }
 0x249   : > { %6553 = vmatmul.mubr.bf16.gmra.mrb[44].mxu1 %v10162_v45 }
 0x24a   : > { %6556 = vmatprep.mubr.msk.bf16.mxu1 %vm8127_vm2, %v11060_v56  ;;  %7095 = vmatpush3.bf16.msra.mxu0 %v7913_v2  ;;  %v11194_v2 = vld [vmem:[#allocation19_spill] sm:$0xff] }
 0x24b   : > { %7096 = vmatprep.subr.bf16.mxu0 %v11060_v56  ;;  %v3781_v58 = vrot.slane %v11194_v2, 3 }
 0x24d   : > { %7013 = vmatmul.mubr.bf16.gmra.mrb[4].mxu0 %v3780_v36  ;;  %v3782_v52 = vsel %vm3775_vm14, %v3779_v38, %v3781_v58  ;;  %v10202_v36 = vsel %vm1948_vm6, %v2002_v49, %v2006_v35  ;;  %v7921_v38 = vld [vmem:[%s10874_s4 + $0x230] sm:$0xff]  }
 0x24e   : > { %7016 = vmatprep.mubr.msk.bf16.mxu0 %vm8127_vm2, %v11060_v56  ;;  %7097 = vmatpush3.bf16.msra.mxu0 %v7915_v0  ;;  %v7920_v0 = vld [vmem:[%s10874_s4 + $0x228] sm:$0xff]  }
 0x24f   : > { %7098 = vmatprep.subr.bf16.mxu0 %v11060_v56 }
 0x251   : > { %6557 = vmatmul.mubr.bf16.gmra.mrb[48].mxu1 %v10182_v59 }
 0x252   : > { %6560 = vmatprep.mubr.msk.bf16.mxu1 %vm8127_vm2, %v11060_v56  ;;  %7099 = vmatpush3.bf16.msra.mxu0 %v7917_v57  ;;  %v11195_v57 = vld [vmem:[#allocation25_spill] sm:$0xff] }
 0x253   : > { %7100 = vmatprep.subr.bf16.mxu0 %v11060_v56  ;;  %v3783_v2 = vrot.slane %v11195_v57, 3 }
 0x255   : > { %7017 = vmatmul.mubr.bf16.gmra.mrb[8].mxu0 %v3782_v52  ;;  %v3784_v49 = vsel %vm3775_vm14, %v3781_v58, %v3783_v2  ;;  %v10222_v52 = vsel %vm1948_vm6, %v2006_v35, %v2010_v28  ;;  %v10234_v35 = vsel %vm1948_vm6, %v2010_v28, %v2014_v30 }
 0x256   : > { %7020 = vmatprep.mubr.msk.bf16.mxu0 %vm8127_vm2, %v11060_v56  ;;  %7101 = vmatpush3.bf16.msra.mxu0 %v7919_v25  ;;  %v7922_v25 = vld [vmem:[%s10874_s4 + $0x238] sm:$0xff]  }
 0x257   : > { %7102 = vmatprep.subr.bf16.mxu0 %v11060_v56 }
 0x259   : > { %6561 = vmatmul.mubr.bf16.gmra.mrb[52].mxu1 %v10202_v36 }
 0x25a   : > { %6564 = vmatprep.mubr.msk.bf16.mxu1 %vm8127_vm2, %v11060_v56  ;;  %7103 = vmatpush3.bf16.msra.mxu0 %v7920_v0  ;;  %v11196_v0 = vld [vmem:[#allocation32_spill] sm:$0xff] }
 0x25b   : > { %7104 = vmatprep.subr.bf16.mxu0 %v11060_v56  ;;  %v3785_v57 = vrot.slane %v11196_v0, 3  ;;  %v2016_v0 = vrot.slane %v9776_v16, 1 }
 0x25d   : > { %7021 = vmatmul.mubr.bf16.gmra.mrb[12].mxu0 %v3784_v49  ;;  %v3786_v58 = vsel %vm3775_vm14, %v3783_v2, %v3785_v57  ;;  %v2018_v2 = vor.u32 %v2017_v37, %v2016_v0  ;;  %v11199_v0 = vld [vmem:[#allocation49_spill] sm:$0xff] }
 0x25e   : > { %7024 = vmatprep.mubr.msk.bf16.mxu0 %vm8127_vm2, %v11060_v56  ;;  %7105 = vmatpush3.bf16.msra.mxu0 %v7921_v38  ;;  %v11197_v38 = vld [vmem:[#allocation37_spill] sm:$0xff] }
 0x25f   : > { %7106 = vmatprep.subr.bf16.mxu0 %v11060_v56  ;;  %v3787_v49 = vrot.slane %v11197_v38, 3  ;;  %v10246_v28 = vsel %vm1948_vm6, %v2014_v30, %v2018_v2  ;;  %v2021_v38 = vrot.slane %v9797_v15, 2  ;;  %v2025_v15 = vrot.slane %v9311_v41, 2 }
 0x260   : > { %v2029_v41 = vrot.slane %v9314_v18, 2 }
 0x261   : > { %6565 = vmatmul.mubr.bf16.gmra.mrb[56].mxu1 %v10222_v52  ;;  %v3788_v50 = vsel %vm3775_vm14, %v3785_v57, %v3787_v49 }
 0x262   : > { %6568 = vmatprep.mubr.msk.bf16.mxu1 %vm8127_vm2, %v11060_v56  ;;  %7107 = vmatpush3.bf16.msra.mxu0 %v7922_v25  ;;  %v11198_v25 = vld [vmem:[#allocation44_spill] sm:$0xff] }
 0x263   : > { %v3789_v22 = vrot.slane %v11198_v25, 3  ;;  %v11200_v25 = vld [vmem:[#allocation66_spill] sm:$0xff] }
 0x265   : > { %7025 = vmatmul.mubr.bf16.gmra.mrb[16].mxu0 %v3786_v58  ;;  %v2020_v58 = vrot.slane %v9800_v10, 1  ;;  %v3790_v37 = vsel %vm3775_vm14, %v3787_v49, %v3789_v22  ;;  %v2024_v10 = vrot.slane %v11200_v25, 1 }
 0x266   : > { %7028 = vmatprep.mubr.msk.bf16.mxu0 %vm8127_vm2, %v11060_v56 }
 0x267   : > { %v2022_v57 = vor.u32 %v2021_v38, %v2020_v58  ;;  %v2026_v58 = vor.u32 %v2025_v15, %v2024_v10  ;;  %v11201_v38 = vld [vmem:[#allocation52_spill] sm:$0xff] }
 0x269   : > { %6569 = vmatmul.mubr.bf16.gmra.mrb[60].mxu1 %v10234_v35  ;;  %v10258_v30 = vsel %vm1948_vm6, %v2018_v2, %v2022_v57  ;;  %v10270_v2 = vsel %vm1948_vm6, %v2022_v57, %v2026_v58 }
 0x26a   : > { %6572 = vmatprep.mubr.msk.bf16.mxu1 %vm8127_vm2, %v11060_v56 }
 0x26d   : > { %7029 = vmatmul.mubr.bf16.gmra.mrb[20].mxu0 %v3788_v50  ;;  %v3791_v50 = vrot.slane %v11199_v0, 3  ;;  %v2028_v0 = vrot.slane %v9585_v53, 1  ;;  %v11202_v53 = vld [vmem:[#allocation57_spill] sm:$0xff] }
 0x26e   : > { %7032 = vmatprep.mubr.msk.bf16.mxu0 %vm8127_vm2, %v11060_v56  ;;  %v3795_v57 = vrot.slane %v11202_v53, 3 }
 0x26f   : > { %v3792_v49 = vsel %vm3775_vm14, %v3789_v22, %v3791_v50  ;;  %v10279_v10 = vor.u32 %v2029_v41, %v2028_v0  ;;  %v11205_v41 = vld [vmem:[#allocation71_spill] sm:$0xff] }
 0x271   : > { %6573 = vmatmul.mubr.bf16.gmra.mrb[64].mxu1 %v10246_v28  ;;  %v10285_v22 = vsel %vm1948_vm6, %v2026_v58, %v10279_v10  ;;  %v11204_v58 = vld [vmem:[#allocation30_spill] sm:$0xff] }
 0x272   : > { %6576 = vmatprep.mubr.msk.bf16.mxu1 %vm8127_vm2, %v11060_v56 }
 0x275   : > { %7033 = vmatmul.mubr.bf16.gmra.mrb[24].mxu0 %v3790_v37  ;;  %v3793_v37 = vrot.slane %v11201_v38, 3  ;;  %v3799_v38 = vrot.slane %v11204_v58, 3 }
 0x276   : > { %7036 = vmatprep.mubr.msk.bf16.mxu0 %vm8127_vm2, %v11060_v56 }
 0x277   : > { %v3794_v15 = vsel %vm3775_vm14, %v3791_v50, %v3793_v37  ;;  %v3796_v18 = vsel %vm3775_vm14, %v3793_v37, %v3795_v57  ;;  %v11203_v50 = vld [vmem:[#allocation68_spill] sm:$0xff]  ;;  %v8109_v37 = vld [vmem:[%s10874_s4 + $0x100] sm:$0xff]  }
 0x278   : > { %v3797_v25 = vrot.slane %v11203_v50, 3 }
 0x279   : > { %6577 = vmatmul.mubr.bf16.gmra.mrb[68].mxu1 %v10258_v30 }
 0x27a   : > { %6580 = vmatprep.mubr.msk.bf16.mxu1 %vm8127_vm2, %v11060_v56  ;;  %v3800_v0 = vsel %vm3775_vm14, %v3797_v25, %v3799_v38 }
 0x27d   : > { %7037 = vmatmul.mubr.bf16.gmra.mrb[28].mxu0 %v3792_v49  ;;  %v3798_v49 = vsel %vm3775_vm14, %v3795_v57, %v3797_v25  ;;  %v8111_v57 = vld [vmem:[%s10874_s4 + $0x110] sm:$0xff]  }
 0x27e   : > { %7040 = vmatprep.mubr.msk.bf16.mxu0 %vm8127_vm2, %v11060_v56  ;;  %v11206_v25 = vld [vmem:[#allocation40_spill] sm:$0xff] }
 0x281   : > { %6581 = vmatmul.mubr.bf16.gmra.mrb[72].mxu1 %v10270_v2 }
 0x282   : > { %6584 = vmatprep.mubr.msk.bf16.mxu1 %vm8127_vm2, %v11060_v56 }
 0x285   : > { %7041 = vmatmul.mubr.bf16.gmra.mrb[32].mxu0 %v3794_v15  ;;  %v3801_v15 = vrot.slane %v11205_v41, 3 }
 0x286   : > { %7044 = vmatprep.mubr.msk.bf16.mxu0 %vm8127_vm2, %v11060_v56 }
 0x289   : > { %6585 = vmatmul.mubr.bf16.gmra.mrb[76].mxu1 %v10285_v22 }
 0x28a   : > { %6588 = vmatprep.mubr.msk.bf16.mxu1 %vm8127_vm2, %v11060_v56 }
 0x28d   : > { %7045 = vmatmul.mubr.bf16.gmra.mrb[36].mxu0 %v3796_v18  ;;  %v3802_v18 = vsel %vm3775_vm14, %v3799_v38, %v3801_v15  ;;  %v8113_v38 = vld [vmem:[%s10874_s4 + $0x120] sm:$0xff]  }
 0x28e   : > { %7048 = vmatprep.mubr.msk.bf16.mxu0 %vm8127_vm2, %v11060_v56 }
 0x291   : > { %6589 = vmatmul.mubr.bf16.gmra.mrb[80].mxu1 %v10279_v10 }
 0x292   : > { %6608 = vmatprep.mubr.msk.bf16.mxu1 %vm8127_vm2, %v11060_v56 }
 0x295   : > { %7049 = vmatmul.mubr.bf16.gmra.mrb[40].mxu0 %v3798_v49  ;;  %v3803_v49 = vrot.slane %v11206_v25, 3 }
 0x296   : > { %7052 = vmatprep.mubr.msk.bf16.mxu0 %vm8127_vm2, %v11060_v56 }
 0x299   : > { %6609 = vmatmul.mubr.bf16.vlgmr.msra.gmra.mrb[0].mxu1 %v10018_v43  ;;  %v8110_v43 = vld [vmem:[%s10874_s4 + $0x108] sm:$0xff]  }
 0x29a   : > { %7200 = vmatpush3.bf16.msra.mxu1 %v8109_v37  ;;  %6612 = vmatprep.mubr.msk.bf16.mxu1 %vm8127_vm2, %v11060_v56  ;;  %v3804_v37 = vsel %vm3775_vm14, %v3801_v15, %v3803_v49  ;;  %v8115_v15 = vld [vmem:[%s10874_s4 + $0x130] sm:$0xff]  }
 0x29b   : > { %7193 = vmatprep.subr.bf16.mxu1 %v11060_v56 }
 0x29d   : > { %7053 = vmatmul.mubr.bf16.gmra.mrb[44].mxu0 %v3800_v0  ;;  %v11207_v0 = vld [vmem:[#allocation75_spill] sm:$0xff] }
 0x29e   : > { %7056 = vmatprep.mubr.msk.bf16.mxu0 %vm8127_vm2, %v11060_v56  ;;  %7201 = vmatpush3.bf16.msra.mxu1 %v8110_v43  ;;  %v3805_v43 = vrot.slane %v11207_v0, 3 }
 0x29f   : > { %7194 = vmatprep.subr.bf16.mxu1 %v11060_v56 }
 0x2a1   : > { %6613 = vmatmul.mubr.bf16.gmra.mrb[4].mxu1 %v10037_v14  ;;  %v8112_v14 = vld [vmem:[%s10874_s4 + $0x118] sm:$0xff]  }
 0x2a2   : > { %6616 = vmatprep.mubr.msk.bf16.mxu1 %vm8127_vm2, %v11060_v56  ;;  %7202 = vmatpush3.bf16.msra.mxu1 %v8111_v57  ;;  %v3806_v57 = vsel %vm3775_vm14, %v3803_v49, %v3805_v43  ;;  %v11209_v49 = vld [vmem:[#allocation60_spill] sm:$0xff] }
 0x2a3   : > { %7195 = vmatprep.subr.bf16.mxu1 %v11060_v56 }
 0x2a5   : > { %7057 = vmatmul.mubr.bf16.gmra.mrb[48].mxu0 %v3802_v18  ;;  %v11208_v18 = vld [vmem:[#allocation76_spill] sm:$0xff] }
 0x2a6   : > { %7060 = vmatprep.mubr.msk.bf16.mxu0 %vm8127_vm2, %v11060_v56  ;;  %7203 = vmatpush3.bf16.msra.mxu1 %v8112_v14  ;;  %v3807_v14 = vrot.slane %v11208_v18, 3 }
 0x2a7   : > { %7196 = vmatprep.subr.bf16.mxu1 %v11060_v56 }
 0x2a9   : > { %6617 = vmatmul.mubr.bf16.gmra.mrb[8].mxu1 %v10056_v51  ;;  %v8114_v51 = vld [vmem:[%s10874_s4 + $0x128] sm:$0xff]  }
 0x2aa   : > { %6620 = vmatprep.mubr.msk.bf16.mxu1 %vm8127_vm2, %v11060_v56  ;;  %7204 = vmatpush3.bf16.msra.mxu1 %v8113_v38  ;;  %v3808_v38 = vsel %vm3775_vm14, %v3805_v43, %v3807_v14 }
 0x2ab   : > { %7197 = vmatprep.subr.bf16.mxu1 %v11060_v56 }
 0x2ad   : > { %7061 = vmatmul.mubr.bf16.gmra.mrb[52].mxu0 %v3804_v37  ;;  %v3809_v37 = vrot.slane %v11209_v49, 3 }
 0x2ae   : > { %7064 = vmatprep.mubr.msk.bf16.mxu0 %vm8127_vm2, %v11060_v56  ;;  %7205 = vmatpush3.bf16.msra.mxu1 %v8114_v51 }
 0x2af   : > { %7198 = vmatprep.subr.bf16.mxu1 %v11060_v56  ;;  %v3810_v51 = vsel %vm3775_vm14, %v3807_v14, %v3809_v37  ;;  %v4149_v14 = vrot.slane %v11181_v54, 4  ;;  %v4152_v54 = vrot.slane %v9362_v17, 3 }
 0x2b1   : > { %6621 = vmatmul.mubr.bf16.gmra.mrb[12].mxu1 %v10072_v23  ;;  %v8116_v23 = vld [vmem:[%s10874_s4 + $0x138] sm:$0xff]  }
 0x2b2   : > { %6624 = vmatprep.mubr.msk.bf16.mxu1 %vm8127_vm2, %v11060_v56  ;;  %7206 = vmatpush3.bf16.msra.mxu1 %v8115_v15 }
 0x2b3   : > { %7199 = vmatprep.subr.bf16.mxu1 %v11060_v56 }
 0x2b5   : > { %7065 = vmatmul.mubr.bf16.gmra.mrb[56].mxu0 %v3806_v57 }
 0x2b6   : > { %7068 = vmatprep.mubr.msk.bf16.mxu0 %vm8127_vm2, %v11060_v56  ;;  %7207 = vmatpush3.bf16.msra.mxu1 %v8116_v23 }
 0x2b9   : > { %6625 = vmatmul.mubr.bf16.gmra.mrb[16].mxu1 %v10083_v5  ;;  %v11210_v5 = vld [vmem:[#allocation61_spill] sm:$0xff] }
 0x2ba   : > { %6628 = vmatprep.mubr.msk.bf16.mxu1 %vm8127_vm2, %v11060_v56  ;;  %v3811_v15 = vrot.slane %v11210_v5, 3 }
 0x2bc   : > { %v3812_v43 = vsel %vm3775_vm14, %v3809_v37, %v3811_v15  ;;  %v4146_v37 = vrot.slane %v11165_v33, 4 }
 0x2bd   : > { %7069 = vmatmul.mubr.bf16.gmra.mrb[60].mxu0 %v3808_v38  ;;  %v11214_v38 = vrot.slane %v11188_v19, 3  ;;  %v4153_v19 = vrot.slane %v11183_v29, 4 }
 0x2be   : > { %7072 = vmatprep.mubr.msk.bf16.mxu0 %vm8127_vm2, %v11060_v56 }
 0x2c1   : > { %6629 = vmatmul.mubr.bf16.gmra.mrb[20].mxu1 %v10094_v27  ;;  %v11211_v27 = vld [vmem:[#allocation41_spill] sm:$0xff] }
 0x2c2   : > { %6632 = vmatprep.mubr.msk.bf16.mxu1 %vm8127_vm2, %v11060_v56  ;;  %v11212_v57 = vrot.slane %v11211_v27, 3 }
 0x2c4   : > { %v3814_v23 = vsel %vm3775_vm14, %v3811_v15, %v11212_v57  ;;  %v4157_v15 = vrot.slane %v11185_v20, 4  ;;  %v4165_v57 = vrot.slane %v9488_v3, 4 }
 0x2c5   : > { %7073 = vmatmul.mubr.bf16.gmra.mrb[64].mxu0 %v3810_v51 }
 0x2c6   : > { %7076 = vmatprep.mubr.msk.bf16.mxu0 %vm8127_vm2, %v11060_v56 }
 0x2c9   : > { %6633 = vmatmul.mubr.bf16.gmra.mrb[24].mxu1 %v10105_v1  ;;  %v11213_v1 = vld [vmem:[#allocation74_spill] sm:$0xff] }
 0x2ca   : > { %6636 = vmatprep.mubr.msk.bf16.mxu1 %vm8127_vm2, %v11060_v56 }
 0x2cd   : > { %7077 = vmatmul.mubr.bf16.gmra.mrb[68].mxu0 %v3812_v43  ;;  %v4161_v43 = vrot.slane %v11186_v42, 4 }
 0x2ce   : > { %7080 = vmatprep.mubr.msk.bf16.mxu0 %vm8127_vm2, %v11060_v56 }
 0x2d1   : > { %6637 = vmatmul.mubr.bf16.gmra.mrb[28].mxu1 %v10120_v62  ;;  %v4148_v62 = vrot.slane %v11171_v63, 3 }
 0x2d2   : > { %6640 = vmatprep.mubr.msk.bf16.mxu1 %vm8127_vm2, %v11060_v56 }
 0x2d3   : > { %v4150_v51 = vor.u32 %v4149_v14, %v4148_v62  ;;  %v4177_v62 = vrot.slane %v9577_v13, 4  ;;  %v4181_v14 = vrot.slane %v9616_v55, 4  ;;  %v4185_v55 = vrot.slane %v9651_v47, 4 }
 0x2d5   : > { %7081 = vmatmul.mubr.bf16.gmra.mrb[72].mxu0 %v3814_v23  ;;  %v4169_v23 = vrot.slane %v11187_v4, 4 }
 0x2d6   : > { %7084 = vmatprep.mubr.msk.bf16.mxu0 %vm8127_vm2, %v11060_v56 }
 0x2d9   : > { %6641 = vmatmul.mubr.bf16.gmra.mrb[32].mxu1 %v10132_v39  ;;  %v4145_v39 = vrot.slane %v11168_v44, 3  ;;  %v4154_v44 = vor.u32 %v4153_v19, %v4152_v54  ;;  %v11216_v54 = vld [vmem:[#allocation83_spill] sm:$0xff] }
 0x2da   : > { %6644 = vmatprep.mubr.msk.bf16.mxu1 %vm8127_vm2, %v11060_v56  ;;  %v4193_v19 = vrot.slane %v11216_v54, 4 }
 0x2db   : > { %v4155_v33 = vsel %vm4144_vm11, %v4150_v51, %v4154_v44 }
 0x2dd   : > { %7085 = vmatmul.mubr.bf16.gmra.mrb[76].mxu0 %v11213_v1  ;;  %v4173_v1 = vrot.slane %v9559_v9, 4 }
 0x2de   : > { %7088 = vmatprep.mubr.msk.bf16.mxu0 %vm8127_vm2, %v11060_v56 }
 0x2e1   : > { %6645 = vmatmul.mubr.bf16.gmra.mrb[36].mxu1 %v10142_v40  ;;  %v4147_v40 = vor.u32 %v4146_v37, %v4145_v39  ;;  %v4188_v37 = vrot.slane %v9673_v11, 3  ;;  %v11217_v11 = vrot.slane %v11202_v53, 2 }
 0x2e2   : > { %6648 = vmatprep.mubr.msk.bf16.mxu1 %vm8127_vm2, %v11060_v56 }
 0x2e3   : > { %v4151_v63 = vsel %vm4144_vm11, %v4147_v40, %v4150_v51  ;;  %v11215_v51 = vld [vmem:[#allocation82_spill] sm:$0xff]  ;;  %v2701_v40 = vrot.slane %v11203_v50, 2  ;;  %v2703_v50 = vrot.slane %v11204_v58, 2  ;;  %v4200_v58 = vrot.slane %v9749_v26, 3 }
 0x2e4   : > { %v4205_v26 = vrot.slane %v9773_v12, 4 }
 0x2e5   : > { %7089 = vmatmul.mubr.bf16.gmra.mrb[80].mxu0 %v11214_v38  ;;  %v2365_v38 = vrot.slane %v9592_v61, 2  ;;  %v2704_v53 = vsel %vm2677_vm0, %v2701_v40, %v2703_v50 }
 0x2e6   : > { %7108 = vmatprep.mubr.msk.bf16.mxu0 %vm8127_vm2, %v11060_v56 }
 0x2e9   : > { %6649 = vmatmul.mubr.bf16.gmra.mrb[40].mxu1 %v10162_v45  ;;  %v4156_v45 = vrot.slane %v9409_v24, 3 }
 0x2ea   : > { %6652 = vmatprep.mubr.msk.bf16.mxu1 %vm8127_vm2, %v11060_v56 }
 0x2eb   : > { %v4158_v17 = vor.u32 %v4157_v15, %v4156_v45  ;;  %v11218_v15 = vld [vmem:[#allocation58_spill] sm:$0xff] }
 0x2ed   : > { %7109 = vmatmul.mubr.bf16.vlgmr.msra.gmra.mrb[0].mxu0 %v4151_v63  ;;  %v4159_v29 = vsel %vm4144_vm11, %v4154_v44, %v4158_v17  ;;  %v4192_v63 = vrot.slane %v9695_v32, 3  ;;  %v2702_v44 = vsel %vm2677_vm0, %v11217_v11, %v2701_v40  ;;  %v4196_v32 = vrot.slane %v9722_v60, 3  ;;  %v11219_v60 = vld [vmem:[#allocation59_spill] sm:$0xff]  ;;  %v11225_v40 = vld [vmem:[#allocation81_spill] sm:$0xff] }
 0x2ee   : > { %7112 = vmatprep.mubr.msk.bf16.mxu0 %vm8127_vm2, %v11060_v56  ;;  %v11226_v11 = vld [vmem:[#allocation79_spill] sm:$0xff] }
 0x2f1   : > { %6653 = vmatmul.mubr.bf16.gmra.mrb[44].mxu1 %v10182_v59  ;;  %v4160_v59 = vrot.slane %v9449_v7, 3 }
 0x2f2   : > { %6656 = vmatprep.mubr.msk.bf16.mxu1 %vm8127_vm2, %v11060_v56 }
 0x2f3   : > { %v4162_v24 = vor.u32 %v4161_v43, %v4160_v59  ;;  %v2705_v43 = vrot.slane %v11205_v41, 2  ;;  %v4204_v41 = vrot.slane %v9776_v16, 3  ;;  %v11221_v16 = vld [vmem:[#allocation85_spill] sm:$0xff] }
 0x2f5   : > { %7113 = vmatmul.mubr.bf16.gmra.mrb[4].mxu0 %v4155_v33  ;;  %v4163_v20 = vsel %vm4144_vm11, %v4158_v17, %v4162_v24  ;;  %v4194_v33 = vor.u32 %v4193_v19, %v4192_v63  ;;  %v4197_v17 = vrot.slane %v11218_v15, 4 }
 0x2f6   : > { %7116 = vmatprep.mubr.msk.bf16.mxu0 %vm8127_vm2, %v11060_v56 }
 0x2f9   : > { %6657 = vmatmul.mubr.bf16.gmra.mrb[48].mxu1 %v10202_v36  ;;  %v4164_v36 = vrot.slane %v9492_v31, 3 }
 0x2fa   : > { %6660 = vmatprep.mubr.msk.bf16.mxu1 %vm8127_vm2, %v11060_v56 }
 0x2fb   : > { %v4166_v7 = vor.u32 %v4165_v57, %v4164_v36 }
 0x2fd   : > { %7117 = vmatmul.mubr.bf16.gmra.mrb[8].mxu0 %v4159_v29  ;;  %v4167_v42 = vsel %vm4144_vm11, %v4162_v24, %v4166_v7  ;;  %v4198_v29 = vor.u32 %v4197_v17, %v4196_v32  ;;  %v4201_v24 = vrot.slane %v11219_v60, 4 }
 0x2fe   : > { %7120 = vmatprep.mubr.msk.bf16.mxu0 %vm8127_vm2, %v11060_v56 }
 0x2ff   : > { %v4199_v59 = vsel %vm4144_vm11, %v4194_v33, %v4198_v29  ;;  %v4202_v36 = vor.u32 %v4201_v24, %v4200_v58 }
 0x301   : > { %6661 = vmatmul.mubr.bf16.gmra.mrb[52].mxu1 %v10222_v52  ;;  %v4168_v52 = vrot.slane %v9534_v6, 3  ;;  %v4203_v57 = vsel %vm4144_vm11, %v4198_v29, %v4202_v36 }
 0x302   : > { %6664 = vmatprep.mubr.msk.bf16.mxu1 %vm8127_vm2, %v11060_v56 }
 0x303   : > { %v4170_v3 = vor.u32 %v4169_v23, %v4168_v52  ;;  %v4206_v52 = vor.u32 %v4205_v26, %v4204_v41 }
 0x305   : > { %7121 = vmatmul.mubr.bf16.gmra.mrb[12].mxu0 %v4163_v20  ;;  %v4171_v31 = vsel %vm4144_vm11, %v4166_v7, %v4170_v3  ;;  %v2706_v20 = vsel %vm2677_vm0, %v2703_v50, %v2705_v43  ;;  %v2707_v7 = vrot.slane %v11206_v25, 2  ;;  %v4207_v23 = vsel %vm4144_vm11, %v4202_v36, %v4206_v52  ;;  %v11220_v25 = vld [vmem:[#allocation86_spill] sm:$0xff] }
 0x306   : > { %7124 = vmatprep.mubr.msk.bf16.mxu0 %vm8127_vm2, %v11060_v56 }
 0x309   : > { %6665 = vmatmul.mubr.bf16.gmra.mrb[56].mxu1 %v10234_v35  ;;  %v4172_v35 = vrot.slane %v9562_v21, 3 }
 0x30a   : > { %6668 = vmatprep.mubr.msk.bf16.mxu1 %vm8127_vm2, %v11060_v56 }
 0x30b   : > { %v4174_v6 = vor.u32 %v4173_v1, %v4172_v35  ;;  %v4209_v35 = vrot.slane %v11221_v16, 4 }
 0x30d   : > { %7125 = vmatmul.mubr.bf16.gmra.mrb[16].mxu0 %v4167_v42  ;;  %v4175_v4 = vsel %vm4144_vm11, %v4170_v3, %v4174_v6  ;;  %v2708_v42 = vsel %vm2677_vm0, %v2705_v43, %v2707_v7  ;;  %v2709_v3 = vrot.slane %v11207_v0, 2 }
 0x30e   : > { %7128 = vmatprep.mubr.msk.bf16.mxu0 %vm8127_vm2, %v11060_v56 }
 0x30f   : > { %v2710_v12 = vsel %vm2677_vm0, %v2707_v7, %v2709_v3 }
 0x311   : > { %6669 = vmatmul.mubr.bf16.gmra.mrb[60].mxu1 %v10246_v28  ;;  %v4176_v28 = vrot.slane %v9580_v48, 3  ;;  %v2362_v48 = vrot.slane %v9589_v8, 1 }
 0x312   : > { %6672 = vmatprep.mubr.msk.bf16.mxu1 %vm8127_vm2, %v11060_v56 }
 0x313   : > { %v4178_v9 = vor.u32 %v4177_v62, %v4176_v28  ;;  %v2366_v39 = vor.u32 %v2365_v38, %v2362_v48  ;;  %v11222_v62 = vld [vmem:[#allocation77_spill] sm:$0xff]  ;;  %v2715_v38 = vrot.slane %v11210_v5, 2 }
 0x315   : > { %7129 = vmatmul.mubr.bf16.gmra.mrb[20].mxu0 %v4171_v31  ;;  %v4179_v21 = vsel %vm4144_vm11, %v4174_v6, %v4178_v9  ;;  %v2367_v8 = vsel %vm1948_vm6, %v10279_v10, %v2366_v39  ;;  %v4208_v31 = vrot.slane %v11220_v25, 3 }
 0x316   : > { %7132 = vmatprep.mubr.msk.bf16.mxu0 %vm8127_vm2, %v11060_v56 }
 0x317   : > { %v4210_v1 = vor.u32 %v4209_v35, %v4208_v31 }
 0x319   : > { %6673 = vmatmul.mubr.bf16.gmra.mrb[64].mxu1 %v10258_v30  ;;  %v4180_v30 = vrot.slane %v9619_v34, 3  ;;  %v4184_v34 = vrot.slane %v9654_v46, 3  ;;  %v4189_v46 = vrot.slane %v11215_v51, 4  ;;  %v4211_v6 = vsel %vm4144_vm11, %v4206_v52, %v4210_v1 }
 0x31a   : > { %6676 = vmatprep.mubr.msk.bf16.mxu1 %vm8127_vm2, %v11060_v56 }
 0x31b   : > { %v4182_v13 = vor.u32 %v4181_v14, %v4180_v30  ;;  %v4186_v61 = vor.u32 %v4185_v55, %v4184_v34  ;;  %v4190_v47 = vor.u32 %v4189_v46, %v4188_v37 }
 0x31d   : > { %7133 = vmatmul.mubr.bf16.gmra.mrb[24].mxu0 %v4175_v4  ;;  %v4191_v10 = vsel %vm4144_vm11, %v4186_v61, %v4190_v47  ;;  %v4195_v45 = vsel %vm4144_vm11, %v4190_v47, %v4194_v33  ;;  %v2711_v4 = vrot.slane %v11208_v18, 2 }
 0x31e   : > { %7136 = vmatprep.mubr.msk.bf16.mxu0 %vm8127_vm2, %v11060_v56 }
 0x31f   : > { %v2712_v0 = vsel %vm2677_vm0, %v2709_v3, %v2711_v4 }
 0x321   : > { %6677 = vmatmul.mubr.bf16.gmra.mrb[68].mxu1 %v10270_v2  ;;  %v4183_v2 = vsel %vm4144_vm11, %v4178_v9, %v4182_v13  ;;  %v4215_v9 = vsel %vm4144_vm11, %v4210_v1, %v11222_v62 }
 0x322   : > { %6680 = vmatprep.mubr.msk.bf16.mxu1 %vm8127_vm2, %v11060_v56 }
 0x325   : > { %7137 = vmatmul.mubr.bf16.gmra.mrb[28].mxu0 %v4179_v21  ;;  %v2713_v21 = vrot.slane %v11209_v49, 2  ;;  %v11223_v49 = vld [vmem:[#allocation78_spill] sm:$0xff] }
 0x326   : > { %7140 = vmatprep.mubr.msk.bf16.mxu0 %vm8127_vm2, %v11060_v56 }
 0x327   : > { %v2716_v55 = vsel %vm2677_vm0, %v2713_v21, %v2715_v38 }
 0x329   : > { %6681 = vmatmul.mubr.bf16.gmra.mrb[72].mxu1 %v10285_v22  ;;  %v4187_v22 = vsel %vm4144_vm11, %v4182_v13, %v4186_v61  ;;  %v2714_v13 = vsel %vm2677_vm0, %v2711_v4, %v2713_v21  ;;  %v2717_v61 = vrot.slane %v11211_v27, 2 }
 0x32a   : > { %6684 = vmatprep.mubr.msk.bf16.mxu1 %vm8127_vm2, %v11060_v56 }
 0x32b   : > { %v2718_v46 = vsel %vm2677_vm0, %v2715_v38, %v2717_v61 }
 0x32d   : > { %7141 = vmatmul.mubr.bf16.gmra.mrb[32].mxu0 %v4183_v2 }
 0x32e   : > { %7144 = vmatprep.mubr.msk.bf16.mxu0 %vm8127_vm2, %v11060_v56 }
 0x331   : > { %6685 = vmatmul.mubr.bf16.gmra.mrb[76].mxu1 %v2367_v8 }
 0x332   : > { %6688 = vmatprep.mubr.msk.bf16.mxu1 %vm8127_vm2, %v11060_v56 }
 0x335   : > { %7145 = vmatmul.mubr.bf16.gmra.mrb[36].mxu0 %v4187_v22  ;;  %v11224_v22 = vld [vmem:[#allocation80_spill] sm:$0xff] }
 0x336   : > { %7148 = vmatprep.mubr.msk.bf16.mxu0 %vm8127_vm2, %v11060_v56 }
 0x339   : > { %6689 = vmatmul.mubr.bf16.gmra.mrb[80].mxu1 %v2366_v39 }
 0x33a   : > { %6752 = vmatprep.mubr.msk.bf16.mxu1 %vm8127_vm2, %v11060_v56 }
 0x33d   : > { %7149 = vmatmul.mubr.bf16.gmra.mrb[40].mxu0 %v4191_v10 }
 0x33e   : > { %7152 = vmatprep.mubr.msk.bf16.mxu0 %vm8127_vm2, %v11060_v56 }
 0x341   : > { %6753 = vmatmul.mubr.bf16.vlgmr.msra.gmra.mrb[44].mxu1 %v2702_v44 }
 0x342   : > { %6756 = vmatprep.mubr.msk.bf16.mxu1 %vm8127_vm2, %v11060_v56 }
 0x345   : > { %7153 = vmatmul.mubr.bf16.gmra.mrb[44].mxu0 %v4195_v45 }
 0x346   : > { %7156 = vmatprep.mubr.msk.bf16.mxu0 %vm8127_vm2, %v11060_v56 }
 0x349   : > { %6757 = vmatmul.mubr.bf16.gmra.mrb[48].mxu1 %v2704_v53 }
 0x34a   : > { %6760 = vmatprep.mubr.msk.bf16.mxu1 %vm8127_vm2, %v11060_v56 }
 0x34d   : > { %7157 = vmatmul.mubr.bf16.gmra.mrb[48].mxu0 %v4199_v59 }
 0x34e   : > { %7160 = vmatprep.mubr.msk.bf16.mxu0 %vm8127_vm2, %v11060_v56 }
 0x351   : > { %6761 = vmatmul.mubr.bf16.gmra.mrb[52].mxu1 %v2706_v20 }
 0x352   : > { %6764 = vmatprep.mubr.msk.bf16.mxu1 %vm8127_vm2, %v11060_v56 }
 0x355   : > { %7161 = vmatmul.mubr.bf16.gmra.mrb[52].mxu0 %v4203_v57 }
 0x356   : > { %7164 = vmatprep.mubr.msk.bf16.mxu0 %vm8127_vm2, %v11060_v56 }
 0x359   : > { %6765 = vmatmul.mubr.bf16.gmra.mrb[56].mxu1 %v2708_v42 }
 0x35a   : > { %6768 = vmatprep.mubr.msk.bf16.mxu1 %vm8127_vm2, %v11060_v56 }
 0x35d   : > { %7165 = vmatmul.mubr.bf16.gmra.mrb[56].mxu0 %v4207_v23 }
 0x35e   : > { %7168 = vmatprep.mubr.msk.bf16.mxu0 %vm8127_vm2, %v11060_v56 }
 0x361   : > { %6769 = vmatmul.mubr.bf16.gmra.mrb[60].mxu1 %v2710_v12 }
 0x362   : > { %6772 = vmatprep.mubr.msk.bf16.mxu1 %vm8127_vm2, %v11060_v56 }
 0x365   : > { %7169 = vmatmul.mubr.bf16.gmra.mrb[60].mxu0 %v4211_v6 }
 0x366   : > { %7172 = vmatprep.mubr.msk.bf16.mxu0 %vm8127_vm2, %v11060_v56 }
 0x369   : > { %6773 = vmatmul.mubr.bf16.gmra.mrb[64].mxu1 %v2712_v0 }
 0x36a   : > { %6776 = vmatprep.mubr.msk.bf16.mxu1 %vm8127_vm2, %v11060_v56 }
 0x36c   : > { %v10545_v28 = vpop.f32.mrb[0].mxu1 }
 0x36d   : > { %v6610_v30 = vpop.f32.mrb[1].mxu1  ;;  %7173 = vmatmul.mubr.bf16.gmra.mrb[64].mxu0 %v4215_v9 }
 0x36e   : > { %v10550_v18 = vpop.f32.mrb[2].mxu1  ;;  %7176 = vmatprep.mubr.msk.bf16.mxu0 %vm8127_vm2, %v11060_v56 }
 0x36f   : > { %v6611_v14 = vpop.f32.mrb[3].mxu1 }
 0x371   : > { %6777 = vmatmul.mubr.bf16.gmra.mrb[68].mxu1 %v2714_v13 }
 0x372   : > { %6780 = vmatprep.mubr.msk.bf16.mxu1 %vm8127_vm2, %v11060_v56 }
 0x374   : > { %v10557_v48 = vpop.f32.mrb[4].mxu1 }
 0x375   : > { %v6614_v2 = vpop.f32.mrb[5].mxu1  ;;  %7177 = vmatmul.mubr.bf16.gmra.mrb[68].mxu0 %v11223_v49 }
 0x376   : > { %v10561_v39 = vpop.f32.mrb[6].mxu1  ;;  %7180 = vmatprep.mubr.msk.bf16.mxu0 %vm8127_vm2, %v11060_v56 }
 0x377   : > { %v6615_v34 = vpop.f32.mrb[7].mxu1 }
 0x379   : > { %6781 = vmatmul.mubr.bf16.gmra.mrb[72].mxu1 %v2716_v55 }
 0x37a   : > { %6784 = vmatprep.mubr.msk.bf16.mxu1 %vm8127_vm2, %v11060_v56 }
 0x37c   : > { %v10568_v8 = vpop.f32.mrb[8].mxu1 }
 0x37d   : > { %v6618_v5 = vpop.f32.mrb[9].mxu1  ;;  %7181 = vmatmul.mubr.bf16.gmra.mrb[72].mxu0 %v11224_v22 }
 0x37e   : > { %v10572_v37 = vpop.f32.mrb[10].mxu1  ;;  %7184 = vmatprep.mubr.msk.bf16.mxu0 %vm8127_vm2, %v11060_v56 }
 0x37f   : > { %v6619_v51 = vpop.f32.mrb[11].mxu1 }
 0x381   : > { %6785 = vmatmul.mubr.bf16.gmra.mrb[76].mxu1 %v2718_v46 }
 0x382   : > { %6788 = vmatprep.mubr.msk.bf16.mxu1 %vm8127_vm2, %v11060_v56 }
 0x384   : > { %v10579_v47 = vpop.f32.mrb[12].mxu1 }
 0x385   : > { %v6622_v10 = vpop.f32.mrb[13].mxu1  ;;  %7185 = vmatmul.mubr.bf16.gmra.mrb[76].mxu0 %v11225_v40 }
 0x386   : > { %v10582_v27 = vpop.f32.mrb[14].mxu1  ;;  %7188 = vmatprep.mubr.msk.bf16.mxu0 %vm8127_vm2, %v11060_v56  ;;  %vm4579_vm2 = vcmask 1043456  }
 0x387   : > { %v6623_v63 = vpop.f32.mrb[15].mxu1 }
 0x389   : > { %6789 = vmatmul.mubr.bf16.gmra.mrb[80].mxu1 %v2717_v61 }
 0x38c   : > { %v10586_v54 = vpop.f32.mrb[16].mxu1 }
 0x38d   : > { %v6626_v19 = vpop.f32.mrb[17].mxu1  ;;  %7189 = vmatmul.mubr.bf16.gmra.mrb[80].mxu0 %v11226_v11 }
 0x38e   : > { %v10589_v44 = vpop.f32.mrb[18].mxu1 }
 0x38f   : > { %v6627_v33 = vpop.f32.mrb[19].mxu1 }
 0x394   : > { %v10591_v45 = vpop.f32.mrb[20].mxu1 }
 0x395   : > { %v6630_v50 = vpop.f32.mrb[21].mxu1 }
 0x396   : > { %v10593_v32 = vpop.f32.mrb[22].mxu1 }
 0x397   : > { %v6631_v15 = vpop.f32.mrb[23].mxu1 }
 0x39c   : > { %v10595_v17 = vpop.f32.mrb[24].mxu1 }
 0x39d   : > { %v6634_v53 = vpop.f32.mrb[25].mxu1 }
 0x39e   : > { %v10597_v56 = vpop.f32.mrb[26].mxu1 }
 0x39f   : > { %v6635_v29 = vpop.f32.mrb[27].mxu1 }
 0x3a4   : > { %v10599_v59 = vpop.f32.mrb[28].mxu1 }
 0x3a5   : > { %v6638_v43 = vpop.f32.mrb[29].mxu1 }
 0x3a6   : > { %v10601_v58 = vpop.f32.mrb[30].mxu1 }
 0x3a7   : > { %v6639_v60 = vpop.f32.mrb[31].mxu1 }
 0x3ac   : > { %v10603_v24 = vpop.f32.mrb[32].mxu1 }
 0x3ad   : > { %v6642_v20 = vpop.f32.mrb[33].mxu1 }
 0x3ae   : > { %v10605_v36 = vpop.f32.mrb[34].mxu1 }
 0x3af   : > { %v6643_v57 = vpop.f32.mrb[35].mxu1 }
 0x3b4   : > { %v10607_v7 = vpop.f32.mrb[36].mxu1 }
 0x3b5   : > { %v6646_v41 = vpop.f32.mrb[37].mxu1 }
 0x3b6   : > { %v10609_v26 = vpop.f32.mrb[38].mxu1 }
 0x3b7   : > { %v6647_v42 = vpop.f32.mrb[39].mxu1 }
 0x3bc   : > { %v10611_v52 = vpop.f32.mrb[40].mxu1 }
 0x3bd   : > { %v6650_v23 = vpop.f32.mrb[41].mxu1 }
 0x3be   : > { %v10613_v3 = vpop.f32.mrb[42].mxu1 }
 0x3bf   : > { %v6651_v25 = vpop.f32.mrb[43].mxu1 }
 0x3c0   : > { %v4331_v31 = vpop.f32.mrb[0].mxu0 }
 0x3c1   : > { %v7208_v16 = vadd.f32 %v4331_v31, %v10545_v28  ;;  %v7110_v35 = vpop.f32.mrb[1].mxu0 }
 0x3c2   : > { %v4334_v12 = vpop.f32.mrb[2].mxu0 }
 0x3c3   : > { %v4580_v1 = vrot.slane %v7208_v16, 4  ;;  %v7209_v6 = vadd.f32 %v4334_v12, %v10550_v18  ;;  %v7111_v4 = vpop.f32.mrb[3].mxu0 }
 0x3c5   : > { %v4702_v62 = vsel %vm1016_vm3, %v4580_v1, 0.0  ;;  %v4581_v9 = vrot.slane %v7209_v6, 4 }
 0x3c6   : > { %v5761_v21 = vpack.c.bf16 %v4702_v62, %v4702_v62  ;;  %v5170_v30 = vmul.f32 %v4702_v62, %v4702_v62  ;;  %v5000_v13 = vrot.slane %v4702_v62, 4 }
 0x3c7   : > { %v4582_v14 = vsel %vm4579_vm2, %v4580_v1, %v4581_v9 }
 0x3c8   : > { %4913 = vst [vmem:[%s8282_s8 + $0x10] sm:$0xc] %v5761_v21  ;;  %v4703_v28 = vsel %vm1017_vm5, %v4582_v14, 0.0  ;;  %v4339_v2 = vpop.f32.mrb[4].mxu0  ;;  %v5252_v5 = vrot.slane %v5170_v30, 4 }
 0x3c9   : > { %v5762_v49 = vpack.c.bf16 %v4703_v28, %v4703_v28  ;;  %v5001_v34 = vrot.slane %v4703_v28, 4  ;;  %v5171_v18 = vmul.f32 %v4703_v28, %v4703_v28  ;;  %v7210_v55 = vadd.f32 %v4339_v2, %v10557_v48  ;;  %v7114_v61 = vpop.f32.mrb[5].mxu0 }
 0x3ca   : > { %v4342_v22 = vpop.f32.mrb[6].mxu0 }
 0x3cb   : > { %4914 = vst [vmem:[%s8282_s8 + $0x14] sm:$0xf] %v5762_v49  ;;  %v5002_v51 = vsel %vm4579_vm2, %v5000_v13, %v5001_v34  ;;  %v5253_v46 = vrot.slane %v5171_v18, 4  ;;  %v4583_v10 = vrot.slane %v7210_v55, 4  ;;  %v7211_v40 = vadd.f32 %v4342_v22, %v10561_v39  ;;  %v7115_v63 = vpop.f32.mrb[7].mxu0 }
 0x3cd   : > { %v5254_v19 = vsel %vm4579_vm2, %v5252_v5, %v5253_v46  ;;  %v4584_v11 = vsel %vm4579_vm2, %v4581_v9, %v4583_v10  ;;  %v4585_v33 = vrot.slane %v7211_v40, 4 }
 0x3ce   : > { %v4704_v15 = vsel %vm1018_vm1, %v4584_v11, 0.0 }
 0x3cf   : > { %v5003_v48 = vrot.slane %v4704_v15, 4  ;;  %v5172_v53 = vmul.f32 %v4704_v15, %v4704_v15  ;;  %v4586_v29 = vsel %vm4579_vm2, %v4583_v10, %v4585_v33 }
 0x3d0   : > { %v4705_v60 = vsel %vm1019_vm4, %v4586_v29, 0.0  ;;  %v4347_v20 = vpop.f32.mrb[8].mxu0 }
 0x3d1   : > { %v5004_v39 = vsel %vm4579_vm2, %v5001_v34, %v5003_v48  ;;  %v5255_v57 = vrot.slane %v5172_v53, 4  ;;  %v5897_v41 = vpack.c.bf16 %v4705_v60, %v4704_v15  ;;  %v5005_v42 = vrot.slane %v4705_v60, 4  ;;  %v7118_v23 = vpop.f32.mrb[9].mxu0 }
 0x3d2   : > { %v5122_v25 = vadd.f32 %v5004_v39, %v5002_v51  ;;  %v5173_v31 = vmul.f32 %v4705_v60, %v4705_v60  ;;  %v7212_v16 = vadd.f32 %v4347_v20, %v10568_v8  ;;  %v4350_v35 = vpop.f32.mrb[10].mxu0  ;;  %v11234_v20 = vld [vmem:[#allocation11_spill] sm:$0xff] }
 0x3d3   : > { %v5256_v12 = vsel %vm4579_vm2, %v5253_v46, %v5255_v57  ;;  %6012 = vst [vmem:[%s8282_s8 + $0x18] sm:$0xff] %v5897_v41   ;;  %v5006_v1 = vsel %vm4579_vm2, %v5003_v48, %v5005_v42  ;;  %v7213_v6 = vadd.f32 %v4350_v35, %v10572_v37  ;;  %v7119_v4 = vpop.f32.mrb[11].mxu0  ;;  %v11232_v37 = vld [vmem:[#allocation7_spill] sm:$0xff]  ;;  %vm11235_vm1 = vcmp.eq.s32.totalorder %v11234_v20, 1  ;;  %v11236_v35 = vld [vmem:[#allocation10_spill] sm:$0xff] }
 0x3d4   : > { %v5374_v0 = vadd.f32 %v5256_v12, %v5254_v19  ;;  %v5123_v62 = vadd.f32 %v5122_v25, %v5006_v1  ;;  %v5257_v9 = vrot.slane %v5173_v31, 4  ;;  %v4587_v21 = vrot.slane %v7212_v16, 4 }
 0x3d5   : > { %v4589_v30 = vrot.slane %v7213_v6, 4  ;;  %vm11233_vm0 = vcmp.eq.s32.totalorder %v11232_v37, 1  ;;  %vm11237_vm3 = vcmp.eq.s32.totalorder %v11236_v35, 1 }
 0x3d6   : > { %v5258_v14 = vsel %vm4579_vm2, %v5255_v57, %v5257_v9  ;;  %v4588_v13 = vsel %vm4579_vm2, %v4585_v33, %v4587_v21 }
 0x3d7   : > { %v5375_v38 = vadd.f32 %v5374_v0, %v5258_v14  ;;  %v4706_v28 = vsel %vm1020_vm10, %v4588_v13, 0.0  ;;  %v4590_v2 = vsel %vm4579_vm2, %v4587_v21, %v4589_v30 }
 0x3d8   : > { %v5007_v49 = vrot.slane %v4706_v28, 4  ;;  %v5174_v34 = vmul.f32 %v4706_v28, %v4706_v28  ;;  %v4707_v18 = vsel %vm11233_vm0, %v4590_v2, 0.0  ;;  %v4355_v55 = vpop.f32.mrb[12].mxu0 }
 0x3d9   : > { %v5902_v61 = vpack.c.bf16 %v4707_v18, %v4706_v28  ;;  %v5009_v5 = vrot.slane %v4707_v18, 4  ;;  %v5175_v22 = vmul.f32 %v4707_v18, %v4707_v18  ;;  %v7214_v51 = vadd.f32 %v4355_v55, %v10579_v47  ;;  %v7122_v46 = vpop.f32.mrb[13].mxu0  ;;  %v11238_v18 = vld [vmem:[#allocation13_spill] sm:$0xff] }
 0x3da   : > { %v5008_v10 = vsel %vm4579_vm2, %v5005_v42, %v5007_v49  ;;  %v5259_v40 = vrot.slane %v5174_v34, 4  ;;  %v4358_v63 = vpop.f32.mrb[14].mxu0  ;;  %vm11239_vm4 = vcmp.eq.s32.totalorder %v11238_v18, 1 }
 0x3db   : > { %v5124_v19 = vadd.f32 %v5123_v62, %v5008_v10  ;;  %6013 = vst [vmem:[%s8282_s8 + $0x20] sm:$0xff] %v5902_v61   ;;  %v5010_v11 = vsel %vm4579_vm2, %v5007_v49, %v5009_v5  ;;  %v5261_v33 = vrot.slane %v5175_v22, 4  ;;  %v4591_v50 = vrot.slane %v7214_v51, 4  ;;  %v7123_v15 = vpop.f32.mrb[15].mxu0  ;;  %v11240_v51 = vld [vmem:[#allocation12_spill] sm:$0xff] }
 0x3dc   : > { %v5260_v48 = vsel %vm4579_vm2, %v5257_v9, %v5259_v40  ;;  %v7215_v53 = vadd.f32 %v4358_v63, %v10582_v27  ;;  %vm11241_vm5 = vcmp.eq.s32.totalorder %v11240_v51, 1 }
 0x3dd   : > { %v5376_v29 = vadd.f32 %v5375_v38, %v5260_v48  ;;  %v5125_v43 = vadd.f32 %v5124_v19, %v5010_v11  ;;  %v5262_v47 = vsel %vm4579_vm2, %v5259_v40, %v5261_v33  ;;  %v4592_v60 = vsel %vm4579_vm2, %v4589_v30, %v4591_v50 }
 0x3de   : > { %v4708_v39 = vsel %vm11235_vm1, %v4592_v60, 0.0  ;;  %v4593_v57 = vrot.slane %v7215_v53, 4 }
 0x3df   : > { %v5377_v41 = vadd.f32 %v5376_v29, %v5262_v47  ;;  %v5011_v42 = vrot.slane %v4708_v39, 4  ;;  %v5176_v23 = vmul.f32 %v4708_v39, %v4708_v39 }
 0x3e0   : > { %v4594_v25 = vsel %vm4579_vm2, %v4591_v50, %v4593_v57  ;;  %v4363_v31 = vpop.f32.mrb[16].mxu0 }
 0x3e1   : > { %v5012_v16 = vsel %vm4579_vm2, %v5009_v5, %v5011_v42  ;;  %v5263_v27 = vrot.slane %v5176_v23, 4  ;;  %v4709_v12 = vsel %vm11237_vm3, %v4594_v25, 0.0  ;;  %v7216_v1 = vadd.f32 %v4363_v31, %v10586_v54  ;;  %v7126_v6 = vpop.f32.mrb[17].mxu0 }
 0x3e2   : > { %v5126_v4 = vadd.f32 %v5125_v43, %v5012_v16  ;;  %v5907_v0 = vpack.c.bf16 %v4709_v12, %v4708_v39  ;;  %v5013_v62 = vrot.slane %v4709_v12, 4  ;;  %v5177_v9 = vmul.f32 %v4709_v12, %v4709_v12  ;;  %v4366_v21 = vpop.f32.mrb[18].mxu0 }
 0x3e3   : > { %v5264_v30 = vsel %vm4579_vm2, %v5261_v33, %v5263_v27  ;;  %v4595_v14 = vrot.slane %v7216_v1, 4  ;;  %v7217_v13 = vadd.f32 %v4366_v21, %v10589_v44  ;;  %v7127_v38 = vpop.f32.mrb[19].mxu0 }
 0x3e4   : > { %v5378_v8 = vadd.f32 %v5377_v41, %v5264_v30  ;;  %6014 = vst [vmem:[%s8282_s8 + $0x28] sm:$0xff] %v5907_v0   ;;  %v5014_v28 = vsel %vm4579_vm2, %v5011_v42, %v5013_v62  ;;  %v5265_v2 = vrot.slane %v5177_v9, 4 }
 0x3e5   : > { %v5127_v49 = vadd.f32 %v5126_v4, %v5014_v28  ;;  %v4596_v54 = vsel %vm4579_vm2, %v4593_v57, %v4595_v14  ;;  %v4597_v34 = vrot.slane %v7217_v13, 4 }
 0x3e6   : > { %v5266_v37 = vsel %vm4579_vm2, %v5263_v27, %v5265_v2  ;;  %v4710_v55 = vsel %vm11239_vm4, %v4596_v54, 0.0 }
 0x3e7   : > { %v5379_v61 = vadd.f32 %v5378_v8, %v5266_v37  ;;  %v5015_v5 = vrot.slane %v4710_v55, 4  ;;  %v5178_v22 = vmul.f32 %v4710_v55, %v4710_v55  ;;  %v4598_v44 = vsel %vm4579_vm2, %v4595_v14, %v4597_v34 }
 0x3e8   : > { %v4711_v46 = vsel %vm11241_vm5, %v4598_v44, 0.0  ;;  %v4371_v10 = vpop.f32.mrb[20].mxu0 }
 0x3e9   : > { %v5016_v40 = vsel %vm4579_vm2, %v5013_v62, %v5015_v5  ;;  %v5267_v63 = vrot.slane %v5178_v22, 4  ;;  %v5912_v19 = vpack.c.bf16 %v4711_v46, %v4710_v55  ;;  %v5017_v11 = vrot.slane %v4711_v46, 4  ;;  %v7130_v33 = vpop.f32.mrb[21].mxu0 }
 0x3ea   : > { %v5128_v50 = vadd.f32 %v5127_v49, %v5016_v40  ;;  %v5179_v15 = vmul.f32 %v4711_v46, %v4711_v46  ;;  %v7218_v48 = vadd.f32 %v4371_v10, %v10591_v45  ;;  %v4374_v53 = vpop.f32.mrb[22].mxu0  ;;  %v11242_v45 = vld [vmem:[#allocation16_spill] sm:$0xff] }
 0x3eb   : > { %v5268_v29 = vsel %vm4579_vm2, %v5265_v2, %v5267_v63  ;;  %6015 = vst [vmem:[%s8282_s8 + $0x30] sm:$0xff] %v5912_v19   ;;  %v5018_v43 = vsel %vm4579_vm2, %v5015_v5, %v5017_v11  ;;  %v7219_v47 = vadd.f32 %v4374_v53, %v10593_v32  ;;  %v7131_v60 = vpop.f32.mrb[23].mxu0  ;;  %vm11243_vm10 = vcmp.eq.s32.totalorder %v11242_v45, 1  ;;  %v11244_v32 = vld [vmem:[#allocation15_spill] sm:$0xff]  ;;  %v11248_v19 = vld [vmem:[#allocation17_spill] sm:$0xff] }
 0x3ec   : > { %v5380_v20 = vadd.f32 %v5379_v61, %v5268_v29  ;;  %v5129_v39 = vadd.f32 %v5128_v50, %v5018_v43  ;;  %v5269_v57 = vrot.slane %v5179_v15, 4  ;;  %v4599_v41 = vrot.slane %v7218_v48, 4  ;;  %v11246_v61 = vld [vmem:[#allocation18_spill] sm:$0xff]  ;;  %v11250_v45 = vld [vmem:[#allocation21_spill] sm:$0xff] }
 0x3ed   : > { %v4601_v42 = vrot.slane %v7219_v47, 4  ;;  %vm11245_vm11 = vcmp.eq.s32.totalorder %v11244_v32, 1  ;;  %vm11247_vm15 = vcmp.eq.s32.totalorder %v11246_v61, 1  ;;  %vm11249_vm7 = vcmp.eq.s32.totalorder %v11248_v19, 1  ;;  %v11252_v32 = vld [vmem:[#allocation20_spill] sm:$0xff] }
 0x3ee   : > { %v5270_v23 = vsel %vm4579_vm2, %v5267_v63, %v5269_v57  ;;  %v4600_v25 = vsel %vm4579_vm2, %v4597_v34, %v4599_v41  ;;  %vm11251_vm14 = vcmp.eq.s32.totalorder %v11250_v45, 1  ;;  %vm11253_vm6 = vcmp.eq.s32.totalorder %v11252_v32, 1 }
 0x3ef   : > { %v5381_v31 = vadd.f32 %v5380_v20, %v5270_v23  ;;  %v4712_v16 = vsel %vm11243_vm10, %v4600_v25, 0.0  ;;  %v4602_v27 = vsel %vm4579_vm2, %v4599_v41, %v4601_v42 }
 0x3f0   : > { %v5019_v35 = vrot.slane %v4712_v16, 4  ;;  %v5180_v12 = vmul.f32 %v4712_v16, %v4712_v16  ;;  %v4713_v1 = vsel %vm11245_vm11, %v4602_v27, 0.0  ;;  %v4379_v6 = vpop.f32.mrb[24].mxu0 }
 0x3f1   : > { %v5917_v4 = vpack.c.bf16 %v4713_v1, %v4712_v16  ;;  %v5021_v0 = vrot.slane %v4713_v1, 4  ;;  %v5181_v62 = vmul.f32 %v4713_v1, %v4713_v1  ;;  %v7220_v9 = vadd.f32 %v4379_v6, %v10595_v17  ;;  %v7134_v21 = vpop.f32.mrb[25].mxu0 }
 0x3f2   : > { %v5020_v30 = vsel %vm4579_vm2, %v5017_v11, %v5019_v35  ;;  %v5271_v14 = vrot.slane %v5180_v12, 4  ;;  %v4382_v13 = vpop.f32.mrb[26].mxu0 }
 0x3f3   : > { %v5130_v38 = vadd.f32 %v5129_v39, %v5020_v30  ;;  %6016 = vst [vmem:[%s8282_s8 + $0x38] sm:$0xff] %v5917_v4   ;;  %v5022_v8 = vsel %vm4579_vm2, %v5019_v35, %v5021_v0  ;;  %v5273_v28 = vrot.slane %v5181_v62, 4  ;;  %v4603_v2 = vrot.slane %v7220_v9, 4  ;;  %v7135_v49 = vpop.f32.mrb[27].mxu0 }
 0x3f4   : > { %v5272_v54 = vsel %vm4579_vm2, %v5269_v57, %v5271_v14  ;;  %v7221_v34 = vadd.f32 %v4382_v13, %v10597_v56 }
 0x3f5   : > { %v5382_v37 = vadd.f32 %v5381_v31, %v5272_v54  ;;  %v5131_v18 = vadd.f32 %v5130_v38, %v5022_v8  ;;  %v5274_v17 = vsel %vm4579_vm2, %v5271_v14, %v5273_v28  ;;  %v4604_v55 = vsel %vm4579_vm2, %v4601_v42, %v4603_v2 }
 0x3f6   : > { %v4714_v5 = vsel %vm11247_vm15, %v4604_v55, 0.0  ;;  %v4605_v22 = vrot.slane %v7221_v34, 4 }
 0x3f7   : > { %v5383_v44 = vadd.f32 %v5382_v37, %v5274_v17  ;;  %v5023_v51 = vrot.slane %v4714_v5, 4  ;;  %v5182_v46 = vmul.f32 %v4714_v5, %v4714_v5 }
 0x3f8   : > { %v4606_v10 = vsel %vm4579_vm2, %v4603_v2, %v4605_v22  ;;  %v4387_v40 = vpop.f32.mrb[28].mxu0 }
 0x3f9   : > { %v5024_v63 = vsel %vm4579_vm2, %v5021_v0, %v5023_v51  ;;  %v5275_v56 = vrot.slane %v5182_v46, 4  ;;  %v4715_v11 = vsel %vm11249_vm7, %v4606_v10, 0.0  ;;  %v7222_v33 = vadd.f32 %v4387_v40, %v10599_v59  ;;  %v7138_v50 = vpop.f32.mrb[29].mxu0 }
 0x3fa   : > { %v5132_v15 = vadd.f32 %v5131_v18, %v5024_v63  ;;  %v5922_v48 = vpack.c.bf16 %v4715_v11, %v4714_v5  ;;  %v5025_v53 = vrot.slane %v4715_v11, 4  ;;  %v5183_v29 = vmul.f32 %v4715_v11, %v4715_v11  ;;  %v4390_v43 = vpop.f32.mrb[30].mxu0 }
 0x3fb   : > { %v5276_v47 = vsel %vm4579_vm2, %v5273_v28, %v5275_v56  ;;  %v4607_v60 = vrot.slane %v7222_v33, 4  ;;  %v7223_v20 = vadd.f32 %v4390_v43, %v10601_v58  ;;  %v7139_v39 = vpop.f32.mrb[31].mxu0 }
 0x3fc   : > { %v5384_v57 = vadd.f32 %v5383_v44, %v5276_v47  ;;  %6017 = vst [vmem:[%s8282_s8 + $0x40] sm:$0xff] %v5922_v48   ;;  %v5026_v41 = vsel %vm4579_vm2, %v5023_v51, %v5025_v53  ;;  %v5277_v42 = vrot.slane %v5183_v29, 4 }
 0x3fd   : > { %v5133_v23 = vadd.f32 %v5132_v15, %v5026_v41  ;;  %v4608_v59 = vsel %vm4579_vm2, %v4605_v22, %v4607_v60  ;;  %v4609_v25 = vrot.slane %v7223_v20, 4 }
 0x3fe   : > { %v5278_v31 = vsel %vm4579_vm2, %v5275_v56, %v5277_v42  ;;  %v4716_v16 = vsel %vm11251_vm14, %v4608_v59, 0.0 }
 0x3ff   : > { %v5385_v27 = vadd.f32 %v5384_v57, %v5278_v31  ;;  %v5027_v35 = vrot.slane %v4716_v16, 4  ;;  %v5184_v12 = vmul.f32 %v4716_v16, %v4716_v16  ;;  %v4610_v58 = vsel %vm4579_vm2, %v4607_v60, %v4609_v25 }
 0x400   : > { %v4717_v1 = vsel %vm11253_vm6, %v4610_v58, 0.0  ;;  %v4395_v6 = vpop.f32.mrb[32].mxu0  ;;  %v11260_v58 = vld [vmem:[#allocation26_spill] sm:$0xff] }
 0x401   : > { %v5028_v4 = vsel %vm4579_vm2, %v5025_v53, %v5027_v35  ;;  %v5279_v0 = vrot.slane %v5184_v12, 4  ;;  %v5927_v62 = vpack.c.bf16 %v4717_v1, %v4716_v16  ;;  %v5029_v9 = vrot.slane %v4717_v1, 4  ;;  %v7142_v21 = vpop.f32.mrb[33].mxu0 }
 0x402   : > { %v5134_v30 = vadd.f32 %v5133_v23, %v5028_v4  ;;  %v5185_v14 = vmul.f32 %v4717_v1, %v4717_v1  ;;  %v7224_v13 = vadd.f32 %v4395_v6, %v10603_v24  ;;  %v4398_v38 = vpop.f32.mrb[34].mxu0  ;;  %v11254_v24 = vld [vmem:[#allocation23_spill] sm:$0xff]  ;;  %vm11261_vm4 = vcmp.eq.s32.totalorder %v11260_v58, 1 }
 0x403   : > { %v5280_v8 = vsel %vm4579_vm2, %v5277_v42, %v5279_v0  ;;  %6018 = vst [vmem:[%s8282_s8 + $0x48] sm:$0xff] %v5927_v62   ;;  %v5030_v28 = vsel %vm4579_vm2, %v5027_v35, %v5029_v9  ;;  %v7225_v2 = vadd.f32 %v4398_v38, %v10605_v36  ;;  %v7143_v49 = vpop.f32.mrb[35].mxu0  ;;  %vm11255_vm0 = vcmp.eq.s32.totalorder %v11254_v24, 1  ;;  %v11256_v36 = vld [vmem:[#allocation22_spill] sm:$0xff]  ;;  %v11258_v23 = vld [vmem:[#allocation27_spill] sm:$0xff] }
 0x404   : > { %v5386_v54 = vadd.f32 %v5385_v27, %v5280_v8  ;;  %v5135_v34 = vadd.f32 %v5134_v30, %v5030_v28  ;;  %v5281_v37 = vrot.slane %v5185_v14, 4  ;;  %v4611_v18 = vrot.slane %v7224_v13, 4 }
 0x405   : > { %v4613_v17 = vrot.slane %v7225_v2, 4  ;;  %vm11257_vm1 = vcmp.eq.s32.totalorder %v11256_v36, 1  ;;  %vm11259_vm3 = vcmp.eq.s32.totalorder %v11258_v23, 1 }
 0x406   : > { %v5282_v55 = vsel %vm4579_vm2, %v5279_v0, %v5281_v37  ;;  %v4612_v61 = vsel %vm4579_vm2, %v4609_v25, %v4611_v18 }
 0x407   : > { %v5387_v5 = vadd.f32 %v5386_v54, %v5282_v55  ;;  %v4718_v22 = vsel %vm11255_vm0, %v4612_v61, 0.0  ;;  %v4614_v44 = vsel %vm4579_vm2, %v4611_v18, %v4613_v17 }
 0x408   : > { %v5031_v51 = vrot.slane %v4718_v22, 4  ;;  %v5186_v46 = vmul.f32 %v4718_v22, %v4718_v22  ;;  %v4719_v10 = vsel %vm11257_vm1, %v4614_v44, 0.0  ;;  %v4403_v40 = vpop.f32.mrb[36].mxu0 }
 0x409   : > { %v5932_v63 = vpack.c.bf16 %v4719_v10, %v4718_v22  ;;  %v5033_v56 = vrot.slane %v4719_v10, 4  ;;  %v5187_v19 = vmul.f32 %v4719_v10, %v4719_v10  ;;  %v7226_v11 = vadd.f32 %v4403_v40, %v10607_v7  ;;  %v7146_v33 = vpop.f32.mrb[37].mxu0 }
 0x40a   : > { %v5032_v50 = vsel %vm4579_vm2, %v5029_v9, %v5031_v51  ;;  %v5283_v15 = vrot.slane %v5186_v46, 4  ;;  %v4406_v48 = vpop.f32.mrb[38].mxu0 }
 0x40b   : > { %v5136_v53 = vadd.f32 %v5135_v34, %v5032_v50  ;;  %6019 = vst [vmem:[%s8282_s8 + $0x50] sm:$0xff] %v5932_v63   ;;  %v5034_v29 = vsel %vm4579_vm2, %v5031_v51, %v5033_v56  ;;  %v5285_v43 = vrot.slane %v5187_v19, 4  ;;  %v4615_v47 = vrot.slane %v7226_v11, 4  ;;  %v7147_v60 = vpop.f32.mrb[39].mxu0  ;;  %v11264_v51 = vld [vmem:[#allocation28_spill] sm:$0xff] }
 0x40c   : > { %v5284_v20 = vsel %vm4579_vm2, %v5281_v37, %v5283_v15  ;;  %v7227_v39 = vadd.f32 %v4406_v48, %v10609_v26  ;;  %vm11265_vm10 = vcmp.eq.s32.totalorder %v11264_v51, 1 }
 0x40d   : > { %v5388_v57 = vadd.f32 %v5387_v5, %v5284_v20  ;;  %v5137_v41 = vadd.f32 %v5136_v53, %v5034_v29  ;;  %v5286_v7 = vsel %vm4579_vm2, %v5283_v15, %v5285_v43  ;;  %v4616_v42 = vsel %vm4579_vm2, %v4613_v17, %v4615_v47  ;;  %v11262_v17 = vld [vmem:[#allocation29_spill] sm:$0xff] }
 0x40e   : > { %v4720_v59 = vsel %vm11259_vm3, %v4616_v42, 0.0  ;;  %v4617_v25 = vrot.slane %v7227_v39, 4  ;;  %vm11263_vm5 = vcmp.eq.s32.totalorder %v11262_v17, 1 }
 0x40f   : > { %v5389_v31 = vadd.f32 %v5388_v57, %v5286_v7  ;;  %v5035_v45 = vrot.slane %v4720_v59, 4  ;;  %v5188_v16 = vmul.f32 %v4720_v59, %v4720_v59 }
 0x410   : > { %v4618_v27 = vsel %vm4579_vm2, %v4615_v47, %v4617_v25  ;;  %v4411_v35 = vpop.f32.mrb[40].mxu0 }
 0x411   : > { %v5036_v12 = vsel %vm4579_vm2, %v5033_v56, %v5035_v45  ;;  %v5287_v26 = vrot.slane %v5188_v16, 4  ;;  %v4721_v32 = vsel %vm11261_vm4, %v4618_v27, 0.0  ;;  %v7228_v1 = vadd.f32 %v4411_v35, %v10611_v52  ;;  %v7150_v6 = vpop.f32.mrb[41].mxu0 }
 0x412   : > { %v5138_v4 = vadd.f32 %v5137_v41, %v5036_v12  ;;  %v5937_v0 = vpack.c.bf16 %v4721_v32, %v4720_v59  ;;  %v5037_v62 = vrot.slane %v4721_v32, 4  ;;  %v5189_v9 = vmul.f32 %v4721_v32, %v4721_v32  ;;  %v4414_v21 = vpop.f32.mrb[42].mxu0 }
 0x413   : > { %v5288_v30 = vsel %vm4579_vm2, %v5285_v43, %v5287_v26  ;;  %v4619_v14 = vrot.slane %v7228_v1, 4  ;;  %v7229_v13 = vadd.f32 %v4414_v21, %v10613_v3  ;;  %v7151_v38 = vpop.f32.mrb[43].mxu0 }
 0x414   : > { %v5390_v8 = vadd.f32 %v5389_v31, %v5288_v30  ;;  %6020 = vst [vmem:[%s8282_s8 + $0x58] sm:$0xff] %v5937_v0   ;;  %v5038_v28 = vsel %vm4579_vm2, %v5035_v45, %v5037_v62  ;;  %v5289_v2 = vrot.slane %v5189_v9, 4  ;;  %v2910_v49 = vpop.f32.mrb[44].mxu1  ;;  %v11266_v31 = vld [vmem:[#allocation34_spill] sm:$0xff] }
 0x415   : > { %v5139_v54 = vadd.f32 %v5138_v4, %v5038_v28  ;;  %v4620_v52 = vsel %vm4579_vm2, %v4617_v25, %v4619_v14  ;;  %v4621_v34 = vrot.slane %v7229_v13, 4  ;;  %v6754_v37 = vpop.f32.mrb[45].mxu1  ;;  %vm11267_vm11 = vcmp.eq.s32.totalorder %v11266_v31, 1  ;;  %v11274_v31 = vld [vmem:[#allocation39_spill] sm:$0xff] }
 0x416   : > { %v5290_v18 = vsel %vm4579_vm2, %v5287_v26, %v5289_v2  ;;  %v4722_v55 = vsel %vm11263_vm5, %v4620_v52, 0.0  ;;  %v2913_v61 = vpop.f32.mrb[46].mxu1  ;;  %v11268_v26 = vld [vmem:[#allocation33_spill] sm:$0xff]  ;;  %vm11275_vm6 = vcmp.eq.s32.totalorder %v11274_v31, 1 }
 0x417   : > { %v5391_v5 = vadd.f32 %v5390_v8, %v5290_v18  ;;  %v5039_v3 = vrot.slane %v4722_v55, 4  ;;  %v5190_v24 = vmul.f32 %v4722_v55, %v4722_v55  ;;  %v4622_v22 = vsel %vm4579_vm2, %v4619_v14, %v4621_v34  ;;  %v6755_v44 = vpop.f32.mrb[47].mxu1 }
 0x418   : > { %v4723_v46 = vsel %vm11265_vm10, %v4622_v22, 0.0  ;;  %v4419_v36 = vpop.f32.mrb[44].mxu0  ;;  %vm11269_vm15 = vcmp.eq.s32.totalorder %v11268_v26, 1 }
 0x419   : > { %v5040_v10 = vsel %vm4579_vm2, %v5037_v62, %v5039_v3  ;;  %v5291_v40 = vrot.slane %v5190_v24, 4  ;;  %v5942_v63 = vpack.c.bf16 %v4723_v46, %v4722_v55  ;;  %v5041_v56 = vrot.slane %v4723_v46, 4  ;;  %v7154_v19 = vpop.f32.mrb[45].mxu0  ;;  %v11270_v55 = vld [vmem:[#allocation36_spill] sm:$0xff] }
 0x41a   : > { %v5140_v11 = vadd.f32 %v5139_v54, %v5040_v10  ;;  %v5191_v33 = vmul.f32 %v4723_v46, %v4723_v46  ;;  %v7230_v50 = vadd.f32 %v4419_v36, %v2910_v49  ;;  %v4422_v15 = vpop.f32.mrb[46].mxu0  ;;  %vm11271_vm7 = vcmp.eq.s32.totalorder %v11270_v55, 1 }
 0x41b   : > { %v5292_v48 = vsel %vm4579_vm2, %v5289_v2, %v5291_v40  ;;  %6021 = vst [vmem:[%s8282_s8 + $0x60] sm:$0xff] %v5942_v63   ;;  %v5042_v53 = vsel %vm4579_vm2, %v5039_v3, %v5041_v56  ;;  %v7231_v29 = vadd.f32 %v4422_v15, %v2913_v61  ;;  %v7155_v43 = vpop.f32.mrb[47].mxu0  ;;  %v11272_v63 = vld [vmem:[#allocation35_spill] sm:$0xff] }
 0x41c   : > { %v5392_v47 = vadd.f32 %v5391_v5, %v5292_v48  ;;  %v5141_v60 = vadd.f32 %v5140_v11, %v5042_v53  ;;  %v5293_v20 = vrot.slane %v5191_v33, 4  ;;  %v4623_v39 = vrot.slane %v7230_v50, 4  ;;  %v2918_v57 = vpop.f32.mrb[48].mxu1 }
 0x41d   : > { %v4625_v41 = vrot.slane %v7231_v29, 4  ;;  %v6758_v7 = vpop.f32.mrb[49].mxu1  ;;  %vm11273_vm14 = vcmp.eq.s32.totalorder %v11272_v63, 1 }
 0x41e   : > { %v5294_v42 = vsel %vm4579_vm2, %v5291_v40, %v5293_v20  ;;  %v4624_v23 = vsel %vm4579_vm2, %v4621_v34, %v4623_v39  ;;  %v2921_v59 = vpop.f32.mrb[50].mxu1 }
 0x41f   : > { %v5393_v25 = vadd.f32 %v5392_v47, %v5294_v42  ;;  %v4724_v45 = vsel %vm11267_vm11, %v4624_v23, 0.0  ;;  %v4626_v16 = vsel %vm4579_vm2, %v4623_v39, %v4625_v41  ;;  %v6759_v27 = vpop.f32.mrb[51].mxu1 }
 0x420   : > { %v5043_v35 = vrot.slane %v4724_v45, 4  ;;  %v5192_v12 = vmul.f32 %v4724_v45, %v4724_v45  ;;  %v4725_v58 = vsel %vm11269_vm15, %v4626_v16, 0.0  ;;  %v4427_v32 = vpop.f32.mrb[48].mxu0 }
 0x421   : > { %v5947_v1 = vpack.c.bf16 %v4725_v58, %v4724_v45  ;;  %v5045_v6 = vrot.slane %v4725_v58, 4  ;;  %v5193_v4 = vmul.f32 %v4725_v58, %v4725_v58  ;;  %v7232_v0 = vadd.f32 %v4427_v32, %v2918_v57  ;;  %v7158_v62 = vpop.f32.mrb[49].mxu0  ;;  %v11276_v32 = vld [vmem:[#allocation38_spill] sm:$0xff] }
 0x422   : > { %v5044_v9 = vsel %vm4579_vm2, %v5041_v56, %v5043_v35  ;;  %v5295_v21 = vrot.slane %v5192_v12, 4  ;;  %v4430_v30 = vpop.f32.mrb[50].mxu0  ;;  %vm11277_vm0 = vcmp.eq.s32.totalorder %v11276_v32, 1 }
 0x423   : > { %v5142_v14 = vadd.f32 %v5141_v60, %v5044_v9  ;;  %6022 = vst [vmem:[%s8282_s8 + $0x68] sm:$0xff] %v5947_v1   ;;  %v5046_v13 = vsel %vm4579_vm2, %v5043_v35, %v5045_v6  ;;  %v5297_v38 = vrot.slane %v5193_v4, 4  ;;  %v4627_v8 = vrot.slane %v7232_v0, 4  ;;  %v7159_v28 = vpop.f32.mrb[51].mxu0 }
 0x424   : > { %v5296_v2 = vsel %vm4579_vm2, %v5293_v20, %v5295_v21  ;;  %v7233_v49 = vadd.f32 %v4430_v30, %v2921_v59  ;;  %v2926_v54 = vpop.f32.mrb[52].mxu1 }
 0x425   : > { %v5394_v52 = vadd.f32 %v5393_v25, %v5296_v2  ;;  %v5143_v34 = vadd.f32 %v5142_v14, %v5046_v13  ;;  %v5298_v37 = vsel %vm4579_vm2, %v5295_v21, %v5297_v38  ;;  %v4628_v18 = vsel %vm4579_vm2, %v4625_v41, %v4627_v8  ;;  %v6762_v17 = vpop.f32.mrb[53].mxu1 }
 0x426   : > { %v4726_v61 = vsel %vm11271_vm7, %v4628_v18, 0.0  ;;  %v4629_v5 = vrot.slane %v7233_v49, 4  ;;  %v2929_v3 = vpop.f32.mrb[54].mxu1 }
 0x427   : > { %v5395_v24 = vadd.f32 %v5394_v52, %v5298_v37  ;;  %v5047_v22 = vrot.slane %v4726_v61, 4  ;;  %v5194_v44 = vmul.f32 %v4726_v61, %v4726_v61  ;;  %v6763_v51 = vpop.f32.mrb[55].mxu1 }
 0x428   : > { %v4630_v46 = vsel %vm4579_vm2, %v4627_v8, %v4629_v5  ;;  %v4435_v36 = vpop.f32.mrb[52].mxu0 }
 0x429   : > { %v5048_v10 = vsel %vm4579_vm2, %v5045_v6, %v5047_v22  ;;  %v5299_v40 = vrot.slane %v5194_v44, 4  ;;  %v4727_v56 = vsel %vm11273_vm14, %v4630_v46, 0.0  ;;  %v7234_v19 = vadd.f32 %v4435_v36, %v2926_v54  ;;  %v7162_v11 = vpop.f32.mrb[53].mxu0 }
 0x42a   : > { %v5144_v33 = vadd.f32 %v5143_v34, %v5048_v10  ;;  %v5952_v50 = vpack.c.bf16 %v4727_v56, %v4726_v61  ;;  %v5049_v15 = vrot.slane %v4727_v56, 4  ;;  %v5195_v48 = vmul.f32 %v4727_v56, %v4727_v56  ;;  %v4438_v53 = vpop.f32.mrb[54].mxu0 }
 0x42b   : > { %v5300_v29 = vsel %vm4579_vm2, %v5297_v38, %v5299_v40  ;;  %v4631_v43 = vrot.slane %v7234_v19, 4  ;;  %v7235_v47 = vadd.f32 %v4438_v53, %v2929_v3  ;;  %v7163_v60 = vpop.f32.mrb[55].mxu0 }
 0x42c   : > { %v5396_v20 = vadd.f32 %v5395_v24, %v5300_v29  ;;  %6023 = vst [vmem:[%s8282_s8 + $0x70] sm:$0xff] %v5952_v50   ;;  %v5050_v39 = vsel %vm4579_vm2, %v5047_v22, %v5049_v15  ;;  %v5301_v57 = vrot.slane %v5195_v48, 4  ;;  %v2934_v41 = vpop.f32.mrb[56].mxu1  ;;  %v11278_v22 = vld [vmem:[#allocation43_spill] sm:$0xff] }
 0x42d   : > { %v5145_v7 = vadd.f32 %v5144_v33, %v5050_v39  ;;  %v4632_v42 = vsel %vm4579_vm2, %v4629_v5, %v4631_v43  ;;  %v4633_v23 = vrot.slane %v7235_v47, 4  ;;  %v6766_v59 = vpop.f32.mrb[57].mxu1  ;;  %vm11279_vm1 = vcmp.eq.s32.totalorder %v11278_v22, 1 }
 0x42e   : > { %v5302_v25 = vsel %vm4579_vm2, %v5299_v40, %v5301_v57  ;;  %v4728_v45 = vsel %vm11275_vm6, %v4632_v42, 0.0  ;;  %v2937_v16 = vpop.f32.mrb[58].mxu1  ;;  %v11280_v40 = vld [vmem:[#allocation42_spill] sm:$0xff] }
 0x42f   : > { %v5397_v27 = vadd.f32 %v5396_v20, %v5302_v25  ;;  %v5051_v35 = vrot.slane %v4728_v45, 4  ;;  %v5196_v12 = vmul.f32 %v4728_v45, %v4728_v45  ;;  %v4634_v26 = vsel %vm4579_vm2, %v4631_v43, %v4633_v23  ;;  %v6767_v58 = vpop.f32.mrb[59].mxu1 }
 0x430   : > { %v4729_v1 = vsel %vm11277_vm0, %v4634_v26, 0.0  ;;  %v4443_v6 = vpop.f32.mrb[56].mxu0  ;;  %vm11281_vm3 = vcmp.eq.s32.totalorder %v11280_v40, 1 }
 0x431   : > { %v5052_v4 = vsel %vm4579_vm2, %v5049_v15, %v5051_v35  ;;  %v5303_v0 = vrot.slane %v5196_v12, 4  ;;  %v5957_v62 = vpack.c.bf16 %v4729_v1, %v4728_v45  ;;  %v5053_v9 = vrot.slane %v4729_v1, 4  ;;  %v7166_v21 = vpop.f32.mrb[57].mxu0 }
 0x432   : > { %v5146_v30 = vadd.f32 %v5145_v7, %v5052_v4  ;;  %v5197_v14 = vmul.f32 %v4729_v1, %v4729_v1  ;;  %v7236_v13 = vadd.f32 %v4443_v6, %v2934_v41  ;;  %v4446_v38 = vpop.f32.mrb[58].mxu0 }
 0x433   : > { %v5304_v8 = vsel %vm4579_vm2, %v5301_v57, %v5303_v0  ;;  %6024 = vst [vmem:[%s8282_s8 + $0x78] sm:$0xff] %v5957_v62   ;;  %v5054_v28 = vsel %vm4579_vm2, %v5051_v35, %v5053_v9  ;;  %v7237_v2 = vadd.f32 %v4446_v38, %v2937_v16  ;;  %v7167_v49 = vpop.f32.mrb[59].mxu0 }
 0x434   : > { %v5398_v54 = vadd.f32 %v5397_v27, %v5304_v8  ;;  %v5147_v52 = vadd.f32 %v5146_v30, %v5054_v28  ;;  %v5305_v34 = vrot.slane %v5197_v14, 4  ;;  %v4635_v37 = vrot.slane %v7236_v13, 4  ;;  %v2942_v18 = vpop.f32.mrb[60].mxu1 }
 0x435   : > { %v4637_v17 = vrot.slane %v7237_v2, 4  ;;  %v6770_v55 = vpop.f32.mrb[61].mxu1 }
 0x436   : > { %v5306_v61 = vsel %vm4579_vm2, %v5303_v0, %v5305_v34  ;;  %v4636_v5 = vsel %vm4579_vm2, %v4633_v23, %v4635_v37  ;;  %v2945_v3 = vpop.f32.mrb[62].mxu1 }
 0x437   : > { %v5399_v24 = vadd.f32 %v5398_v54, %v5306_v61  ;;  %v4730_v44 = vsel %vm11279_vm1, %v4636_v5, 0.0  ;;  %v4638_v51 = vsel %vm4579_vm2, %v4635_v37, %v4637_v17  ;;  %v6771_v46 = vpop.f32.mrb[63].mxu1 }
 0x438   : > { %v5055_v36 = vrot.slane %v4730_v44, 4  ;;  %v5198_v10 = vmul.f32 %v4730_v44, %v4730_v44  ;;  %v4731_v63 = vsel %vm11281_vm3, %v4638_v51, 0.0  ;;  %v4451_v56 = vpop.f32.mrb[60].mxu0 }
 0x439   : > { %v5962_v19 = vpack.c.bf16 %v4731_v63, %v4730_v44  ;;  %v5057_v11 = vrot.slane %v4731_v63, 4  ;;  %v5199_v33 = vmul.f32 %v4731_v63, %v4731_v63  ;;  %v7238_v50 = vadd.f32 %v4451_v56, %v2942_v18  ;;  %v7170_v15 = vpop.f32.mrb[61].mxu0  ;;  %v11285_v56 = vld [vmem:[#allocation47_spill] sm:$0xff] }
 0x43a   : > { %v5056_v48 = vsel %vm4579_vm2, %v5053_v9, %v5055_v36  ;;  %v5307_v53 = vrot.slane %v5198_v10, 4  ;;  %v4454_v29 = vpop.f32.mrb[62].mxu0 }
 0x43b   : > { %v5148_v43 = vadd.f32 %v5147_v52, %v5056_v48  ;;  %6025 = vst [vmem:[%s8282_s8 + $0x80] sm:$0xff] %v5962_v19   ;;  %v5058_v47 = vsel %vm4579_vm2, %v5055_v36, %v5057_v11  ;;  %v5309_v60 = vrot.slane %v5199_v33, 4  ;;  %v4639_v20 = vrot.slane %v7238_v50, 4  ;;  %v7171_v39 = vpop.f32.mrb[63].mxu0 }
 0x43c   : > { %v5308_v57 = vsel %vm4579_vm2, %v5305_v34, %v5307_v53  ;;  %v7239_v41 = vadd.f32 %v4454_v29, %v2945_v3  ;;  %v2950_v7 = vpop.f32.mrb[64].mxu1 }
 0x43d   : > { %v5400_v42 = vadd.f32 %v5399_v24, %v5308_v57  ;;  %v5149_v23 = vadd.f32 %v5148_v43, %v5058_v47  ;;  %v5310_v59 = vsel %vm4579_vm2, %v5307_v53, %v5309_v60  ;;  %v4640_v25 = vsel %vm4579_vm2, %v4637_v17, %v4639_v20  ;;  %v6774_v31 = vpop.f32.mrb[65].mxu1 }
 0x43e   : > { %v4732_v16 = vsel %vm1046_vm8, %v4640_v25, 0.0  ;;  %v4641_v27 = vrot.slane %v7239_v41, 4  ;;  %v2953_v35 = vpop.f32.mrb[66].mxu1 }
 0x43f   : > { %v5401_v12 = vadd.f32 %v5400_v42, %v5310_v59  ;;  %v5059_v26 = vrot.slane %v4732_v16, 4  ;;  %v5200_v58 = vmul.f32 %v4732_v16, %v4732_v16  ;;  %v6775_v32 = vpop.f32.mrb[67].mxu1 }
 0x440   : > { %v4642_v1 = vsel %vm4579_vm2, %v4639_v20, %v4641_v27  ;;  %v4459_v6 = vpop.f32.mrb[64].mxu0 }
 0x441   : > { %v5060_v4 = vsel %vm4579_vm2, %v5057_v11, %v5059_v26  ;;  %v5311_v0 = vrot.slane %v5200_v58, 4  ;;  %v4733_v9 = vsel %vm1047_vm13, %v4642_v1, 0.0  ;;  %v7240_v21 = vadd.f32 %v4459_v6, %v2950_v7  ;;  %v7174_v30 = vpop.f32.mrb[65].mxu0 }
 0x442   : > { %v5150_v14 = vadd.f32 %v5149_v23, %v5060_v4  ;;  %v5967_v13 = vpack.c.bf16 %v4733_v9, %v4732_v16  ;;  %v5061_v38 = vrot.slane %v4733_v9, 4  ;;  %v5201_v8 = vmul.f32 %v4733_v9, %v4733_v9  ;;  %v4462_v28 = vpop.f32.mrb[66].mxu0 }
 0x443   : > { %v5312_v2 = vsel %vm4579_vm2, %v5309_v60, %v5311_v0  ;;  %v4643_v49 = vrot.slane %v7240_v21, 4  ;;  %v7241_v54 = vadd.f32 %v4462_v28, %v2953_v35  ;;  %v7175_v52 = vpop.f32.mrb[67].mxu0  ;;  %vm11286_vm13 = vcmp.eq.s32.totalorder %v11285_v56, 1 }
 0x444   : > { %v5402_v34 = vadd.f32 %v5401_v12, %v5312_v2  ;;  %6026 = vst [vmem:[%s8282_s8 + $0x88] sm:$0xff] %v5967_v13   ;;  %v5062_v37 = vsel %vm4579_vm2, %v5059_v26, %v5061_v38  ;;  %v5313_v18 = vrot.slane %v5201_v8, 4  ;;  %v2958_v17 = vpop.f32.mrb[68].mxu1  ;;  %v11294_v26 = vld [vmem:[#allocation56_spill] sm:$0xff] }
 0x445   : > { %v5151_v55 = vadd.f32 %v5150_v14, %v5062_v37  ;;  %v4644_v61 = vsel %vm4579_vm2, %v4641_v27, %v4643_v49  ;;  %v4645_v5 = vrot.slane %v7241_v54, 4  ;;  %v6778_v3 = vpop.f32.mrb[69].mxu1  ;;  %vm11295_vm4 = vcmp.eq.s32.totalorder %v11294_v26, 1 }
 0x446   : > { %v5314_v24 = vsel %vm4579_vm2, %v5311_v0, %v5313_v18  ;;  %v4734_v44 = vsel %vm1048_vm12, %v4644_v61, 0.0  ;;  %v2961_v51 = vpop.f32.mrb[70].mxu1  ;;  %v11288_v0 = vld [vmem:[#allocation50_spill] sm:$0xff] }
 0x447   : > { %v5403_v46 = vadd.f32 %v5402_v34, %v5314_v24  ;;  %v5063_v36 = vrot.slane %v4734_v44, 4  ;;  %v5202_v10 = vmul.f32 %v4734_v44, %v4734_v44  ;;  %v4646_v40 = vsel %vm4579_vm2, %v4643_v49, %v4645_v5  ;;  %v6779_v63 = vpop.f32.mrb[71].mxu1 }
 0x448   : > { %v4735_v19 = vsel %vm11286_vm13, %v4646_v40, 0.0  ;;  %v4467_v11 = vpop.f32.mrb[68].mxu0  ;;  %vm11289_vm8 = vcmp.eq.s32.totalorder %v11288_v0, 1 }
 0x449   : > { %v5064_v33 = vsel %vm4579_vm2, %v5061_v38, %v5063_v36  ;;  %v5315_v50 = vrot.slane %v5202_v10, 4  ;;  %v5972_v15 = vpack.c.bf16 %v4735_v19, %v4734_v44  ;;  %v5065_v48 = vrot.slane %v4735_v19, 4  ;;  %v7178_v53 = vpop.f32.mrb[69].mxu0  ;;  %v11290_v44 = vld [vmem:[#allocation54_spill] sm:$0xff] }
 0x44a   : > { %v5152_v29 = vadd.f32 %v5151_v55, %v5064_v33  ;;  %v5203_v43 = vmul.f32 %v4735_v19, %v4735_v19  ;;  %v7242_v47 = vadd.f32 %v4467_v11, %v2958_v17  ;;  %v4470_v60 = vpop.f32.mrb[70].mxu0 }
 0x44b   : > { %v5316_v20 = vsel %vm4579_vm2, %v5313_v18, %v5315_v50  ;;  %6027 = vst [vmem:[%s8282_s8 + $0x90] sm:$0xff] %v5972_v15   ;;  %v5066_v39 = vsel %vm4579_vm2, %v5063_v36, %v5065_v48  ;;  %v7243_v57 = vadd.f32 %v4470_v60, %v2961_v51  ;;  %v7179_v41 = vpop.f32.mrb[71].mxu0  ;;  %v11292_v15 = vld [vmem:[#allocation53_spill] sm:$0xff] }
 0x44c   : > { %v5404_v7 = vadd.f32 %v5403_v46, %v5316_v20  ;;  %v5153_v42 = vadd.f32 %v5152_v29, %v5066_v39  ;;  %v5317_v23 = vrot.slane %v5203_v43, 4  ;;  %v4647_v59 = vrot.slane %v7242_v47, 4  ;;  %v2966_v25 = vpop.f32.mrb[72].mxu1 }
 0x44d   : > { %v4649_v31 = vrot.slane %v7243_v57, 4  ;;  %v6782_v45 = vpop.f32.mrb[73].mxu1  ;;  %vm11293_vm12 = vcmp.eq.s32.totalorder %v11292_v15, 1 }
 0x44e   : > { %v5318_v16 = vsel %vm4579_vm2, %v5315_v50, %v5317_v23  ;;  %v4648_v27 = vsel %vm4579_vm2, %v4645_v5, %v4647_v59  ;;  %v2969_v35 = vpop.f32.mrb[74].mxu1 }
 0x44f   : > { %v5405_v12 = vadd.f32 %v5404_v7, %v5318_v16  ;;  %v4736_v58 = vsel %vm1050_vm9, %v4648_v27, 0.0  ;;  %v4650_v32 = vsel %vm4579_vm2, %v4647_v59, %v4649_v31  ;;  %v6783_v1 = vpop.f32.mrb[75].mxu1  ;;  %vm11291_vm9 = vcmp.eq.s32.totalorder %v11290_v44, 1  ;;  %v11298_v44 = vld [vmem:[#allocation31_spill] sm:$0xff] }
 0x450   : > { %v5067_v6 = vrot.slane %v4736_v58, 4  ;;  %v5204_v4 = vmul.f32 %v4736_v58, %v4736_v58  ;;  %v4737_v62 = vsel %vm11289_vm8, %v4650_v32, 0.0  ;;  %v4475_v9 = vpop.f32.mrb[72].mxu0  ;;  %vm11299_vm10 = vcmp.eq.s32.totalorder %v11298_v44, 1 }
 0x451   : > { %v5977_v21 = vpack.c.bf16 %v4737_v62, %v4736_v58  ;;  %v5069_v30 = vrot.slane %v4737_v62, 4  ;;  %v5205_v14 = vmul.f32 %v4737_v62, %v4737_v62  ;;  %v7244_v13 = vadd.f32 %v4475_v9, %v2966_v25  ;;  %v7182_v38 = vpop.f32.mrb[73].mxu0  ;;  %v11296_v9 = vld [vmem:[#allocation55_spill] sm:$0xff] }
 0x452   : > { %v5068_v8 = vsel %vm4579_vm2, %v5065_v48, %v5067_v6  ;;  %v5319_v28 = vrot.slane %v5204_v4, 4  ;;  %v4478_v2 = vpop.f32.mrb[74].mxu0  ;;  %vm11297_vm5 = vcmp.eq.s32.totalorder %v11296_v9, 1 }
 0x453   : > { %v5154_v49 = vadd.f32 %v5153_v42, %v5068_v8  ;;  %6028 = vst [vmem:[%s8282_s8 + $0x98] sm:$0xff] %v5977_v21   ;;  %v5070_v54 = vsel %vm4579_vm2, %v5067_v6, %v5069_v30  ;;  %v5321_v52 = vrot.slane %v5205_v14, 4  ;;  %v4651_v34 = vrot.slane %v7244_v13, 4  ;;  %v7183_v37 = vpop.f32.mrb[75].mxu0 }
 0x454   : > { %v5320_v18 = vsel %vm4579_vm2, %v5317_v23, %v5319_v28  ;;  %v7245_v17 = vadd.f32 %v4478_v2, %v2969_v35  ;;  %v2974_v55 = vpop.f32.mrb[76].mxu1 }
 0x455   : > { %v5406_v61 = vadd.f32 %v5405_v12, %v5320_v18  ;;  %v5155_v5 = vadd.f32 %v5154_v49, %v5070_v54  ;;  %v5322_v3 = vsel %vm4579_vm2, %v5319_v28, %v5321_v52  ;;  %v4652_v24 = vsel %vm4579_vm2, %v4649_v31, %v4651_v34  ;;  %v6786_v22 = vpop.f32.mrb[77].mxu1 }
 0x456   : > { %v4738_v51 = vsel %vm11291_vm9, %v4652_v24, 0.0  ;;  %v4653_v46 = vrot.slane %v7245_v17, 4  ;;  %v2977_v36 = vpop.f32.mrb[78].mxu1 }
 0x457   : > { %v5407_v10 = vadd.f32 %v5406_v61, %v5322_v3  ;;  %v5071_v40 = vrot.slane %v4738_v51, 4  ;;  %v5206_v63 = vmul.f32 %v4738_v51, %v4738_v51  ;;  %v6787_v56 = vpop.f32.mrb[79].mxu1 }
 0x458   : > { %v4654_v19 = vsel %vm4579_vm2, %v4651_v34, %v4653_v46  ;;  %v4483_v11 = vpop.f32.mrb[76].mxu0 }
 0x459   : > { %v5072_v33 = vsel %vm4579_vm2, %v5069_v30, %v5071_v40  ;;  %v5323_v50 = vrot.slane %v5206_v63, 4  ;;  %v4739_v48 = vsel %vm11293_vm12, %v4654_v19, 0.0  ;;  %v7246_v53 = vadd.f32 %v4483_v11, %v2974_v55  ;;  %v7186_v29 = vpop.f32.mrb[77].mxu0 }
 0x45a   : > { %v5156_v43 = vadd.f32 %v5155_v5, %v5072_v33  ;;  %v5982_v47 = vpack.c.bf16 %v4739_v48, %v4738_v51  ;;  %v5073_v60 = vrot.slane %v4739_v48, 4  ;;  %v5207_v20 = vmul.f32 %v4739_v48, %v4739_v48  ;;  %v4486_v39 = vpop.f32.mrb[78].mxu0 }
 0x45b   : > { %v5324_v57 = vsel %vm4579_vm2, %v5321_v52, %v5323_v50  ;;  %v4655_v41 = vrot.slane %v7246_v53, 4  ;;  %v7247_v7 = vadd.f32 %v4486_v39, %v2977_v36  ;;  %v7187_v42 = vpop.f32.mrb[79].mxu0 }
 0x45c   : > { %v5408_v23 = vadd.f32 %v5407_v10, %v5324_v57  ;;  %6029 = vst [vmem:[%s8282_s8 + $0xa0] sm:$0xff] %v5982_v47   ;;  %v5074_v59 = vsel %vm4579_vm2, %v5071_v40, %v5073_v60  ;;  %v5325_v25 = vrot.slane %v5207_v20, 4  ;;  %v2982_v31 = vpop.f32.mrb[80].mxu1 }
 0x45d   : > { %v5157_v45 = vadd.f32 %v5156_v43, %v5074_v59  ;;  %v4656_v16 = vsel %vm4579_vm2, %v4653_v46, %v4655_v41  ;;  %v4657_v27 = vrot.slane %v7247_v7, 4  ;;  %v6790_v35 = vpop.f32.mrb[81].mxu1 }
 0x45e   : > { %v5326_v12 = vsel %vm4579_vm2, %v5323_v50, %v5325_v25  ;;  %v4740_v58 = vsel %vm11295_vm4, %v4656_v16, 0.0  ;;  %v2985_v32 = vpop.f32.mrb[82].mxu1 }
 0x45f   : > { %v5409_v1 = vadd.f32 %v5408_v23, %v5326_v12  ;;  %v5075_v6 = vrot.slane %v4740_v58, 4  ;;  %v5208_v4 = vmul.f32 %v4740_v58, %v4740_v58  ;;  %v4658_v0 = vsel %vm4579_vm2, %v4655_v41, %v4657_v27  ;;  %v6791_v62 = vpop.f32.mrb[83].mxu1 }
 0x460   : > { %v4741_v21 = vsel %vm11297_vm5, %v4658_v0, 0.0  ;;  %v4491_v30 = vpop.f32.mrb[80].mxu0 }
 0x461   : > { %v5076_v14 = vsel %vm4579_vm2, %v5073_v60, %v5075_v6  ;;  %v5327_v13 = vrot.slane %v5208_v4, 4  ;;  %v5987_v38 = vpack.c.bf16 %v4741_v21, %v4740_v58  ;;  %v5077_v8 = vrot.slane %v4741_v21, 4  ;;  %v7190_v28 = vpop.f32.mrb[81].mxu0 }
 0x462   : > { %v5158_v2 = vadd.f32 %v5157_v45, %v5076_v14  ;;  %v5209_v49 = vmul.f32 %v4741_v21, %v4741_v21  ;;  %v7248_v54 = vadd.f32 %v4491_v30, %v2982_v31  ;;  %v4494_v52 = vpop.f32.mrb[82].mxu0 }
 0x463   : > { %v5328_v34 = vsel %vm4579_vm2, %v5325_v25, %v5327_v13  ;;  %6030 = vst [vmem:[%s8282_s8 + $0xa8] sm:$0xff] %v5987_v38   ;;  %v5078_v37 = vsel %vm4579_vm2, %v5075_v6, %v5077_v8  ;;  %v7191_v18 = vpop.f32.mrb[83].mxu0 }
 0x464   : > { %v5410_v17 = vadd.f32 %v5409_v1, %v5328_v34  ;;  %v5159_v55 = vadd.f32 %v5158_v2, %v5078_v37  ;;  %v5329_v61 = vrot.slane %v5209_v49, 4  ;;  %v4659_v5 = vrot.slane %v7248_v54, 4 }
 0x466   : > { %v5330_v3 = vsel %vm4579_vm2, %v5327_v13, %v5329_v61  ;;  %v4660_v24 = vsel %vm4579_vm2, %v4657_v27, %v4659_v5 }
 0x467   : > { %v5411_v22 = vadd.f32 %v5410_v17, %v5330_v3  ;;  %v4742_v51 = vsel %vm11299_vm10, %v4660_v24, 0.0 }
 0x468   : > { %v5801_v46 = vpack.c.bf16 %v4742_v51, %v4742_v51  ;;  %v5079_v36 = vrot.slane %v4742_v51, 4  ;;  %v5210_v10 = vmul.f32 %v4742_v51, %v4742_v51 }
 0x46a   : > { %4953 = vst [vmem:[%s8282_s8 + $0xb0] sm:$0xf] %v5801_v46  ;;  %v5080_v40 = vsel %vm4579_vm2, %v5077_v8, %v5079_v36  ;;  %v5331_v63 = vrot.slane %v5210_v10, 4  ;;  %v5161_v19 = vsel %vm4579_vm2, %v5079_v36, 0.0 }
 0x46b   : > { %v5160_v56 = vadd.f32 %v5159_v55, %v5080_v40 }
 0x46c   : > { %v5332_v11 = vsel %vm4579_vm2, %v5329_v61, %v5331_v63  ;;  %v5413_v15 = vsel %vm4579_vm2, %v5331_v63, 0.0 }
 0x46d   : > { %v5162_v33 = vadd.f32 %v5161_v19, %v5160_v56  ;;  %v5412_v50 = vadd.f32 %v5411_v22, %v5332_v11 }
 0x46f   : > { %v5163_v48 = vrot.slane %v5162_v33, 4  ;;  %v5414_v53 = vadd.f32 %v5413_v15, %v5412_v50 }
 0x471   : > { %v5164_v29 = vadd.f32 %v5163_v48, %v5162_v33  ;;  %v5415_v43 = vrot.slane %v5414_v53, 4 }
 0x473   : > { %v5165_v47 = vrot.slane %v5164_v29, 2  ;;  %v5416_v60 = vadd.f32 %v5415_v43, %v5414_v53 }
 0x475   : > { %v5166_v20 = vadd.f32 %v5165_v47, %v5164_v29  ;;  %v5417_v39 = vrot.slane %v5416_v60, 2 }
 0x477   : > { %v5167_v57 = vrot.slane %v5166_v20, 1  ;;  %v5418_v41 = vadd.f32 %v5417_v39, %v5416_v60 }
 0x479   : > { %v5168_v7 = vadd.f32 %v5167_v57, %v5166_v20  ;;  %v5419_v42 = vrot.slane %v5418_v41, 1 }
 0x47b   : > { %5169 = vst [vmem:[%s262_s18] sm:$0x1] %v5168_v7  ;;  %v5420_v23 = vadd.f32 %v5419_v42, %v5418_v41 }
 0x47d   : > { %5421 = vst [vmem:[%s262_s18 + $0x1] sm:$0x1] %v5420_v23 }
 0x47e PF: > { %s17_s21 = sadd.s32 1, %s8123_s21  }
 0x47f   : > { %p14_p4 = scmp.ge.s32.totalorder %s17_s21, 4  }
 0x481   :  { %16 = sbr.rel (!%p14_p4) target bundleno = 1 (0x1), region = 90 }

</bundles_post_ra>
